<compile_context>
chip_gen: v7x
topology: tpu7x:2x2x1
jax: 0.10.0
libtpu: 0.0.40
codegen_flags: <defaults>
</compile_context>

<pallas_src>
import functools

import jax
import jax.numpy as jnp
from jax.experimental import pallas as pl
from jax.experimental.pallas import tpu as pltpu

VMEM_LIMIT = 32 * 1024 * 1024
LRELU_SLOPE = 0.2
BN_EPS = 1e-5
SINGLE_STEP_MAX_M = 256     # whole layer fits one tile -> fuse BN+LReLU in-kernel


def _leaky(x):
    return jnp.where(x > 0.0, x, LRELU_SLOPE * x)


# ----------------------------------------------------------------------------
# Pallas kernels
# ----------------------------------------------------------------------------
def _conv_bias_kernel(p_ref, w_ref, b_ref, y_ref):
    """im2col matmul + bias (init 7x7 conv).  p:(tm,K) bf16, w:(K,N) bf16, b:(1,N) f32."""
    acc = jnp.dot(p_ref[...], w_ref[...], preferred_element_type=jnp.float32)
    y_ref[...] = (acc + b_ref[...]).astype(y_ref.dtype)


def _conv_stats_kernel(p_ref, w_ref, y_ref, stats_ref):
    """Bias-free conv + fused per-tile BN partial stats.

    y_ref     : (tm, N) f32 raw conv output tile
    stats_ref : (1, 2, N) f32 -> [sum ; sum of squares] of this tile (finalized in wrapper)
    """
    acc = jnp.dot(p_ref[...], w_ref[...], preferred_element_type=jnp.float32)
    y_ref[...] = acc.astype(y_ref.dtype)
    s = jnp.sum(acc, axis=0, keepdims=True)
    ss = jnp.sum(acc * acc, axis=0, keepdims=True)
    stats_ref[0] = jnp.concatenate([s, ss], axis=0)


def _conv_bn_act_kernel(p_ref, w_ref, gamma_ref, beta_ref, y_ref):
    """Single-step DownBlock: conv -> batch-stats BN -> LeakyReLU, all on one tile."""
    acc = jnp.dot(p_ref[...], w_ref[...], preferred_element_type=jnp.float32)
    mean = jnp.mean(acc, axis=0, keepdims=True)
    var = jnp.mean((acc - mean) ** 2, axis=0, keepdims=True)   # biased (training-mode BN)
    inv = jax.lax.rsqrt(var + BN_EPS)
    x = (acc - mean) * (inv * gamma_ref[...]) + beta_ref[...]
    y_ref[...] = _leaky(x).astype(y_ref.dtype)


def _tail_kernel(p_ref, w_ref, gamma_ref, beta_ref, pool_ref, wl_ref, bl_ref, o_ref):
    """Fused last DownBlock + adaptive_avg_pool2d(1) + Linear.

    pool_ref : (B, M) f32 pooling matrix (1/S on rows belonging to each batch element).
    """
    acc = jnp.dot(p_ref[...], w_ref[...], preferred_element_type=jnp.float32)   # (M, C)
    mean = jnp.mean(acc, axis=0, keepdims=True)
    var = jnp.mean((acc - mean) ** 2, axis=0, keepdims=True)
    inv = jax.lax.rsqrt(var + BN_EPS)
    x = _leaky((acc - mean) * (inv * gamma_ref[...]) + beta_ref[...])
    pooled = jnp.dot(pool_ref[...], x, preferred_element_type=jnp.float32)      # (B, C)
    out = jnp.dot(pooled.astype(jnp.bfloat16), wl_ref[...],
                  preferred_element_type=jnp.float32)
    o_ref[...] = (out + bl_ref[...]).astype(o_ref.dtype)


# ----------------------------------------------------------------------------
# Wrapper helpers
# ----------------------------------------------------------------------------
def _round_up(v, m):
    return (v + m - 1) // m * m


def _pad_axis(a, axis, to):
    if a.shape[axis] >= to:
        return a
    widths = [(0, 0)] * a.ndim
    widths[axis] = (0, to - a.shape[axis])
    return jnp.pad(a, widths)


def _pick_tile(m):
    """>= 2 grid steps when M is big enough (v7x dual TensorCore), else one big tile."""
    if m >= 2048:
        tm = 1024
    elif m >= 512:
        tm = m // 2
    else:
        tm = m
    while m % tm:          # defensive: non-power-of-two M
        tm //= 2
    return max(tm, 1)


def _im2col(x, ksize, stride, pad):
    """Zero-pad + tap gather in the wrapper (cheap XLA fusion); column order (dy, dx, cin)."""
    B, H, W, C = x.shape
    xp = jnp.pad(x, ((0, 0), (pad, pad), (pad, pad), (0, 0)))
    Ho = (H + 2 * pad - ksize) // stride + 1
    Wo = (W + 2 * pad - ksize) // stride + 1
    taps = []
    for dy in range(ksize):
        for dx in range(ksize):
            taps.append(xp[:, dy:dy + (Ho - 1) * stride + 1:stride,
                           dx:dx + (Wo - 1) * stride + 1:stride, :])
    patches = jnp.concatenate(taps, axis=-1).reshape(B * Ho * Wo, ksize * ksize * C)
    return patches.astype(jnp.bfloat16), (B, Ho, Wo)


# ----------------------------------------------------------------------------
# Pallas wrappers (one per layer type)
# ----------------------------------------------------------------------------
def conv_init(x, w, b):
    """Conv2d(3, C, 7, 1, 3) with bias; returns raw conv output NHWC bf16 (real channels)."""
    kh, kw, _, cout = w.shape
    patches, (B, Ho, Wo) = _im2col(x, kh, stride=1, pad=3)
    M, K = patches.shape
    Kp = _round_up(K, 128)       # 147 -> 256: dense/aligned patch loads
    Np = _round_up(cout, 128)    # 32  -> 128: dense (unmasked) output stores
    patches = _pad_axis(patches, 1, Kp)
    w_k = _pad_axis(_pad_axis(w.reshape(K, cout), 0, Kp), 1, Np).astype(jnp.bfloat16)
    b_k = _pad_axis(b.reshape(1, cout), 1, Np).astype(jnp.float32)

    tm = _pick_tile(M)
    nsteps = M // tm
    y = pl.pallas_call(
        _conv_bias_kernel,
        out_shape=jax.ShapeDtypeStruct((M, Np), jnp.bfloat16),
        grid=(nsteps,),
        in_specs=[
            pl.BlockSpec((tm, Kp), lambda i: (i, 0)),
            pl.BlockSpec((Kp, Np), lambda i: (0, 0)),
            pl.BlockSpec((1, Np), lambda i: (0, 0)),
        ],
        out_specs=pl.BlockSpec((tm, Np), lambda i: (i, 0)),
        compiler_params=pltpu.CompilerParams(
            dimension_semantics=("parallel",), vmem_limit_bytes=VMEM_LIMIT),
        cost_estimate=pl.CostEstimate(
            flops=2 * M * Kp * Np, transcendentals=0,
            bytes_accessed=M * Kp * 2 + Kp * Np * 2 + M * Np * 2),
    )(patches, w_k, b_k)
    return y[:, :cout].reshape(B, Ho, Wo, cout)


def conv_down_stats(x, w, gamma, beta):
    """Multi-step DownBlock: conv (no bias) + per-tile stats in-kernel; BN+LReLU finalized
    once per element in the wrapper (NOT on the kh*kw-redundant patch domain)."""
    kh, kw, _, cout = w.shape
    patches, (B, Ho, Wo) = _im2col(x, kh, stride=2, pad=1)
    M, K = patches.shape                       # K is a multiple of 128 here
    Np = _round_up(cout, 128)                  # 64 -> 128 lane-dense stores
    w_k = _pad_axis(w.reshape(K, cout), 1, Np).astype(jnp.bfloat16)

    tm = _pick_tile(M)
    nsteps = M // tm
    y, stats = pl.pallas_call(
        _conv_stats_kernel,
        out_shape=(jax.ShapeDtypeStruct((M, Np), jnp.float32),
                   jax.ShapeDtypeStruct((nsteps, 2, Np), jnp.float32)),
        grid=(nsteps,),
        in_specs=[
            pl.BlockSpec((tm, K), lambda i: (i, 0)),
            pl.BlockSpec((K, Np), lambda i: (0, 0)),
        ],
        out_specs=(pl.BlockSpec((tm, Np), lambda i: (i, 0)),
                   pl.BlockSpec((1, 2, Np), lambda i: (i, 0, 0))),
        compiler_params=pltpu.CompilerParams(
            dimension_semantics=("parallel",), vmem_limit_bytes=VMEM_LIMIT),
        cost_estimate=pl.CostEstimate(
            flops=2 * M * K * Np, transcendentals=0,
            bytes_accessed=M * K * 2 + K * Np * 2 + M * Np * 4 + nsteps * 2 * Np * 4),
    )(patches, w_k)

    y = y[:, :cout]                                            # drop dead padded channels
    tot = jnp.sum(stats[:, 0, :cout], axis=0)
    tot_sq = jnp.sum(stats[:, 1, :cout], axis=0)
    mean = tot / M
    var = jnp.maximum(tot_sq / M - mean * mean, 0.0)           # biased (training-mode BN)
    inv = jax.lax.rsqrt(var + BN_EPS)
    a = _leaky((y - mean) * (inv * gamma) + beta)              # f32, once per element
    return a.reshape(B, Ho, Wo, cout)


def conv_down_fused(x, w, gamma, beta):
    """Single-step DownBlock: conv + batch-stats BN + LeakyReLU all in one kernel."""
    kh, kw, _, cout = w.shape
    patches, (B, Ho, Wo) = _im2col(x, kh, stride=2, pad=1)
    M, K = patches.shape
    w_k = w.reshape(K, cout).astype(jnp.bfloat16)
    y = pl.pallas_call(
        _conv_bn_act_kernel,
        out_shape=jax.ShapeDtypeStruct((M, cout), jnp.bfloat16),
        grid=(1,),
        in_specs=[
            pl.BlockSpec((M, K), lambda i: (0, 0)),
            pl.BlockSpec((K, cout), lambda i: (0, 0)),
            pl.BlockSpec((1, cout), lambda i: (0, 0)),
            pl.BlockSpec((1, cout), lambda i: (0, 0)),
        ],
        out_specs=pl.BlockSpec((M, cout), lambda i: (0, 0)),
        compiler_params=pltpu.CompilerParams(
            dimension_semantics=("arbitrary",), vmem_limit_bytes=VMEM_LIMIT),
        cost_estimate=pl.CostEstimate(
            flops=2 * M * K * cout, transcendentals=0,
            bytes_accessed=M * K * 2 + K * cout * 2 + M * cout * 2),
    )(patches, w_k,
      gamma.reshape(1, cout).astype(jnp.float32),
      beta.reshape(1, cout).astype(jnp.float32))
    return y.reshape(B, Ho, Wo, cout)


def tail(x, w, gamma, beta, w_lin, b_lin):
    """Fused final DownBlock + global average pool + Linear(+bias)."""
    kh, kw, _, cout = w.shape
    patches, (B, Ho, Wo) = _im2col(x, kh, stride=2, pad=1)
    M, K = patches.shape
    S = Ho * Wo
    nout = w_lin.shape[-1]
    w_k = w.reshape(K, cout).astype(jnp.bfloat16)
    # (B, M) pooling matrix: pooled[b] = mean over that batch element's spatial rows.
    pool = jnp.kron(jnp.eye(B, dtype=jnp.float32),
                    jnp.ones((1, S), jnp.float32)) / float(S)
    return pl.pallas_call(
        _tail_kernel,
        out_shape=jax.ShapeDtypeStruct((B, nout), jnp.float32),
        grid=(1,),
        in_specs=[
            pl.BlockSpec((M, K), lambda i: (0, 0)),
            pl.BlockSpec((K, cout), lambda i: (0, 0)),
            pl.BlockSpec((1, cout), lambda i: (0, 0)),
            pl.BlockSpec((1, cout), lambda i: (0, 0)),
            pl.BlockSpec((B, M), lambda i: (0, 0)),
            pl.BlockSpec((cout, nout), lambda i: (0, 0)),
            pl.BlockSpec((1, nout), lambda i: (0, 0)),
        ],
        out_specs=pl.BlockSpec((B, nout), lambda i: (0, 0)),
        compiler_params=pltpu.CompilerParams(
            dimension_semantics=("arbitrary",), vmem_limit_bytes=VMEM_LIMIT),
        cost_estimate=pl.CostEstimate(
            flops=2 * M * K * cout + 2 * B * M * cout + 2 * B * cout * nout,
            transcendentals=0,
            bytes_accessed=M * K * 2 + K * cout * 2 + cout * nout * 2 + B * nout * 4),
    )(patches, w_k,
      gamma.reshape(1, cout).astype(jnp.float32),
      beta.reshape(1, cout).astype(jnp.float32),
      pool, w_lin.astype(jnp.bfloat16),
      b_lin.reshape(1, nout).astype(jnp.float32))


# ----------------------------------------------------------------------------
# Parameter construction + forward composition
# ----------------------------------------------------------------------------
def build_params(key, ngf=16, img_resolution=32, num_outputs=128):
    nfc_multi = {2: 16, 4: 16, 8: 8, 16: 4, 32: 2, 64: 2, 128: 1,
                 256: 0.5, 512: 0.25, 1024: 0.125}
    nfc = {k: int(v * ngf) for k, v in nfc_multi.items()}
    assert img_resolution in nfc
    keys = iter(jax.random.split(key, 32))

    def conv_w(kh, kw, cin, cout):
        std = (2.0 / (kh * kw * cin)) ** 0.5
        return std * jax.random.normal(next(keys), (kh, kw, cin, cout), jnp.float32)

    params = {}
    c0 = nfc[img_resolution]
    params["init_w"] = conv_w(7, 7, 3, c0)                 # Conv2d(3, nfc[res], 7, 1, 3)
    params["init_b"] = 0.01 * jax.random.normal(next(keys), (c0,), jnp.float32)

    down = []
    res = img_resolution
    while res > 2:
        cin, cout = nfc[res], nfc[res // 2]
        down.append({
            "w": conv_w(4, 4, cin, cout),                  # Conv2d(cin, cout, 4, 2, 1, bias=False)
            "gamma": jnp.ones((cout,), jnp.float32),       # BatchNorm2d default affine params
            "beta": jnp.zeros((cout,), jnp.float32),
        })
        res //= 2
    params["down"] = down

    c_last = nfc[res]                                      # res == 2
    std = (1.0 / c_last) ** 0.5
    params["lin_w"] = std * jax.random.normal(next(keys), (c_last, num_outputs), jnp.float32)
    params["lin_b"] = 0.01 * jax.random.normal(next(keys), (num_outputs,), jnp.float32)
    return params


def encoder_forward(params, img):
    """img: (B, 3, H, W) NCHW like the PyTorch module; returns (B, num_outputs)."""
    x = jnp.transpose(img, (0, 2, 3, 1))                   # NHWC: channels on the lane dim

    # init 7x7 conv (bias, no norm / activation afterwards)
    y = conv_init(x, params["init_w"], params["init_b"])

    # DownBlock chain; the last block is fused with the head into a single kernel.
    for blk in params["down"][:-1]:
        B_, H_, W_, _ = y.shape
        m_out = B_ * (H_ // 2) * (W_ // 2)
        if m_out <= SINGLE_STEP_MAX_M:
            y = conv_down_fused(y, blk["w"], blk["gamma"], blk["beta"])
        else:
            y = conv_down_stats(y, blk["w"], blk["gamma"], blk["beta"])

    last = params["down"][-1]
    return tail(y, last["w"], last["gamma"], last["beta"],
                params["lin_w"], params["lin_b"])


if __name__ == "__main__":
    key = jax.random.PRNGKey(0)
    pkey, xkey = jax.random.split(key)

    params = build_params(pkey, ngf=16, img_resolution=32, num_outputs=128)
    img = jax.random.normal(xkey, (2, 3, 32, 32), jnp.float32)

    fwd = jax.jit(encoder_forward)
    out = jax.block_until_ready(fwd(params, img))

    assert out.shape == (2, 128), out.shape
    assert bool(jnp.all(jnp.isfinite(out)))
    print("KERNEL_OK")
</pallas_src>

<mosaic_0001>
module attributes {stable_mosaic.version = 11 : i64} {
  func.func @_conv_bias_kernel(%arg0: i32, %arg1: memref<1024x256xbf16, #tpu.memory_space<vmem>>, %arg2: memref<256x128xbf16, #tpu.memory_space<vmem>>, %arg3: memref<1x128xf32, #tpu.memory_space<vmem>>, %arg4: memref<1024x128xbf16, #tpu.memory_space<vmem>>) attributes {dimension_semantics = [#tpu.dimension_semantics<parallel>], iteration_bounds = array<i64: 2>, scalar_prefetch = 0 : i64, scratch_operands = 0 : i64, tpu.core_type = #tpu.core_type<tc>, window_params = [{transform_indices = @transform_0, window_bounds = array<i64: 1024, 256>}, {pipeline_mode = #tpu.pipeline_mode<synchronous>, transform_indices = @transform_1, window_bounds = array<i64: 256, 128>}, {pipeline_mode = #tpu.pipeline_mode<synchronous>, transform_indices = @transform_2, window_bounds = array<i64: 1, 128>}, {transform_indices = @transform_3, window_bounds = array<i64: 1024, 128>}]} {
    %c0 = arith.constant 0 : index
    %c0_0 = arith.constant 0 : index
    %0 = vector.load %arg1[%c0, %c0_0] : memref<1024x256xbf16, #tpu.memory_space<vmem>>, vector<1024x256xbf16>
    %c0_1 = arith.constant 0 : index
    %c0_2 = arith.constant 0 : index
    %1 = vector.load %arg2[%c0_1, %c0_2] : memref<256x128xbf16, #tpu.memory_space<vmem>>, vector<256x128xbf16>
    %cst = arith.constant dense<0.000000e+00> : vector<1024x128xf32>
    %2 = tpu.matmul %0, %1, %cst {dimension_numbers = #tpu.dot_dimension_numbers<[1], [0], [0], [1], [0, 0, 1, 1], [], []>} : vector<1024x256xbf16>, vector<256x128xbf16>, vector<1024x128xf32> -> vector<1024x128xf32>
    %c0_3 = arith.constant 0 : index
    %c0_4 = arith.constant 0 : index
    %3 = vector.load %arg3[%c0_3, %c0_4] : memref<1x128xf32, #tpu.memory_space<vmem>>, vector<1x128xf32>
    %4 = vector.broadcast %3 : vector<1x128xf32> to vector<1024x128xf32>
    %5 = arith.addf %2, %4 : vector<1024x128xf32>
    %6 = arith.truncf %5 : vector<1024x128xf32> to vector<1024x128xbf16>
    %c0_5 = arith.constant 0 : index
    %c0_6 = arith.constant 0 : index
    %7 = vector.load %arg4[%c0_5, %c0_6] : memref<1024x128xbf16, #tpu.memory_space<vmem>>, vector<1024x128xbf16>
    tpu.vector_store %arg4[%c0_5, %c0_6], %6 {strides = array<i32>} : memref<1024x128xbf16, #tpu.memory_space<vmem>>, vector<1024x128xbf16>,
    return
  }
  func.func @transform_0(%arg0: i32) -> (i32, i32) {
    %c0_i32 = arith.constant 0 : i32
    %c0_i32_0 = arith.constant 0 : i32
    return %arg0, %c0_i32 : i32, i32
  }
  func.func @transform_1(%arg0: i32) -> (i32, i32) {
    %c0_i32 = arith.constant 0 : i32
    %c0_i32_0 = arith.constant 0 : i32
    %c0_i32_1 = arith.constant 0 : i32
    return %c0_i32, %c0_i32_0 : i32, i32
  }
  func.func @transform_2(%arg0: i32) -> (i32, i32) {
    %c0_i32 = arith.constant 0 : i32
    %c0_i32_0 = arith.constant 0 : i32
    %c0_i32_1 = arith.constant 0 : i32
    return %c0_i32, %c0_i32_0 : i32, i32
  }
  func.func @transform_3(%arg0: i32) -> (i32, i32) {
    %c0_i32 = arith.constant 0 : i32
    %c0_i32_0 = arith.constant 0 : i32
    return %arg0, %c0_i32 : i32, i32
  }
}

module attributes {stable_mosaic.version = 11 : i64} {
  func.func @_conv_stats_kernel(%arg0: i32, %arg1: memref<256x512xbf16, #tpu.memory_space<vmem>>, %arg2: memref<512x128xbf16, #tpu.memory_space<vmem>>, %arg3: memref<256x128xf32, #tpu.memory_space<vmem>>, %arg4: memref<1x2x128xf32, #tpu.memory_space<vmem>>) attributes {dimension_semantics = [#tpu.dimension_semantics<parallel>], iteration_bounds = array<i64: 2>, scalar_prefetch = 0 : i64, scratch_operands = 0 : i64, tpu.core_type = #tpu.core_type<tc>, window_params = [{transform_indices = @transform_0, window_bounds = array<i64: 256, 512>}, {pipeline_mode = #tpu.pipeline_mode<synchronous>, transform_indices = @transform_1, window_bounds = array<i64: 512, 128>}, {transform_indices = @transform_2, window_bounds = array<i64: 256, 128>}, {transform_indices = @transform_3, window_bounds = array<i64: 1, 2, 128>}]} {
    %c0 = arith.constant 0 : index
    %c0_0 = arith.constant 0 : index
    %0 = vector.load %arg1[%c0, %c0_0] : memref<256x512xbf16, #tpu.memory_space<vmem>>, vector<256x512xbf16>
    %c0_1 = arith.constant 0 : index
    %c0_2 = arith.constant 0 : index
    %1 = vector.load %arg2[%c0_1, %c0_2] : memref<512x128xbf16, #tpu.memory_space<vmem>>, vector<512x128xbf16>
    %cst = arith.constant dense<0.000000e+00> : vector<256x128xf32>
    %2 = tpu.matmul %0, %1, %cst {dimension_numbers = #tpu.dot_dimension_numbers<[1], [0], [0], [1], [0, 0, 1, 1], [], []>} : vector<256x512xbf16>, vector<512x128xbf16>, vector<256x128xf32> -> vector<256x128xf32>
    %c0_3 = arith.constant 0 : index
    %c0_4 = arith.constant 0 : index
    %3 = vector.load %arg3[%c0_3, %c0_4] : memref<256x128xf32, #tpu.memory_space<vmem>>, vector<256x128xf32>
    tpu.vector_store %arg3[%c0_3, %c0_4], %2 {strides = array<i32>} : memref<256x128xf32, #tpu.memory_space<vmem>>, vector<256x128xf32>,
    %cst_5 = arith.constant dense<0.000000e+00> : vector<128xf32>
    %4 = vector.multi_reduction <add>, %2, %cst_5 [0] : vector<256x128xf32> to vector<128xf32>
    %5 = vector.shape_cast %4 : vector<128xf32> to vector<1x128xf32>
    %6 = arith.mulf %2, %2 : vector<256x128xf32>
    %cst_6 = arith.constant dense<0.000000e+00> : vector<128xf32>
    %7 = vector.multi_reduction <add>, %6, %cst_6 [0] : vector<256x128xf32> to vector<128xf32>
    %8 = vector.shape_cast %7 : vector<128xf32> to vector<1x128xf32>
    %9 = tpu.concatenate %5, %8 in 0 : vector<1x128xf32>, vector<1x128xf32> -> vector<2x128xf32>
    %c0_7 = arith.constant 0 : index
    %c0_8 = arith.constant 0 : index
    %c0_9 = arith.constant 0 : index
    %10 = vector.load %arg4[%c0_7, %c0_8, %c0_9] : memref<1x2x128xf32, #tpu.memory_space<vmem>>, vector<1x2x128xf32>
    %11 = vector.shape_cast %10 : vector<1x2x128xf32> to vector<2x128xf32>
    %12 = vector.shape_cast %9 : vector<2x128xf32> to vector<1x2x128xf32>
    tpu.vector_store %arg4[%c0_7, %c0_8, %c0_9], %12 {strides = array<i32>} : memref<1x2x128xf32, #tpu.memory_space<vmem>>, vector<1x2x128xf32>,
    return
  }
  func.func @transform_0(%arg0: i32) -> (i32, i32) {
    %c0_i32 = arith.constant 0 : i32
    %c0_i32_0 = arith.constant 0 : i32
    return %arg0, %c0_i32 : i32, i32
  }
  func.func @transform_1(%arg0: i32) -> (i32, i32) {
    %c0_i32 = arith.constant 0 : i32
    %c0_i32_0 = arith.constant 0 : i32
    %c0_i32_1 = arith.constant 0 : i32
    return %c0_i32, %c0_i32_0 : i32, i32
  }
  func.func @transform_2(%arg0: i32) -> (i32, i32) {
    %c0_i32 = arith.constant 0 : i32
    %c0_i32_0 = arith.constant 0 : i32
    return %arg0, %c0_i32 : i32, i32
  }
  func.func @transform_3(%arg0: i32) -> (i32, i32, i32) {
    %c0_i32 = arith.constant 0 : i32
    %c0_i32_0 = arith.constant 0 : i32
    %c0_i32_1 = arith.constant 0 : i32
    return %arg0, %c0_i32, %c0_i32_0 : i32, i32, i32
  }
}

module attributes {stable_mosaic.version = 11 : i64} {
  func.func @_conv_bn_act_kernel(%arg0: i32, %arg1: memref<128x1024xbf16, #tpu.memory_space<vmem>>, %arg2: memref<1024x128xbf16, #tpu.memory_space<vmem>>, %arg3: memref<1x128xf32, #tpu.memory_space<vmem>>, %arg4: memref<1x128xf32, #tpu.memory_space<vmem>>, %arg5: memref<128x128xbf16, #tpu.memory_space<vmem>>) attributes {dimension_semantics = [#tpu.dimension_semantics<arbitrary>], iteration_bounds = array<i64: 1>, scalar_prefetch = 0 : i64, scratch_operands = 0 : i64, tpu.core_type = #tpu.core_type<tc>, window_params = [{pipeline_mode = #tpu.pipeline_mode<synchronous>, transform_indices = @transform_0, window_bounds = array<i64: 128, 1024>}, {pipeline_mode = #tpu.pipeline_mode<synchronous>, transform_indices = @transform_1, window_bounds = array<i64: 1024, 128>}, {pipeline_mode = #tpu.pipeline_mode<synchronous>, transform_indices = @transform_2, window_bounds = array<i64: 1, 128>}, {pipeline_mode = #tpu.pipeline_mode<synchronous>, transform_indices = @transform_3, window_bounds = array<i64: 1, 128>}, {pipeline_mode = #tpu.pipeline_mode<synchronous>, transform_indices = @transform_4, window_bounds = array<i64: 128, 128>}]} {
    %c0 = arith.constant 0 : index
    %c0_0 = arith.constant 0 : index
    %0 = vector.load %arg1[%c0, %c0_0] : memref<128x1024xbf16, #tpu.memory_space<vmem>>, vector<128x1024xbf16>
    %c0_1 = arith.constant 0 : index
    %c0_2 = arith.constant 0 : index
    %1 = vector.load %arg2[%c0_1, %c0_2] : memref<1024x128xbf16, #tpu.memory_space<vmem>>, vector<1024x128xbf16>
    %cst = arith.constant dense<0.000000e+00> : vector<128x128xf32>
    %2 = tpu.matmul %0, %1, %cst {dimension_numbers = #tpu.dot_dimension_numbers<[1], [0], [0], [1], [0, 0, 1, 1], [], []>} : vector<128x1024xbf16>, vector<1024x128xbf16>, vector<128x128xf32> -> vector<128x128xf32>
    %cst_3 = arith.constant dense<0.000000e+00> : vector<128xf32>
    %3 = vector.multi_reduction <add>, %2, %cst_3 [0] : vector<128x128xf32> to vector<128xf32>
    %4 = vector.shape_cast %3 : vector<128xf32> to vector<1x128xf32>
    %cst_4 = arith.constant 1.280000e+02 : f32
    %5 = vector.broadcast %cst_4 : f32 to vector<1x128xf32>
    %6 = arith.divf %4, %5 : vector<1x128xf32>
    %7 = vector.broadcast %6 : vector<1x128xf32> to vector<128x128xf32>
    %8 = arith.subf %2, %7 : vector<128x128xf32>
    %9 = arith.mulf %8, %8 : vector<128x128xf32>
    %cst_5 = arith.constant dense<0.000000e+00> : vector<128xf32>
    %10 = vector.multi_reduction <add>, %9, %cst_5 [0] : vector<128x128xf32> to vector<128xf32>
    %11 = vector.shape_cast %10 : vector<128xf32> to vector<1x128xf32>
    %cst_6 = arith.constant 1.280000e+02 : f32
    %12 = vector.broadcast %cst_6 : f32 to vector<1x128xf32>
    %13 = arith.divf %11, %12 : vector<1x128xf32>
    %cst_7 = arith.constant 9.99999974E-6 : f32
    %14 = vector.broadcast %cst_7 : f32 to vector<1x128xf32>
    %15 = arith.addf %13, %14 : vector<1x128xf32>
    %16 = math.rsqrt %15 : vector<1x128xf32>
    %17 = vector.broadcast %6 : vector<1x128xf32> to vector<128x128xf32>
    %18 = arith.subf %2, %17 : vector<128x128xf32>
    %c0_8 = arith.constant 0 : index
    %c0_9 = arith.constant 0 : index
    %19 = vector.load %arg3[%c0_8, %c0_9] : memref<1x128xf32, #tpu.memory_space<vmem>>, vector<1x128xf32>
    %20 = arith.mulf %16, %19 : vector<1x128xf32>
    %21 = vector.broadcast %20 : vector<1x128xf32> to vector<128x128xf32>
    %22 = arith.mulf %18, %21 : vector<128x128xf32>
    %c0_10 = arith.constant 0 : index
    %c0_11 = arith.constant 0 : index
    %23 = vector.load %arg4[%c0_10, %c0_11] : memref<1x128xf32, #tpu.memory_space<vmem>>, vector<1x128xf32>
    %24 = vector.broadcast %23 : vector<1x128xf32> to vector<128x128xf32>
    %25 = arith.addf %22, %24 : vector<128x128xf32>
    %cst_12 = arith.constant 0.000000e+00 : f32
    %26 = vector.broadcast %cst_12 : f32 to vector<128x128xf32>
    %27 = arith.cmpf ogt, %25, %26 : vector<128x128xf32>
    %cst_13 = arith.constant 2.000000e-01 : f32
    %28 = vector.broadcast %cst_13 : f32 to vector<128x128xf32>
    %29 = arith.mulf %28, %25 : vector<128x128xf32>
    %30 = arith.select %27, %25, %29 : vector<128x128xi1>, vector<128x128xf32>
    %31 = arith.truncf %30 : vector<128x128xf32> to vector<128x128xbf16>
    %c0_14 = arith.constant 0 : index
    %c0_15 = arith.constant 0 : index
    %32 = vector.load %arg5[%c0_14, %c0_15] : memref<128x128xbf16, #tpu.memory_space<vmem>>, vector<128x128xbf16>
    tpu.vector_store %arg5[%c0_14, %c0_15], %31 {strides = array<i32>} : memref<128x128xbf16, #tpu.memory_space<vmem>>, vector<128x128xbf16>,
    return
  }
  func.func @transform_0(%arg0: i32) -> (i32, i32) {
    %c0_i32 = arith.constant 0 : i32
    %c0_i32_0 = arith.constant 0 : i32
    %c0_i32_1 = arith.constant 0 : i32
    return %c0_i32, %c0_i32_0 : i32, i32
  }
  func.func @transform_1(%arg0: i32) -> (i32, i32) {
    %c0_i32 = arith.constant 0 : i32
    %c0_i32_0 = arith.constant 0 : i32
    %c0_i32_1 = arith.constant 0 : i32
    return %c0_i32, %c0_i32_0 : i32, i32
  }
  func.func @transform_2(%arg0: i32) -> (i32, i32) {
    %c0_i32 = arith.constant 0 : i32
    %c0_i32_0 = arith.constant 0 : i32
    %c0_i32_1 = arith.constant 0 : i32
    return %c0_i32, %c0_i32_0 : i32, i32
  }
  func.func @transform_3(%arg0: i32) -> (i32, i32) {
    %c0_i32 = arith.constant 0 : i32
    %c0_i32_0 = arith.constant 0 : i32
    %c0_i32_1 = arith.constant 0 : i32
    return %c0_i32, %c0_i32_0 : i32, i32
  }
  func.func @transform_4(%arg0: i32) -> (i32, i32) {
    %c0_i32 = arith.constant 0 : i32
    %c0_i32_0 = arith.constant 0 : i32
    %c0_i32_1 = arith.constant 0 : i32
    return %c0_i32, %c0_i32_0 : i32, i32
  }
}

module attributes {stable_mosaic.version = 11 : i64} {
  func.func @_conv_bn_act_kernel(%arg0: i32, %arg1: memref<32x2048xbf16, #tpu.memory_space<vmem>>, %arg2: memref<2048x256xbf16, #tpu.memory_space<vmem>>, %arg3: memref<1x256xf32, #tpu.memory_space<vmem>>, %arg4: memref<1x256xf32, #tpu.memory_space<vmem>>, %arg5: memref<32x256xbf16, #tpu.memory_space<vmem>>) attributes {dimension_semantics = [#tpu.dimension_semantics<arbitrary>], iteration_bounds = array<i64: 1>, scalar_prefetch = 0 : i64, scratch_operands = 0 : i64, tpu.core_type = #tpu.core_type<tc>, window_params = [{pipeline_mode = #tpu.pipeline_mode<synchronous>, transform_indices = @transform_0, window_bounds = array<i64: 32, 2048>}, {pipeline_mode = #tpu.pipeline_mode<synchronous>, transform_indices = @transform_1, window_bounds = array<i64: 2048, 256>}, {pipeline_mode = #tpu.pipeline_mode<synchronous>, transform_indices = @transform_2, window_bounds = array<i64: 1, 256>}, {pipeline_mode = #tpu.pipeline_mode<synchronous>, transform_indices = @transform_3, window_bounds = array<i64: 1, 256>}, {pipeline_mode = #tpu.pipeline_mode<synchronous>, transform_indices = @transform_4, window_bounds = array<i64: 32, 256>}]} {
    %c0 = arith.constant 0 : index
    %c0_0 = arith.constant 0 : index
    %0 = vector.load %arg1[%c0, %c0_0] : memref<32x2048xbf16, #tpu.memory_space<vmem>>, vector<32x2048xbf16>
    %c0_1 = arith.constant 0 : index
    %c0_2 = arith.constant 0 : index
    %1 = vector.load %arg2[%c0_1, %c0_2] : memref<2048x256xbf16, #tpu.memory_space<vmem>>, vector<2048x256xbf16>
    %cst = arith.constant dense<0.000000e+00> : vector<32x256xf32>
    %2 = tpu.matmul %0, %1, %cst {dimension_numbers = #tpu.dot_dimension_numbers<[1], [0], [0], [1], [0, 0, 1, 1], [], []>} : vector<32x2048xbf16>, vector<2048x256xbf16>, vector<32x256xf32> -> vector<32x256xf32>
    %cst_3 = arith.constant dense<0.000000e+00> : vector<256xf32>
    %3 = vector.multi_reduction <add>, %2, %cst_3 [0] : vector<32x256xf32> to vector<256xf32>
    %4 = vector.shape_cast %3 : vector<256xf32> to vector<1x256xf32>
    %cst_4 = arith.constant 3.200000e+01 : f32
    %5 = vector.broadcast %cst_4 : f32 to vector<1x256xf32>
    %6 = arith.divf %4, %5 : vector<1x256xf32>
    %7 = vector.broadcast %6 : vector<1x256xf32> to vector<32x256xf32>
    %8 = arith.subf %2, %7 : vector<32x256xf32>
    %9 = arith.mulf %8, %8 : vector<32x256xf32>
    %cst_5 = arith.constant dense<0.000000e+00> : vector<256xf32>
    %10 = vector.multi_reduction <add>, %9, %cst_5 [0] : vector<32x256xf32> to vector<256xf32>
    %11 = vector.shape_cast %10 : vector<256xf32> to vector<1x256xf32>
    %cst_6 = arith.constant 3.200000e+01 : f32
    %12 = vector.broadcast %cst_6 : f32 to vector<1x256xf32>
    %13 = arith.divf %11, %12 : vector<1x256xf32>
    %cst_7 = arith.constant 9.99999974E-6 : f32
    %14 = vector.broadcast %cst_7 : f32 to vector<1x256xf32>
    %15 = arith.addf %13, %14 : vector<1x256xf32>
    %16 = math.rsqrt %15 : vector<1x256xf32>
    %17 = vector.broadcast %6 : vector<1x256xf32> to vector<32x256xf32>
    %18 = arith.subf %2, %17 : vector<32x256xf32>
    %c0_8 = arith.constant 0 : index
    %c0_9 = arith.constant 0 : index
    %19 = vector.load %arg3[%c0_8, %c0_9] : memref<1x256xf32, #tpu.memory_space<vmem>>, vector<1x256xf32>
    %20 = arith.mulf %16, %19 : vector<1x256xf32>
    %21 = vector.broadcast %20 : vector<1x256xf32> to vector<32x256xf32>
    %22 = arith.mulf %18, %21 : vector<32x256xf32>
    %c0_10 = arith.constant 0 : index
    %c0_11 = arith.constant 0 : index
    %23 = vector.load %arg4[%c0_10, %c0_11] : memref<1x256xf32, #tpu.memory_space<vmem>>, vector<1x256xf32>
    %24 = vector.broadcast %23 : vector<1x256xf32> to vector<32x256xf32>
    %25 = arith.addf %22, %24 : vector<32x256xf32>
    %cst_12 = arith.constant 0.000000e+00 : f32
    %26 = vector.broadcast %cst_12 : f32 to vector<32x256xf32>
    %27 = arith.cmpf ogt, %25, %26 : vector<32x256xf32>
    %cst_13 = arith.constant 2.000000e-01 : f32
    %28 = vector.broadcast %cst_13 : f32 to vector<32x256xf32>
    %29 = arith.mulf %28, %25 : vector<32x256xf32>
    %30 = arith.select %27, %25, %29 : vector<32x256xi1>, vector<32x256xf32>
    %31 = arith.truncf %30 : vector<32x256xf32> to vector<32x256xbf16>
    %c0_14 = arith.constant 0 : index
    %c0_15 = arith.constant 0 : index
    %32 = vector.load %arg5[%c0_14, %c0_15] : memref<32x256xbf16, #tpu.memory_space<vmem>>, vector<32x256xbf16>
    tpu.vector_store %arg5[%c0_14, %c0_15], %31 {strides = array<i32>} : memref<32x256xbf16, #tpu.memory_space<vmem>>, vector<32x256xbf16>,
    return
  }
  func.func @transform_0(%arg0: i32) -> (i32, i32) {
    %c0_i32 = arith.constant 0 : i32
    %c0_i32_0 = arith.constant 0 : i32
    %c0_i32_1 = arith.constant 0 : i32
    return %c0_i32, %c0_i32_0 : i32, i32
  }
  func.func @transform_1(%arg0: i32) -> (i32, i32) {
    %c0_i32 = arith.constant 0 : i32
    %c0_i32_0 = arith.constant 0 : i32
    %c0_i32_1 = arith.constant 0 : i32
    return %c0_i32, %c0_i32_0 : i32, i32
  }
  func.func @transform_2(%arg0: i32) -> (i32, i32) {
    %c0_i32 = arith.constant 0 : i32
    %c0_i32_0 = arith.constant 0 : i32
    %c0_i32_1 = arith.constant 0 : i32
    return %c0_i32, %c0_i32_0 : i32, i32
  }
  func.func @transform_3(%arg0: i32) -> (i32, i32) {
    %c0_i32 = arith.constant 0 : i32
    %c0_i32_0 = arith.constant 0 : i32
    %c0_i32_1 = arith.constant 0 : i32
    return %c0_i32, %c0_i32_0 : i32, i32
  }
  func.func @transform_4(%arg0: i32) -> (i32, i32) {
    %c0_i32 = arith.constant 0 : i32
    %c0_i32_0 = arith.constant 0 : i32
    %c0_i32_1 = arith.constant 0 : i32
    return %c0_i32, %c0_i32_0 : i32, i32
  }
}

module attributes {stable_mosaic.version = 11 : i64} {
  func.func @_tail_kernel(%arg0: i32, %arg1: memref<8x4096xbf16, #tpu.memory_space<vmem>>, %arg2: memref<4096x256xbf16, #tpu.memory_space<vmem>>, %arg3: memref<1x256xf32, #tpu.memory_space<vmem>>, %arg4: memref<1x256xf32, #tpu.memory_space<vmem>>, %arg5: memref<2x8xf32, #tpu.memory_space<vmem>>, %arg6: memref<256x128xbf16, #tpu.memory_space<vmem>>, %arg7: memref<1x128xf32, #tpu.memory_space<vmem>>, %arg8: memref<2x128xf32, #tpu.memory_space<vmem>>) attributes {dimension_semantics = [#tpu.dimension_semantics<arbitrary>], iteration_bounds = array<i64: 1>, scalar_prefetch = 0 : i64, scratch_operands = 0 : i64, tpu.core_type = #tpu.core_type<tc>, window_params = [{pipeline_mode = #tpu.pipeline_mode<synchronous>, transform_indices = @transform_0, window_bounds = array<i64: 8, 4096>}, {pipeline_mode = #tpu.pipeline_mode<synchronous>, transform_indices = @transform_1, window_bounds = array<i64: 4096, 256>}, {pipeline_mode = #tpu.pipeline_mode<synchronous>, transform_indices = @transform_2, window_bounds = array<i64: 1, 256>}, {pipeline_mode = #tpu.pipeline_mode<synchronous>, transform_indices = @transform_3, window_bounds = array<i64: 1, 256>}, {pipeline_mode = #tpu.pipeline_mode<synchronous>, transform_indices = @transform_4, window_bounds = array<i64: 2, 8>}, {pipeline_mode = #tpu.pipeline_mode<synchronous>, transform_indices = @transform_5, window_bounds = array<i64: 256, 128>}, {pipeline_mode = #tpu.pipeline_mode<synchronous>, transform_indices = @transform_6, window_bounds = array<i64: 1, 128>}, {pipeline_mode = #tpu.pipeline_mode<synchronous>, transform_indices = @transform_7, window_bounds = array<i64: 2, 128>}]} {
    %c0 = arith.constant 0 : index
    %c0_0 = arith.constant 0 : index
    %0 = vector.load %arg1[%c0, %c0_0] : memref<8x4096xbf16, #tpu.memory_space<vmem>>, vector<8x4096xbf16>
    %c0_1 = arith.constant 0 : index
    %c0_2 = arith.constant 0 : index
    %1 = vector.load %arg2[%c0_1, %c0_2] : memref<4096x256xbf16, #tpu.memory_space<vmem>>, vector<4096x256xbf16>
    %cst = arith.constant dense<0.000000e+00> : vector<8x256xf32>
    %2 = tpu.matmul %0, %1, %cst {dimension_numbers = #tpu.dot_dimension_numbers<[1], [0], [0], [1], [0, 0, 1, 1], [], []>} : vector<8x4096xbf16>, vector<4096x256xbf16>, vector<8x256xf32> -> vector<8x256xf32>
    %cst_3 = arith.constant dense<0.000000e+00> : vector<256xf32>
    %3 = vector.multi_reduction <add>, %2, %cst_3 [0] : vector<8x256xf32> to vector<256xf32>
    %4 = vector.shape_cast %3 : vector<256xf32> to vector<1x256xf32>
    %cst_4 = arith.constant 8.000000e+00 : f32
    %5 = vector.broadcast %cst_4 : f32 to vector<1x256xf32>
    %6 = arith.divf %4, %5 : vector<1x256xf32>
    %7 = vector.broadcast %6 : vector<1x256xf32> to vector<8x256xf32>
    %8 = arith.subf %2, %7 : vector<8x256xf32>
    %9 = arith.mulf %8, %8 : vector<8x256xf32>
    %cst_5 = arith.constant dense<0.000000e+00> : vector<256xf32>
    %10 = vector.multi_reduction <add>, %9, %cst_5 [0] : vector<8x256xf32> to vector<256xf32>
    %11 = vector.shape_cast %10 : vector<256xf32> to vector<1x256xf32>
    %cst_6 = arith.constant 8.000000e+00 : f32
    %12 = vector.broadcast %cst_6 : f32 to vector<1x256xf32>
    %13 = arith.divf %11, %12 : vector<1x256xf32>
    %cst_7 = arith.constant 9.99999974E-6 : f32
    %14 = vector.broadcast %cst_7 : f32 to vector<1x256xf32>
    %15 = arith.addf %13, %14 : vector<1x256xf32>
    %16 = math.rsqrt %15 : vector<1x256xf32>
    %17 = vector.broadcast %6 : vector<1x256xf32> to vector<8x256xf32>
    %18 = arith.subf %2, %17 : vector<8x256xf32>
    %c0_8 = arith.constant 0 : index
    %c0_9 = arith.constant 0 : index
    %19 = vector.load %arg3[%c0_8, %c0_9] : memref<1x256xf32, #tpu.memory_space<vmem>>, vector<1x256xf32>
    %20 = arith.mulf %16, %19 : vector<1x256xf32>
    %21 = vector.broadcast %20 : vector<1x256xf32> to vector<8x256xf32>
    %22 = arith.mulf %18, %21 : vector<8x256xf32>
    %c0_10 = arith.constant 0 : index
    %c0_11 = arith.constant 0 : index
    %23 = vector.load %arg4[%c0_10, %c0_11] : memref<1x256xf32, #tpu.memory_space<vmem>>, vector<1x256xf32>
    %24 = vector.broadcast %23 : vector<1x256xf32> to vector<8x256xf32>
    %25 = arith.addf %22, %24 : vector<8x256xf32>
    %cst_12 = arith.constant 0.000000e+00 : f32
    %26 = vector.broadcast %cst_12 : f32 to vector<8x256xf32>
    %27 = arith.cmpf ogt, %25, %26 : vector<8x256xf32>
    %cst_13 = arith.constant 2.000000e-01 : f32
    %28 = vector.broadcast %cst_13 : f32 to vector<8x256xf32>
    %29 = arith.mulf %28, %25 : vector<8x256xf32>
    %30 = arith.select %27, %25, %29 : vector<8x256xi1>, vector<8x256xf32>
    %c0_14 = arith.constant 0 : index
    %c0_15 = arith.constant 0 : index
    %31 = vector.load %arg5[%c0_14, %c0_15] : memref<2x8xf32, #tpu.memory_space<vmem>>, vector<2x8xf32>
    %cst_16 = arith.constant dense<0.000000e+00> : vector<2x256xf32>
    %32 = tpu.matmul %31, %30, %cst_16 {dimension_numbers = #tpu.dot_dimension_numbers<[1], [0], [0], [1], [0, 0, 1, 1], [], []>} : vector<2x8xf32>, vector<8x256xf32>, vector<2x256xf32> -> vector<2x256xf32>
    %33 = arith.truncf %32 : vector<2x256xf32> to vector<2x256xbf16>
    %c0_17 = arith.constant 0 : index
    %c0_18 = arith.constant 0 : index
    %34 = vector.load %arg6[%c0_17, %c0_18] : memref<256x128xbf16, #tpu.memory_space<vmem>>, vector<256x128xbf16>
    %cst_19 = arith.constant dense<0.000000e+00> : vector<2x128xf32>
    %35 = tpu.matmul %33, %34, %cst_19 {dimension_numbers = #tpu.dot_dimension_numbers<[1], [0], [0], [1], [0, 0, 1, 1], [], []>} : vector<2x256xbf16>, vector<256x128xbf16>, vector<2x128xf32> -> vector<2x128xf32>
    %c0_20 = arith.constant 0 : index
    %c0_21 = arith.constant 0 : index
    %36 = vector.load %arg7[%c0_20, %c0_21] : memref<1x128xf32, #tpu.memory_space<vmem>>, vector<1x128xf32>
    %37 = vector.broadcast %36 : vector<1x128xf32> to vector<2x128xf32>
    %38 = arith.addf %35, %37 : vector<2x128xf32>
    %c0_22 = arith.constant 0 : index
    %c0_23 = arith.constant 0 : index
    %39 = vector.load %arg8[%c0_22, %c0_23] : memref<2x128xf32, #tpu.memory_space<vmem>>, vector<2x128xf32>
    tpu.vector_store %arg8[%c0_22, %c0_23], %38 {strides = array<i32>} : memref<2x128xf32, #tpu.memory_space<vmem>>, vector<2x128xf32>,
    return
  }
  func.func @transform_0(%arg0: i32) -> (i32, i32) {
    %c0_i32 = arith.constant 0 : i32
    %c0_i32_0 = arith.constant 0 : i32
    %c0_i32_1 = arith.constant 0 : i32
    return %c0_i32, %c0_i32_0 : i32, i32
  }
  func.func @transform_1(%arg0: i32) -> (i32, i32) {
    %c0_i32 = arith.constant 0 : i32
    %c0_i32_0 = arith.constant 0 : i32
    %c0_i32_1 = arith.constant 0 : i32
    return %c0_i32, %c0_i32_0 : i32, i32
  }
  func.func @transform_2(%arg0: i32) -> (i32, i32) {
    %c0_i32 = arith.constant 0 : i32
    %c0_i32_0 = arith.constant 0 : i32
    %c0_i32_1 = arith.constant 0 : i32
    return %c0_i32, %c0_i32_0 : i32, i32
  }
  func.func @transform_3(%arg0: i32) -> (i32, i32) {
    %c0_i32 = arith.constant 0 : i32
    %c0_i32_0 = arith.constant 0 : i32
    %c0_i32_1 = arith.constant 0 : i32
    return %c0_i32, %c0_i32_0 : i32, i32
  }
  func.func @transform_4(%arg0: i32) -> (i32, i32) {
    %c0_i32 = arith.constant 0 : i32
    %c0_i32_0 = arith.constant 0 : i32
    %c0_i32_1 = arith.constant 0 : i32
    return %c0_i32, %c0_i32_0 : i32, i32
  }
  func.func @transform_5(%arg0: i32) -> (i32, i32) {
    %c0_i32 = arith.constant 0 : i32
    %c0_i32_0 = arith.constant 0 : i32
    %c0_i32_1 = arith.constant 0 : i32
    return %c0_i32, %c0_i32_0 : i32, i32
  }
  func.func @transform_6(%arg0: i32) -> (i32, i32) {
    %c0_i32 = arith.constant 0 : i32
    %c0_i32_0 = arith.constant 0 : i32
    %c0_i32_1 = arith.constant 0 : i32
    return %c0_i32, %c0_i32_0 : i32, i32
  }
  func.func @transform_7(%arg0: i32) -> (i32, i32) {
    %c0_i32 = arith.constant 0 : i32
    %c0_i32_0 = arith.constant 0 : i32
    %c0_i32_1 = arith.constant 0 : i32
    return %c0_i32, %c0_i32_0 : i32, i32
  }
}

</mosaic_0001>

<bundles_post_ra>
// kernel: encoder_forward.5
= control target key start
LH: loop header
LB: loop body
LE: loop exit
PB: predicated region body
PF: predicated region fallthrough
CT: control target
= control target key end

     0   :  { %s3398_s12 = smov 0   ;;  %s3822_s0 = inlined_call_operand.vmem [shape: bf16[2048,256], index: 0, kind: input, shape index: {}]   ;;  %s3823_s1 = inlined_call_operand.vmem [shape: bf16[256,128], index: 1, kind: input, shape index: {}]   ;;  %s3824_s2 = inlined_call_operand.vmem [shape: f32[1,128], index: 2, kind: input, shape index: {}]   ;;  %s3825_s3 = inlined_call_operand.vmem [shape: bf16[2048,128], index: 3, kind: output, shape index: {}]  }
   0x1 LB: > { %s2322_s13 = sadd.s32 4294967295, %s3375_s12   ;;  %p2326_p0 = scmp.ge.s32.totalorder %s3375_s12, 1  ;;  %s3375_s12 = sphi %s3398_s12, %s13_s12  }
   0x2   : > { %p139_p1 = scmp.lt.s32.totalorder %s3375_s12, 3 }
   0x4   : > { %p140_p2 = pnand %p2326_p0, %p139_p1 }
   0x5   : > { %v3160_v0 = vld [vmem:[%s3823_s1] sm:$0xff] (!%p140_p2)   ;;  %v3377_v1 = vmov (!%p140_p2), 0   ;;  %s2327_s16 = sshll.u32 (!%p140_p2), %s2322_s13, 7  ;;  %v3161_v2 = vld [vmem:[%s3823_s1 + $0x8] sm:$0xff] (!%p140_p2)   ;;  %v3162_v3 = vld [vmem:[%s3823_s1 + $0x10] sm:$0xff] (!%p140_p2)  }
   0x6   : > { %143 = sbr.rel (%p140_p2) target bundleno = 537 (0x219), region = 32  ;;  %1081 = vmatprep.subr.bf16.mxu0 (!%p140_p2), %v3377_v1  ;;  %3119 = vmatprep.subr.bf16.mxu1 (!%p140_p2), %v3377_v1  ;;  %p165_p3 = scmp.lt.s32.totalorder (!%p140_p2), %s2327_s16, 255  ;;  %v3163_v4 = vld [vmem:[%s3823_s1 + $0x18] sm:$0xff] (!%p140_p2)   ;;  %v3164_v5 = vld [vmem:[%s3823_s1 + $0x20] sm:$0xff] (!%p140_p2)   ;;  %v3165_v7 = vld [vmem:[%s3823_s1 + $0x28] sm:$0xff] (!%p140_p2)  }
   0x7   : > { %1082 = vmatpush1.bf16.msra.mxu0 (!%p140_p2), %v3160_v0  ;;  %3135 = vmatpush1.bf16.msra.mxu1 (!%p140_p2), %v3160_v0  ;;  %v3166_v9 = vld [vmem:[%s3823_s1 + $0x30] sm:$0xff] (!%p140_p2)   ;;  %v3167_v10 = vld [vmem:[%s3823_s1 + $0x38] sm:$0xff] (!%p140_p2)   ;;  %v3168_v11 = vld [vmem:[%s3823_s1 + $0x40] sm:$0xff] (!%p140_p2)  }
   0x8   : > { %1083 = vmatprep.subr.bf16.mxu0 (!%p140_p2), %v3377_v1  ;;  %3120 = vmatprep.subr.bf16.mxu1 (!%p140_p2), %v3377_v1  ;;  %v3169_v12 = vld [vmem:[%s3823_s1 + $0x48] sm:$0xff] (!%p140_p2)   ;;  %v3170_v13 = vld [vmem:[%s3823_s1 + $0x50] sm:$0xff] (!%p140_p2)   ;;  %v3171_v14 = vld [vmem:[%s3823_s1 + $0x58] sm:$0xff] (!%p140_p2)  }
   0x9   : > { %v3172_v15 = vld [vmem:[%s3823_s1 + $0x60] sm:$0xff] (!%p140_p2)   ;;  %v3173_v16 = vld [vmem:[%s3823_s1 + $0x68] sm:$0xff] (!%p140_p2)   ;;  %v3174_v17 = vld [vmem:[%s3823_s1 + $0x70] sm:$0xff] (!%p140_p2)  }
   0xa   : > { %v3175_v18 = vld [vmem:[%s3823_s1 + $0x78] sm:$0xff] (!%p140_p2)  }
   0xb   : > { %1084 = vmatpush1.bf16.msra.mxu0 (!%p140_p2), %v3161_v2  ;;  %3136 = vmatpush1.bf16.msra.mxu1 (!%p140_p2), %v3161_v2 }
   0xc   : > { %1085 = vmatprep.subr.bf16.mxu0 (!%p140_p2), %v3377_v1  ;;  %3121 = vmatprep.subr.bf16.mxu1 (!%p140_p2), %v3377_v1 }
   0xd   : > { %s3827_s16 = smov (!%p165_p3, %s2327_s16), 255 }
   0xe   : > { %s2607_s23 = sshll.u32 %s3827_s16, 3  ;;  %s2331_s29 = sshll.u32 %s3827_s16, 2 }
   0xf   : > { %1086 = vmatpush1.bf16.msra.mxu0 %v3162_v3  ;;  %3137 = vmatpush1.bf16.msra.mxu1 %v3162_v3  ;;  %s3435_s28 = scalar_lea.vmem %s3822_s0, %s2607_s23  ;;  %s3621_s4 = scalar_lea.vmem %s3825_s3, %s2331_s29 }
  0x10   : > { %1087 = vmatprep.subr.bf16.mxu0 %v3377_v1  ;;  %3122 = vmatprep.subr.bf16.mxu1 %v3377_v1  ;;  %v3178_v6 = vld [vmem:[%s3435_s28 + $0x4] ss:$8 sps:$4 sm:$0xff]   ;;  %v3176_v19 = vld [vmem:[%s3435_s28] ss:$8 sps:$4 sm:$0xff]   ;;  %v3182_v21 = vld [vmem:[%s3435_s28 + $0x14] ss:$8 sps:$4 sm:$0xff]  }
  0x11   : > { %v3181_v8 = vld [vmem:[%s3435_s28 + $0x204] ss:$8 sps:$4 sm:$0xff]   ;;  %1113 = vmatprep.mubr.bf16.mxu0 %v3178_v6  ;;  %v3179_v20 = vld [vmem:[%s3435_s28 + $0x200] ss:$8 sps:$4 sm:$0xff]   ;;  %v3184_v22 = vld [vmem:[%s3435_s28 + $0x214] ss:$8 sps:$4 sm:$0xff]  }
  0x12   : > { %1369 = vmatprep.mubr.bf16.mxu1 %v3181_v8  ;;  %v3186_v23 = vld [vmem:[%s3435_s28 + $0x10] ss:$8 sps:$4 sm:$0xff]   ;;  %v3188_v25 = vld [vmem:[%s3435_s28 + $0x24] ss:$8 sps:$4 sm:$0xff]   ;;  %v3192_v27 = vld [vmem:[%s3435_s28 + $0x20] ss:$8 sps:$4 sm:$0xff]  }
  0x13   : > { %1088 = vmatpush1.bf16.msra.mxu0 %v3163_v4  ;;  %3138 = vmatpush1.bf16.msra.mxu1 %v3163_v4  ;;  %v3187_v24 = vld [vmem:[%s3435_s28 + $0x210] ss:$8 sps:$4 sm:$0xff]   ;;  %v3190_v26 = vld [vmem:[%s3435_s28 + $0x224] ss:$8 sps:$4 sm:$0xff]   ;;  %v3193_v28 = vld [vmem:[%s3435_s28 + $0x220] ss:$8 sps:$4 sm:$0xff]  }
  0x14   : > { %1089 = vmatprep.subr.bf16.mxu0 %v3377_v1  ;;  %3123 = vmatprep.subr.bf16.mxu1 %v3377_v1  ;;  %v3194_v29 = vld [vmem:[%s3435_s28 + $0x34] ss:$8 sps:$4 sm:$0xff]   ;;  %v3198_v31 = vld [vmem:[%s3435_s28 + $0x30] ss:$8 sps:$4 sm:$0xff]   ;;  %v3200_v33 = vld [vmem:[%s3435_s28 + $0x44] ss:$8 sps:$4 sm:$0xff]  }
  0x15   : > { %v3196_v30 = vld [vmem:[%s3435_s28 + $0x234] ss:$8 sps:$4 sm:$0xff]   ;;  %v3199_v32 = vld [vmem:[%s3435_s28 + $0x230] ss:$8 sps:$4 sm:$0xff]   ;;  %v3202_v34 = vld [vmem:[%s3435_s28 + $0x244] ss:$8 sps:$4 sm:$0xff]  }
  0x16   : > { %v3204_v35 = vld [vmem:[%s3435_s28 + $0x40] ss:$8 sps:$4 sm:$0xff]   ;;  %v3206_v37 = vld [vmem:[%s3435_s28 + $0x54] ss:$8 sps:$4 sm:$0xff]   ;;  %v3210_v39 = vld [vmem:[%s3435_s28 + $0x50] ss:$8 sps:$4 sm:$0xff]  }
  0x17   : > { %1090 = vmatpush1.bf16.msra.mxu0 %v3164_v5  ;;  %3139 = vmatpush1.bf16.msra.mxu1 %v3164_v5  ;;  %v3205_v36 = vld [vmem:[%s3435_s28 + $0x240] ss:$8 sps:$4 sm:$0xff]   ;;  %v3208_v38 = vld [vmem:[%s3435_s28 + $0x254] ss:$8 sps:$4 sm:$0xff]   ;;  %v3211_v40 = vld [vmem:[%s3435_s28 + $0x250] ss:$8 sps:$4 sm:$0xff]  }
  0x18   : > { %1091 = vmatprep.subr.bf16.mxu0 %v3377_v1  ;;  %3124 = vmatprep.subr.bf16.mxu1 %v3377_v1  ;;  %v3212_v41 = vld [vmem:[%s3435_s28 + $0x64] ss:$8 sps:$4 sm:$0xff]   ;;  %v3216_v43 = vld [vmem:[%s3435_s28 + $0x60] ss:$8 sps:$4 sm:$0xff]   ;;  %v3218_v45 = vld [vmem:[%s3435_s28 + $0x74] ss:$8 sps:$4 sm:$0xff]  }
  0x19   : > { %v3214_v42 = vld [vmem:[%s3435_s28 + $0x264] ss:$8 sps:$4 sm:$0xff]   ;;  %v3217_v44 = vld [vmem:[%s3435_s28 + $0x260] ss:$8 sps:$4 sm:$0xff]   ;;  %v3220_v46 = vld [vmem:[%s3435_s28 + $0x274] ss:$8 sps:$4 sm:$0xff]  }
  0x1a   : > { %v3222_v47 = vld [vmem:[%s3435_s28 + $0x70] ss:$8 sps:$4 sm:$0xff]   ;;  %v3224_v49 = vld [vmem:[%s3435_s28 + $0x84] ss:$8 sps:$4 sm:$0xff]   ;;  %v3228_v51 = vld [vmem:[%s3435_s28 + $0x80] ss:$8 sps:$4 sm:$0xff]  }
  0x1b   : > { %1092 = vmatpush1.bf16.msra.mxu0 %v3165_v7  ;;  %3140 = vmatpush1.bf16.msra.mxu1 %v3165_v7  ;;  %v3223_v48 = vld [vmem:[%s3435_s28 + $0x270] ss:$8 sps:$4 sm:$0xff]   ;;  %v3226_v50 = vld [vmem:[%s3435_s28 + $0x284] ss:$8 sps:$4 sm:$0xff]   ;;  %v3229_v52 = vld [vmem:[%s3435_s28 + $0x280] ss:$8 sps:$4 sm:$0xff]  }
  0x1c   : > { %1093 = vmatprep.subr.bf16.mxu0 %v3377_v1  ;;  %3125 = vmatprep.subr.bf16.mxu1 %v3377_v1  ;;  %v3230_v53 = vld [vmem:[%s3435_s28 + $0x94] ss:$8 sps:$4 sm:$0xff]   ;;  %v3234_v55 = vld [vmem:[%s3435_s28 + $0x90] ss:$8 sps:$4 sm:$0xff]   ;;  %v3236_v57 = vld [vmem:[%s3435_s28 + $0xa4] ss:$8 sps:$4 sm:$0xff]  }
  0x1d   : > { %v3232_v54 = vld [vmem:[%s3435_s28 + $0x294] ss:$8 sps:$4 sm:$0xff]   ;;  %v3235_v56 = vld [vmem:[%s3435_s28 + $0x290] ss:$8 sps:$4 sm:$0xff]   ;;  %v3238_v58 = vld [vmem:[%s3435_s28 + $0x2a4] ss:$8 sps:$4 sm:$0xff]  }
  0x1e   : > { %v3240_v59 = vld [vmem:[%s3435_s28 + $0xa0] ss:$8 sps:$4 sm:$0xff]   ;;  %v3242_v61 = vld [vmem:[%s3435_s28 + $0xb4] ss:$8 sps:$4 sm:$0xff]   ;;  %v3246_v63 = vld [vmem:[%s3435_s28 + $0xb0] ss:$8 sps:$4 sm:$0xff]  }
  0x1f   : > { %1094 = vmatpush1.bf16.msra.mxu0 %v3166_v9  ;;  %3141 = vmatpush1.bf16.msra.mxu1 %v3166_v9  ;;  %v3241_v60 = vld [vmem:[%s3435_s28 + $0x2a0] ss:$8 sps:$4 sm:$0xff]   ;;  %v3244_v62 = vld [vmem:[%s3435_s28 + $0x2b4] ss:$8 sps:$4 sm:$0xff]   ;;  %v3247_v0 = vld [vmem:[%s3435_s28 + $0x2b0] ss:$8 sps:$4 sm:$0xff]  }
  0x20   : > { %1095 = vmatprep.subr.bf16.mxu0 %v3377_v1  ;;  %3126 = vmatprep.subr.bf16.mxu1 %v3377_v1  ;;  %v3250_v2 = vld [vmem:[%s3435_s28 + $0x2c4] ss:$8 sps:$4 sm:$0xff]   ;;  %v3252_v3 = vld [vmem:[%s3435_s28 + $0xc0] ss:$8 sps:$4 sm:$0xff]   ;;  %v3254_v5 = vld [vmem:[%s3435_s28 + $0xd4] ss:$8 sps:$4 sm:$0xff]  }
  0x21   : > { %v3253_v4 = vld [vmem:[%s3435_s28 + $0x2c0] ss:$8 sps:$4 sm:$0xff]   ;;  %v3256_v6 = vld [vmem:[%s3435_s28 + $0x2d4] ss:$8 sps:$4 sm:$0xff]   ;;  %v3258_v7 = vld [vmem:[%s3435_s28 + $0xd0] ss:$8 sps:$4 sm:$0xff]  }
  0x22   : > { %v3259_v8 = vld [vmem:[%s3435_s28 + $0x2d0] ss:$8 sps:$4 sm:$0xff]   ;;  %v3260_v9 = vld [vmem:[%s3435_s28 + $0xe4] ss:$8 sps:$4 sm:$0xff]  }
  0x23   : > { %1096 = vmatpush1.bf16.msra.mxu0 %v3167_v10  ;;  %3142 = vmatpush1.bf16.msra.mxu1 %v3167_v10  ;;  %v3262_v10 = vld [vmem:[%s3435_s28 + $0x2e4] ss:$8 sps:$4 sm:$0xff]  }
  0x24   : > { %1097 = vmatprep.subr.bf16.mxu0 %v3377_v1  ;;  %3127 = vmatprep.subr.bf16.mxu1 %v3377_v1 }
  0x27   : > { %1098 = vmatpush1.bf16.msra.mxu0 %v3168_v11  ;;  %3143 = vmatpush1.bf16.msra.mxu1 %v3168_v11  ;;  %v3264_v11 = vld [vmem:[%s3435_s28 + $0xe0] ss:$8 sps:$4 sm:$0xff]  }
  0x28   : > { %1099 = vmatprep.subr.bf16.mxu0 %v3377_v1  ;;  %3128 = vmatprep.subr.bf16.mxu1 %v3377_v1 }
  0x2b   : > { %1100 = vmatpush1.bf16.msra.mxu0 %v3169_v12  ;;  %3144 = vmatpush1.bf16.msra.mxu1 %v3169_v12  ;;  %v3265_v12 = vld [vmem:[%s3435_s28 + $0x2e0] ss:$8 sps:$4 sm:$0xff]  }
  0x2c   : > { %1101 = vmatprep.subr.bf16.mxu0 %v3377_v1  ;;  %3129 = vmatprep.subr.bf16.mxu1 %v3377_v1 }
  0x2f   : > { %1102 = vmatpush1.bf16.msra.mxu0 %v3170_v13  ;;  %3145 = vmatpush1.bf16.msra.mxu1 %v3170_v13  ;;  %v3266_v13 = vld [vmem:[%s3435_s28 + $0xf4] ss:$8 sps:$4 sm:$0xff]  }
  0x30   : > { %1103 = vmatprep.subr.bf16.mxu0 %v3377_v1  ;;  %3130 = vmatprep.subr.bf16.mxu1 %v3377_v1 }
  0x33   : > { %1104 = vmatpush1.bf16.msra.mxu0 %v3171_v14  ;;  %3146 = vmatpush1.bf16.msra.mxu1 %v3171_v14  ;;  %v3268_v14 = vld [vmem:[%s3435_s28 + $0x2f4] ss:$8 sps:$4 sm:$0xff]  }
  0x34   : > { %1105 = vmatprep.subr.bf16.mxu0 %v3377_v1  ;;  %3131 = vmatprep.subr.bf16.mxu1 %v3377_v1 }
  0x37   : > { %1106 = vmatpush1.bf16.msra.mxu0 %v3172_v15  ;;  %3147 = vmatpush1.bf16.msra.mxu1 %v3172_v15  ;;  %v3270_v15 = vld [vmem:[%s3435_s28 + $0xf0] ss:$8 sps:$4 sm:$0xff]  }
  0x38   : > { %1107 = vmatprep.subr.bf16.mxu0 %v3377_v1  ;;  %3132 = vmatprep.subr.bf16.mxu1 %v3377_v1 }
  0x3b   : > { %1108 = vmatpush1.bf16.msra.mxu0 %v3173_v16  ;;  %3148 = vmatpush1.bf16.msra.mxu1 %v3173_v16  ;;  %v3271_v16 = vld [vmem:[%s3435_s28 + $0x2f0] ss:$8 sps:$4 sm:$0xff]  }
  0x3c   : > { %1109 = vmatprep.subr.bf16.mxu0 %v3377_v1  ;;  %3133 = vmatprep.subr.bf16.mxu1 %v3377_v1 }
  0x3f   : > { %1110 = vmatpush1.bf16.msra.mxu0 %v3174_v17  ;;  %3149 = vmatpush1.bf16.msra.mxu1 %v3174_v17  ;;  %v3272_v17 = vld [vmem:[%s3435_s28 + $0x104] ss:$8 sps:$4 sm:$0xff]  }
  0x40   : > { %1111 = vmatprep.subr.bf16.mxu0 %v3377_v1  ;;  %3134 = vmatprep.subr.bf16.mxu1 %v3377_v1  ;;  %v3248_v1 = vld [vmem:[%s3435_s28 + $0xc4] ss:$8 sps:$4 sm:$0xff]  }
  0x43   : > { %1112 = vmatpush1.bf16.msra.mxu0 %v3175_v18  ;;  %3150 = vmatpush1.bf16.msra.mxu1 %v3175_v18  ;;  %v3274_v18 = vld [vmem:[%s3435_s28 + $0x304] ss:$8 sps:$4 sm:$0xff]  }
  0x46   : > { %1114 = vmatmul.mubr.bf16.vlgmr.msra.gmra.mrb[0].mxu0 %v3176_v19  ;;  %1370 = vmatmul.mubr.bf16.vlgmr.msra.gmra.mrb[0].mxu1 %v3179_v20  ;;  %v3276_v19 = vld [vmem:[%s3435_s28 + $0x100] ss:$8 sps:$4 sm:$0xff]  }
  0x47   : > { %1121 = vmatprep.mubr.bf16.mxu0 %v3182_v21  ;;  %1377 = vmatprep.mubr.bf16.mxu1 %v3184_v22  ;;  %v3277_v20 = vld [vmem:[%s3435_s28 + $0x300] ss:$8 sps:$4 sm:$0xff]   ;;  %v3278_v21 = vld [vmem:[%s3435_s28 + $0x114] ss:$8 sps:$4 sm:$0xff]  }
  0x48   : > { %v3280_v22 = vld [vmem:[%s3435_s28 + $0x314] ss:$8 sps:$4 sm:$0xff]  }
  0x4e   : > { %1122 = vmatmul.mubr.bf16.gmra.mrb[4].mxu0 %v3186_v23  ;;  %1378 = vmatmul.mubr.bf16.gmra.mrb[4].mxu1 %v3187_v24  ;;  %v3282_v23 = vld [vmem:[%s3435_s28 + $0x110] ss:$8 sps:$4 sm:$0xff]  }
  0x4f   : > { %1129 = vmatprep.mubr.bf16.mxu0 %v3188_v25  ;;  %1385 = vmatprep.mubr.bf16.mxu1 %v3190_v26  ;;  %v3283_v24 = vld [vmem:[%s3435_s28 + $0x310] ss:$8 sps:$4 sm:$0xff]   ;;  %v3284_v25 = vld [vmem:[%s3435_s28 + $0x124] ss:$8 sps:$4 sm:$0xff]  }
  0x50   : > { %v3286_v26 = vld [vmem:[%s3435_s28 + $0x324] ss:$8 sps:$4 sm:$0xff]  }
  0x56   : > { %1130 = vmatmul.mubr.bf16.gmra.mrb[8].mxu0 %v3192_v27  ;;  %1386 = vmatmul.mubr.bf16.gmra.mrb[8].mxu1 %v3193_v28  ;;  %v3288_v27 = vld [vmem:[%s3435_s28 + $0x120] ss:$8 sps:$4 sm:$0xff]  }
  0x57   : > { %1137 = vmatprep.mubr.bf16.mxu0 %v3194_v29  ;;  %1393 = vmatprep.mubr.bf16.mxu1 %v3196_v30  ;;  %v3289_v28 = vld [vmem:[%s3435_s28 + $0x320] ss:$8 sps:$4 sm:$0xff]   ;;  %v3290_v29 = vld [vmem:[%s3435_s28 + $0x134] ss:$8 sps:$4 sm:$0xff]  }
  0x58   : > { %v3292_v30 = vld [vmem:[%s3435_s28 + $0x334] ss:$8 sps:$4 sm:$0xff]  }
  0x5e   : > { %1138 = vmatmul.mubr.bf16.gmra.mrb[12].mxu0 %v3198_v31  ;;  %1394 = vmatmul.mubr.bf16.gmra.mrb[12].mxu1 %v3199_v32  ;;  %v3294_v31 = vld [vmem:[%s3435_s28 + $0x130] ss:$8 sps:$4 sm:$0xff]  }
  0x5f   : > { %1145 = vmatprep.mubr.bf16.mxu0 %v3200_v33  ;;  %1401 = vmatprep.mubr.bf16.mxu1 %v3202_v34  ;;  %v3295_v32 = vld [vmem:[%s3435_s28 + $0x330] ss:$8 sps:$4 sm:$0xff]   ;;  %v3296_v33 = vld [vmem:[%s3435_s28 + $0x144] ss:$8 sps:$4 sm:$0xff]  }
  0x60   : > { %v3298_v34 = vld [vmem:[%s3435_s28 + $0x344] ss:$8 sps:$4 sm:$0xff]  }
  0x66   : > { %1146 = vmatmul.mubr.bf16.gmra.mrb[16].mxu0 %v3204_v35  ;;  %1402 = vmatmul.mubr.bf16.gmra.mrb[16].mxu1 %v3205_v36  ;;  %v3300_v35 = vld [vmem:[%s3435_s28 + $0x140] ss:$8 sps:$4 sm:$0xff]  }
  0x67   : > { %1153 = vmatprep.mubr.bf16.mxu0 %v3206_v37  ;;  %1409 = vmatprep.mubr.bf16.mxu1 %v3208_v38  ;;  %v3301_v36 = vld [vmem:[%s3435_s28 + $0x340] ss:$8 sps:$4 sm:$0xff]   ;;  %v3302_v37 = vld [vmem:[%s3435_s28 + $0x154] ss:$8 sps:$4 sm:$0xff]  }
  0x68   : > { %v3304_v38 = vld [vmem:[%s3435_s28 + $0x354] ss:$8 sps:$4 sm:$0xff]  }
  0x6e   : > { %1154 = vmatmul.mubr.bf16.gmra.mrb[20].mxu0 %v3210_v39  ;;  %1410 = vmatmul.mubr.bf16.gmra.mrb[20].mxu1 %v3211_v40  ;;  %v3306_v39 = vld [vmem:[%s3435_s28 + $0x150] ss:$8 sps:$4 sm:$0xff]  }
  0x6f   : > { %1161 = vmatprep.mubr.bf16.mxu0 %v3212_v41  ;;  %1417 = vmatprep.mubr.bf16.mxu1 %v3214_v42  ;;  %v3307_v40 = vld [vmem:[%s3435_s28 + $0x350] ss:$8 sps:$4 sm:$0xff]   ;;  %v3308_v41 = vld [vmem:[%s3435_s28 + $0x164] ss:$8 sps:$4 sm:$0xff]  }
  0x70   : > { %v3310_v42 = vld [vmem:[%s3435_s28 + $0x364] ss:$8 sps:$4 sm:$0xff]  }
  0x76   : > { %1162 = vmatmul.mubr.bf16.gmra.mrb[24].mxu0 %v3216_v43  ;;  %1418 = vmatmul.mubr.bf16.gmra.mrb[24].mxu1 %v3217_v44  ;;  %v3312_v43 = vld [vmem:[%s3435_s28 + $0x160] ss:$8 sps:$4 sm:$0xff]  }
  0x77   : > { %1169 = vmatprep.mubr.bf16.mxu0 %v3218_v45  ;;  %1425 = vmatprep.mubr.bf16.mxu1 %v3220_v46  ;;  %v3313_v44 = vld [vmem:[%s3435_s28 + $0x360] ss:$8 sps:$4 sm:$0xff]   ;;  %v3314_v45 = vld [vmem:[%s3435_s28 + $0x174] ss:$8 sps:$4 sm:$0xff]  }
  0x78   : > { %v3316_v46 = vld [vmem:[%s3435_s28 + $0x374] ss:$8 sps:$4 sm:$0xff]  }
  0x7e   : > { %1170 = vmatmul.mubr.bf16.gmra.mrb[28].mxu0 %v3222_v47  ;;  %1426 = vmatmul.mubr.bf16.gmra.mrb[28].mxu1 %v3223_v48  ;;  %v3318_v47 = vld [vmem:[%s3435_s28 + $0x170] ss:$8 sps:$4 sm:$0xff]  }
  0x7f   : > { %1177 = vmatprep.mubr.bf16.mxu0 %v3224_v49  ;;  %1433 = vmatprep.mubr.bf16.mxu1 %v3226_v50  ;;  %v3319_v48 = vld [vmem:[%s3435_s28 + $0x370] ss:$8 sps:$4 sm:$0xff]   ;;  %v3320_v49 = vld [vmem:[%s3435_s28 + $0x184] ss:$8 sps:$4 sm:$0xff]  }
  0x80   : > { %v3322_v50 = vld [vmem:[%s3435_s28 + $0x384] ss:$8 sps:$4 sm:$0xff]  }
  0x86   : > { %1178 = vmatmul.mubr.bf16.gmra.mrb[32].mxu0 %v3228_v51  ;;  %1434 = vmatmul.mubr.bf16.gmra.mrb[32].mxu1 %v3229_v52  ;;  %v3324_v51 = vld [vmem:[%s3435_s28 + $0x180] ss:$8 sps:$4 sm:$0xff]  }
  0x87   : > { %1185 = vmatprep.mubr.bf16.mxu0 %v3230_v53  ;;  %1441 = vmatprep.mubr.bf16.mxu1 %v3232_v54  ;;  %v3325_v52 = vld [vmem:[%s3435_s28 + $0x380] ss:$8 sps:$4 sm:$0xff]   ;;  %v3326_v53 = vld [vmem:[%s3435_s28 + $0x194] ss:$8 sps:$4 sm:$0xff]  }
  0x88   : > { %v3328_v54 = vld [vmem:[%s3435_s28 + $0x394] ss:$8 sps:$4 sm:$0xff]  }
  0x8e   : > { %1186 = vmatmul.mubr.bf16.gmra.mrb[36].mxu0 %v3234_v55  ;;  %1442 = vmatmul.mubr.bf16.gmra.mrb[36].mxu1 %v3235_v56  ;;  %v3330_v55 = vld [vmem:[%s3435_s28 + $0x190] ss:$8 sps:$4 sm:$0xff]  }
  0x8f   : > { %1193 = vmatprep.mubr.bf16.mxu0 %v3236_v57  ;;  %1449 = vmatprep.mubr.bf16.mxu1 %v3238_v58  ;;  %v3331_v56 = vld [vmem:[%s3435_s28 + $0x390] ss:$8 sps:$4 sm:$0xff]   ;;  %v3332_v57 = vld [vmem:[%s3435_s28 + $0x1a4] ss:$8 sps:$4 sm:$0xff]  }
  0x90   : > { %v3334_v58 = vld [vmem:[%s3435_s28 + $0x3a4] ss:$8 sps:$4 sm:$0xff]  }
  0x96   : > { %1194 = vmatmul.mubr.bf16.gmra.mrb[40].mxu0 %v3240_v59  ;;  %1450 = vmatmul.mubr.bf16.gmra.mrb[40].mxu1 %v3241_v60  ;;  %v3336_v59 = vld [vmem:[%s3435_s28 + $0x1a0] ss:$8 sps:$4 sm:$0xff]  }
  0x97   : > { %1201 = vmatprep.mubr.bf16.mxu0 %v3242_v61  ;;  %1457 = vmatprep.mubr.bf16.mxu1 %v3244_v62  ;;  %v3337_v60 = vld [vmem:[%s3435_s28 + $0x3a0] ss:$8 sps:$4 sm:$0xff]   ;;  %v3338_v61 = vld [vmem:[%s3435_s28 + $0x1b4] ss:$8 sps:$4 sm:$0xff]  }
  0x98   : > { %v3340_v62 = vld [vmem:[%s3435_s28 + $0x3b4] ss:$8 sps:$4 sm:$0xff]  }
  0x9e   : > { %1202 = vmatmul.mubr.bf16.gmra.mrb[44].mxu0 %v3246_v63  ;;  %1458 = vmatmul.mubr.bf16.gmra.mrb[44].mxu1 %v3247_v0  ;;  %v3607_v63 = vld [vmem:[%s3824_s2] ss:$0 sm:$0xff] }
  0x9f   : > { %1209 = vmatprep.mubr.bf16.mxu0 %v3248_v1  ;;  %1465 = vmatprep.mubr.bf16.mxu1 %v3250_v2 }
  0xa6   : > { %1210 = vmatmul.mubr.bf16.gmra.mrb[48].mxu0 %v3252_v3  ;;  %1466 = vmatmul.mubr.bf16.gmra.mrb[48].mxu1 %v3253_v4  ;;  %v3342_v4 = vld [vmem:[%s3435_s28 + $0x1b0] ss:$8 sps:$4 sm:$0xff]  }
  0xa7   : > { %1217 = vmatprep.mubr.bf16.mxu0 %v3254_v5  ;;  %1473 = vmatprep.mubr.bf16.mxu1 %v3256_v6  ;;  %v3343_v5 = vld [vmem:[%s3435_s28 + $0x3b0] ss:$8 sps:$4 sm:$0xff]  }
  0xae   : > { %1218 = vmatmul.mubr.bf16.gmra.mrb[52].mxu0 %v3258_v7  ;;  %1474 = vmatmul.mubr.bf16.gmra.mrb[52].mxu1 %v3259_v8  ;;  %v3344_v8 = vld [vmem:[%s3435_s28 + $0x1c4] ss:$8 sps:$4 sm:$0xff]  }
  0xaf   : > { %1225 = vmatprep.mubr.bf16.mxu0 %v3260_v9  ;;  %1481 = vmatprep.mubr.bf16.mxu1 %v3262_v10  ;;  %v3346_v9 = vld [vmem:[%s3435_s28 + $0x3c4] ss:$8 sps:$4 sm:$0xff]  }
  0xb6   : > { %1226 = vmatmul.mubr.bf16.gmra.mrb[56].mxu0 %v3264_v11  ;;  %1482 = vmatmul.mubr.bf16.gmra.mrb[56].mxu1 %v3265_v12 }
  0xb7   : > { %1233 = vmatprep.mubr.bf16.mxu0 %v3266_v13  ;;  %1489 = vmatprep.mubr.bf16.mxu1 %v3268_v14 }
  0xbe   : > { %1234 = vmatmul.mubr.bf16.gmra.mrb[60].mxu0 %v3270_v15  ;;  %1490 = vmatmul.mubr.bf16.gmra.mrb[60].mxu1 %v3271_v16 }
  0xbf   : > { %1241 = vmatprep.mubr.bf16.mxu0 %v3272_v17  ;;  %1497 = vmatprep.mubr.bf16.mxu1 %v3274_v18 }
  0xc6   : > { %1242 = vmatmul.mubr.bf16.gmra.mrb[64].mxu0 %v3276_v19  ;;  %1498 = vmatmul.mubr.bf16.gmra.mrb[64].mxu1 %v3277_v20 }
  0xc7   : > { %1249 = vmatprep.mubr.bf16.mxu0 %v3278_v21  ;;  %1505 = vmatprep.mubr.bf16.mxu1 %v3280_v22  ;;  %v3348_v22 = vld [vmem:[%s3435_s28 + $0x1c0] ss:$8 sps:$4 sm:$0xff]  }
  0xce   : > { %1250 = vmatmul.mubr.bf16.gmra.mrb[68].mxu0 %v3282_v23  ;;  %1506 = vmatmul.mubr.bf16.gmra.mrb[68].mxu1 %v3283_v24  ;;  %v3349_v23 = vld [vmem:[%s3435_s28 + $0x3c0] ss:$8 sps:$4 sm:$0xff]  }
  0xcf   : > { %1257 = vmatprep.mubr.bf16.mxu0 %v3284_v25  ;;  %1513 = vmatprep.mubr.bf16.mxu1 %v3286_v26  ;;  %v3350_v26 = vld [vmem:[%s3435_s28 + $0x1d4] ss:$8 sps:$4 sm:$0xff]  }
  0xd6   : > { %1258 = vmatmul.mubr.bf16.gmra.mrb[72].mxu0 %v3288_v27  ;;  %1514 = vmatmul.mubr.bf16.gmra.mrb[72].mxu1 %v3289_v28  ;;  %v3352_v27 = vld [vmem:[%s3435_s28 + $0x3d4] ss:$8 sps:$4 sm:$0xff]  }
  0xd7   : > { %1265 = vmatprep.mubr.bf16.mxu0 %v3290_v29  ;;  %1521 = vmatprep.mubr.bf16.mxu1 %v3292_v30 }
  0xde   : > { %1266 = vmatmul.mubr.bf16.gmra.mrb[76].mxu0 %v3294_v31  ;;  %1522 = vmatmul.mubr.bf16.gmra.mrb[76].mxu1 %v3295_v32 }
  0xdf   : > { %1273 = vmatprep.mubr.bf16.mxu0 %v3296_v33  ;;  %1529 = vmatprep.mubr.bf16.mxu1 %v3298_v34 }
  0xe6   : > { %1274 = vmatmul.mubr.bf16.gmra.mrb[80].mxu0 %v3300_v35  ;;  %1530 = vmatmul.mubr.bf16.gmra.mrb[80].mxu1 %v3301_v36 }
  0xe7   : > { %1281 = vmatprep.mubr.bf16.mxu0 %v3302_v37  ;;  %1537 = vmatprep.mubr.bf16.mxu1 %v3304_v38 }
  0xee   : > { %1282 = vmatmul.mubr.bf16.gmra.mrb[84].mxu0 %v3306_v39  ;;  %1538 = vmatmul.mubr.bf16.gmra.mrb[84].mxu1 %v3307_v40  ;;  %v3354_v40 = vld [vmem:[%s3435_s28 + $0x1d0] ss:$8 sps:$4 sm:$0xff]  }
  0xef   : > { %1289 = vmatprep.mubr.bf16.mxu0 %v3308_v41  ;;  %1545 = vmatprep.mubr.bf16.mxu1 %v3310_v42  ;;  %v3355_v41 = vld [vmem:[%s3435_s28 + $0x3d0] ss:$8 sps:$4 sm:$0xff]  }
  0xf6   : > { %1290 = vmatmul.mubr.bf16.gmra.mrb[88].mxu0 %v3312_v43  ;;  %1546 = vmatmul.mubr.bf16.gmra.mrb[88].mxu1 %v3313_v44  ;;  %v3356_v44 = vld [vmem:[%s3435_s28 + $0x1e4] ss:$8 sps:$4 sm:$0xff]  }
  0xf7   : > { %1297 = vmatprep.mubr.bf16.mxu0 %v3314_v45  ;;  %1553 = vmatprep.mubr.bf16.mxu1 %v3316_v46  ;;  %v3358_v45 = vld [vmem:[%s3435_s28 + $0x3e4] ss:$8 sps:$4 sm:$0xff]  }
  0xfe   : > { %1298 = vmatmul.mubr.bf16.gmra.mrb[92].mxu0 %v3318_v47  ;;  %1554 = vmatmul.mubr.bf16.gmra.mrb[92].mxu1 %v3319_v48 }
  0xff   : > { %1305 = vmatprep.mubr.bf16.mxu0 %v3320_v49  ;;  %1561 = vmatprep.mubr.bf16.mxu1 %v3322_v50 }
 0x106   : > { %1306 = vmatmul.mubr.bf16.gmra.mrb[96].mxu0 %v3324_v51  ;;  %1562 = vmatmul.mubr.bf16.gmra.mrb[96].mxu1 %v3325_v52 }
 0x107   : > { %1313 = vmatprep.mubr.bf16.mxu0 %v3326_v53  ;;  %1569 = vmatprep.mubr.bf16.mxu1 %v3328_v54 }
 0x10e   : > { %1314 = vmatmul.mubr.bf16.gmra.mrb[100].mxu0 %v3330_v55  ;;  %1570 = vmatmul.mubr.bf16.gmra.mrb[100].mxu1 %v3331_v56 }
 0x10f   : > { %1321 = vmatprep.mubr.bf16.mxu0 %v3332_v57  ;;  %1577 = vmatprep.mubr.bf16.mxu1 %v3334_v58  ;;  %v3360_v58 = vld [vmem:[%s3435_s28 + $0x1e0] ss:$8 sps:$4 sm:$0xff]  }
 0x116   : > { %1322 = vmatmul.mubr.bf16.gmra.mrb[104].mxu0 %v3336_v59  ;;  %1578 = vmatmul.mubr.bf16.gmra.mrb[104].mxu1 %v3337_v60  ;;  %v3361_v59 = vld [vmem:[%s3435_s28 + $0x3e0] ss:$8 sps:$4 sm:$0xff]  }
 0x117   : > { %1329 = vmatprep.mubr.bf16.mxu0 %v3338_v61  ;;  %1585 = vmatprep.mubr.bf16.mxu1 %v3340_v62  ;;  %v3362_v62 = vld [vmem:[%s3435_s28 + $0x1f4] ss:$8 sps:$4 sm:$0xff]  }
 0x119   : > { %v1115_v0 = vpop.f32.mrb[0].mxu0  ;;  %v1371_v1 = vpop.f32.mrb[0].mxu1 }
 0x11a   : > { %v1117_v2 = vpop.f32.mrb[1].mxu0  ;;  %v1373_v3 = vpop.f32.mrb[1].mxu1  ;;  %v1116_v10 = vadd.f32 %v3607_v63, %v1115_v0  ;;  %v1372_v11 = vadd.f32 %v3607_v63, %v1371_v1  ;;  %v3364_v0 = vld [vmem:[%s3435_s28 + $0x3f4] ss:$8 sps:$4 sm:$0xff]  }
 0x11b   : > { %v1118_v6 = vpop.f32.mrb[2].mxu0  ;;  %v1374_v7 = vpop.f32.mrb[2].mxu1 }
 0x11c   : > { %v1119_v12 = vadd.f32 %v3607_v63, %v1118_v6  ;;  %v1375_v13 = vadd.f32 %v3607_v63, %v1374_v7  ;;  %v1120_v14 = vpop.f32.mrb[3].mxu0  ;;  %v1376_v15 = vpop.f32.mrb[3].mxu1 }
 0x11d   : > { %v3367_v14 = vld [vmem:[%s3435_s28 + $0x3f0] ss:$8 sps:$4 sm:$0xff]  }
 0x11e   : > { %v2739_v16 = vpack.c.bf16 %v1119_v12, %v1116_v10  ;;  %v2899_v17 = vpack.c.bf16 %v1375_v13, %v1372_v11  ;;  %1330 = vmatmul.mubr.bf16.gmra.mrb[108].mxu0 %v3342_v4  ;;  %1586 = vmatmul.mubr.bf16.gmra.mrb[108].mxu1 %v3343_v5  ;;  %v3366_v13 = vld [vmem:[%s3435_s28 + $0x1f0] ss:$8 sps:$4 sm:$0xff]  }
 0x11f   : > { %1337 = vmatprep.mubr.bf16.mxu0 %v3344_v8  ;;  %1593 = vmatprep.mubr.bf16.mxu1 %v3346_v9 }
 0x120   : > { %2740 = vst [vmem:[%s3621_s4] sm:$0xff] %v2739_v16   ;;  %3087 = vst [vmem:[%s3621_s4 + $0x100] sm:$0xff] %v2899_v17  }
 0x121   : > { %v1123_v18 = vpop.f32.mrb[4].mxu0  ;;  %v1379_v19 = vpop.f32.mrb[4].mxu1 }
 0x122   : > { %v1125_v20 = vpop.f32.mrb[5].mxu0  ;;  %v1381_v21 = vpop.f32.mrb[5].mxu1  ;;  %v1124_v28 = vadd.f32 %v3607_v63, %v1123_v18  ;;  %v1380_v29 = vadd.f32 %v3607_v63, %v1379_v19 }
 0x123   : > { %v1126_v24 = vpop.f32.mrb[6].mxu0  ;;  %v1382_v25 = vpop.f32.mrb[6].mxu1 }
 0x124   : > { %v1127_v30 = vadd.f32 %v3607_v63, %v1126_v24  ;;  %v1383_v31 = vadd.f32 %v3607_v63, %v1382_v25  ;;  %v1128_v32 = vpop.f32.mrb[7].mxu0  ;;  %v1384_v33 = vpop.f32.mrb[7].mxu1 }
 0x126   : > { %v2744_v34 = vpack.c.bf16 %v1127_v30, %v1124_v28  ;;  %v2904_v35 = vpack.c.bf16 %v1383_v31, %v1380_v29  ;;  %1338 = vmatmul.mubr.bf16.gmra.mrb[112].mxu0 %v3348_v22  ;;  %1594 = vmatmul.mubr.bf16.gmra.mrb[112].mxu1 %v3349_v23 }
 0x127   : > { %1345 = vmatprep.mubr.bf16.mxu0 %v3350_v26  ;;  %1601 = vmatprep.mubr.bf16.mxu1 %v3352_v27 }
 0x128   : > { %3056 = vst [vmem:[%s3621_s4 + $0x8] sm:$0xff] %v2744_v34   ;;  %3088 = vst [vmem:[%s3621_s4 + $0x108] sm:$0xff] %v2904_v35  }
 0x129   : > { %v1131_v36 = vpop.f32.mrb[8].mxu0  ;;  %v1387_v37 = vpop.f32.mrb[8].mxu1 }
 0x12a   : > { %v1133_v38 = vpop.f32.mrb[9].mxu0  ;;  %v1389_v39 = vpop.f32.mrb[9].mxu1  ;;  %v1132_v46 = vadd.f32 %v3607_v63, %v1131_v36  ;;  %v1388_v47 = vadd.f32 %v3607_v63, %v1387_v37 }
 0x12b   : > { %v1134_v42 = vpop.f32.mrb[10].mxu0  ;;  %v1390_v43 = vpop.f32.mrb[10].mxu1 }
 0x12c   : > { %v1135_v48 = vadd.f32 %v3607_v63, %v1134_v42  ;;  %v1391_v49 = vadd.f32 %v3607_v63, %v1390_v43  ;;  %v1136_v50 = vpop.f32.mrb[11].mxu0  ;;  %v1392_v51 = vpop.f32.mrb[11].mxu1 }
 0x12e   : > { %v2749_v52 = vpack.c.bf16 %v1135_v48, %v1132_v46  ;;  %v2909_v53 = vpack.c.bf16 %v1391_v49, %v1388_v47  ;;  %1346 = vmatmul.mubr.bf16.gmra.mrb[116].mxu0 %v3354_v40  ;;  %1602 = vmatmul.mubr.bf16.gmra.mrb[116].mxu1 %v3355_v41 }
 0x12f   : > { %1353 = vmatprep.mubr.bf16.mxu0 %v3356_v44  ;;  %1609 = vmatprep.mubr.bf16.mxu1 %v3358_v45 }
 0x130   : > { %3057 = vst [vmem:[%s3621_s4 + $0x10] sm:$0xff] %v2749_v52   ;;  %3089 = vst [vmem:[%s3621_s4 + $0x110] sm:$0xff] %v2909_v53  }
 0x131   : > { %v1139_v54 = vpop.f32.mrb[12].mxu0  ;;  %v1395_v55 = vpop.f32.mrb[12].mxu1 }
 0x132   : > { %v1141_v56 = vpop.f32.mrb[13].mxu0  ;;  %v1397_v57 = vpop.f32.mrb[13].mxu1  ;;  %v1140_v1 = vadd.f32 %v3607_v63, %v1139_v54  ;;  %v1396_v2 = vadd.f32 %v3607_v63, %v1395_v55 }
 0x133   : > { %v1142_v60 = vpop.f32.mrb[14].mxu0  ;;  %v1398_v61 = vpop.f32.mrb[14].mxu1 }
 0x134   : > { %v1143_v3 = vadd.f32 %v3607_v63, %v1142_v60  ;;  %v1399_v4 = vadd.f32 %v3607_v63, %v1398_v61  ;;  %v1144_v5 = vpop.f32.mrb[15].mxu0  ;;  %v1400_v6 = vpop.f32.mrb[15].mxu1 }
 0x136   : > { %v2754_v7 = vpack.c.bf16 %v1143_v3, %v1140_v1  ;;  %v2914_v8 = vpack.c.bf16 %v1399_v4, %v1396_v2  ;;  %1354 = vmatmul.mubr.bf16.gmra.mrb[120].mxu0 %v3360_v58  ;;  %1610 = vmatmul.mubr.bf16.gmra.mrb[120].mxu1 %v3361_v59 }
 0x137   : > { %1361 = vmatprep.mubr.bf16.mxu0 %v3362_v62  ;;  %1617 = vmatprep.mubr.bf16.mxu1 %v3364_v0 }
 0x138   : > { %3058 = vst [vmem:[%s3621_s4 + $0x18] sm:$0xff] %v2754_v7   ;;  %3090 = vst [vmem:[%s3621_s4 + $0x118] sm:$0xff] %v2914_v8  }
 0x139   : > { %v1147_v9 = vpop.f32.mrb[16].mxu0  ;;  %v1403_v10 = vpop.f32.mrb[16].mxu1 }
 0x13a   : > { %v1149_v11 = vpop.f32.mrb[17].mxu0  ;;  %v1405_v12 = vpop.f32.mrb[17].mxu1  ;;  %v1148_v17 = vadd.f32 %v3607_v63, %v1147_v9  ;;  %v1404_v18 = vadd.f32 %v3607_v63, %v1403_v10 }
 0x13b   : > { %v1150_v15 = vpop.f32.mrb[18].mxu0  ;;  %v1406_v16 = vpop.f32.mrb[18].mxu1 }
 0x13c   : > { %v1151_v19 = vadd.f32 %v3607_v63, %v1150_v15  ;;  %v1407_v20 = vadd.f32 %v3607_v63, %v1406_v16  ;;  %v1152_v21 = vpop.f32.mrb[19].mxu0  ;;  %v1408_v22 = vpop.f32.mrb[19].mxu1 }
 0x13e   : > { %v2759_v23 = vpack.c.bf16 %v1151_v19, %v1148_v17  ;;  %v2919_v24 = vpack.c.bf16 %v1407_v20, %v1404_v18  ;;  %1362 = vmatmul.mubr.bf16.gmra.mrb[124].mxu0 %v3366_v13  ;;  %1618 = vmatmul.mubr.bf16.gmra.mrb[124].mxu1 %v3367_v14 }
 0x140   : > { %3059 = vst [vmem:[%s3621_s4 + $0x20] sm:$0xff] %v2759_v23   ;;  %3091 = vst [vmem:[%s3621_s4 + $0x120] sm:$0xff] %v2919_v24  }
 0x141   : > { %v1155_v25 = vpop.f32.mrb[20].mxu0  ;;  %v1411_v26 = vpop.f32.mrb[20].mxu1 }
 0x142   : > { %v1157_v27 = vpop.f32.mrb[21].mxu0  ;;  %v1413_v28 = vpop.f32.mrb[21].mxu1  ;;  %v1156_v31 = vadd.f32 %v3607_v63, %v1155_v25  ;;  %v1412_v32 = vadd.f32 %v3607_v63, %v1411_v26 }
 0x143   : > { %v1158_v29 = vpop.f32.mrb[22].mxu0  ;;  %v1414_v30 = vpop.f32.mrb[22].mxu1 }
 0x144   : > { %v1159_v33 = vadd.f32 %v3607_v63, %v1158_v29  ;;  %v1415_v34 = vadd.f32 %v3607_v63, %v1414_v30  ;;  %v1160_v35 = vpop.f32.mrb[23].mxu0  ;;  %v1416_v36 = vpop.f32.mrb[23].mxu1 }
 0x146   : > { %v2764_v37 = vpack.c.bf16 %v1159_v33, %v1156_v31  ;;  %v2924_v38 = vpack.c.bf16 %v1415_v34, %v1412_v32 }
 0x148   : > { %3060 = vst [vmem:[%s3621_s4 + $0x28] sm:$0xff] %v2764_v37   ;;  %3092 = vst [vmem:[%s3621_s4 + $0x128] sm:$0xff] %v2924_v38  }
 0x149   : > { %v1163_v39 = vpop.f32.mrb[24].mxu0  ;;  %v1419_v40 = vpop.f32.mrb[24].mxu1 }
 0x14a   : > { %v1165_v41 = vpop.f32.mrb[25].mxu0  ;;  %v1421_v42 = vpop.f32.mrb[25].mxu1  ;;  %v1164_v45 = vadd.f32 %v3607_v63, %v1163_v39  ;;  %v1420_v46 = vadd.f32 %v3607_v63, %v1419_v40 }
 0x14b   : > { %v1166_v43 = vpop.f32.mrb[26].mxu0  ;;  %v1422_v44 = vpop.f32.mrb[26].mxu1 }
 0x14c   : > { %v1167_v47 = vadd.f32 %v3607_v63, %v1166_v43  ;;  %v1423_v48 = vadd.f32 %v3607_v63, %v1422_v44  ;;  %v1168_v49 = vpop.f32.mrb[27].mxu0  ;;  %v1424_v50 = vpop.f32.mrb[27].mxu1 }
 0x14e   : > { %v2769_v51 = vpack.c.bf16 %v1167_v47, %v1164_v45  ;;  %v2929_v52 = vpack.c.bf16 %v1423_v48, %v1420_v46 }
 0x150   : > { %3061 = vst [vmem:[%s3621_s4 + $0x30] sm:$0xff] %v2769_v51   ;;  %3093 = vst [vmem:[%s3621_s4 + $0x130] sm:$0xff] %v2929_v52  }
 0x151   : > { %v1171_v53 = vpop.f32.mrb[28].mxu0  ;;  %v1427_v54 = vpop.f32.mrb[28].mxu1 }
 0x152   : > { %v1173_v55 = vpop.f32.mrb[29].mxu0  ;;  %v1429_v56 = vpop.f32.mrb[29].mxu1  ;;  %v1172_v59 = vadd.f32 %v3607_v63, %v1171_v53  ;;  %v1428_v60 = vadd.f32 %v3607_v63, %v1427_v54 }
 0x153   : > { %v1174_v57 = vpop.f32.mrb[30].mxu0  ;;  %v1430_v58 = vpop.f32.mrb[30].mxu1 }
 0x154   : > { %v1175_v61 = vadd.f32 %v3607_v63, %v1174_v57  ;;  %v1431_v62 = vadd.f32 %v3607_v63, %v1430_v58  ;;  %v1176_v0 = vpop.f32.mrb[31].mxu0  ;;  %v1432_v1 = vpop.f32.mrb[31].mxu1 }
 0x156   : > { %v2774_v2 = vpack.c.bf16 %v1175_v61, %v1172_v59  ;;  %v2934_v3 = vpack.c.bf16 %v1431_v62, %v1428_v60 }
 0x158   : > { %3062 = vst [vmem:[%s3621_s4 + $0x38] sm:$0xff] %v2774_v2   ;;  %3094 = vst [vmem:[%s3621_s4 + $0x138] sm:$0xff] %v2934_v3  }
 0x159   : > { %v1179_v4 = vpop.f32.mrb[32].mxu0  ;;  %v1435_v5 = vpop.f32.mrb[32].mxu1 }
 0x15a   : > { %v1181_v6 = vpop.f32.mrb[33].mxu0  ;;  %v1437_v7 = vpop.f32.mrb[33].mxu1  ;;  %v1180_v10 = vadd.f32 %v3607_v63, %v1179_v4  ;;  %v1436_v11 = vadd.f32 %v3607_v63, %v1435_v5 }
 0x15b   : > { %v1182_v8 = vpop.f32.mrb[34].mxu0  ;;  %v1438_v9 = vpop.f32.mrb[34].mxu1 }
 0x15c   : > { %v1183_v12 = vadd.f32 %v3607_v63, %v1182_v8  ;;  %v1439_v13 = vadd.f32 %v3607_v63, %v1438_v9  ;;  %v1184_v14 = vpop.f32.mrb[35].mxu0  ;;  %v1440_v15 = vpop.f32.mrb[35].mxu1 }
 0x15e   : > { %v2779_v16 = vpack.c.bf16 %v1183_v12, %v1180_v10  ;;  %v2939_v17 = vpack.c.bf16 %v1439_v13, %v1436_v11 }
 0x160   : > { %3063 = vst [vmem:[%s3621_s4 + $0x40] sm:$0xff] %v2779_v16   ;;  %3095 = vst [vmem:[%s3621_s4 + $0x140] sm:$0xff] %v2939_v17  }
 0x161   : > { %v1187_v18 = vpop.f32.mrb[36].mxu0  ;;  %v1443_v19 = vpop.f32.mrb[36].mxu1 }
 0x162   : > { %v1189_v20 = vpop.f32.mrb[37].mxu0  ;;  %v1445_v21 = vpop.f32.mrb[37].mxu1  ;;  %v1188_v24 = vadd.f32 %v3607_v63, %v1187_v18  ;;  %v1444_v25 = vadd.f32 %v3607_v63, %v1443_v19 }
 0x163   : > { %v1190_v22 = vpop.f32.mrb[38].mxu0  ;;  %v1446_v23 = vpop.f32.mrb[38].mxu1 }
 0x164   : > { %v1191_v26 = vadd.f32 %v3607_v63, %v1190_v22  ;;  %v1447_v27 = vadd.f32 %v3607_v63, %v1446_v23  ;;  %v1192_v28 = vpop.f32.mrb[39].mxu0  ;;  %v1448_v29 = vpop.f32.mrb[39].mxu1 }
 0x166   : > { %v2784_v30 = vpack.c.bf16 %v1191_v26, %v1188_v24  ;;  %v2944_v31 = vpack.c.bf16 %v1447_v27, %v1444_v25 }
 0x168   : > { %3064 = vst [vmem:[%s3621_s4 + $0x48] sm:$0xff] %v2784_v30   ;;  %3096 = vst [vmem:[%s3621_s4 + $0x148] sm:$0xff] %v2944_v31  }
 0x169   : > { %v1195_v32 = vpop.f32.mrb[40].mxu0  ;;  %v1451_v33 = vpop.f32.mrb[40].mxu1 }
 0x16a   : > { %v1197_v34 = vpop.f32.mrb[41].mxu0  ;;  %v1453_v35 = vpop.f32.mrb[41].mxu1  ;;  %v1196_v38 = vadd.f32 %v3607_v63, %v1195_v32  ;;  %v1452_v39 = vadd.f32 %v3607_v63, %v1451_v33 }
 0x16b   : > { %v1198_v36 = vpop.f32.mrb[42].mxu0  ;;  %v1454_v37 = vpop.f32.mrb[42].mxu1 }
 0x16c   : > { %v1199_v40 = vadd.f32 %v3607_v63, %v1198_v36  ;;  %v1455_v41 = vadd.f32 %v3607_v63, %v1454_v37  ;;  %v1200_v42 = vpop.f32.mrb[43].mxu0  ;;  %v1456_v43 = vpop.f32.mrb[43].mxu1 }
 0x16e   : > { %v2789_v44 = vpack.c.bf16 %v1199_v40, %v1196_v38  ;;  %v2949_v45 = vpack.c.bf16 %v1455_v41, %v1452_v39 }
 0x170   : > { %3065 = vst [vmem:[%s3621_s4 + $0x50] sm:$0xff] %v2789_v44   ;;  %3097 = vst [vmem:[%s3621_s4 + $0x150] sm:$0xff] %v2949_v45  }
 0x171   : > { %v1203_v46 = vpop.f32.mrb[44].mxu0  ;;  %v1459_v47 = vpop.f32.mrb[44].mxu1 }
 0x172   : > { %v1205_v48 = vpop.f32.mrb[45].mxu0  ;;  %v1461_v49 = vpop.f32.mrb[45].mxu1  ;;  %v1204_v52 = vadd.f32 %v3607_v63, %v1203_v46  ;;  %v1460_v53 = vadd.f32 %v3607_v63, %v1459_v47 }
 0x173   : > { %v1206_v50 = vpop.f32.mrb[46].mxu0  ;;  %v1462_v51 = vpop.f32.mrb[46].mxu1 }
 0x174   : > { %v1207_v54 = vadd.f32 %v3607_v63, %v1206_v50  ;;  %v1463_v55 = vadd.f32 %v3607_v63, %v1462_v51  ;;  %v1208_v56 = vpop.f32.mrb[47].mxu0  ;;  %v1464_v57 = vpop.f32.mrb[47].mxu1 }
 0x176   : > { %v2794_v58 = vpack.c.bf16 %v1207_v54, %v1204_v52  ;;  %v2954_v59 = vpack.c.bf16 %v1463_v55, %v1460_v53 }
 0x178   : > { %3066 = vst [vmem:[%s3621_s4 + $0x58] sm:$0xff] %v2794_v58   ;;  %3098 = vst [vmem:[%s3621_s4 + $0x158] sm:$0xff] %v2954_v59  }
 0x179   : > { %v1211_v60 = vpop.f32.mrb[48].mxu0  ;;  %v1467_v61 = vpop.f32.mrb[48].mxu1 }
 0x17a   : > { %v1213_v62 = vpop.f32.mrb[49].mxu0  ;;  %v1469_v0 = vpop.f32.mrb[49].mxu1  ;;  %v1212_v3 = vadd.f32 %v3607_v63, %v1211_v60  ;;  %v1468_v4 = vadd.f32 %v3607_v63, %v1467_v61 }
 0x17b   : > { %v1214_v1 = vpop.f32.mrb[50].mxu0  ;;  %v1470_v2 = vpop.f32.mrb[50].mxu1 }
 0x17c   : > { %v1215_v5 = vadd.f32 %v3607_v63, %v1214_v1  ;;  %v1471_v6 = vadd.f32 %v3607_v63, %v1470_v2  ;;  %v1216_v7 = vpop.f32.mrb[51].mxu0  ;;  %v1472_v8 = vpop.f32.mrb[51].mxu1 }
 0x17e   : > { %v2799_v9 = vpack.c.bf16 %v1215_v5, %v1212_v3  ;;  %v2959_v10 = vpack.c.bf16 %v1471_v6, %v1468_v4 }
 0x180   : > { %3067 = vst [vmem:[%s3621_s4 + $0x60] sm:$0xff] %v2799_v9   ;;  %3099 = vst [vmem:[%s3621_s4 + $0x160] sm:$0xff] %v2959_v10  }
 0x181   : > { %v1219_v11 = vpop.f32.mrb[52].mxu0  ;;  %v1475_v12 = vpop.f32.mrb[52].mxu1 }
 0x182   : > { %v1221_v13 = vpop.f32.mrb[53].mxu0  ;;  %v1477_v14 = vpop.f32.mrb[53].mxu1  ;;  %v1220_v17 = vadd.f32 %v3607_v63, %v1219_v11  ;;  %v1476_v18 = vadd.f32 %v3607_v63, %v1475_v12 }
 0x183   : > { %v1222_v15 = vpop.f32.mrb[54].mxu0  ;;  %v1478_v16 = vpop.f32.mrb[54].mxu1 }
 0x184   : > { %v1223_v19 = vadd.f32 %v3607_v63, %v1222_v15  ;;  %v1479_v20 = vadd.f32 %v3607_v63, %v1478_v16  ;;  %v1224_v21 = vpop.f32.mrb[55].mxu0  ;;  %v1480_v22 = vpop.f32.mrb[55].mxu1 }
 0x186   : > { %v2804_v23 = vpack.c.bf16 %v1223_v19, %v1220_v17  ;;  %v2964_v24 = vpack.c.bf16 %v1479_v20, %v1476_v18 }
 0x188   : > { %3068 = vst [vmem:[%s3621_s4 + $0x68] sm:$0xff] %v2804_v23   ;;  %3100 = vst [vmem:[%s3621_s4 + $0x168] sm:$0xff] %v2964_v24  }
 0x189   : > { %v1227_v25 = vpop.f32.mrb[56].mxu0  ;;  %v1483_v26 = vpop.f32.mrb[56].mxu1 }
 0x18a   : > { %v1229_v27 = vpop.f32.mrb[57].mxu0  ;;  %v1485_v28 = vpop.f32.mrb[57].mxu1  ;;  %v1228_v31 = vadd.f32 %v3607_v63, %v1227_v25  ;;  %v1484_v32 = vadd.f32 %v3607_v63, %v1483_v26 }
 0x18b   : > { %v1230_v29 = vpop.f32.mrb[58].mxu0  ;;  %v1486_v30 = vpop.f32.mrb[58].mxu1 }
 0x18c   : > { %v1231_v33 = vadd.f32 %v3607_v63, %v1230_v29  ;;  %v1487_v34 = vadd.f32 %v3607_v63, %v1486_v30  ;;  %v1232_v35 = vpop.f32.mrb[59].mxu0  ;;  %v1488_v36 = vpop.f32.mrb[59].mxu1 }
 0x18e   : > { %v2809_v37 = vpack.c.bf16 %v1231_v33, %v1228_v31  ;;  %v2969_v38 = vpack.c.bf16 %v1487_v34, %v1484_v32 }
 0x190   : > { %3069 = vst [vmem:[%s3621_s4 + $0x70] sm:$0xff] %v2809_v37   ;;  %3101 = vst [vmem:[%s3621_s4 + $0x170] sm:$0xff] %v2969_v38  }
 0x191   : > { %v1235_v39 = vpop.f32.mrb[60].mxu0  ;;  %v1491_v40 = vpop.f32.mrb[60].mxu1 }
 0x192   : > { %v1237_v41 = vpop.f32.mrb[61].mxu0  ;;  %v1493_v42 = vpop.f32.mrb[61].mxu1  ;;  %v1236_v45 = vadd.f32 %v3607_v63, %v1235_v39  ;;  %v1492_v46 = vadd.f32 %v3607_v63, %v1491_v40 }
 0x193   : > { %v1238_v43 = vpop.f32.mrb[62].mxu0  ;;  %v1494_v44 = vpop.f32.mrb[62].mxu1 }
 0x194   : > { %v1239_v47 = vadd.f32 %v3607_v63, %v1238_v43  ;;  %v1495_v48 = vadd.f32 %v3607_v63, %v1494_v44  ;;  %v1240_v49 = vpop.f32.mrb[63].mxu0  ;;  %v1496_v50 = vpop.f32.mrb[63].mxu1 }
 0x196   : > { %v2814_v51 = vpack.c.bf16 %v1239_v47, %v1236_v45  ;;  %v2974_v52 = vpack.c.bf16 %v1495_v48, %v1492_v46 }
 0x198   : > { %3070 = vst [vmem:[%s3621_s4 + $0x78] sm:$0xff] %v2814_v51   ;;  %3102 = vst [vmem:[%s3621_s4 + $0x178] sm:$0xff] %v2974_v52  }
 0x199   : > { %v1243_v53 = vpop.f32.mrb[64].mxu0  ;;  %v1499_v54 = vpop.f32.mrb[64].mxu1 }
 0x19a   : > { %v1245_v55 = vpop.f32.mrb[65].mxu0  ;;  %v1501_v56 = vpop.f32.mrb[65].mxu1  ;;  %v1244_v59 = vadd.f32 %v3607_v63, %v1243_v53  ;;  %v1500_v60 = vadd.f32 %v3607_v63, %v1499_v54 }
 0x19b   : > { %v1246_v57 = vpop.f32.mrb[66].mxu0  ;;  %v1502_v58 = vpop.f32.mrb[66].mxu1 }
 0x19c   : > { %v1247_v61 = vadd.f32 %v3607_v63, %v1246_v57  ;;  %v1503_v62 = vadd.f32 %v3607_v63, %v1502_v58  ;;  %v1248_v0 = vpop.f32.mrb[67].mxu0  ;;  %v1504_v1 = vpop.f32.mrb[67].mxu1 }
 0x19e   : > { %v2819_v2 = vpack.c.bf16 %v1247_v61, %v1244_v59  ;;  %v2979_v3 = vpack.c.bf16 %v1503_v62, %v1500_v60 }
 0x1a0   : > { %3071 = vst [vmem:[%s3621_s4 + $0x80] sm:$0xff] %v2819_v2   ;;  %3103 = vst [vmem:[%s3621_s4 + $0x180] sm:$0xff] %v2979_v3  }
 0x1a1   : > { %v1251_v4 = vpop.f32.mrb[68].mxu0  ;;  %v1507_v5 = vpop.f32.mrb[68].mxu1 }
 0x1a2   : > { %v1253_v6 = vpop.f32.mrb[69].mxu0  ;;  %v1509_v7 = vpop.f32.mrb[69].mxu1  ;;  %v1252_v10 = vadd.f32 %v3607_v63, %v1251_v4  ;;  %v1508_v11 = vadd.f32 %v3607_v63, %v1507_v5 }
 0x1a3   : > { %v1254_v8 = vpop.f32.mrb[70].mxu0  ;;  %v1510_v9 = vpop.f32.mrb[70].mxu1 }
 0x1a4   : > { %v1255_v12 = vadd.f32 %v3607_v63, %v1254_v8  ;;  %v1511_v13 = vadd.f32 %v3607_v63, %v1510_v9  ;;  %v1256_v14 = vpop.f32.mrb[71].mxu0  ;;  %v1512_v15 = vpop.f32.mrb[71].mxu1 }
 0x1a6   : > { %v2824_v16 = vpack.c.bf16 %v1255_v12, %v1252_v10  ;;  %v2984_v17 = vpack.c.bf16 %v1511_v13, %v1508_v11 }
 0x1a8   : > { %3072 = vst [vmem:[%s3621_s4 + $0x88] sm:$0xff] %v2824_v16   ;;  %3104 = vst [vmem:[%s3621_s4 + $0x188] sm:$0xff] %v2984_v17  }
 0x1a9   : > { %v1259_v18 = vpop.f32.mrb[72].mxu0  ;;  %v1515_v19 = vpop.f32.mrb[72].mxu1 }
 0x1aa   : > { %v1261_v20 = vpop.f32.mrb[73].mxu0  ;;  %v1517_v21 = vpop.f32.mrb[73].mxu1  ;;  %v1260_v24 = vadd.f32 %v3607_v63, %v1259_v18  ;;  %v1516_v25 = vadd.f32 %v3607_v63, %v1515_v19 }
 0x1ab   : > { %v1262_v22 = vpop.f32.mrb[74].mxu0  ;;  %v1518_v23 = vpop.f32.mrb[74].mxu1 }
 0x1ac   : > { %v1263_v26 = vadd.f32 %v3607_v63, %v1262_v22  ;;  %v1519_v27 = vadd.f32 %v3607_v63, %v1518_v23  ;;  %v1264_v28 = vpop.f32.mrb[75].mxu0  ;;  %v1520_v29 = vpop.f32.mrb[75].mxu1 }
 0x1ae   : > { %v2829_v30 = vpack.c.bf16 %v1263_v26, %v1260_v24  ;;  %v2989_v31 = vpack.c.bf16 %v1519_v27, %v1516_v25 }
 0x1b0   : > { %3073 = vst [vmem:[%s3621_s4 + $0x90] sm:$0xff] %v2829_v30   ;;  %3105 = vst [vmem:[%s3621_s4 + $0x190] sm:$0xff] %v2989_v31  }
 0x1b1   : > { %v1267_v32 = vpop.f32.mrb[76].mxu0  ;;  %v1523_v33 = vpop.f32.mrb[76].mxu1 }
 0x1b2   : > { %v1269_v34 = vpop.f32.mrb[77].mxu0  ;;  %v1525_v35 = vpop.f32.mrb[77].mxu1  ;;  %v1268_v38 = vadd.f32 %v3607_v63, %v1267_v32  ;;  %v1524_v39 = vadd.f32 %v3607_v63, %v1523_v33 }
 0x1b3   : > { %v1270_v36 = vpop.f32.mrb[78].mxu0  ;;  %v1526_v37 = vpop.f32.mrb[78].mxu1 }
 0x1b4   : > { %v1271_v40 = vadd.f32 %v3607_v63, %v1270_v36  ;;  %v1527_v41 = vadd.f32 %v3607_v63, %v1526_v37  ;;  %v1272_v42 = vpop.f32.mrb[79].mxu0  ;;  %v1528_v43 = vpop.f32.mrb[79].mxu1 }
 0x1b6   : > { %v2834_v44 = vpack.c.bf16 %v1271_v40, %v1268_v38  ;;  %v2994_v45 = vpack.c.bf16 %v1527_v41, %v1524_v39 }
 0x1b8   : > { %3074 = vst [vmem:[%s3621_s4 + $0x98] sm:$0xff] %v2834_v44   ;;  %3106 = vst [vmem:[%s3621_s4 + $0x198] sm:$0xff] %v2994_v45  }
 0x1b9   : > { %v1275_v46 = vpop.f32.mrb[80].mxu0  ;;  %v1531_v47 = vpop.f32.mrb[80].mxu1 }
 0x1ba   : > { %v1277_v48 = vpop.f32.mrb[81].mxu0  ;;  %v1533_v49 = vpop.f32.mrb[81].mxu1  ;;  %v1276_v52 = vadd.f32 %v3607_v63, %v1275_v46  ;;  %v1532_v53 = vadd.f32 %v3607_v63, %v1531_v47 }
 0x1bb   : > { %v1278_v50 = vpop.f32.mrb[82].mxu0  ;;  %v1534_v51 = vpop.f32.mrb[82].mxu1 }
 0x1bc   : > { %v1279_v54 = vadd.f32 %v3607_v63, %v1278_v50  ;;  %v1535_v55 = vadd.f32 %v3607_v63, %v1534_v51  ;;  %v1280_v56 = vpop.f32.mrb[83].mxu0  ;;  %v1536_v57 = vpop.f32.mrb[83].mxu1 }
 0x1be   : > { %v2839_v58 = vpack.c.bf16 %v1279_v54, %v1276_v52  ;;  %v2999_v59 = vpack.c.bf16 %v1535_v55, %v1532_v53 }
 0x1c0   : > { %3075 = vst [vmem:[%s3621_s4 + $0xa0] sm:$0xff] %v2839_v58   ;;  %3107 = vst [vmem:[%s3621_s4 + $0x1a0] sm:$0xff] %v2999_v59  }
 0x1c1   : > { %v1283_v60 = vpop.f32.mrb[84].mxu0  ;;  %v1539_v61 = vpop.f32.mrb[84].mxu1 }
 0x1c2   : > { %v1285_v62 = vpop.f32.mrb[85].mxu0  ;;  %v1541_v0 = vpop.f32.mrb[85].mxu1  ;;  %v1284_v3 = vadd.f32 %v3607_v63, %v1283_v60  ;;  %v1540_v4 = vadd.f32 %v3607_v63, %v1539_v61 }
 0x1c3   : > { %v1286_v1 = vpop.f32.mrb[86].mxu0  ;;  %v1542_v2 = vpop.f32.mrb[86].mxu1 }
 0x1c4   : > { %v1287_v5 = vadd.f32 %v3607_v63, %v1286_v1  ;;  %v1543_v6 = vadd.f32 %v3607_v63, %v1542_v2  ;;  %v1288_v7 = vpop.f32.mrb[87].mxu0  ;;  %v1544_v8 = vpop.f32.mrb[87].mxu1 }
 0x1c6   : > { %v2844_v9 = vpack.c.bf16 %v1287_v5, %v1284_v3  ;;  %v3004_v10 = vpack.c.bf16 %v1543_v6, %v1540_v4 }
 0x1c8   : > { %3076 = vst [vmem:[%s3621_s4 + $0xa8] sm:$0xff] %v2844_v9   ;;  %3108 = vst [vmem:[%s3621_s4 + $0x1a8] sm:$0xff] %v3004_v10  }
 0x1c9   : > { %v1291_v11 = vpop.f32.mrb[88].mxu0  ;;  %v1547_v12 = vpop.f32.mrb[88].mxu1 }
 0x1ca   : > { %v1293_v13 = vpop.f32.mrb[89].mxu0  ;;  %v1549_v14 = vpop.f32.mrb[89].mxu1  ;;  %v1292_v17 = vadd.f32 %v3607_v63, %v1291_v11  ;;  %v1548_v18 = vadd.f32 %v3607_v63, %v1547_v12 }
 0x1cb   : > { %v1294_v15 = vpop.f32.mrb[90].mxu0  ;;  %v1550_v16 = vpop.f32.mrb[90].mxu1 }
 0x1cc   : > { %v1295_v19 = vadd.f32 %v3607_v63, %v1294_v15  ;;  %v1551_v20 = vadd.f32 %v3607_v63, %v1550_v16  ;;  %v1296_v21 = vpop.f32.mrb[91].mxu0  ;;  %v1552_v22 = vpop.f32.mrb[91].mxu1 }
 0x1ce   : > { %v2849_v23 = vpack.c.bf16 %v1295_v19, %v1292_v17  ;;  %v3009_v24 = vpack.c.bf16 %v1551_v20, %v1548_v18 }
 0x1d0   : > { %3077 = vst [vmem:[%s3621_s4 + $0xb0] sm:$0xff] %v2849_v23   ;;  %3109 = vst [vmem:[%s3621_s4 + $0x1b0] sm:$0xff] %v3009_v24  }
 0x1d1   : > { %v1299_v25 = vpop.f32.mrb[92].mxu0  ;;  %v1555_v26 = vpop.f32.mrb[92].mxu1 }
 0x1d2   : > { %v1301_v27 = vpop.f32.mrb[93].mxu0  ;;  %v1557_v28 = vpop.f32.mrb[93].mxu1  ;;  %v1300_v31 = vadd.f32 %v3607_v63, %v1299_v25  ;;  %v1556_v32 = vadd.f32 %v3607_v63, %v1555_v26 }
 0x1d3   : > { %v1302_v29 = vpop.f32.mrb[94].mxu0  ;;  %v1558_v30 = vpop.f32.mrb[94].mxu1 }
 0x1d4   : > { %v1303_v33 = vadd.f32 %v3607_v63, %v1302_v29  ;;  %v1559_v34 = vadd.f32 %v3607_v63, %v1558_v30  ;;  %v1304_v35 = vpop.f32.mrb[95].mxu0  ;;  %v1560_v36 = vpop.f32.mrb[95].mxu1 }
 0x1d6   : > { %v2854_v37 = vpack.c.bf16 %v1303_v33, %v1300_v31  ;;  %v3014_v38 = vpack.c.bf16 %v1559_v34, %v1556_v32 }
 0x1d8   : > { %3078 = vst [vmem:[%s3621_s4 + $0xb8] sm:$0xff] %v2854_v37   ;;  %3110 = vst [vmem:[%s3621_s4 + $0x1b8] sm:$0xff] %v3014_v38  }
 0x1d9   : > { %v1307_v39 = vpop.f32.mrb[96].mxu0  ;;  %v1563_v40 = vpop.f32.mrb[96].mxu1 }
 0x1da   : > { %v1309_v41 = vpop.f32.mrb[97].mxu0  ;;  %v1565_v42 = vpop.f32.mrb[97].mxu1  ;;  %v1308_v45 = vadd.f32 %v3607_v63, %v1307_v39  ;;  %v1564_v46 = vadd.f32 %v3607_v63, %v1563_v40 }
 0x1db   : > { %v1310_v43 = vpop.f32.mrb[98].mxu0  ;;  %v1566_v44 = vpop.f32.mrb[98].mxu1 }
 0x1dc   : > { %v1311_v47 = vadd.f32 %v3607_v63, %v1310_v43  ;;  %v1567_v48 = vadd.f32 %v3607_v63, %v1566_v44  ;;  %v1312_v49 = vpop.f32.mrb[99].mxu0  ;;  %v1568_v50 = vpop.f32.mrb[99].mxu1 }
 0x1de   : > { %v2859_v51 = vpack.c.bf16 %v1311_v47, %v1308_v45  ;;  %v3019_v52 = vpack.c.bf16 %v1567_v48, %v1564_v46 }
 0x1e0   : > { %3079 = vst [vmem:[%s3621_s4 + $0xc0] sm:$0xff] %v2859_v51   ;;  %3111 = vst [vmem:[%s3621_s4 + $0x1c0] sm:$0xff] %v3019_v52  }
 0x1e1   : > { %v1315_v53 = vpop.f32.mrb[100].mxu0  ;;  %v1571_v54 = vpop.f32.mrb[100].mxu1 }
 0x1e2   : > { %v1317_v55 = vpop.f32.mrb[101].mxu0  ;;  %v1573_v56 = vpop.f32.mrb[101].mxu1  ;;  %v1316_v59 = vadd.f32 %v3607_v63, %v1315_v53  ;;  %v1572_v60 = vadd.f32 %v3607_v63, %v1571_v54 }
 0x1e3   : > { %v1318_v57 = vpop.f32.mrb[102].mxu0  ;;  %v1574_v58 = vpop.f32.mrb[102].mxu1  ;;  %v3368_v55 = vld [vmem:[%s3824_s2] ss:$0 sm:$0xff] }
 0x1e4   : > { %v1319_v61 = vadd.f32 %v3607_v63, %v1318_v57  ;;  %v1575_v62 = vadd.f32 %v3607_v63, %v1574_v58  ;;  %v1320_v0 = vpop.f32.mrb[103].mxu0  ;;  %v1576_v1 = vpop.f32.mrb[103].mxu1 }
 0x1e6   : > { %v2864_v2 = vpack.c.bf16 %v1319_v61, %v1316_v59  ;;  %v3024_v3 = vpack.c.bf16 %v1575_v62, %v1572_v60 }
 0x1e8   : > { %3080 = vst [vmem:[%s3621_s4 + $0xc8] sm:$0xff] %v2864_v2   ;;  %3112 = vst [vmem:[%s3621_s4 + $0x1c8] sm:$0xff] %v3024_v3  }
 0x1e9   : > { %v1323_v4 = vpop.f32.mrb[104].mxu0  ;;  %v1579_v5 = vpop.f32.mrb[104].mxu1 }
 0x1ea   : > { %v1325_v6 = vpop.f32.mrb[105].mxu0  ;;  %v1581_v7 = vpop.f32.mrb[105].mxu1  ;;  %v1324_v10 = vadd.f32 %v3607_v63, %v1323_v4  ;;  %v1580_v11 = vadd.f32 %v3607_v63, %v1579_v5 }
 0x1eb   : > { %v1326_v8 = vpop.f32.mrb[106].mxu0  ;;  %v1582_v9 = vpop.f32.mrb[106].mxu1 }
 0x1ec   : > { %v1327_v12 = vadd.f32 %v3607_v63, %v1326_v8  ;;  %v1583_v13 = vadd.f32 %v3607_v63, %v1582_v9  ;;  %v1328_v14 = vpop.f32.mrb[107].mxu0  ;;  %v1584_v15 = vpop.f32.mrb[107].mxu1 }
 0x1ee   : > { %v2869_v16 = vpack.c.bf16 %v1327_v12, %v1324_v10  ;;  %v3029_v17 = vpack.c.bf16 %v1583_v13, %v1580_v11 }
 0x1f0   : > { %3081 = vst [vmem:[%s3621_s4 + $0xd0] sm:$0xff] %v2869_v16   ;;  %3113 = vst [vmem:[%s3621_s4 + $0x1d0] sm:$0xff] %v3029_v17  }
 0x1f1   : > { %v1331_v18 = vpop.f32.mrb[108].mxu0  ;;  %v1587_v19 = vpop.f32.mrb[108].mxu1 }
 0x1f2   : > { %v1333_v20 = vpop.f32.mrb[109].mxu0  ;;  %v1589_v21 = vpop.f32.mrb[109].mxu1  ;;  %v1332_v24 = vadd.f32 %v3607_v63, %v1331_v18  ;;  %v1588_v25 = vadd.f32 %v3607_v63, %v1587_v19 }
 0x1f3   : > { %v1334_v22 = vpop.f32.mrb[110].mxu0  ;;  %v1590_v23 = vpop.f32.mrb[110].mxu1 }
 0x1f4   : > { %v1335_v26 = vadd.f32 %v3607_v63, %v1334_v22  ;;  %v1591_v27 = vadd.f32 %v3607_v63, %v1590_v23  ;;  %v1336_v28 = vpop.f32.mrb[111].mxu0  ;;  %v1592_v29 = vpop.f32.mrb[111].mxu1 }
 0x1f6   : > { %v2874_v30 = vpack.c.bf16 %v1335_v26, %v1332_v24  ;;  %v3034_v31 = vpack.c.bf16 %v1591_v27, %v1588_v25 }
 0x1f8   : > { %3082 = vst [vmem:[%s3621_s4 + $0xd8] sm:$0xff] %v2874_v30   ;;  %3114 = vst [vmem:[%s3621_s4 + $0x1d8] sm:$0xff] %v3034_v31  }
 0x1f9   : > { %v1339_v32 = vpop.f32.mrb[112].mxu0  ;;  %v1595_v33 = vpop.f32.mrb[112].mxu1 }
 0x1fa   : > { %v1341_v34 = vpop.f32.mrb[113].mxu0  ;;  %v1597_v35 = vpop.f32.mrb[113].mxu1  ;;  %v1340_v38 = vadd.f32 %v3607_v63, %v1339_v32  ;;  %v1596_v39 = vadd.f32 %v3607_v63, %v1595_v33 }
 0x1fb   : > { %v1342_v36 = vpop.f32.mrb[114].mxu0  ;;  %v1598_v37 = vpop.f32.mrb[114].mxu1 }
 0x1fc   : > { %v1343_v40 = vadd.f32 %v3607_v63, %v1342_v36  ;;  %v1599_v41 = vadd.f32 %v3607_v63, %v1598_v37  ;;  %v1344_v42 = vpop.f32.mrb[115].mxu0  ;;  %v1600_v43 = vpop.f32.mrb[115].mxu1 }
 0x1fe   : > { %v2879_v44 = vpack.c.bf16 %v1343_v40, %v1340_v38  ;;  %v3039_v45 = vpack.c.bf16 %v1599_v41, %v1596_v39 }
 0x200   : > { %3083 = vst [vmem:[%s3621_s4 + $0xe0] sm:$0xff] %v2879_v44   ;;  %3115 = vst [vmem:[%s3621_s4 + $0x1e0] sm:$0xff] %v3039_v45  }
 0x201   : > { %v1347_v46 = vpop.f32.mrb[116].mxu0  ;;  %v1603_v47 = vpop.f32.mrb[116].mxu1 }
 0x202   : > { %v1349_v48 = vpop.f32.mrb[117].mxu0  ;;  %v1605_v49 = vpop.f32.mrb[117].mxu1  ;;  %v1348_v52 = vadd.f32 %v3607_v63, %v1347_v46  ;;  %v1604_v53 = vadd.f32 %v3607_v63, %v1603_v47 }
 0x203   : > { %v1350_v50 = vpop.f32.mrb[118].mxu0  ;;  %v1606_v51 = vpop.f32.mrb[118].mxu1 }
 0x204   : > { %v1351_v54 = vadd.f32 %v3607_v63, %v1350_v50  ;;  %v1607_v56 = vadd.f32 %v3368_v55, %v1606_v51  ;;  %v1352_v57 = vpop.f32.mrb[119].mxu0  ;;  %v1608_v58 = vpop.f32.mrb[119].mxu1 }
 0x206   : > { %v2884_v59 = vpack.c.bf16 %v1351_v54, %v1348_v52  ;;  %v3044_v60 = vpack.c.bf16 %v1607_v56, %v1604_v53 }
 0x208   : > { %3084 = vst [vmem:[%s3621_s4 + $0xe8] sm:$0xff] %v2884_v59   ;;  %3116 = vst [vmem:[%s3621_s4 + $0x1e8] sm:$0xff] %v3044_v60  }
 0x209   : > { %v1355_v61 = vpop.f32.mrb[120].mxu0  ;;  %v1611_v62 = vpop.f32.mrb[120].mxu1 }
 0x20a   : > { %v1357_v0 = vpop.f32.mrb[121].mxu0  ;;  %v1613_v1 = vpop.f32.mrb[121].mxu1  ;;  %v1356_v63 = vadd.f32 %v3368_v55, %v1355_v61  ;;  %v1612_v4 = vadd.f32 %v3368_v55, %v1611_v62 }
 0x20b   : > { %v1358_v2 = vpop.f32.mrb[122].mxu0  ;;  %v1614_v3 = vpop.f32.mrb[122].mxu1 }
 0x20c   : > { %v1359_v5 = vadd.f32 %v3368_v55, %v1358_v2  ;;  %v1615_v6 = vadd.f32 %v3368_v55, %v1614_v3  ;;  %v1360_v7 = vpop.f32.mrb[123].mxu0  ;;  %v1616_v8 = vpop.f32.mrb[123].mxu1 }
 0x20e   : > { %v2889_v9 = vpack.c.bf16 %v1359_v5, %v1356_v63  ;;  %v3049_v10 = vpack.c.bf16 %v1615_v6, %v1612_v4 }
 0x210   : > { %3085 = vst [vmem:[%s3621_s4 + $0xf0] sm:$0xff] %v2889_v9   ;;  %3117 = vst [vmem:[%s3621_s4 + $0x1f0] sm:$0xff] %v3049_v10  }
 0x211   : > { %v1363_v11 = vpop.f32.mrb[124].mxu0  ;;  %v1619_v12 = vpop.f32.mrb[124].mxu1 }
 0x212   : > { %v1365_v13 = vpop.f32.mrb[125].mxu0  ;;  %v1621_v14 = vpop.f32.mrb[125].mxu1  ;;  %v1364_v17 = vadd.f32 %v3368_v55, %v1363_v11  ;;  %v1620_v18 = vadd.f32 %v3368_v55, %v1619_v12 }
 0x213   : > { %v1366_v15 = vpop.f32.mrb[126].mxu0  ;;  %v1622_v16 = vpop.f32.mrb[126].mxu1 }
 0x214   : > { %v1367_v19 = vadd.f32 %v3368_v55, %v1366_v15  ;;  %v1623_v20 = vadd.f32 %v3368_v55, %v1622_v16  ;;  %v1368_v21 = vpop.f32.mrb[127].mxu0  ;;  %v1624_v22 = vpop.f32.mrb[127].mxu1 }
 0x216   : > { %v2894_v23 = vpack.c.bf16 %v1367_v19, %v1364_v17  ;;  %v3054_v24 = vpack.c.bf16 %v1623_v20, %v1620_v18 }
 0x218   : > { %3086 = vst [vmem:[%s3621_s4 + $0xf8] sm:$0xff] %v2894_v23   ;;  %3118 = vst [vmem:[%s3621_s4 + $0x1f8] sm:$0xff] %v3054_v24  }
 0x219 PF: > { %s13_s12 = sadd.s32 1, %s3375_s12  }
 0x21a   : > { %p10_p4 = scmp.ge.s32.totalorder %s13_s12, 4  }
 0x21c   :  { %12 = sbr.rel (!%p10_p4) target bundleno = 1 (0x1), region = 62 }

// kernel: encoder_forward.6
= control target key start
LH: loop header
LB: loop body
LE: loop exit
PB: predicated region body
PF: predicated region fallthrough
CT: control target
= control target key end

     0   :  { %s1877_s12 = smov 0   ;;  %s2102_s0 = inlined_call_operand.vmem [shape: bf16[512,512], index: 0, kind: input, shape index: {}]   ;;  %s2103_s1 = inlined_call_operand.vmem [shape: bf16[512,128], index: 1, kind: input, shape index: {}]   ;;  %s2104_s2 = inlined_call_operand.vmem [shape: f32[512,128], index: 2, kind: output, shape index: {0}]   ;;  %s2105_s3 = inlined_call_operand.vmem [shape: f32[2,2,128], index: 3, kind: output, shape index: {1}]  }
   0x1 LB: > { %s1883_s13 = sadd.s32 4294967295, %s1855_s12   ;;  %p1383_p0 = scmp.ge.s32.totalorder %s1855_s12, 1  ;;  %s1855_s12 = sphi %s1877_s12, %s14_s12  }
   0x2   : > { %p142_p1 = scmp.lt.s32.totalorder %s1855_s12, 3 }
   0x4   : > { %p143_p2 = pnand %p1383_p0, %p142_p1 }
   0x5   : > { %v1721_v0 = vld [vmem:[%s2103_s1 + $0x40] sm:$0xff] (!%p143_p2)   ;;  %v1725_v4 = vld [vmem:[%s2103_s1 + $0x48] sm:$0xff] (!%p143_p2)   ;;  %v1729_v8 = vld [vmem:[%s2103_s1 + $0x50] sm:$0xff] (!%p143_p2)   ;;  %s1384_s21 = sshll.u32 (!%p143_p2), %s1883_s13, 5  ;;  %p184_p4 = scmp.lt.s32.totalorder (!%p143_p2), %s1883_s13, 1  ;;  %vm1289_vm0 = vcmask (!%p143_p2), 1040384  }
   0x6   : > { %146 = sbr.rel (%p143_p2) target bundleno = 397 (0x18d), region = 28  ;;  %v1722_v1 = vld [vmem:[%s2103_s1 + $0xc0] sm:$0xff] (!%p143_p2)   ;;  %1489 = vmatprep.subr.bf16.mxu0 (!%p143_p2), %v1721_v0  ;;  %v1726_v5 = vld [vmem:[%s2103_s1 + $0xc8] sm:$0xff] (!%p143_p2)   ;;  %v1730_v9 = vld [vmem:[%s2103_s1 + $0xd0] sm:$0xff] (!%p143_p2)   ;;  %p172_p3 = scmp.lt.s32.totalorder (!%p143_p2), %s1384_s21, 63 }
   0x7   : > { %v1723_v2 = vld [vmem:[%s2103_s1] sm:$0xff] (!%p143_p2)   ;;  %1601 = vmatprep.subr.bf16.mxu1 (!%p143_p2), %v1722_v1  ;;  %v1727_v6 = vld [vmem:[%s2103_s1 + $0x8] sm:$0xff] (!%p143_p2)   ;;  %v1731_v10 = vld [vmem:[%s2103_s1 + $0x10] sm:$0xff] (!%p143_p2)  }
   0x8   : > { %v1724_v3 = vld [vmem:[%s2103_s1 + $0x80] sm:$0xff] (!%p143_p2)   ;;  %1490 = vmatpush3.bf16.msra.mxu0 (!%p143_p2), %v1723_v2  ;;  %v1728_v7 = vld [vmem:[%s2103_s1 + $0x88] sm:$0xff] (!%p143_p2)   ;;  %v1732_v11 = vld [vmem:[%s2103_s1 + $0x90] sm:$0xff] (!%p143_p2)  }
   0x9   : > { %1602 = vmatpush3.bf16.msra.mxu1 (!%p143_p2), %v1724_v3  ;;  %1491 = vmatprep.subr.bf16.mxu0 (!%p143_p2), %v1725_v4  ;;  %v1733_v12 = vld [vmem:[%s2103_s1 + $0x58] sm:$0xff] (!%p143_p2)   ;;  %v1737_v16 = vld [vmem:[%s2103_s1 + $0x60] sm:$0xff] (!%p143_p2)   ;;  %v1741_v20 = vld [vmem:[%s2103_s1 + $0x68] sm:$0xff] (!%p143_p2)  }
   0xa   : > { %1603 = vmatprep.subr.bf16.mxu1 (!%p143_p2), %v1726_v5  ;;  %v1734_v13 = vld [vmem:[%s2103_s1 + $0xd8] sm:$0xff] (!%p143_p2)   ;;  %v1738_v17 = vld [vmem:[%s2103_s1 + $0xe0] sm:$0xff] (!%p143_p2)   ;;  %v1742_v21 = vld [vmem:[%s2103_s1 + $0xe8] sm:$0xff] (!%p143_p2)  }
   0xb   : > { %v1735_v14 = vld [vmem:[%s2103_s1 + $0x18] sm:$0xff] (!%p143_p2)   ;;  %v1739_v18 = vld [vmem:[%s2103_s1 + $0x20] sm:$0xff] (!%p143_p2)   ;;  %v1743_v22 = vld [vmem:[%s2103_s1 + $0x28] sm:$0xff] (!%p143_p2)  }
   0xc   : > { %1492 = vmatpush3.bf16.msra.mxu0 (!%p143_p2), %v1727_v6  ;;  %v1736_v15 = vld [vmem:[%s2103_s1 + $0x98] sm:$0xff] (!%p143_p2)   ;;  %v1740_v19 = vld [vmem:[%s2103_s1 + $0xa0] sm:$0xff] (!%p143_p2)   ;;  %v1744_v23 = vld [vmem:[%s2103_s1 + $0xa8] sm:$0xff] (!%p143_p2)  }
   0xd   : > { %1604 = vmatpush3.bf16.msra.mxu1 %v1728_v7  ;;  %1493 = vmatprep.subr.bf16.mxu0 %v1729_v8  ;;  %s2107_s21 = smov (!%p172_p3, %s1384_s21), 63  ;;  %v1745_v24 = vld [vmem:[%s2103_s1 + $0x70] sm:$0xff]   ;;  %v1749_v28 = vld [vmem:[%s2103_s1 + $0x78] sm:$0xff]   ;;  %s2109_s13 = smov (!%p184_p4, %s1883_s13), 1 }
   0xe   : > { %1605 = vmatprep.subr.bf16.mxu1 %v1730_v9  ;;  %v1746_v25 = vld [vmem:[%s2103_s1 + $0xf0] sm:$0xff]   ;;  %s1488_s19 = sshll.u32 %s2107_s21, 4  ;;  %v1750_v29 = vld [vmem:[%s2103_s1 + $0xf8] sm:$0xff]   ;;  %s1388_s7 = sshll.u32 %s2107_s21, 3 }
   0xf   : > { %v1747_v26 = vld [vmem:[%s2103_s1 + $0x30] sm:$0xff]   ;;  %s1984_s29 = scalar_lea.vmem %s2102_s0, %s1488_s19  ;;  %v1751_v30 = vld [vmem:[%s2103_s1 + $0x38] sm:$0xff]   ;;  %s2060_s10 = scalar_lea.vmem %s2104_s2, %s1388_s7 }
  0x10   : > { %1494 = vmatpush3.bf16.msra.mxu0 %v1731_v10  ;;  %v1748_v27 = vld [vmem:[%s2103_s1 + $0xb0] sm:$0xff]   ;;  %v1752_v31 = vld [vmem:[%s2103_s1 + $0xb8] sm:$0xff]   ;;  %s1389_s21 = sshll.u32 %s2109_s13, 1 }
  0x11   : > { %1606 = vmatpush3.bf16.msra.mxu1 %v1732_v11  ;;  %1495 = vmatprep.subr.bf16.mxu0 %v1733_v12  ;;  %v1753_v32 = vld [vmem:[%s1984_s29] ss:$16 sps:$4 sm:$0xff]   ;;  %v1755_v33 = vld [vmem:[%s1984_s29 + $0x4] ss:$16 sps:$4 sm:$0xff]   ;;  %v1756_v34 = vld [vmem:[%s1984_s29 + $0x8] ss:$16 sps:$4 sm:$0xff]   ;;  %s187_s15 = scalar_lea.vmem %s2105_s3, %s1389_s21 }
  0x12   : > { %1607 = vmatprep.subr.bf16.mxu1 %v1734_v13  ;;  %v1758_v35 = vld [vmem:[%s1984_s29 + $0xc] ss:$16 sps:$4 sm:$0xff]   ;;  %861 = vmatprep.mubr.bf16.mxu0 %v1755_v33  ;;  %v1759_v36 = vld [vmem:[%s1984_s29 + $0x24] ss:$16 sps:$4 sm:$0xff]   ;;  %v1763_v38 = vld [vmem:[%s1984_s29 + $0x20] ss:$16 sps:$4 sm:$0xff]  }
  0x13   : > { %1022 = vmatprep.mubr.bf16.mxu1 %v1758_v35  ;;  %v1761_v37 = vld [vmem:[%s1984_s29 + $0x2c] ss:$16 sps:$4 sm:$0xff]   ;;  %v1764_v39 = vld [vmem:[%s1984_s29 + $0x28] ss:$16 sps:$4 sm:$0xff]   ;;  %v1765_v40 = vld [vmem:[%s1984_s29 + $0x44] ss:$16 sps:$4 sm:$0xff]  }
  0x14   : > { %1496 = vmatpush3.bf16.msra.mxu0 %v1735_v14  ;;  %v1767_v41 = vld [vmem:[%s1984_s29 + $0x4c] ss:$16 sps:$4 sm:$0xff]   ;;  %v1769_v42 = vld [vmem:[%s1984_s29 + $0x40] ss:$16 sps:$4 sm:$0xff]   ;;  %v1770_v43 = vld [vmem:[%s1984_s29 + $0x48] ss:$16 sps:$4 sm:$0xff]  }
  0x15   : > { %1608 = vmatpush3.bf16.msra.mxu1 %v1736_v15  ;;  %1497 = vmatprep.subr.bf16.mxu0 %v1737_v16  ;;  %v1771_v44 = vld [vmem:[%s1984_s29 + $0x64] ss:$16 sps:$4 sm:$0xff]   ;;  %v1773_v45 = vld [vmem:[%s1984_s29 + $0x6c] ss:$16 sps:$4 sm:$0xff]   ;;  %v1775_v46 = vld [vmem:[%s1984_s29 + $0x60] ss:$16 sps:$4 sm:$0xff]  }
  0x16   : > { %1609 = vmatprep.subr.bf16.mxu1 %v1738_v17  ;;  %v1776_v47 = vld [vmem:[%s1984_s29 + $0x68] ss:$16 sps:$4 sm:$0xff]   ;;  %v1777_v48 = vld [vmem:[%s1984_s29 + $0x84] ss:$16 sps:$4 sm:$0xff]   ;;  %v1779_v49 = vld [vmem:[%s1984_s29 + $0x8c] ss:$16 sps:$4 sm:$0xff]  }
  0x17   : > { %v1781_v50 = vld [vmem:[%s1984_s29 + $0x80] ss:$16 sps:$4 sm:$0xff]   ;;  %v1782_v51 = vld [vmem:[%s1984_s29 + $0x88] ss:$16 sps:$4 sm:$0xff]   ;;  %v1783_v52 = vld [vmem:[%s1984_s29 + $0xa4] ss:$16 sps:$4 sm:$0xff]  }
  0x18   : > { %1498 = vmatpush3.bf16.msra.mxu0 %v1739_v18  ;;  %v1785_v53 = vld [vmem:[%s1984_s29 + $0xac] ss:$16 sps:$4 sm:$0xff]   ;;  %v1787_v54 = vld [vmem:[%s1984_s29 + $0xa0] ss:$16 sps:$4 sm:$0xff]   ;;  %v1788_v55 = vld [vmem:[%s1984_s29 + $0xa8] ss:$16 sps:$4 sm:$0xff]  }
  0x19   : > { %1610 = vmatpush3.bf16.msra.mxu1 %v1740_v19  ;;  %1499 = vmatprep.subr.bf16.mxu0 %v1741_v20  ;;  %v1789_v56 = vld [vmem:[%s1984_s29 + $0xc4] ss:$16 sps:$4 sm:$0xff]   ;;  %v1791_v57 = vld [vmem:[%s1984_s29 + $0xcc] ss:$16 sps:$4 sm:$0xff]   ;;  %v1793_v58 = vld [vmem:[%s1984_s29 + $0xc0] ss:$16 sps:$4 sm:$0xff]  }
  0x1a   : > { %1611 = vmatprep.subr.bf16.mxu1 %v1742_v21  ;;  %v1794_v59 = vld [vmem:[%s1984_s29 + $0xc8] ss:$16 sps:$4 sm:$0xff]   ;;  %v1795_v60 = vld [vmem:[%s1984_s29 + $0xe4] ss:$16 sps:$4 sm:$0xff]   ;;  %v1797_v61 = vld [vmem:[%s1984_s29 + $0xec] ss:$16 sps:$4 sm:$0xff]  }
  0x1b   : > { %v1799_v62 = vld [vmem:[%s1984_s29 + $0xe0] ss:$16 sps:$4 sm:$0xff]   ;;  %v1800_v63 = vld [vmem:[%s1984_s29 + $0xe8] ss:$16 sps:$4 sm:$0xff]   ;;  %v1801_v0 = vld [vmem:[%s1984_s29 + $0x104] ss:$16 sps:$4 sm:$0xff]  }
  0x1c   : > { %1500 = vmatpush3.bf16.msra.mxu0 %v1743_v22  ;;  %v1803_v1 = vld [vmem:[%s1984_s29 + $0x10c] ss:$16 sps:$4 sm:$0xff]   ;;  %v1805_v2 = vld [vmem:[%s1984_s29 + $0x100] ss:$16 sps:$4 sm:$0xff]   ;;  %v1806_v3 = vld [vmem:[%s1984_s29 + $0x108] ss:$16 sps:$4 sm:$0xff]  }
  0x1d   : > { %1612 = vmatpush3.bf16.msra.mxu1 %v1744_v23  ;;  %1501 = vmatprep.subr.bf16.mxu0 %v1745_v24  ;;  %v1807_v4 = vld [vmem:[%s1984_s29 + $0x124] ss:$16 sps:$4 sm:$0xff]   ;;  %v1809_v5 = vld [vmem:[%s1984_s29 + $0x12c] ss:$16 sps:$4 sm:$0xff]   ;;  %v1811_v6 = vld [vmem:[%s1984_s29 + $0x120] ss:$16 sps:$4 sm:$0xff]  }
  0x1e   : > { %1613 = vmatprep.subr.bf16.mxu1 %v1746_v25  ;;  %v1812_v7 = vld [vmem:[%s1984_s29 + $0x128] ss:$16 sps:$4 sm:$0xff]   ;;  %v1813_v8 = vld [vmem:[%s1984_s29 + $0x144] ss:$16 sps:$4 sm:$0xff]   ;;  %v1815_v9 = vld [vmem:[%s1984_s29 + $0x14c] ss:$16 sps:$4 sm:$0xff]  }
  0x1f   : > { %v1817_v10 = vld [vmem:[%s1984_s29 + $0x140] ss:$16 sps:$4 sm:$0xff]   ;;  %v1818_v11 = vld [vmem:[%s1984_s29 + $0x148] ss:$16 sps:$4 sm:$0xff]   ;;  %v1819_v12 = vld [vmem:[%s1984_s29 + $0x164] ss:$16 sps:$4 sm:$0xff]  }
  0x20   : > { %1502 = vmatpush3.bf16.msra.mxu0 %v1747_v26  ;;  %v1821_v13 = vld [vmem:[%s1984_s29 + $0x16c] ss:$16 sps:$4 sm:$0xff]   ;;  %v1823_v14 = vld [vmem:[%s1984_s29 + $0x160] ss:$16 sps:$4 sm:$0xff]   ;;  %v1824_v15 = vld [vmem:[%s1984_s29 + $0x168] ss:$16 sps:$4 sm:$0xff]  }
  0x21   : > { %1614 = vmatpush3.bf16.msra.mxu1 %v1748_v27  ;;  %1503 = vmatprep.subr.bf16.mxu0 %v1749_v28  ;;  %v1825_v16 = vld [vmem:[%s1984_s29 + $0x184] ss:$16 sps:$4 sm:$0xff]   ;;  %v1827_v17 = vld [vmem:[%s1984_s29 + $0x18c] ss:$16 sps:$4 sm:$0xff]   ;;  %v1829_v18 = vld [vmem:[%s1984_s29 + $0x180] ss:$16 sps:$4 sm:$0xff]  }
  0x22   : > { %1615 = vmatprep.subr.bf16.mxu1 %v1750_v29  ;;  %v1830_v19 = vld [vmem:[%s1984_s29 + $0x188] ss:$16 sps:$4 sm:$0xff]   ;;  %v1831_v20 = vld [vmem:[%s1984_s29 + $0x1a4] ss:$16 sps:$4 sm:$0xff]   ;;  %v1833_v21 = vld [vmem:[%s1984_s29 + $0x1ac] ss:$16 sps:$4 sm:$0xff]  }
  0x23   : > { %v1835_v22 = vld [vmem:[%s1984_s29 + $0x1a0] ss:$16 sps:$4 sm:$0xff]   ;;  %v1836_v23 = vld [vmem:[%s1984_s29 + $0x1a8] ss:$16 sps:$4 sm:$0xff]   ;;  %v1837_v24 = vld [vmem:[%s1984_s29 + $0x1c4] ss:$16 sps:$4 sm:$0xff]  }
  0x24   : > { %1504 = vmatpush3.bf16.msra.mxu0 %v1751_v30  ;;  %v1839_v25 = vld [vmem:[%s1984_s29 + $0x1cc] ss:$16 sps:$4 sm:$0xff]   ;;  %v1841_v26 = vld [vmem:[%s1984_s29 + $0x1c0] ss:$16 sps:$4 sm:$0xff]   ;;  %v1842_v27 = vld [vmem:[%s1984_s29 + $0x1c8] ss:$16 sps:$4 sm:$0xff]  }
  0x25   : > { %1616 = vmatpush3.bf16.msra.mxu1 %v1752_v31  ;;  %v1843_v28 = vld [vmem:[%s1984_s29 + $0x1e4] ss:$16 sps:$4 sm:$0xff]   ;;  %v1845_v29 = vld [vmem:[%s1984_s29 + $0x1ec] ss:$16 sps:$4 sm:$0xff]   ;;  %v1847_v30 = vld [vmem:[%s1984_s29 + $0x1e0] ss:$16 sps:$4 sm:$0xff]  }
  0x26   : > { %v1848_v31 = vld [vmem:[%s1984_s29 + $0x1e8] ss:$16 sps:$4 sm:$0xff]  }
  0x27   : > { %862 = vmatmul.mubr.bf16.vlgmr.msra.gmra.mrb[0].mxu0 %v1753_v32 }
  0x28   : > { %1023 = vmatmul.mubr.bf16.vlgmr.msra.gmra.mrb[0].mxu1 %v1756_v34  ;;  %869 = vmatprep.mubr.bf16.mxu0 %v1759_v36 }
  0x29   : > { %1030 = vmatprep.mubr.bf16.mxu1 %v1761_v37 }
  0x2f   : > { %870 = vmatmul.mubr.bf16.gmra.mrb[4].mxu0 %v1763_v38 }
  0x30   : > { %1031 = vmatmul.mubr.bf16.gmra.mrb[4].mxu1 %v1764_v39  ;;  %877 = vmatprep.mubr.bf16.mxu0 %v1765_v40 }
  0x31   : > { %1038 = vmatprep.mubr.bf16.mxu1 %v1767_v41 }
  0x37   : > { %878 = vmatmul.mubr.bf16.gmra.mrb[8].mxu0 %v1769_v42 }
  0x38   : > { %1039 = vmatmul.mubr.bf16.gmra.mrb[8].mxu1 %v1770_v43  ;;  %885 = vmatprep.mubr.bf16.mxu0 %v1771_v44 }
  0x39   : > { %1046 = vmatprep.mubr.bf16.mxu1 %v1773_v45 }
  0x3f   : > { %886 = vmatmul.mubr.bf16.gmra.mrb[12].mxu0 %v1775_v46 }
  0x40   : > { %1047 = vmatmul.mubr.bf16.gmra.mrb[12].mxu1 %v1776_v47  ;;  %893 = vmatprep.mubr.bf16.mxu0 %v1777_v48 }
  0x41   : > { %1054 = vmatprep.mubr.bf16.mxu1 %v1779_v49 }
  0x47   : > { %894 = vmatmul.mubr.bf16.gmra.mrb[16].mxu0 %v1781_v50 }
  0x48   : > { %1055 = vmatmul.mubr.bf16.gmra.mrb[16].mxu1 %v1782_v51  ;;  %901 = vmatprep.mubr.bf16.mxu0 %v1783_v52 }
  0x49   : > { %1062 = vmatprep.mubr.bf16.mxu1 %v1785_v53 }
  0x4f   : > { %902 = vmatmul.mubr.bf16.gmra.mrb[20].mxu0 %v1787_v54 }
  0x50   : > { %1063 = vmatmul.mubr.bf16.gmra.mrb[20].mxu1 %v1788_v55  ;;  %909 = vmatprep.mubr.bf16.mxu0 %v1789_v56 }
  0x51   : > { %1070 = vmatprep.mubr.bf16.mxu1 %v1791_v57 }
  0x57   : > { %910 = vmatmul.mubr.bf16.gmra.mrb[24].mxu0 %v1793_v58 }
  0x58   : > { %1071 = vmatmul.mubr.bf16.gmra.mrb[24].mxu1 %v1794_v59  ;;  %917 = vmatprep.mubr.bf16.mxu0 %v1795_v60 }
  0x59   : > { %1078 = vmatprep.mubr.bf16.mxu1 %v1797_v61 }
  0x5f   : > { %918 = vmatmul.mubr.bf16.gmra.mrb[28].mxu0 %v1799_v62 }
  0x60   : > { %1079 = vmatmul.mubr.bf16.gmra.mrb[28].mxu1 %v1800_v63  ;;  %925 = vmatprep.mubr.bf16.mxu0 %v1801_v0 }
  0x61   : > { %1086 = vmatprep.mubr.bf16.mxu1 %v1803_v1 }
  0x67   : > { %926 = vmatmul.mubr.bf16.gmra.mrb[32].mxu0 %v1805_v2 }
  0x68   : > { %1087 = vmatmul.mubr.bf16.gmra.mrb[32].mxu1 %v1806_v3  ;;  %933 = vmatprep.mubr.bf16.mxu0 %v1807_v4 }
  0x69   : > { %1094 = vmatprep.mubr.bf16.mxu1 %v1809_v5 }
  0x6f   : > { %934 = vmatmul.mubr.bf16.gmra.mrb[36].mxu0 %v1811_v6 }
  0x70   : > { %1095 = vmatmul.mubr.bf16.gmra.mrb[36].mxu1 %v1812_v7  ;;  %941 = vmatprep.mubr.bf16.mxu0 %v1813_v8 }
  0x71   : > { %1102 = vmatprep.mubr.bf16.mxu1 %v1815_v9 }
  0x77   : > { %942 = vmatmul.mubr.bf16.gmra.mrb[40].mxu0 %v1817_v10 }
  0x78   : > { %1103 = vmatmul.mubr.bf16.gmra.mrb[40].mxu1 %v1818_v11  ;;  %949 = vmatprep.mubr.bf16.mxu0 %v1819_v12 }
  0x79   : > { %1110 = vmatprep.mubr.bf16.mxu1 %v1821_v13 }
  0x7f   : > { %950 = vmatmul.mubr.bf16.gmra.mrb[44].mxu0 %v1823_v14 }
  0x80   : > { %1111 = vmatmul.mubr.bf16.gmra.mrb[44].mxu1 %v1824_v15  ;;  %957 = vmatprep.mubr.bf16.mxu0 %v1825_v16 }
  0x81   : > { %1118 = vmatprep.mubr.bf16.mxu1 %v1827_v17 }
  0x87   : > { %958 = vmatmul.mubr.bf16.gmra.mrb[48].mxu0 %v1829_v18 }
  0x88   : > { %1119 = vmatmul.mubr.bf16.gmra.mrb[48].mxu1 %v1830_v19  ;;  %965 = vmatprep.mubr.bf16.mxu0 %v1831_v20 }
  0x89   : > { %1126 = vmatprep.mubr.bf16.mxu1 %v1833_v21 }
  0x8f   : > { %966 = vmatmul.mubr.bf16.gmra.mrb[52].mxu0 %v1835_v22 }
  0x90   : > { %1127 = vmatmul.mubr.bf16.gmra.mrb[52].mxu1 %v1836_v23  ;;  %973 = vmatprep.mubr.bf16.mxu0 %v1837_v24 }
  0x91   : > { %1134 = vmatprep.mubr.bf16.mxu1 %v1839_v25 }
  0x97   : > { %974 = vmatmul.mubr.bf16.gmra.mrb[56].mxu0 %v1841_v26 }
  0x98   : > { %1135 = vmatmul.mubr.bf16.gmra.mrb[56].mxu1 %v1842_v27  ;;  %981 = vmatprep.mubr.bf16.mxu0 %v1843_v28 }
  0x99   : > { %1142 = vmatprep.mubr.bf16.mxu1 %v1845_v29 }
  0x9f   : > { %982 = vmatmul.mubr.bf16.gmra.mrb[60].mxu0 %v1847_v30 }
  0xa0   : > { %1143 = vmatmul.mubr.bf16.gmra.mrb[60].mxu1 %v1848_v31 }
  0xfa   : > { %v1505_v32 = vpop.f32.mrb[0].mxu0 }
  0xfb   : > { %v1617_v33 = vpop.f32.mrb[0].mxu1  ;;  %v1506_v34 = vpop.f32.mrb[1].mxu0 }
  0xfc   : > { %v1507_v35 = vadd.f32 %v1506_v34, %v1505_v32  ;;  %v1618_v36 = vpop.f32.mrb[1].mxu1  ;;  %v1508_v37 = vpop.f32.mrb[2].mxu0 }
  0xfd   : > { %v1619_v38 = vadd.f32 %v1618_v36, %v1617_v33  ;;  %v1620_v39 = vpop.f32.mrb[2].mxu1  ;;  %v1509_v40 = vpop.f32.mrb[3].mxu0 }
  0xfe   : > { %v1510_v41 = vadd.f32 %v1509_v40, %v1508_v37  ;;  %v1621_v42 = vpop.f32.mrb[3].mxu1 }
  0xff   : > { %v1025_v43 = vadd.f32 %v1619_v38, %v1507_v35  ;;  %v1622_v44 = vadd.f32 %v1621_v42, %v1620_v39 }
 0x101   : > { %1151 = vst [vmem:[%s2060_s10] sm:$0xff] %v1025_v43  ;;  %v1028_v45 = vadd.f32 %v1622_v44, %v1510_v41  ;;  %v1220_v47 = vmul.f32 %v1025_v43, %v1025_v43 }
 0x102   : > { %v1511_v46 = vpop.f32.mrb[4].mxu0 }
 0x103   : > { %1152 = vst [vmem:[%s2060_s10 + $0x8] sm:$0xff] %v1028_v45  ;;  %v1183_v48 = vadd.f32 %v1028_v45, %v1025_v43  ;;  %v1221_v49 = vmul.f32 %v1028_v45, %v1028_v45  ;;  %v1623_v50 = vpop.f32.mrb[4].mxu1  ;;  %v1512_v51 = vpop.f32.mrb[5].mxu0 }
 0x104   : > { %v1513_v52 = vadd.f32 %v1512_v51, %v1511_v46  ;;  %v1624_v53 = vpop.f32.mrb[5].mxu1  ;;  %v1514_v54 = vpop.f32.mrb[6].mxu0 }
 0x105   : > { %v1252_v55 = vadd.f32 %v1221_v49, %v1220_v47  ;;  %v1625_v56 = vadd.f32 %v1624_v53, %v1623_v50  ;;  %v1626_v57 = vpop.f32.mrb[6].mxu1  ;;  %v1515_v58 = vpop.f32.mrb[7].mxu0 }
 0x106   : > { %v1516_v59 = vadd.f32 %v1515_v58, %v1514_v54  ;;  %v1627_v60 = vpop.f32.mrb[7].mxu1 }
 0x107   : > { %v1033_v61 = vadd.f32 %v1625_v56, %v1513_v52  ;;  %v1628_v62 = vadd.f32 %v1627_v60, %v1626_v57 }
 0x109   : > { %1153 = vst [vmem:[%s2060_s10 + $0x10] sm:$0xff] %v1033_v61  ;;  %v1184_v63 = vadd.f32 %v1183_v48, %v1033_v61  ;;  %v1222_v0 = vmul.f32 %v1033_v61, %v1033_v61  ;;  %v1036_v1 = vadd.f32 %v1628_v62, %v1516_v59 }
 0x10a   : > { %v1517_v2 = vpop.f32.mrb[8].mxu0 }
 0x10b   : > { %v1253_v3 = vadd.f32 %v1252_v55, %v1222_v0  ;;  %1154 = vst [vmem:[%s2060_s10 + $0x18] sm:$0xff] %v1036_v1  ;;  %v1185_v4 = vadd.f32 %v1184_v63, %v1036_v1  ;;  %v1223_v5 = vmul.f32 %v1036_v1, %v1036_v1  ;;  %v1629_v6 = vpop.f32.mrb[8].mxu1  ;;  %v1518_v7 = vpop.f32.mrb[9].mxu0 }
 0x10c   : > { %v1519_v8 = vadd.f32 %v1518_v7, %v1517_v2  ;;  %v1630_v9 = vpop.f32.mrb[9].mxu1  ;;  %v1520_v10 = vpop.f32.mrb[10].mxu0 }
 0x10d   : > { %v1254_v11 = vadd.f32 %v1253_v3, %v1223_v5  ;;  %v1631_v12 = vadd.f32 %v1630_v9, %v1629_v6  ;;  %v1632_v13 = vpop.f32.mrb[10].mxu1  ;;  %v1521_v14 = vpop.f32.mrb[11].mxu0 }
 0x10e   : > { %v1522_v15 = vadd.f32 %v1521_v14, %v1520_v10  ;;  %v1633_v16 = vpop.f32.mrb[11].mxu1 }
 0x10f   : > { %v1041_v17 = vadd.f32 %v1631_v12, %v1519_v8  ;;  %v1634_v18 = vadd.f32 %v1633_v16, %v1632_v13 }
 0x111   : > { %1155 = vst [vmem:[%s2060_s10 + $0x20] sm:$0xff] %v1041_v17  ;;  %v1186_v19 = vadd.f32 %v1185_v4, %v1041_v17  ;;  %v1224_v20 = vmul.f32 %v1041_v17, %v1041_v17  ;;  %v1044_v21 = vadd.f32 %v1634_v18, %v1522_v15 }
 0x112   : > { %v1523_v22 = vpop.f32.mrb[12].mxu0 }
 0x113   : > { %v1255_v23 = vadd.f32 %v1254_v11, %v1224_v20  ;;  %1156 = vst [vmem:[%s2060_s10 + $0x28] sm:$0xff] %v1044_v21  ;;  %v1187_v24 = vadd.f32 %v1186_v19, %v1044_v21  ;;  %v1225_v25 = vmul.f32 %v1044_v21, %v1044_v21  ;;  %v1635_v26 = vpop.f32.mrb[12].mxu1  ;;  %v1524_v27 = vpop.f32.mrb[13].mxu0 }
 0x114   : > { %v1525_v28 = vadd.f32 %v1524_v27, %v1523_v22  ;;  %v1636_v29 = vpop.f32.mrb[13].mxu1  ;;  %v1526_v30 = vpop.f32.mrb[14].mxu0 }
 0x115   : > { %v1256_v31 = vadd.f32 %v1255_v23, %v1225_v25  ;;  %v1637_v32 = vadd.f32 %v1636_v29, %v1635_v26  ;;  %v1638_v33 = vpop.f32.mrb[14].mxu1  ;;  %v1527_v34 = vpop.f32.mrb[15].mxu0 }
 0x116   : > { %v1528_v35 = vadd.f32 %v1527_v34, %v1526_v30  ;;  %v1639_v36 = vpop.f32.mrb[15].mxu1 }
 0x117   : > { %v1049_v37 = vadd.f32 %v1637_v32, %v1525_v28  ;;  %v1640_v38 = vadd.f32 %v1639_v36, %v1638_v33 }
 0x119   : > { %1157 = vst [vmem:[%s2060_s10 + $0x30] sm:$0xff] %v1049_v37  ;;  %v1188_v39 = vadd.f32 %v1187_v24, %v1049_v37  ;;  %v1226_v40 = vmul.f32 %v1049_v37, %v1049_v37  ;;  %v1052_v41 = vadd.f32 %v1640_v38, %v1528_v35 }
 0x11a   : > { %v1529_v42 = vpop.f32.mrb[16].mxu0 }
 0x11b   : > { %v1257_v43 = vadd.f32 %v1256_v31, %v1226_v40  ;;  %1158 = vst [vmem:[%s2060_s10 + $0x38] sm:$0xff] %v1052_v41  ;;  %v1189_v44 = vadd.f32 %v1188_v39, %v1052_v41  ;;  %v1227_v45 = vmul.f32 %v1052_v41, %v1052_v41  ;;  %v1641_v46 = vpop.f32.mrb[16].mxu1  ;;  %v1530_v47 = vpop.f32.mrb[17].mxu0 }
 0x11c   : > { %v1531_v48 = vadd.f32 %v1530_v47, %v1529_v42  ;;  %v1642_v49 = vpop.f32.mrb[17].mxu1  ;;  %v1532_v50 = vpop.f32.mrb[18].mxu0 }
 0x11d   : > { %v1258_v51 = vadd.f32 %v1257_v43, %v1227_v45  ;;  %v1643_v52 = vadd.f32 %v1642_v49, %v1641_v46  ;;  %v1644_v53 = vpop.f32.mrb[18].mxu1  ;;  %v1533_v54 = vpop.f32.mrb[19].mxu0 }
 0x11e   : > { %v1534_v55 = vadd.f32 %v1533_v54, %v1532_v50  ;;  %v1645_v56 = vpop.f32.mrb[19].mxu1 }
 0x11f   : > { %v1057_v57 = vadd.f32 %v1643_v52, %v1531_v48  ;;  %v1646_v58 = vadd.f32 %v1645_v56, %v1644_v53 }
 0x121   : > { %1159 = vst [vmem:[%s2060_s10 + $0x40] sm:$0xff] %v1057_v57  ;;  %v1190_v59 = vadd.f32 %v1189_v44, %v1057_v57  ;;  %v1228_v60 = vmul.f32 %v1057_v57, %v1057_v57  ;;  %v1060_v61 = vadd.f32 %v1646_v58, %v1534_v55 }
 0x122   : > { %v1535_v62 = vpop.f32.mrb[20].mxu0 }
 0x123   : > { %v1259_v63 = vadd.f32 %v1258_v51, %v1228_v60  ;;  %1160 = vst [vmem:[%s2060_s10 + $0x48] sm:$0xff] %v1060_v61  ;;  %v1191_v0 = vadd.f32 %v1190_v59, %v1060_v61  ;;  %v1229_v1 = vmul.f32 %v1060_v61, %v1060_v61  ;;  %v1647_v2 = vpop.f32.mrb[20].mxu1  ;;  %v1536_v3 = vpop.f32.mrb[21].mxu0 }
 0x124   : > { %v1537_v4 = vadd.f32 %v1536_v3, %v1535_v62  ;;  %v1648_v5 = vpop.f32.mrb[21].mxu1  ;;  %v1538_v6 = vpop.f32.mrb[22].mxu0 }
 0x125   : > { %v1260_v7 = vadd.f32 %v1259_v63, %v1229_v1  ;;  %v1649_v8 = vadd.f32 %v1648_v5, %v1647_v2  ;;  %v1650_v9 = vpop.f32.mrb[22].mxu1  ;;  %v1539_v10 = vpop.f32.mrb[23].mxu0 }
 0x126   : > { %v1540_v11 = vadd.f32 %v1539_v10, %v1538_v6  ;;  %v1651_v12 = vpop.f32.mrb[23].mxu1 }
 0x127   : > { %v1065_v13 = vadd.f32 %v1649_v8, %v1537_v4  ;;  %v1652_v14 = vadd.f32 %v1651_v12, %v1650_v9 }
 0x129   : > { %1161 = vst [vmem:[%s2060_s10 + $0x50] sm:$0xff] %v1065_v13  ;;  %v1192_v15 = vadd.f32 %v1191_v0, %v1065_v13  ;;  %v1230_v16 = vmul.f32 %v1065_v13, %v1065_v13  ;;  %v1068_v17 = vadd.f32 %v1652_v14, %v1540_v11 }
 0x12a   : > { %v1541_v18 = vpop.f32.mrb[24].mxu0 }
 0x12b   : > { %v1261_v19 = vadd.f32 %v1260_v7, %v1230_v16  ;;  %1162 = vst [vmem:[%s2060_s10 + $0x58] sm:$0xff] %v1068_v17  ;;  %v1193_v20 = vadd.f32 %v1192_v15, %v1068_v17  ;;  %v1231_v21 = vmul.f32 %v1068_v17, %v1068_v17  ;;  %v1653_v22 = vpop.f32.mrb[24].mxu1  ;;  %v1542_v23 = vpop.f32.mrb[25].mxu0 }
 0x12c   : > { %v1543_v24 = vadd.f32 %v1542_v23, %v1541_v18  ;;  %v1654_v25 = vpop.f32.mrb[25].mxu1  ;;  %v1544_v26 = vpop.f32.mrb[26].mxu0 }
 0x12d   : > { %v1262_v27 = vadd.f32 %v1261_v19, %v1231_v21  ;;  %v1655_v28 = vadd.f32 %v1654_v25, %v1653_v22  ;;  %v1656_v29 = vpop.f32.mrb[26].mxu1  ;;  %v1545_v30 = vpop.f32.mrb[27].mxu0 }
 0x12e   : > { %v1546_v31 = vadd.f32 %v1545_v30, %v1544_v26  ;;  %v1657_v32 = vpop.f32.mrb[27].mxu1 }
 0x12f   : > { %v1073_v33 = vadd.f32 %v1655_v28, %v1543_v24  ;;  %v1658_v34 = vadd.f32 %v1657_v32, %v1656_v29 }
 0x131   : > { %1163 = vst [vmem:[%s2060_s10 + $0x60] sm:$0xff] %v1073_v33  ;;  %v1194_v35 = vadd.f32 %v1193_v20, %v1073_v33  ;;  %v1232_v36 = vmul.f32 %v1073_v33, %v1073_v33  ;;  %v1076_v37 = vadd.f32 %v1658_v34, %v1546_v31 }
 0x132   : > { %v1547_v38 = vpop.f32.mrb[28].mxu0 }
 0x133   : > { %v1263_v39 = vadd.f32 %v1262_v27, %v1232_v36  ;;  %1164 = vst [vmem:[%s2060_s10 + $0x68] sm:$0xff] %v1076_v37  ;;  %v1195_v40 = vadd.f32 %v1194_v35, %v1076_v37  ;;  %v1233_v41 = vmul.f32 %v1076_v37, %v1076_v37  ;;  %v1659_v42 = vpop.f32.mrb[28].mxu1  ;;  %v1548_v43 = vpop.f32.mrb[29].mxu0 }
 0x134   : > { %v1549_v44 = vadd.f32 %v1548_v43, %v1547_v38  ;;  %v1660_v45 = vpop.f32.mrb[29].mxu1  ;;  %v1550_v46 = vpop.f32.mrb[30].mxu0 }
 0x135   : > { %v1264_v47 = vadd.f32 %v1263_v39, %v1233_v41  ;;  %v1661_v48 = vadd.f32 %v1660_v45, %v1659_v42  ;;  %v1662_v49 = vpop.f32.mrb[30].mxu1  ;;  %v1551_v50 = vpop.f32.mrb[31].mxu0 }
 0x136   : > { %v1552_v51 = vadd.f32 %v1551_v50, %v1550_v46  ;;  %v1663_v52 = vpop.f32.mrb[31].mxu1 }
 0x137   : > { %v1081_v53 = vadd.f32 %v1661_v48, %v1549_v44  ;;  %v1664_v54 = vadd.f32 %v1663_v52, %v1662_v49 }
 0x139   : > { %1165 = vst [vmem:[%s2060_s10 + $0x70] sm:$0xff] %v1081_v53  ;;  %v1196_v55 = vadd.f32 %v1195_v40, %v1081_v53  ;;  %v1234_v56 = vmul.f32 %v1081_v53, %v1081_v53  ;;  %v1084_v57 = vadd.f32 %v1664_v54, %v1552_v51 }
 0x13a   : > { %v1553_v58 = vpop.f32.mrb[32].mxu0 }
 0x13b   : > { %v1265_v59 = vadd.f32 %v1264_v47, %v1234_v56  ;;  %1166 = vst [vmem:[%s2060_s10 + $0x78] sm:$0xff] %v1084_v57  ;;  %v1197_v60 = vadd.f32 %v1196_v55, %v1084_v57  ;;  %v1235_v61 = vmul.f32 %v1084_v57, %v1084_v57  ;;  %v1665_v62 = vpop.f32.mrb[32].mxu1  ;;  %v1554_v63 = vpop.f32.mrb[33].mxu0 }
 0x13c   : > { %v1555_v0 = vadd.f32 %v1554_v63, %v1553_v58  ;;  %v1666_v1 = vpop.f32.mrb[33].mxu1  ;;  %v1556_v2 = vpop.f32.mrb[34].mxu0 }
 0x13d   : > { %v1266_v3 = vadd.f32 %v1265_v59, %v1235_v61  ;;  %v1667_v4 = vadd.f32 %v1666_v1, %v1665_v62  ;;  %v1668_v5 = vpop.f32.mrb[34].mxu1  ;;  %v1557_v6 = vpop.f32.mrb[35].mxu0 }
 0x13e   : > { %v1558_v7 = vadd.f32 %v1557_v6, %v1556_v2  ;;  %v1669_v8 = vpop.f32.mrb[35].mxu1 }
 0x13f   : > { %v1089_v9 = vadd.f32 %v1667_v4, %v1555_v0  ;;  %v1670_v10 = vadd.f32 %v1669_v8, %v1668_v5 }
 0x141   : > { %1167 = vst [vmem:[%s2060_s10 + $0x80] sm:$0xff] %v1089_v9  ;;  %v1198_v11 = vadd.f32 %v1197_v60, %v1089_v9  ;;  %v1236_v12 = vmul.f32 %v1089_v9, %v1089_v9  ;;  %v1092_v13 = vadd.f32 %v1670_v10, %v1558_v7 }
 0x142   : > { %v1559_v14 = vpop.f32.mrb[36].mxu0 }
 0x143   : > { %v1267_v15 = vadd.f32 %v1266_v3, %v1236_v12  ;;  %1168 = vst [vmem:[%s2060_s10 + $0x88] sm:$0xff] %v1092_v13  ;;  %v1199_v16 = vadd.f32 %v1198_v11, %v1092_v13  ;;  %v1237_v17 = vmul.f32 %v1092_v13, %v1092_v13  ;;  %v1671_v18 = vpop.f32.mrb[36].mxu1  ;;  %v1560_v19 = vpop.f32.mrb[37].mxu0 }
 0x144   : > { %v1561_v20 = vadd.f32 %v1560_v19, %v1559_v14  ;;  %v1672_v21 = vpop.f32.mrb[37].mxu1  ;;  %v1562_v22 = vpop.f32.mrb[38].mxu0 }
 0x145   : > { %v1268_v23 = vadd.f32 %v1267_v15, %v1237_v17  ;;  %v1673_v24 = vadd.f32 %v1672_v21, %v1671_v18  ;;  %v1674_v25 = vpop.f32.mrb[38].mxu1  ;;  %v1563_v26 = vpop.f32.mrb[39].mxu0 }
 0x146   : > { %v1564_v27 = vadd.f32 %v1563_v26, %v1562_v22  ;;  %v1675_v28 = vpop.f32.mrb[39].mxu1 }
 0x147   : > { %v1097_v29 = vadd.f32 %v1673_v24, %v1561_v20  ;;  %v1676_v30 = vadd.f32 %v1675_v28, %v1674_v25 }
 0x149   : > { %1169 = vst [vmem:[%s2060_s10 + $0x90] sm:$0xff] %v1097_v29  ;;  %v1200_v31 = vadd.f32 %v1199_v16, %v1097_v29  ;;  %v1238_v32 = vmul.f32 %v1097_v29, %v1097_v29  ;;  %v1100_v33 = vadd.f32 %v1676_v30, %v1564_v27 }
 0x14a   : > { %v1565_v34 = vpop.f32.mrb[40].mxu0 }
 0x14b   : > { %v1269_v35 = vadd.f32 %v1268_v23, %v1238_v32  ;;  %1170 = vst [vmem:[%s2060_s10 + $0x98] sm:$0xff] %v1100_v33  ;;  %v1201_v36 = vadd.f32 %v1200_v31, %v1100_v33  ;;  %v1239_v37 = vmul.f32 %v1100_v33, %v1100_v33  ;;  %v1677_v38 = vpop.f32.mrb[40].mxu1  ;;  %v1566_v39 = vpop.f32.mrb[41].mxu0 }
 0x14c   : > { %v1567_v40 = vadd.f32 %v1566_v39, %v1565_v34  ;;  %v1678_v41 = vpop.f32.mrb[41].mxu1  ;;  %v1568_v42 = vpop.f32.mrb[42].mxu0 }
 0x14d   : > { %v1270_v43 = vadd.f32 %v1269_v35, %v1239_v37  ;;  %v1679_v44 = vadd.f32 %v1678_v41, %v1677_v38  ;;  %v1680_v45 = vpop.f32.mrb[42].mxu1  ;;  %v1569_v46 = vpop.f32.mrb[43].mxu0 }
 0x14e   : > { %v1570_v47 = vadd.f32 %v1569_v46, %v1568_v42  ;;  %v1681_v48 = vpop.f32.mrb[43].mxu1 }
 0x14f   : > { %v1105_v49 = vadd.f32 %v1679_v44, %v1567_v40  ;;  %v1682_v50 = vadd.f32 %v1681_v48, %v1680_v45 }
 0x151   : > { %1171 = vst [vmem:[%s2060_s10 + $0xa0] sm:$0xff] %v1105_v49  ;;  %v1202_v51 = vadd.f32 %v1201_v36, %v1105_v49  ;;  %v1240_v52 = vmul.f32 %v1105_v49, %v1105_v49  ;;  %v1108_v53 = vadd.f32 %v1682_v50, %v1570_v47 }
 0x152   : > { %v1571_v54 = vpop.f32.mrb[44].mxu0 }
 0x153   : > { %v1271_v55 = vadd.f32 %v1270_v43, %v1240_v52  ;;  %1172 = vst [vmem:[%s2060_s10 + $0xa8] sm:$0xff] %v1108_v53  ;;  %v1203_v56 = vadd.f32 %v1202_v51, %v1108_v53  ;;  %v1241_v57 = vmul.f32 %v1108_v53, %v1108_v53  ;;  %v1683_v58 = vpop.f32.mrb[44].mxu1  ;;  %v1572_v59 = vpop.f32.mrb[45].mxu0 }
 0x154   : > { %v1573_v60 = vadd.f32 %v1572_v59, %v1571_v54  ;;  %v1684_v61 = vpop.f32.mrb[45].mxu1  ;;  %v1574_v62 = vpop.f32.mrb[46].mxu0 }
 0x155   : > { %v1272_v63 = vadd.f32 %v1271_v55, %v1241_v57  ;;  %v1685_v0 = vadd.f32 %v1684_v61, %v1683_v58  ;;  %v1686_v1 = vpop.f32.mrb[46].mxu1  ;;  %v1575_v2 = vpop.f32.mrb[47].mxu0 }
 0x156   : > { %v1576_v3 = vadd.f32 %v1575_v2, %v1574_v62  ;;  %v1687_v4 = vpop.f32.mrb[47].mxu1 }
 0x157   : > { %v1113_v5 = vadd.f32 %v1685_v0, %v1573_v60  ;;  %v1688_v6 = vadd.f32 %v1687_v4, %v1686_v1 }
 0x159   : > { %1173 = vst [vmem:[%s2060_s10 + $0xb0] sm:$0xff] %v1113_v5  ;;  %v1204_v7 = vadd.f32 %v1203_v56, %v1113_v5  ;;  %v1242_v8 = vmul.f32 %v1113_v5, %v1113_v5  ;;  %v1116_v9 = vadd.f32 %v1688_v6, %v1576_v3 }
 0x15a   : > { %v1577_v10 = vpop.f32.mrb[48].mxu0 }
 0x15b   : > { %v1273_v11 = vadd.f32 %v1272_v63, %v1242_v8  ;;  %1174 = vst [vmem:[%s2060_s10 + $0xb8] sm:$0xff] %v1116_v9  ;;  %v1205_v12 = vadd.f32 %v1204_v7, %v1116_v9  ;;  %v1243_v13 = vmul.f32 %v1116_v9, %v1116_v9  ;;  %v1689_v14 = vpop.f32.mrb[48].mxu1  ;;  %v1578_v15 = vpop.f32.mrb[49].mxu0 }
 0x15c   : > { %v1579_v16 = vadd.f32 %v1578_v15, %v1577_v10  ;;  %v1690_v17 = vpop.f32.mrb[49].mxu1  ;;  %v1580_v18 = vpop.f32.mrb[50].mxu0 }
 0x15d   : > { %v1274_v19 = vadd.f32 %v1273_v11, %v1243_v13  ;;  %v1691_v20 = vadd.f32 %v1690_v17, %v1689_v14  ;;  %v1692_v21 = vpop.f32.mrb[50].mxu1  ;;  %v1581_v22 = vpop.f32.mrb[51].mxu0 }
 0x15e   : > { %v1582_v23 = vadd.f32 %v1581_v22, %v1580_v18  ;;  %v1693_v24 = vpop.f32.mrb[51].mxu1 }
 0x15f   : > { %v1121_v25 = vadd.f32 %v1691_v20, %v1579_v16  ;;  %v1694_v26 = vadd.f32 %v1693_v24, %v1692_v21 }
 0x161   : > { %1175 = vst [vmem:[%s2060_s10 + $0xc0] sm:$0xff] %v1121_v25  ;;  %v1206_v27 = vadd.f32 %v1205_v12, %v1121_v25  ;;  %v1244_v28 = vmul.f32 %v1121_v25, %v1121_v25  ;;  %v1124_v29 = vadd.f32 %v1694_v26, %v1582_v23 }
 0x162   : > { %v1583_v30 = vpop.f32.mrb[52].mxu0 }
 0x163   : > { %v1275_v31 = vadd.f32 %v1274_v19, %v1244_v28  ;;  %1176 = vst [vmem:[%s2060_s10 + $0xc8] sm:$0xff] %v1124_v29  ;;  %v1207_v32 = vadd.f32 %v1206_v27, %v1124_v29  ;;  %v1245_v33 = vmul.f32 %v1124_v29, %v1124_v29  ;;  %v1695_v34 = vpop.f32.mrb[52].mxu1  ;;  %v1584_v35 = vpop.f32.mrb[53].mxu0 }
 0x164   : > { %v1585_v36 = vadd.f32 %v1584_v35, %v1583_v30  ;;  %v1696_v37 = vpop.f32.mrb[53].mxu1  ;;  %v1586_v38 = vpop.f32.mrb[54].mxu0 }
 0x165   : > { %v1276_v39 = vadd.f32 %v1275_v31, %v1245_v33  ;;  %v1697_v40 = vadd.f32 %v1696_v37, %v1695_v34  ;;  %v1698_v41 = vpop.f32.mrb[54].mxu1  ;;  %v1587_v42 = vpop.f32.mrb[55].mxu0 }
 0x166   : > { %v1588_v43 = vadd.f32 %v1587_v42, %v1586_v38  ;;  %v1699_v44 = vpop.f32.mrb[55].mxu1 }
 0x167   : > { %v1129_v45 = vadd.f32 %v1697_v40, %v1585_v36  ;;  %v1700_v46 = vadd.f32 %v1699_v44, %v1698_v41 }
 0x169   : > { %1177 = vst [vmem:[%s2060_s10 + $0xd0] sm:$0xff] %v1129_v45  ;;  %v1208_v47 = vadd.f32 %v1207_v32, %v1129_v45  ;;  %v1246_v48 = vmul.f32 %v1129_v45, %v1129_v45  ;;  %v1132_v49 = vadd.f32 %v1700_v46, %v1588_v43 }
 0x16a   : > { %v1589_v50 = vpop.f32.mrb[56].mxu0 }
 0x16b   : > { %v1277_v51 = vadd.f32 %v1276_v39, %v1246_v48  ;;  %1178 = vst [vmem:[%s2060_s10 + $0xd8] sm:$0xff] %v1132_v49  ;;  %v1209_v52 = vadd.f32 %v1208_v47, %v1132_v49  ;;  %v1247_v53 = vmul.f32 %v1132_v49, %v1132_v49  ;;  %v1701_v54 = vpop.f32.mrb[56].mxu1  ;;  %v1590_v55 = vpop.f32.mrb[57].mxu0 }
 0x16c   : > { %v1591_v56 = vadd.f32 %v1590_v55, %v1589_v50  ;;  %v1702_v57 = vpop.f32.mrb[57].mxu1  ;;  %v1592_v58 = vpop.f32.mrb[58].mxu0 }
 0x16d   : > { %v1278_v59 = vadd.f32 %v1277_v51, %v1247_v53  ;;  %v1703_v60 = vadd.f32 %v1702_v57, %v1701_v54  ;;  %v1704_v61 = vpop.f32.mrb[58].mxu1  ;;  %v1593_v62 = vpop.f32.mrb[59].mxu0 }
 0x16e   : > { %v1594_v63 = vadd.f32 %v1593_v62, %v1592_v58  ;;  %v1705_v0 = vpop.f32.mrb[59].mxu1 }
 0x16f   : > { %v1137_v1 = vadd.f32 %v1703_v60, %v1591_v56  ;;  %v1706_v2 = vadd.f32 %v1705_v0, %v1704_v61 }
 0x171   : > { %1179 = vst [vmem:[%s2060_s10 + $0xe0] sm:$0xff] %v1137_v1  ;;  %v1210_v3 = vadd.f32 %v1209_v52, %v1137_v1  ;;  %v1248_v4 = vmul.f32 %v1137_v1, %v1137_v1  ;;  %v1140_v5 = vadd.f32 %v1706_v2, %v1594_v63 }
 0x172   : > { %v1595_v6 = vpop.f32.mrb[60].mxu0 }
 0x173   : > { %v1279_v7 = vadd.f32 %v1278_v59, %v1248_v4  ;;  %1180 = vst [vmem:[%s2060_s10 + $0xe8] sm:$0xff] %v1140_v5  ;;  %v1211_v8 = vadd.f32 %v1210_v3, %v1140_v5  ;;  %v1249_v9 = vmul.f32 %v1140_v5, %v1140_v5  ;;  %v1707_v10 = vpop.f32.mrb[60].mxu1  ;;  %v1596_v11 = vpop.f32.mrb[61].mxu0 }
 0x174   : > { %v1597_v12 = vadd.f32 %v1596_v11, %v1595_v6  ;;  %v1708_v13 = vpop.f32.mrb[61].mxu1  ;;  %v1598_v14 = vpop.f32.mrb[62].mxu0 }
 0x175   : > { %v1280_v15 = vadd.f32 %v1279_v7, %v1249_v9  ;;  %v1709_v16 = vadd.f32 %v1708_v13, %v1707_v10  ;;  %v1710_v17 = vpop.f32.mrb[62].mxu1  ;;  %v1599_v18 = vpop.f32.mrb[63].mxu0 }
 0x176   : > { %v1600_v19 = vadd.f32 %v1599_v18, %v1598_v14  ;;  %v1711_v20 = vpop.f32.mrb[63].mxu1 }
 0x177   : > { %v1145_v21 = vadd.f32 %v1709_v16, %v1597_v12  ;;  %v1712_v22 = vadd.f32 %v1711_v20, %v1710_v17 }
 0x179   : > { %1181 = vst [vmem:[%s2060_s10 + $0xf0] sm:$0xff] %v1145_v21  ;;  %v1212_v23 = vadd.f32 %v1211_v8, %v1145_v21  ;;  %v1250_v24 = vmul.f32 %v1145_v21, %v1145_v21  ;;  %v1148_v25 = vadd.f32 %v1712_v22, %v1600_v19 }
 0x17b   : > { %v1281_v26 = vadd.f32 %v1280_v15, %v1250_v24  ;;  %1182 = vst [vmem:[%s2060_s10 + $0xf8] sm:$0xff] %v1148_v25  ;;  %v1213_v27 = vadd.f32 %v1212_v23, %v1148_v25  ;;  %v1251_v28 = vmul.f32 %v1148_v25, %v1148_v25 }
 0x17d   : > { %v1214_v29 = vrot.slane %v1213_v27, 4  ;;  %v1282_v30 = vadd.f32 %v1281_v26, %v1251_v28 }
 0x17f   : > { %v1215_v31 = vadd.f32 %v1214_v29, %v1213_v27  ;;  %v1283_v32 = vrot.slane %v1282_v30, 4 }
 0x181   : > { %v1216_v33 = vrot.slane %v1215_v31, 2  ;;  %v1284_v34 = vadd.f32 %v1283_v32, %v1282_v30 }
 0x183   : > { %v1217_v35 = vadd.f32 %v1216_v33, %v1215_v31  ;;  %v1285_v36 = vrot.slane %v1284_v34, 2 }
 0x185   : > { %v1218_v37 = vrot.slane %v1217_v35, 1  ;;  %v1286_v38 = vadd.f32 %v1285_v36, %v1284_v34 }
 0x187   : > { %v1287_v39 = vrot.slane %v1286_v38, 1  ;;  %v1219_v40 = vadd.f32 %v1218_v37, %v1217_v35 }
 0x189   : > { %v1288_v41 = vadd.f32 %v1287_v39, %v1286_v38 }
 0x18b   : > { %v1290_v42 = vsel %vm1289_vm0, %v1219_v40, %v1288_v41 }
 0x18c   : > { %1291 = vst [vmem:[%s187_s15] sm:$0x3] %v1290_v42 }
 0x18d PF: > { %s14_s12 = sadd.s32 1, %s1855_s12  }
 0x18e   : > { %p11_p5 = scmp.ge.s32.totalorder %s14_s12, 4  }
 0x190   :  { %13 = sbr.rel (!%p11_p5) target bundleno = 1 (0x1), region = 70 }

// kernel: encoder_forward.7
= control target key start
LH: loop header
LB: loop body
LE: loop exit
PB: predicated region body
PF: predicated region fallthrough
CT: control target
= control target key end

     0   :  { %s2711_s1 = inlined_call_operand.vmem [shape: bf16[1024,128], index: 1, kind: input, shape index: {}]   ;;  %s2712_s0 = inlined_call_operand.vmem [shape: bf16[128,1024], index: 0, kind: input, shape index: {}]   ;;  %s2713_s2 = inlined_call_operand.vmem [shape: f32[1,128], index: 2, kind: input, shape index: {}]   ;;  %s2714_s3 = inlined_call_operand.vmem [shape: f32[1,128], index: 3, kind: input, shape index: {}]   ;;  %s2715_s4 = inlined_call_operand.vmem [shape: bf16[128,128], index: 4, kind: output, shape index: {}]  }
   0x1   :  { %v2022_v0 = vld [vmem:[%s2711_s1 + $0x40] sm:$0xff]   ;;  %v2026_v4 = vld [vmem:[%s2711_s1 + $0x48] sm:$0xff]   ;;  %v2030_v8 = vld [vmem:[%s2711_s1 + $0x50] sm:$0xff]  }
   0x2   :  { %v2023_v1 = vld [vmem:[%s2711_s1 + $0xc0] sm:$0xff]   ;;  %1766 = vmatprep.subr.bf16.mxu0 %v2022_v0  ;;  %v2027_v5 = vld [vmem:[%s2711_s1 + $0xc8] sm:$0xff]   ;;  %v2031_v9 = vld [vmem:[%s2711_s1 + $0xd0] sm:$0xff]  }
   0x3   :  { %v2024_v2 = vld [vmem:[%s2711_s1] sm:$0xff]   ;;  %1830 = vmatprep.subr.bf16.mxu1 %v2023_v1  ;;  %v2028_v6 = vld [vmem:[%s2711_s1 + $0x8] sm:$0xff]   ;;  %v2032_v10 = vld [vmem:[%s2711_s1 + $0x10] sm:$0xff]  }
   0x4   :  { %v2025_v3 = vld [vmem:[%s2711_s1 + $0x80] sm:$0xff]   ;;  %1767 = vmatpush3.bf16.msra.mxu0 %v2024_v2  ;;  %v2029_v7 = vld [vmem:[%s2711_s1 + $0x88] sm:$0xff]   ;;  %v2033_v11 = vld [vmem:[%s2711_s1 + $0x90] sm:$0xff]  }
   0x5   :  { %1831 = vmatpush3.bf16.msra.mxu1 %v2025_v3  ;;  %1768 = vmatprep.subr.bf16.mxu0 %v2026_v4  ;;  %v2034_v12 = vld [vmem:[%s2711_s1 + $0x58] sm:$0xff]   ;;  %v2038_v16 = vld [vmem:[%s2711_s1 + $0x60] sm:$0xff]   ;;  %v2042_v20 = vld [vmem:[%s2711_s1 + $0x68] sm:$0xff]  }
   0x6   :  { %1832 = vmatprep.subr.bf16.mxu1 %v2027_v5  ;;  %v2035_v13 = vld [vmem:[%s2711_s1 + $0xd8] sm:$0xff]   ;;  %v2039_v17 = vld [vmem:[%s2711_s1 + $0xe0] sm:$0xff]   ;;  %v2043_v21 = vld [vmem:[%s2711_s1 + $0xe8] sm:$0xff]  }
   0x7   :  { %v2036_v14 = vld [vmem:[%s2711_s1 + $0x18] sm:$0xff]   ;;  %v2040_v18 = vld [vmem:[%s2711_s1 + $0x20] sm:$0xff]   ;;  %v2044_v22 = vld [vmem:[%s2711_s1 + $0x28] sm:$0xff]  }
   0x8   :  { %1769 = vmatpush3.bf16.msra.mxu0 %v2028_v6  ;;  %v2037_v15 = vld [vmem:[%s2711_s1 + $0x98] sm:$0xff]   ;;  %v2041_v19 = vld [vmem:[%s2711_s1 + $0xa0] sm:$0xff]   ;;  %v2045_v23 = vld [vmem:[%s2711_s1 + $0xa8] sm:$0xff]  }
   0x9   :  { %1833 = vmatpush3.bf16.msra.mxu1 %v2029_v7  ;;  %1770 = vmatprep.subr.bf16.mxu0 %v2030_v8  ;;  %v2046_v24 = vld [vmem:[%s2711_s1 + $0x70] sm:$0xff]   ;;  %v2050_v28 = vld [vmem:[%s2711_s1 + $0x78] sm:$0xff]   ;;  %v18_v32 = vld [vmem:[%s2712_s0] sm:$0xff] }
   0xa   :  { %1834 = vmatprep.subr.bf16.mxu1 %v2031_v9  ;;  %v2047_v25 = vld [vmem:[%s2711_s1 + $0xf0] sm:$0xff]   ;;  %v2051_v29 = vld [vmem:[%s2711_s1 + $0xf8] sm:$0xff]   ;;  %v22_v33 = vld [vmem:[%s2712_s0 + $0x20] sm:$0xff] }
   0xb   :  { %v2048_v26 = vld [vmem:[%s2711_s1 + $0x30] sm:$0xff]   ;;  %v2052_v30 = vld [vmem:[%s2711_s1 + $0x38] sm:$0xff]   ;;  %v19_v34 = vld [vmem:[%s2712_s0 + $0x8] sm:$0xff]  ;;  %v1558_v35 = vcombine.low %v18_v32, %v22_v33  ;;  %v1559_v36 = vcombine.high %v18_v32, %v22_v33 }
   0xc   :  { %1771 = vmatpush3.bf16.msra.mxu0 %v2032_v10  ;;  %v2049_v27 = vld [vmem:[%s2711_s1 + $0xb0] sm:$0xff]   ;;  %v2053_v31 = vld [vmem:[%s2711_s1 + $0xb8] sm:$0xff]   ;;  %v23_v37 = vld [vmem:[%s2712_s0 + $0x28] sm:$0xff] }
   0xd   :  { %1835 = vmatpush3.bf16.msra.mxu1 %v2033_v11  ;;  %1772 = vmatprep.subr.bf16.mxu0 %v2034_v12  ;;  %v1560_v38 = vcombine.low %v19_v34, %v23_v37  ;;  %v1561_v39 = vcombine.high %v19_v34, %v23_v37  ;;  %v2054_v40 = vld [vmem:[%s2711_s1 + $0x140] sm:$0xff]   ;;  %v27_v47 = vld [vmem:[%s2712_s0 + $0x48] sm:$0xff]  ;;  %v2062_v62 = vld [vmem:[%s2711_s1 + $0x150] sm:$0xff]  }
   0xe   :  { %1836 = vmatprep.subr.bf16.mxu1 %v2035_v13  ;;  %946 = vmatprep.mubr.bf16.mxu0 %v1559_v36  ;;  %v2055_v41 = vld [vmem:[%s2711_s1 + $0x100] sm:$0xff]   ;;  %v31_v48 = vld [vmem:[%s2712_s0 + $0x68] sm:$0xff]  ;;  %v2063_v63 = vld [vmem:[%s2711_s1 + $0x110] sm:$0xff]  }
   0xf   :  { %1043 = vmatprep.mubr.bf16.mxu1 %v1561_v39  ;;  %v2056_v42 = vld [vmem:[%s2711_s1 + $0x1c0] sm:$0xff]   ;;  %v1569_v49 = vcombine.high %v27_v47, %v31_v48  ;;  %v2058_v50 = vld [vmem:[%s2711_s1 + $0x148] sm:$0xff]   ;;  %v1568_v53 = vcombine.low %v27_v47, %v31_v48  ;;  %v2064_v0 = vld [vmem:[%s2711_s1 + $0x1d0] sm:$0xff]  }
  0x10   :  { %1773 = vmatpush3.bf16.msra.mxu0 %v2036_v14  ;;  %v2057_v43 = vld [vmem:[%s2711_s1 + $0x180] sm:$0xff]   ;;  %v2059_v52 = vld [vmem:[%s2711_s1 + $0x108] sm:$0xff]   ;;  %v2065_v1 = vld [vmem:[%s2711_s1 + $0x190] sm:$0xff]  }
  0x11   :  { %1837 = vmatpush3.bf16.msra.mxu1 %v2037_v15  ;;  %1774 = vmatprep.subr.bf16.mxu0 %v2038_v16  ;;  %v26_v44 = vld [vmem:[%s2712_s0 + $0x40] sm:$0xff]  ;;  %v2060_v54 = vld [vmem:[%s2711_s1 + $0x1c8] sm:$0xff]   ;;  %v2066_v10 = vld [vmem:[%s2711_s1 + $0x158] sm:$0xff]  }
  0x12   :  { %1838 = vmatprep.subr.bf16.mxu1 %v2039_v17  ;;  %v30_v45 = vld [vmem:[%s2712_s0 + $0x60] sm:$0xff]  ;;  %v2061_v55 = vld [vmem:[%s2711_s1 + $0x188] sm:$0xff]   ;;  %v2067_v11 = vld [vmem:[%s2711_s1 + $0x118] sm:$0xff]  }
  0x13   :  { %v1567_v46 = vcombine.high %v26_v44, %v30_v45  ;;  %v1566_v51 = vcombine.low %v26_v44, %v30_v45  ;;  %v34_v56 = vld [vmem:[%s2712_s0 + $0x80] sm:$0xff]  ;;  %v35_v58 = vld [vmem:[%s2712_s0 + $0x88] sm:$0xff]  ;;  %v2068_v12 = vld [vmem:[%s2711_s1 + $0x1d8] sm:$0xff]  }
  0x14   :  { %1775 = vmatpush3.bf16.msra.mxu0 %v2040_v18  ;;  %v38_v57 = vld [vmem:[%s2712_s0 + $0xa0] sm:$0xff]  ;;  %v39_v59 = vld [vmem:[%s2712_s0 + $0xa8] sm:$0xff]  ;;  %v2069_v13 = vld [vmem:[%s2711_s1 + $0x198] sm:$0xff]  }
  0x15   :  { %1839 = vmatpush3.bf16.msra.mxu1 %v2041_v19  ;;  %1776 = vmatprep.subr.bf16.mxu0 %v2042_v20  ;;  %v1575_v60 = vcombine.high %v34_v56, %v38_v57  ;;  %v1577_v61 = vcombine.high %v35_v58, %v39_v59  ;;  %v1574_v2 = vcombine.low %v34_v56, %v38_v57  ;;  %v42_v3 = vld [vmem:[%s2712_s0 + $0xc0] sm:$0xff]  ;;  %v43_v5 = vld [vmem:[%s2712_s0 + $0xc8] sm:$0xff]  ;;  %v2079_v39 = vld [vmem:[%s2711_s1 + $0x130] sm:$0xff]  }
  0x16   :  { %1840 = vmatprep.subr.bf16.mxu1 %v2043_v21  ;;  %v46_v4 = vld [vmem:[%s2712_s0 + $0xe0] sm:$0xff]  ;;  %v1576_v6 = vcombine.low %v35_v58, %v39_v59  ;;  %v47_v8 = vld [vmem:[%s2712_s0 + $0xe8] sm:$0xff]  ;;  %v2083_v48 = vld [vmem:[%s2711_s1 + $0x138] sm:$0xff]  }
  0x17   :  { %v1583_v7 = vcombine.high %v42_v3, %v46_v4  ;;  %v1585_v9 = vcombine.high %v43_v5, %v47_v8  ;;  %v50_v14 = vld [vmem:[%s2712_s0 + $0x100] sm:$0xff]  ;;  %v51_v16 = vld [vmem:[%s2712_s0 + $0x108] sm:$0xff]  ;;  %v1582_v19 = vcombine.low %v42_v3, %v46_v4  ;;  %v1584_v21 = vcombine.low %v43_v5, %v47_v8  ;;  %v29_v8 = vld [vmem:[%s2712_s0 + $0x58] sm:$0xff] }
  0x18   :  { %1777 = vmatpush3.bf16.msra.mxu0 %v2044_v22  ;;  %v54_v15 = vld [vmem:[%s2712_s0 + $0x120] sm:$0xff]  ;;  %v55_v17 = vld [vmem:[%s2712_s0 + $0x128] sm:$0xff] }
  0x19   :  { %1841 = vmatpush3.bf16.msra.mxu1 %v2045_v23  ;;  %1778 = vmatprep.subr.bf16.mxu0 %v2046_v24  ;;  %v2070_v18 = vld [vmem:[%s2711_s1 + $0x160] sm:$0xff]   ;;  %v1591_v22 = vcombine.high %v50_v14, %v54_v15  ;;  %v1593_v24 = vcombine.high %v51_v16, %v55_v17  ;;  %v2076_v32 = vld [vmem:[%s2711_s1 + $0x1e8] sm:$0xff]   ;;  %v1590_v34 = vcombine.low %v50_v14, %v54_v15  ;;  %v36_v14 = vld [vmem:[%s2712_s0 + $0x90] sm:$0xff] }
  0x1a   :  { %1842 = vmatprep.subr.bf16.mxu1 %v2047_v25  ;;  %v2071_v20 = vld [vmem:[%s2711_s1 + $0x120] sm:$0xff]   ;;  %v2077_v33 = vld [vmem:[%s2711_s1 + $0x1a8] sm:$0xff]   ;;  %v40_v15 = vld [vmem:[%s2712_s0 + $0xb0] sm:$0xff] }
  0x1b   :  { %v2072_v23 = vld [vmem:[%s2711_s1 + $0x1e0] sm:$0xff]   ;;  %v67_v44 = vld [vmem:[%s2712_s0 + $0x188] sm:$0xff] }
  0x1c   :  { %1779 = vmatpush3.bf16.msra.mxu0 %v2048_v26  ;;  %v2073_v25 = vld [vmem:[%s2711_s1 + $0x1a0] sm:$0xff]   ;;  %v71_v45 = vld [vmem:[%s2712_s0 + $0x1a8] sm:$0xff] }
  0x1d   :  { %1843 = vmatpush3.bf16.msra.mxu1 %v2049_v27  ;;  %1780 = vmatprep.subr.bf16.mxu0 %v2050_v28  ;;  %v58_v26 = vld [vmem:[%s2712_s0 + $0x140] sm:$0xff]  ;;  %v2074_v28 = vld [vmem:[%s2711_s1 + $0x168] sm:$0xff]   ;;  %v1608_v59 = vcombine.low %v67_v44, %v71_v45 }
  0x1e   :  { %1844 = vmatprep.subr.bf16.mxu1 %v2051_v29  ;;  %v62_v27 = vld [vmem:[%s2712_s0 + $0x160] sm:$0xff]  ;;  %v59_v29 = vld [vmem:[%s2712_s0 + $0x148] sm:$0xff] }
  0x1f   :  { %v1599_v36 = vcombine.high %v58_v26, %v62_v27  ;;  %v1598_v47 = vcombine.low %v58_v26, %v62_v27  ;;  %v75_v56 = vld [vmem:[%s2712_s0 + $0x1c8] sm:$0xff]  ;;  %v1578_v26 = vcombine.low %v36_v14, %v40_v15 }
  0x20   :  { %1781 = vmatpush3.bf16.msra.mxu0 %v2052_v30  ;;  %v63_v30 = vld [vmem:[%s2712_s0 + $0x168] sm:$0xff] }
  0x21   :  { %1845 = vmatpush3.bf16.msra.mxu1 %v2053_v31  ;;  %1894 = vmatprep.subr.bf16.mxu0 %v2054_v40  ;;  %v2075_v31 = vld [vmem:[%s2711_s1 + $0x128] sm:$0xff]   ;;  %v1601_v37 = vcombine.high %v59_v29, %v63_v30  ;;  %v2080_v40 = vld [vmem:[%s2711_s1 + $0x1f0] sm:$0xff]  }
  0x22   :  { %1958 = vmatprep.subr.bf16.mxu1 %v2056_v42  ;;  %v70_v42 = vld [vmem:[%s2712_s0 + $0x1a0] sm:$0xff]  ;;  %v79_v57 = vld [vmem:[%s2712_s0 + $0x1e8] sm:$0xff] }
  0x23   :  { %947 = vmatmul.mubr.bf16.vlgmr.msra.gmra.mrb[0].mxu0 %v1558_v35  ;;  %v1592_v35 = vcombine.low %v51_v16, %v55_v17  ;;  %v1616_v3 = vcombine.low %v75_v56, %v79_v57  ;;  %v37_v16 = vld [vmem:[%s2712_s0 + $0x98] sm:$0xff] }
  0x24   :  { %1044 = vmatmul.mubr.bf16.vlgmr.msra.gmra.mrb[0].mxu1 %v1560_v38  ;;  %1895 = vmatpush3.bf16.msra.mxu0 %v2055_v41  ;;  %v2078_v38 = vld [vmem:[%s2711_s1 + $0x170] sm:$0xff]   ;;  %v66_v41 = vld [vmem:[%s2712_s0 + $0x180] sm:$0xff]  ;;  %v41_v17 = vld [vmem:[%s2712_s0 + $0xb8] sm:$0xff] }
  0x25   :  { %1959 = vmatpush3.bf16.msra.mxu1 %v2057_v43  ;;  %954 = vmatprep.mubr.bf16.mxu0 %v1567_v46  ;;  %v2081_v43 = vld [vmem:[%s2711_s1 + $0x1b0] sm:$0xff]   ;;  %v2082_v46 = vld [vmem:[%s2711_s1 + $0x178] sm:$0xff]   ;;  %v1606_v58 = vcombine.low %v66_v41, %v70_v42  ;;  %v1580_v27 = vcombine.low %v37_v16, %v41_v17 }
  0x26   :  { %1051 = vmatprep.mubr.bf16.mxu1 %v1569_v49  ;;  %1896 = vmatprep.subr.bf16.mxu0 %v2058_v50  ;;  %v1600_v49 = vcombine.low %v59_v29, %v63_v30  ;;  %v1607_v50 = vcombine.high %v66_v41, %v70_v42  ;;  %v52_v30 = vld [vmem:[%s2712_s0 + $0x110] sm:$0xff]  ;;  %v65_v41 = vld [vmem:[%s2712_s0 + $0x178] sm:$0xff] }
  0x27   :  { %1960 = vmatprep.subr.bf16.mxu1 %v2060_v54  ;;  %v74_v54 = vld [vmem:[%s2712_s0 + $0x1c0] sm:$0xff] }
  0x28   :  { %1897 = vmatpush3.bf16.msra.mxu0 %v2059_v52  ;;  %v1609_v52 = vcombine.high %v67_v44, %v71_v45 }
  0x29   :  { %1961 = vmatpush3.bf16.msra.mxu1 %v2061_v55  ;;  %1898 = vmatprep.subr.bf16.mxu0 %v2062_v62  ;;  %v78_v55 = vld [vmem:[%s2712_s0 + $0x1e0] sm:$0xff]  ;;  %v20_v62 = vld [vmem:[%s2712_s0 + $0x10] sm:$0xff] }
  0x2a   :  { %1962 = vmatprep.subr.bf16.mxu1 %v2064_v0  ;;  %v21_v0 = vld [vmem:[%s2712_s0 + $0x18] sm:$0xff] }
  0x2b   :  { %955 = vmatmul.mubr.bf16.gmra.mrb[4].mxu0 %v1566_v51  ;;  %v2084_v51 = vld [vmem:[%s2711_s1 + $0x1f8] sm:$0xff]  }
  0x2c   :  { %1052 = vmatmul.mubr.bf16.gmra.mrb[4].mxu1 %v1568_v53  ;;  %962 = vmatprep.mubr.bf16.mxu0 %v1575_v60  ;;  %v2085_v53 = vld [vmem:[%s2711_s1 + $0x1b8] sm:$0xff]   ;;  %v1615_v60 = vcombine.high %v74_v54, %v78_v55 }
  0x2d   :  { %1059 = vmatprep.mubr.bf16.mxu1 %v1577_v61  ;;  %1899 = vmatpush3.bf16.msra.mxu0 %v2063_v63  ;;  %v1617_v61 = vcombine.high %v75_v56, %v79_v57  ;;  %v24_v63 = vld [vmem:[%s2712_s0 + $0x30] sm:$0xff]  ;;  %v77_v56 = vld [vmem:[%s2712_s0 + $0x1d8] sm:$0xff] }
  0x2e   :  { %1963 = vmatpush3.bf16.msra.mxu1 %v2065_v1  ;;  %1900 = vmatprep.subr.bf16.mxu0 %v2066_v10  ;;  %v25_v1 = vld [vmem:[%s2712_s0 + $0x38] sm:$0xff]  ;;  %v1563_v4 = vcombine.high %v20_v62, %v24_v63  ;;  %v1562_v10 = vcombine.low %v20_v62, %v24_v63 }
  0x2f   :  { %1964 = vmatprep.subr.bf16.mxu1 %v2068_v12  ;;  %v1565_v5 = vcombine.high %v21_v0, %v25_v1  ;;  %v81_v57 = vld [vmem:[%s2712_s0 + $0x1f8] sm:$0xff] }
  0x30   :  { %v1620_v63 = vcombine.low %v77_v56, %v81_v57 }
  0x31   :  { %1901 = vmatpush3.bf16.msra.mxu0 %v2067_v11  ;;  %v1564_v11 = vcombine.low %v21_v0, %v25_v1 }
  0x32   :  { %1965 = vmatpush3.bf16.msra.mxu1 %v2069_v13  ;;  %1902 = vmatprep.subr.bf16.mxu0 %v2070_v18 }
  0x33   :  { %963 = vmatmul.mubr.bf16.gmra.mrb[8].mxu0 %v1574_v2  ;;  %1966 = vmatprep.subr.bf16.mxu1 %v2072_v23  ;;  %v1614_v2 = vcombine.low %v74_v54, %v78_v55  ;;  %v48_v23 = vld [vmem:[%s2712_s0 + $0xf0] sm:$0xff] }
  0x34   :  { %1060 = vmatmul.mubr.bf16.gmra.mrb[8].mxu1 %v1576_v6  ;;  %970 = vmatprep.mubr.bf16.mxu0 %v1583_v7  ;;  %v28_v6 = vld [vmem:[%s2712_s0 + $0x50] sm:$0xff] }
  0x35   :  { %1067 = vmatprep.mubr.bf16.mxu1 %v1585_v9  ;;  %1903 = vmatpush3.bf16.msra.mxu0 %v2071_v20  ;;  %v32_v7 = vld [vmem:[%s2712_s0 + $0x70] sm:$0xff]  ;;  %v33_v9 = vld [vmem:[%s2712_s0 + $0x78] sm:$0xff]  ;;  %v1579_v20 = vcombine.high %v36_v14, %v40_v15 }
  0x36   :  { %1967 = vmatpush3.bf16.msra.mxu1 %v2073_v25  ;;  %1904 = vmatprep.subr.bf16.mxu0 %v2074_v28  ;;  %v1571_v12 = vcombine.high %v28_v6, %v32_v7  ;;  %v1573_v13 = vcombine.high %v29_v8, %v33_v9  ;;  %v1570_v18 = vcombine.low %v28_v6, %v32_v7  ;;  %v49_v25 = vld [vmem:[%s2712_s0 + $0xf8] sm:$0xff]  ;;  %v76_v54 = vld [vmem:[%s2712_s0 + $0x1d0] sm:$0xff] }
  0x37   :  { %1968 = vmatprep.subr.bf16.mxu1 %v2076_v32  ;;  %v53_v32 = vld [vmem:[%s2712_s0 + $0x118] sm:$0xff]  ;;  %v80_v55 = vld [vmem:[%s2712_s0 + $0x1f0] sm:$0xff] }
  0x38   :  { %v1618_v62 = vcombine.low %v76_v54, %v80_v55 }
  0x39   :  { %1905 = vmatpush3.bf16.msra.mxu0 %v2075_v31  ;;  %v56_v31 = vld [vmem:[%s2712_s0 + $0x130] sm:$0xff] }
  0x3a   :  { %1969 = vmatpush3.bf16.msra.mxu1 %v2077_v33  ;;  %1906 = vmatprep.subr.bf16.mxu0 %v2078_v38  ;;  %v57_v33 = vld [vmem:[%s2712_s0 + $0x138] sm:$0xff]  ;;  %v60_v38 = vld [vmem:[%s2712_s0 + $0x150] sm:$0xff]  ;;  %v1594_v42 = vcombine.low %v52_v30, %v56_v31 }
  0x3b   :  { %971 = vmatmul.mubr.bf16.gmra.mrb[12].mxu0 %v1582_v19  ;;  %1970 = vmatprep.subr.bf16.mxu1 %v2080_v40  ;;  %v1572_v19 = vcombine.low %v29_v8, %v33_v9  ;;  %v61_v40 = vld [vmem:[%s2712_s0 + $0x158] sm:$0xff] }
  0x3c   :  { %1068 = vmatmul.mubr.bf16.gmra.mrb[12].mxu1 %v1584_v21  ;;  %978 = vmatprep.mubr.bf16.mxu0 %v1591_v22  ;;  %v1581_v21 = vcombine.high %v37_v16, %v41_v17  ;;  %v44_v22 = vld [vmem:[%s2712_s0 + $0xd0] sm:$0xff]  ;;  %v1605_v45 = vcombine.high %v61_v40, %v65_v41 }
  0x3d   :  { %1075 = vmatprep.mubr.bf16.mxu1 %v1593_v24  ;;  %1907 = vmatpush3.bf16.msra.mxu0 %v2079_v39  ;;  %v45_v24 = vld [vmem:[%s2712_s0 + $0xd8] sm:$0xff]  ;;  %v1587_v28 = vcombine.high %v44_v22, %v48_v23  ;;  %v64_v39 = vld [vmem:[%s2712_s0 + $0x170] sm:$0xff] }
  0x3e   :  { %1971 = vmatpush3.bf16.msra.mxu1 %v2081_v43  ;;  %1908 = vmatprep.subr.bf16.mxu0 %v2082_v46  ;;  %v1589_v29 = vcombine.high %v45_v24, %v49_v25  ;;  %v1596_v43 = vcombine.low %v53_v32, %v57_v33  ;;  %v1603_v44 = vcombine.high %v60_v38, %v64_v39  ;;  %v68_v46 = vld [vmem:[%s2712_s0 + $0x190] sm:$0xff] }
  0x3f   :  { %1972 = vmatprep.subr.bf16.mxu1 %v2084_v51  ;;  %v1604_v51 = vcombine.low %v61_v40, %v65_v41 }
  0x41   :  { %1909 = vmatpush3.bf16.msra.mxu0 %v2083_v48  ;;  %v69_v48 = vld [vmem:[%s2712_s0 + $0x198] sm:$0xff] }
  0x42   :  { %1973 = vmatpush3.bf16.msra.mxu1 %v2085_v53 }
  0x43   :  { %979 = vmatmul.mubr.bf16.gmra.mrb[16].mxu0 %v1590_v34  ;;  %v1586_v34 = vcombine.low %v44_v22, %v48_v23 }
  0x44   :  { %1076 = vmatmul.mubr.bf16.gmra.mrb[16].mxu1 %v1592_v35  ;;  %986 = vmatprep.mubr.bf16.mxu0 %v1599_v36  ;;  %v1588_v35 = vcombine.low %v45_v24, %v49_v25  ;;  %v1595_v36 = vcombine.high %v52_v30, %v56_v31 }
  0x45   :  { %1083 = vmatprep.mubr.bf16.mxu1 %v1601_v37  ;;  %v1597_v37 = vcombine.high %v53_v32, %v57_v33 }
  0x4b   :  { %987 = vmatmul.mubr.bf16.gmra.mrb[20].mxu0 %v1598_v47  ;;  %v72_v47 = vld [vmem:[%s2712_s0 + $0x1b0] sm:$0xff] }
  0x4c   :  { %1084 = vmatmul.mubr.bf16.gmra.mrb[20].mxu1 %v1600_v49  ;;  %994 = vmatprep.mubr.bf16.mxu0 %v1607_v50  ;;  %v73_v49 = vld [vmem:[%s2712_s0 + $0x1b8] sm:$0xff]  ;;  %v1602_v50 = vcombine.low %v60_v38, %v64_v39 }
  0x4d   :  { %1091 = vmatprep.mubr.bf16.mxu1 %v1609_v52  ;;  %v1611_v52 = vcombine.high %v68_v46, %v72_v47  ;;  %v1613_v53 = vcombine.high %v69_v48, %v73_v49 }
  0x53   :  { %995 = vmatmul.mubr.bf16.gmra.mrb[24].mxu0 %v1606_v58  ;;  %v1610_v58 = vcombine.low %v68_v46, %v72_v47 }
  0x54   :  { %1092 = vmatmul.mubr.bf16.gmra.mrb[24].mxu1 %v1608_v59  ;;  %1002 = vmatprep.mubr.bf16.mxu0 %v1615_v60  ;;  %v1612_v59 = vcombine.low %v69_v48, %v73_v49  ;;  %v1619_v60 = vcombine.high %v76_v54, %v80_v55 }
  0x55   :  { %1099 = vmatprep.mubr.bf16.mxu1 %v1617_v61  ;;  %v1621_v61 = vcombine.high %v77_v56, %v81_v57 }
  0x5b   :  { %1003 = vmatmul.mubr.bf16.gmra.mrb[28].mxu0 %v1614_v2 }
  0x5c   :  { %1100 = vmatmul.mubr.bf16.gmra.mrb[28].mxu1 %v1616_v3  ;;  %1140 = vmatprep.mubr.bf16.mxu0 %v1563_v4 }
  0x5d   :  { %1237 = vmatprep.mubr.bf16.mxu1 %v1565_v5 }
  0x63   :  { %1141 = vmatmul.mubr.bf16.vlgmr.msra.gmra.mrb[32].mxu0 %v1562_v10 }
  0x64   :  { %1238 = vmatmul.mubr.bf16.vlgmr.msra.gmra.mrb[32].mxu1 %v1564_v11  ;;  %1148 = vmatprep.mubr.bf16.mxu0 %v1571_v12 }
  0x65   :  { %1245 = vmatprep.mubr.bf16.mxu1 %v1573_v13 }
  0x6b   :  { %1149 = vmatmul.mubr.bf16.gmra.mrb[36].mxu0 %v1570_v18 }
  0x6c   :  { %1246 = vmatmul.mubr.bf16.gmra.mrb[36].mxu1 %v1572_v19  ;;  %1156 = vmatprep.mubr.bf16.mxu0 %v1579_v20 }
  0x6d   :  { %1253 = vmatprep.mubr.bf16.mxu1 %v1581_v21 }
  0x73   :  { %1157 = vmatmul.mubr.bf16.gmra.mrb[40].mxu0 %v1578_v26 }
  0x74   :  { %1254 = vmatmul.mubr.bf16.gmra.mrb[40].mxu1 %v1580_v27  ;;  %1164 = vmatprep.mubr.bf16.mxu0 %v1587_v28 }
  0x75   :  { %1261 = vmatprep.mubr.bf16.mxu1 %v1589_v29 }
  0x7b   :  { %1165 = vmatmul.mubr.bf16.gmra.mrb[44].mxu0 %v1586_v34 }
  0x7c   :  { %1262 = vmatmul.mubr.bf16.gmra.mrb[44].mxu1 %v1588_v35  ;;  %1172 = vmatprep.mubr.bf16.mxu0 %v1595_v36 }
  0x7d   :  { %1269 = vmatprep.mubr.bf16.mxu1 %v1597_v37 }
  0x83   :  { %1173 = vmatmul.mubr.bf16.gmra.mrb[48].mxu0 %v1594_v42 }
  0x84   :  { %1270 = vmatmul.mubr.bf16.gmra.mrb[48].mxu1 %v1596_v43  ;;  %1180 = vmatprep.mubr.bf16.mxu0 %v1603_v44 }
  0x85   :  { %1277 = vmatprep.mubr.bf16.mxu1 %v1605_v45 }
  0x8b   :  { %1181 = vmatmul.mubr.bf16.gmra.mrb[52].mxu0 %v1602_v50 }
  0x8c   :  { %1278 = vmatmul.mubr.bf16.gmra.mrb[52].mxu1 %v1604_v51  ;;  %1188 = vmatprep.mubr.bf16.mxu0 %v1611_v52 }
  0x8d   :  { %1285 = vmatprep.mubr.bf16.mxu1 %v1613_v53 }
  0x93   :  { %1189 = vmatmul.mubr.bf16.gmra.mrb[56].mxu0 %v1610_v58 }
  0x94   :  { %1286 = vmatmul.mubr.bf16.gmra.mrb[56].mxu1 %v1612_v59  ;;  %1196 = vmatprep.mubr.bf16.mxu0 %v1619_v60 }
  0x95   :  { %1293 = vmatprep.mubr.bf16.mxu1 %v1621_v61 }
  0x9b   :  { %1197 = vmatmul.mubr.bf16.gmra.mrb[60].mxu0 %v1618_v62 }
  0x9c   :  { %1294 = vmatmul.mubr.bf16.gmra.mrb[60].mxu1 %v1620_v63 }
  0xf6   :  { %v1782_v0 = vpop.f32.mrb[0].mxu0 }
  0xf7   :  { %v1846_v1 = vpop.f32.mrb[0].mxu1  ;;  %v1783_v2 = vpop.f32.mrb[1].mxu0 }
  0xf8   :  { %v1784_v3 = vadd.f32 %v1783_v2, %v1782_v0  ;;  %v1847_v4 = vpop.f32.mrb[1].mxu1  ;;  %v1785_v5 = vpop.f32.mrb[2].mxu0 }
  0xf9   :  { %v1848_v6 = vadd.f32 %v1847_v4, %v1846_v1  ;;  %v1849_v7 = vpop.f32.mrb[2].mxu1  ;;  %v1786_v8 = vpop.f32.mrb[3].mxu0 }
  0xfa   :  { %v1787_v9 = vadd.f32 %v1786_v8, %v1785_v5  ;;  %v1850_v10 = vpop.f32.mrb[3].mxu1 }
  0xfb   :  { %v2497_v11 = vadd.f32 %v1848_v6, %v1784_v3  ;;  %v1851_v12 = vadd.f32 %v1850_v10, %v1849_v7 }
  0xfd   :  { %v2499_v13 = vadd.f32 %v1851_v12, %v1787_v9 }
  0xfe   :  { %v1788_v14 = vpop.f32.mrb[4].mxu0 }
  0xff   :  { %v1852_v15 = vpop.f32.mrb[4].mxu1  ;;  %v1789_v16 = vpop.f32.mrb[5].mxu0 }
 0x100   :  { %v1790_v17 = vadd.f32 %v1789_v16, %v1788_v14  ;;  %v1853_v18 = vpop.f32.mrb[5].mxu1  ;;  %v1791_v19 = vpop.f32.mrb[6].mxu0 }
 0x101   :  { %v1854_v20 = vadd.f32 %v1853_v18, %v1852_v15  ;;  %v1855_v21 = vpop.f32.mrb[6].mxu1  ;;  %v1792_v22 = vpop.f32.mrb[7].mxu0 }
 0x102   :  { %v1793_v23 = vadd.f32 %v1792_v22, %v1791_v19  ;;  %v1856_v24 = vpop.f32.mrb[7].mxu1 }
 0x103   :  { %v2501_v25 = vadd.f32 %v1854_v20, %v1790_v17  ;;  %v1857_v26 = vadd.f32 %v1856_v24, %v1855_v21 }
 0x105   :  { %v2503_v27 = vadd.f32 %v1857_v26, %v1793_v23 }
 0x106   :  { %v1794_v28 = vpop.f32.mrb[8].mxu0 }
 0x107   :  { %v1858_v29 = vpop.f32.mrb[8].mxu1  ;;  %v1795_v30 = vpop.f32.mrb[9].mxu0 }
 0x108   :  { %v1796_v31 = vadd.f32 %v1795_v30, %v1794_v28  ;;  %v1859_v32 = vpop.f32.mrb[9].mxu1  ;;  %v1797_v33 = vpop.f32.mrb[10].mxu0 }
 0x109   :  { %v1860_v34 = vadd.f32 %v1859_v32, %v1858_v29  ;;  %v1861_v35 = vpop.f32.mrb[10].mxu1  ;;  %v1798_v36 = vpop.f32.mrb[11].mxu0 }
 0x10a   :  { %v1799_v37 = vadd.f32 %v1798_v36, %v1797_v33  ;;  %v1862_v38 = vpop.f32.mrb[11].mxu1 }
 0x10b   :  { %v2505_v39 = vadd.f32 %v1860_v34, %v1796_v31  ;;  %v1863_v40 = vadd.f32 %v1862_v38, %v1861_v35 }
 0x10d   :  { %v2507_v41 = vadd.f32 %v1863_v40, %v1799_v37 }
 0x10e   :  { %v1800_v42 = vpop.f32.mrb[12].mxu0 }
 0x10f   :  { %v1864_v43 = vpop.f32.mrb[12].mxu1  ;;  %v1801_v44 = vpop.f32.mrb[13].mxu0 }
 0x110   :  { %v1802_v45 = vadd.f32 %v1801_v44, %v1800_v42  ;;  %v1865_v46 = vpop.f32.mrb[13].mxu1  ;;  %v1803_v47 = vpop.f32.mrb[14].mxu0 }
 0x111   :  { %v1866_v48 = vadd.f32 %v1865_v46, %v1864_v43  ;;  %v1867_v49 = vpop.f32.mrb[14].mxu1  ;;  %v1804_v50 = vpop.f32.mrb[15].mxu0 }
 0x112   :  { %v1805_v51 = vadd.f32 %v1804_v50, %v1803_v47  ;;  %v1868_v52 = vpop.f32.mrb[15].mxu1 }
 0x113   :  { %v2509_v53 = vadd.f32 %v1866_v48, %v1802_v45  ;;  %v1869_v54 = vadd.f32 %v1868_v52, %v1867_v49 }
 0x115   :  { %v2511_v55 = vadd.f32 %v1869_v54, %v1805_v51 }
 0x116   :  { %v1806_v56 = vpop.f32.mrb[16].mxu0 }
 0x117   :  { %v1870_v57 = vpop.f32.mrb[16].mxu1  ;;  %v1807_v58 = vpop.f32.mrb[17].mxu0 }
 0x118   :  { %v1808_v59 = vadd.f32 %v1807_v58, %v1806_v56  ;;  %v1871_v60 = vpop.f32.mrb[17].mxu1  ;;  %v1809_v61 = vpop.f32.mrb[18].mxu0 }
 0x119   :  { %v1872_v62 = vadd.f32 %v1871_v60, %v1870_v57  ;;  %v1873_v63 = vpop.f32.mrb[18].mxu1  ;;  %v1810_v0 = vpop.f32.mrb[19].mxu0 }
 0x11a   :  { %v1811_v1 = vadd.f32 %v1810_v0, %v1809_v61  ;;  %v1874_v2 = vpop.f32.mrb[19].mxu1 }
 0x11b   :  { %v2513_v3 = vadd.f32 %v1872_v62, %v1808_v59  ;;  %v1875_v4 = vadd.f32 %v1874_v2, %v1873_v63 }
 0x11d   :  { %v2515_v5 = vadd.f32 %v1875_v4, %v1811_v1 }
 0x11e   :  { %v1812_v6 = vpop.f32.mrb[20].mxu0 }
 0x11f   :  { %v1876_v7 = vpop.f32.mrb[20].mxu1  ;;  %v1813_v8 = vpop.f32.mrb[21].mxu0 }
 0x120   :  { %v1814_v9 = vadd.f32 %v1813_v8, %v1812_v6  ;;  %v1877_v10 = vpop.f32.mrb[21].mxu1  ;;  %v1815_v12 = vpop.f32.mrb[22].mxu0 }
 0x121   :  { %v1878_v14 = vadd.f32 %v1877_v10, %v1876_v7  ;;  %v1879_v15 = vpop.f32.mrb[22].mxu1  ;;  %v1816_v16 = vpop.f32.mrb[23].mxu0 }
 0x122   :  { %v1817_v17 = vadd.f32 %v1816_v16, %v1815_v12  ;;  %v1880_v18 = vpop.f32.mrb[23].mxu1 }
 0x123   :  { %v2517_v19 = vadd.f32 %v1878_v14, %v1814_v9  ;;  %v1881_v20 = vadd.f32 %v1880_v18, %v1879_v15 }
 0x125   :  { %v2519_v21 = vadd.f32 %v1881_v20, %v1817_v17 }
 0x126   :  { %v1818_v22 = vpop.f32.mrb[24].mxu0 }
 0x127   :  { %v1882_v23 = vpop.f32.mrb[24].mxu1  ;;  %v1819_v24 = vpop.f32.mrb[25].mxu0 }
 0x128   :  { %v1820_v26 = vadd.f32 %v1819_v24, %v1818_v22  ;;  %v1883_v28 = vpop.f32.mrb[25].mxu1  ;;  %v1821_v29 = vpop.f32.mrb[26].mxu0 }
 0x129   :  { %v1884_v30 = vadd.f32 %v1883_v28, %v1882_v23  ;;  %v1885_v31 = vpop.f32.mrb[26].mxu1  ;;  %v1822_v32 = vpop.f32.mrb[27].mxu0 }
 0x12a   :  { %v1823_v33 = vadd.f32 %v1822_v32, %v1821_v29  ;;  %v1886_v34 = vpop.f32.mrb[27].mxu1 }
 0x12b   :  { %v2521_v35 = vadd.f32 %v1884_v30, %v1820_v26  ;;  %v1887_v36 = vadd.f32 %v1886_v34, %v1885_v31 }
 0x12d   :  { %v2523_v37 = vadd.f32 %v1887_v36, %v1823_v33 }
 0x12e   :  { %v1824_v38 = vpop.f32.mrb[28].mxu0 }
 0x12f   :  { %v1888_v40 = vpop.f32.mrb[28].mxu1  ;;  %v1825_v42 = vpop.f32.mrb[29].mxu0 }
 0x130   :  { %v1826_v43 = vadd.f32 %v1825_v42, %v1824_v38  ;;  %v1889_v44 = vpop.f32.mrb[29].mxu1  ;;  %v1827_v45 = vpop.f32.mrb[30].mxu0 }
 0x131   :  { %v1890_v46 = vadd.f32 %v1889_v44, %v1888_v40  ;;  %v1891_v47 = vpop.f32.mrb[30].mxu1  ;;  %v1828_v48 = vpop.f32.mrb[31].mxu0 }
 0x132   :  { %v1829_v49 = vadd.f32 %v1828_v48, %v1827_v45  ;;  %v1892_v50 = vpop.f32.mrb[31].mxu1 }
 0x133   :  { %v2525_v51 = vadd.f32 %v1890_v46, %v1826_v43  ;;  %v1893_v52 = vadd.f32 %v1892_v50, %v1891_v47 }
 0x135   :  { %v2527_v54 = vadd.f32 %v1893_v52, %v1829_v49 }
 0x136   :  { %v1910_v56 = vpop.f32.mrb[32].mxu0 }
 0x137   :  { %v1974_v57 = vpop.f32.mrb[32].mxu1  ;;  %v1911_v58 = vpop.f32.mrb[33].mxu0 }
 0x138   :  { %v1912_v59 = vadd.f32 %v1911_v58, %v1910_v56  ;;  %v1975_v60 = vpop.f32.mrb[33].mxu1  ;;  %v1913_v61 = vpop.f32.mrb[34].mxu0 }
 0x139   :  { %v1976_v62 = vadd.f32 %v1975_v60, %v1974_v57  ;;  %v1977_v63 = vpop.f32.mrb[34].mxu1  ;;  %v1914_v0 = vpop.f32.mrb[35].mxu0 }
 0x13a   :  { %v1143_v1 = vadd.f32 %v1912_v59, %v2497_v11  ;;  %v1915_v2 = vadd.f32 %v1914_v0, %v1913_v61  ;;  %v1978_v4 = vpop.f32.mrb[35].mxu1 }
 0x13b   :  { %v1979_v6 = vadd.f32 %v1978_v4, %v1977_v63 }
 0x13c   :  { %v2530_v7 = vadd.f32 %v1976_v62, %v1143_v1  ;;  %v1146_v8 = vadd.f32 %v1915_v2, %v2499_v13 }
 0x13e   :  { %v2533_v9 = vadd.f32 %v1979_v6, %v1146_v8  ;;  %v1916_v10 = vpop.f32.mrb[36].mxu0 }
 0x13f   :  { %v1980_v12 = vpop.f32.mrb[36].mxu1  ;;  %v1917_v14 = vpop.f32.mrb[37].mxu0 }
 0x140   :  { %v1302_v15 = vadd.f32 %v2533_v9, %v2530_v7  ;;  %v1918_v16 = vadd.f32 %v1917_v14, %v1916_v10  ;;  %v1981_v17 = vpop.f32.mrb[37].mxu1  ;;  %v1919_v18 = vpop.f32.mrb[38].mxu0 }
 0x141   :  { %v1982_v20 = vadd.f32 %v1981_v17, %v1980_v12  ;;  %v1983_v11 = vpop.f32.mrb[38].mxu1  ;;  %v1920_v22 = vpop.f32.mrb[39].mxu0 }
 0x142   :  { %v1151_v23 = vadd.f32 %v1918_v16, %v2501_v25  ;;  %v1921_v24 = vadd.f32 %v1920_v22, %v1919_v18  ;;  %v1984_v26 = vpop.f32.mrb[39].mxu1 }
 0x143   :  { %v1985_v28 = vadd.f32 %v1984_v26, %v1983_v11 }
 0x144   :  { %v2538_v13 = vadd.f32 %v1982_v20, %v1151_v23  ;;  %v1154_v29 = vadd.f32 %v1921_v24, %v2503_v27 }
 0x146   :  { %v1303_v30 = vadd.f32 %v1302_v15, %v2538_v13  ;;  %v2542_v31 = vadd.f32 %v1985_v28, %v1154_v29  ;;  %v1922_v32 = vpop.f32.mrb[40].mxu0 }
 0x147   :  { %v1986_v33 = vpop.f32.mrb[40].mxu1  ;;  %v1923_v34 = vpop.f32.mrb[41].mxu0 }
 0x148   :  { %v1304_v36 = vadd.f32 %v1303_v30, %v2542_v31  ;;  %v1924_v38 = vadd.f32 %v1923_v34, %v1922_v32  ;;  %v1987_v40 = vpop.f32.mrb[41].mxu1  ;;  %v1925_v42 = vpop.f32.mrb[42].mxu0 }
 0x149   :  { %v1988_v25 = vadd.f32 %v1987_v40, %v1986_v33  ;;  %v1989_v43 = vpop.f32.mrb[42].mxu1  ;;  %v1926_v44 = vpop.f32.mrb[43].mxu0 }
 0x14a   :  { %v1159_v45 = vadd.f32 %v1924_v38, %v2505_v39  ;;  %v1927_v46 = vadd.f32 %v1926_v44, %v1925_v42  ;;  %v1990_v47 = vpop.f32.mrb[43].mxu1 }
 0x14b   :  { %v1991_v27 = vadd.f32 %v1990_v47, %v1989_v43 }
 0x14c   :  { %v2546_v48 = vadd.f32 %v1988_v25, %v1159_v45  ;;  %v1162_v49 = vadd.f32 %v1927_v46, %v2507_v41 }
 0x14e   :  { %v1305_v50 = vadd.f32 %v1304_v36, %v2546_v48  ;;  %v2550_v52 = vadd.f32 %v1991_v27, %v1162_v49  ;;  %v1928_v56 = vpop.f32.mrb[44].mxu0 }
 0x14f   :  { %v1992_v57 = vpop.f32.mrb[44].mxu1  ;;  %v1929_v58 = vpop.f32.mrb[45].mxu0 }
 0x150   :  { %v1306_v59 = vadd.f32 %v1305_v50, %v2550_v52  ;;  %v1930_v60 = vadd.f32 %v1929_v58, %v1928_v56  ;;  %v1993_v61 = vpop.f32.mrb[45].mxu1  ;;  %v1931_v62 = vpop.f32.mrb[46].mxu0 }
 0x151   :  { %v1994_v39 = vadd.f32 %v1993_v61, %v1992_v57  ;;  %v1995_v63 = vpop.f32.mrb[46].mxu1  ;;  %v1932_v0 = vpop.f32.mrb[47].mxu0 }
 0x152   :  { %v1167_v1 = vadd.f32 %v1930_v60, %v2509_v53  ;;  %v1933_v2 = vadd.f32 %v1932_v0, %v1931_v62  ;;  %v1996_v4 = vpop.f32.mrb[47].mxu1 }
 0x153   :  { %v1997_v41 = vadd.f32 %v1996_v4, %v1995_v63 }
 0x154   :  { %v2554_v6 = vadd.f32 %v1994_v39, %v1167_v1  ;;  %v1170_v8 = vadd.f32 %v1933_v2, %v2511_v55 }
 0x156   :  { %v1307_v10 = vadd.f32 %v1306_v59, %v2554_v6  ;;  %v2558_v12 = vadd.f32 %v1997_v41, %v1170_v8  ;;  %v1934_v14 = vpop.f32.mrb[48].mxu0 }
 0x157   :  { %v1998_v15 = vpop.f32.mrb[48].mxu1  ;;  %v1935_v16 = vpop.f32.mrb[49].mxu0 }
 0x158   :  { %v1308_v17 = vadd.f32 %v1307_v10, %v2558_v12  ;;  %v1936_v18 = vadd.f32 %v1935_v16, %v1934_v14  ;;  %v1999_v20 = vpop.f32.mrb[49].mxu1  ;;  %v1937_v11 = vpop.f32.mrb[50].mxu0 }
 0x159   :  { %v2000_v53 = vadd.f32 %v1999_v20, %v1998_v15  ;;  %v2001_v22 = vpop.f32.mrb[50].mxu1  ;;  %v1938_v23 = vpop.f32.mrb[51].mxu0 }
 0x15a   :  { %v1175_v24 = vadd.f32 %v1936_v18, %v2513_v3  ;;  %v1939_v26 = vadd.f32 %v1938_v23, %v1937_v11  ;;  %v2002_v28 = vpop.f32.mrb[51].mxu1 }
 0x15b   :  { %v2003_v55 = vadd.f32 %v2002_v28, %v2001_v22 }
 0x15c   :  { %v2562_v29 = vadd.f32 %v2000_v53, %v1175_v24  ;;  %v1178_v30 = vadd.f32 %v1939_v26, %v2515_v5 }
 0x15e   :  { %v1309_v32 = vadd.f32 %v1308_v17, %v2562_v29  ;;  %v2566_v33 = vadd.f32 %v2003_v55, %v1178_v30  ;;  %v1940_v34 = vpop.f32.mrb[52].mxu0 }
 0x15f   :  { %v2004_v36 = vpop.f32.mrb[52].mxu1  ;;  %v1941_v38 = vpop.f32.mrb[53].mxu0 }
 0x160   :  { %v1310_v40 = vadd.f32 %v1309_v32, %v2566_v33  ;;  %v1942_v42 = vadd.f32 %v1941_v38, %v1940_v34  ;;  %v2005_v25 = vpop.f32.mrb[53].mxu1  ;;  %v1943_v43 = vpop.f32.mrb[54].mxu0 }
 0x161   :  { %v2006_v3 = vadd.f32 %v2005_v25, %v2004_v36  ;;  %v2007_v44 = vpop.f32.mrb[54].mxu1  ;;  %v1944_v45 = vpop.f32.mrb[55].mxu0 }
 0x162   :  { %v1183_v46 = vadd.f32 %v1942_v42, %v2517_v19  ;;  %v1945_v47 = vadd.f32 %v1944_v45, %v1943_v43  ;;  %v2008_v27 = vpop.f32.mrb[55].mxu1 }
 0x163   :  { %v2009_v5 = vadd.f32 %v2008_v27, %v2007_v44 }
 0x164   :  { %v1280_v49 = vadd.f32 %v2006_v3, %v1183_v46  ;;  %v1186_v50 = vadd.f32 %v1945_v47, %v2519_v21 }
 0x166   :  { %v1311_v56 = vadd.f32 %v1310_v40, %v1280_v49  ;;  %v1283_v57 = vadd.f32 %v2009_v5, %v1186_v50  ;;  %v1946_v58 = vpop.f32.mrb[56].mxu0 }
 0x167   :  { %v2010_v59 = vpop.f32.mrb[56].mxu1  ;;  %v1947_v60 = vpop.f32.mrb[57].mxu0 }
 0x168   :  { %v1312_v61 = vadd.f32 %v1311_v56, %v1283_v57  ;;  %v1948_v62 = vadd.f32 %v1947_v60, %v1946_v58  ;;  %v2011_v39 = vpop.f32.mrb[57].mxu1  ;;  %v1949_v63 = vpop.f32.mrb[58].mxu0 }
 0x169   :  { %v2012_v0 = vadd.f32 %v2011_v39, %v2010_v59  ;;  %v2013_v1 = vpop.f32.mrb[58].mxu1  ;;  %v1950_v2 = vpop.f32.mrb[59].mxu0 }
 0x16a   :  { %v1191_v19 = vadd.f32 %v1948_v62, %v2521_v35  ;;  %v1951_v4 = vadd.f32 %v1950_v2, %v1949_v63  ;;  %v2014_v41 = vpop.f32.mrb[59].mxu1 }
 0x16b   :  { %v2015_v8 = vadd.f32 %v2014_v41, %v2013_v1 }
 0x16c   :  { %v1288_v10 = vadd.f32 %v2012_v0, %v1191_v19  ;;  %v1194_v21 = vadd.f32 %v1951_v4, %v2523_v37 }
 0x16e   :  { %v1313_v14 = vadd.f32 %v1312_v61, %v1288_v10  ;;  %v1291_v15 = vadd.f32 %v2015_v8, %v1194_v21  ;;  %v1952_v16 = vpop.f32.mrb[60].mxu0 }
 0x16f   :  { %v2016_v17 = vpop.f32.mrb[60].mxu1  ;;  %v1953_v18 = vpop.f32.mrb[61].mxu0 }
 0x170   :  { %v1314_v20 = vadd.f32 %v1313_v14, %v1291_v15  ;;  %v1954_v11 = vadd.f32 %v1953_v18, %v1952_v16  ;;  %v2017_v53 = vpop.f32.mrb[61].mxu1  ;;  %v1955_v22 = vpop.f32.mrb[62].mxu0 }
 0x171   :  { %v2018_v23 = vadd.f32 %v2017_v53, %v2016_v17  ;;  %v2019_v24 = vpop.f32.mrb[62].mxu1  ;;  %v1956_v26 = vpop.f32.mrb[63].mxu0 }
 0x172   :  { %v1199_v35 = vadd.f32 %v1954_v11, %v2525_v51  ;;  %v1957_v28 = vadd.f32 %v1956_v26, %v1955_v22  ;;  %v2020_v55 = vpop.f32.mrb[63].mxu1 }
 0x173   :  { %v2021_v30 = vadd.f32 %v2020_v55, %v2019_v24 }
 0x174   :  { %v1296_v32 = vadd.f32 %v2018_v23, %v1199_v35  ;;  %v1202_v37 = vadd.f32 %v1957_v28, %v2527_v54 }
 0x176   :  { %v1315_v34 = vadd.f32 %v1314_v20, %v1296_v32  ;;  %v1299_v36 = vadd.f32 %v2021_v30, %v1202_v37 }
 0x178   :  { %v1316_v38 = vadd.f32 %v1315_v34, %v1299_v36 }
 0x17a   :  { %v1317_v40 = vrot.slane %v1316_v38, 4 }
 0x17c   :  { %v1318_v42 = vadd.f32 %v1317_v40, %v1316_v38  ;;  %v1381_v40 = vld [vmem:[%s2713_s2] sm:$0x1] }
 0x17e   :  { %v1319_v25 = vrot.slane %v1318_v42, 2 }
 0x180   :  { %v1320_v43 = vadd.f32 %v1319_v25, %v1318_v42 }
 0x182   :  { %v1321_v3 = vrot.slane %v1320_v43, 1 }
 0x184   :  { %v1322_v44 = vadd.f32 %v1321_v3, %v1320_v43 }
 0x186   :  { %v1324_v45 = vmul.f32 0.0078125, %v1322_v44 }
 0x188   :  { %v2576_v46 = vsub.f32 %v2530_v7, %v1324_v45  ;;  %v2579_v51 = vsub.f32 %v2533_v9, %v1324_v45  ;;  %v2582_v47 = vsub.f32 %v2538_v13, %v1324_v45  ;;  %v2585_v54 = vsub.f32 %v2542_v31, %v1324_v45 }
 0x189   :  { %v2588_v27 = vsub.f32 %v2546_v48, %v1324_v45  ;;  %v2591_v5 = vsub.f32 %v2550_v52, %v1324_v45  ;;  %v2594_v50 = vsub.f32 %v2554_v6, %v1324_v45  ;;  %v2597_v7 = vsub.f32 %v2558_v12, %v1324_v45 }
 0x18a   :  { %v2600_v9 = vsub.f32 %v2562_v29, %v1324_v45  ;;  %v2603_v13 = vsub.f32 %v2566_v33, %v1324_v45  ;;  %v2605_v31 = vsub.f32 %v1280_v49, %v1324_v45  ;;  %v2607_v56 = vsub.f32 %v1283_v57, %v1324_v45 }
 0x18b   :  { %v2609_v48 = vsub.f32 %v1288_v10, %v1324_v45  ;;  %v2611_v52 = vsub.f32 %v1291_v15, %v1324_v45  ;;  %v2613_v58 = vsub.f32 %v1296_v32, %v1324_v45  ;;  %v2615_v6 = vsub.f32 %v1299_v36, %v1324_v45 }
 0x18c   :  { %v1341_v12 = vmul.f32 %v2576_v46, %v2576_v46  ;;  %v1342_v29 = vmul.f32 %v2579_v51, %v2579_v51  ;;  %v1343_v33 = vmul.f32 %v2582_v47, %v2582_v47  ;;  %v1344_v57 = vmul.f32 %v2585_v54, %v2585_v54 }
 0x18d   :  { %v1345_v60 = vmul.f32 %v2588_v27, %v2588_v27  ;;  %v1346_v62 = vmul.f32 %v2591_v5, %v2591_v5  ;;  %v1347_v63 = vmul.f32 %v2594_v50, %v2594_v50  ;;  %v1348_v1 = vmul.f32 %v2597_v7, %v2597_v7 }
 0x18e   :  { %v1357_v49 = vadd.f32 %v1342_v29, %v1341_v12  ;;  %v1349_v19 = vmul.f32 %v2600_v9, %v2600_v9  ;;  %v1350_v41 = vmul.f32 %v2603_v13, %v2603_v13  ;;  %v1351_v10 = vmul.f32 %v2605_v31, %v2605_v31 }
 0x18f   :  { %v1352_v14 = vmul.f32 %v2607_v56, %v2607_v56  ;;  %v1353_v16 = vmul.f32 %v2609_v48, %v2609_v48  ;;  %v1354_v18 = vmul.f32 %v2611_v52, %v2611_v52  ;;  %v1355_v11 = vmul.f32 %v2613_v58, %v2613_v58 }
 0x190   :  { %v1358_v59 = vadd.f32 %v1357_v49, %v1343_v33  ;;  %v1356_v22 = vmul.f32 %v2615_v6, %v2615_v6  ;;  %v1383_v36 = vlaneseq }
 0x192   :  { %v1359_v61 = vadd.f32 %v1358_v59, %v1344_v57  ;;  %v1384_v38 = vshrl.u32 %v1383_v36, 7 }
 0x194   :  { %v1360_v39 = vadd.f32 %v1359_v61, %v1345_v60  ;;  %v1385_v42 = vsub.s32 0, %v1384_v38  ;;  %v1686_v60 = vld [vmem:[%s2714_s3] ss:$0 sm:$0xff] }
 0x196   :  { %v1361_v0 = vadd.f32 %v1360_v39, %v1346_v62 }
 0x198   :  { %v1362_v2 = vadd.f32 %v1361_v0, %v1347_v63 }
 0x19a   :  { %v1363_v4 = vadd.f32 %v1362_v2, %v1348_v1 }
 0x19c   :  { %v1364_v8 = vadd.f32 %v1363_v4, %v1349_v19 }
 0x19e   :  { %v1365_v21 = vadd.f32 %v1364_v8, %v1350_v41 }
 0x1a0   :  { %v1366_v15 = vadd.f32 %v1365_v21, %v1351_v10 }
 0x1a2   :  { %v1367_v17 = vadd.f32 %v1366_v15, %v1352_v14 }
 0x1a4   :  { %v1368_v20 = vadd.f32 %v1367_v17, %v1353_v16 }
 0x1a6   :  { %v1369_v53 = vadd.f32 %v1368_v20, %v1354_v18 }
 0x1a8   :  { %v1370_v23 = vadd.f32 %v1369_v53, %v1355_v11 }
 0x1aa   :  { %v1371_v24 = vadd.f32 %v1370_v23, %v1356_v22 }
 0x1ac   :  { %v1372_v26 = vrot.slane %v1371_v24, 4 }
 0x1ae   :  { %v1373_v35 = vadd.f32 %v1372_v26, %v1371_v24 }
 0x1b0   :  { %v1374_v28 = vrot.slane %v1373_v35, 2 }
 0x1b2   :  { %v1375_v55 = vadd.f32 %v1374_v28, %v1373_v35 }
 0x1b4   :  { %v1376_v30 = vrot.slane %v1375_v55, 1 }
 0x1b6   :  { %v1377_v32 = vadd.f32 %v1376_v30, %v1375_v55 }
 0x1b8   :  { %v1378_v37 = vmul.f32 0.0078125, %v1377_v32 }
 0x1ba   :  { %v1379_v34 = vadd.f32 1e-05, %v1378_v37 }
 0x1bc   :  { %2086 = vrsqrt.f32 %v1379_v34 }
 0x1c6   :  { %v2087_v25 = vpop.eup %2086 }
 0x1c7   :  { %v1382_v43 = vmul.f32 %v2087_v25, %v1381_v40 }
 0x1c9   :  { %v1386_v3 = vrot.slane %v1382_v43, %v1385_v42 }
 0x1cb   :  { %v1387_v44 = vmul.f32 %v1386_v3, %v2576_v46  ;;  %v1388_v45 = vmul.f32 %v1386_v3, %v2579_v51  ;;  %v1389_v12 = vmul.f32 %v1386_v3, %v2582_v47  ;;  %v1390_v29 = vmul.f32 %v1386_v3, %v2585_v54 }
 0x1cc   :  { %v1391_v33 = vmul.f32 %v1386_v3, %v2588_v27  ;;  %v1392_v49 = vmul.f32 %v1386_v3, %v2591_v5  ;;  %v1393_v57 = vmul.f32 %v1386_v3, %v2594_v50  ;;  %v1394_v59 = vmul.f32 %v1386_v3, %v2597_v7 }
 0x1cd   :  { %v1395_v46 = vmul.f32 %v1386_v3, %v2600_v9  ;;  %v1396_v51 = vmul.f32 %v1386_v3, %v2603_v13  ;;  %v1397_v47 = vmul.f32 %v1386_v3, %v2605_v31  ;;  %v1398_v54 = vmul.f32 %v1386_v3, %v2607_v56 }
 0x1ce   :  { %v1399_v27 = vmul.f32 %v1386_v3, %v2609_v48  ;;  %v1400_v5 = vmul.f32 %v1386_v3, %v2611_v52  ;;  %v1401_v50 = vmul.f32 %v1386_v3, %v2613_v58  ;;  %v1402_v7 = vmul.f32 %v1386_v3, %v2615_v6 }
 0x1cf   :  { %v1410_v61 = vadd.f32 %v1686_v60, %v1387_v44  ;;  %v1411_v62 = vadd.f32 %v1686_v60, %v1388_v45  ;;  %v1412_v39 = vadd.f32 %v1686_v60, %v1389_v12  ;;  %v1413_v63 = vadd.f32 %v1686_v60, %v1390_v29 }
 0x1d0   :  { %v1414_v0 = vadd.f32 %v1686_v60, %v1391_v33  ;;  %v1415_v9 = vadd.f32 %v1686_v60, %v1392_v49  ;;  %v1416_v1 = vadd.f32 %v1686_v60, %v1393_v57  ;;  %v1417_v13 = vadd.f32 %v1686_v60, %v1394_v59 }
 0x1d1   :  { %v1418_v2 = vadd.f32 %v1686_v60, %v1395_v46  ;;  %v1419_v31 = vadd.f32 %v1686_v60, %v1396_v51  ;;  %v1420_v19 = vadd.f32 %v1686_v60, %v1397_v47  ;;  %v1421_v56 = vadd.f32 %v1686_v60, %v1398_v54 }
 0x1d2   :  { %v1422_v4 = vadd.f32 %v1686_v60, %v1399_v27  ;;  %v1423_v48 = vadd.f32 %v1686_v60, %v1400_v5  ;;  %v1424_v41 = vadd.f32 %v1686_v60, %v1401_v50  ;;  %v1425_v52 = vadd.f32 %v1686_v60, %v1402_v7 }
 0x1d3   :  { %vm1426_vm0 = vcmp.gt.f32.partialorder %v1410_v61, 0.0  ;;  %vm1427_vm1 = vcmp.gt.f32.partialorder %v1411_v62, 0.0  ;;  %vm1428_vm2 = vcmp.gt.f32.partialorder %v1412_v39, 0.0  ;;  %vm1429_vm3 = vcmp.gt.f32.partialorder %v1413_v63, 0.0 }
 0x1d4   :  { %vm1430_vm4 = vcmp.gt.f32.partialorder %v1414_v0, 0.0  ;;  %vm1431_vm5 = vcmp.gt.f32.partialorder %v1415_v9, 0.0  ;;  %vm1432_vm6 = vcmp.gt.f32.partialorder %v1416_v1, 0.0  ;;  %vm1433_vm7 = vcmp.gt.f32.partialorder %v1417_v13, 0.0 }
 0x1d5   :  { %vm1434_vm8 = vcmp.gt.f32.partialorder %v1418_v2, 0.0  ;;  %vm1435_vm9 = vcmp.gt.f32.partialorder %v1419_v31, 0.0  ;;  %vm1436_vm10 = vcmp.gt.f32.partialorder %v1420_v19, 0.0  ;;  %vm1437_vm11 = vcmp.gt.f32.partialorder %v1421_v56, 0.0 }
 0x1d6   :  { %vm1438_vm12 = vcmp.gt.f32.partialorder %v1422_v4, 0.0  ;;  %vm1439_vm13 = vcmp.gt.f32.partialorder %v1423_v48, 0.0  ;;  %vm1440_vm14 = vcmp.gt.f32.partialorder %v1424_v41, 0.0  ;;  %vm1441_vm15 = vcmp.gt.f32.partialorder %v1425_v52, 0.0 }
 0x1d7   :  { %v1442_v58 = vmul.f32 0.2, %v1410_v61  ;;  %v1443_v6 = vmul.f32 0.2, %v1411_v62  ;;  %v1444_v8 = vmul.f32 0.2, %v1412_v39 }
 0x1d8   :  { %v1445_v10 = vmul.f32 0.2, %v1413_v63  ;;  %v1446_v21 = vmul.f32 0.2, %v1414_v0  ;;  %v1447_v14 = vmul.f32 0.2, %v1415_v9 }
 0x1d9   :  { %v1448_v15 = vmul.f32 0.2, %v1416_v1  ;;  %v1449_v16 = vmul.f32 0.2, %v1417_v13  ;;  %v1450_v17 = vmul.f32 0.2, %v1418_v2  ;;  %v1458_v18 = vsel %vm1426_vm0, %v1410_v61, %v1442_v58 }
 0x1da   :  { %v1451_v20 = vmul.f32 0.2, %v1419_v31  ;;  %v1452_v11 = vmul.f32 0.2, %v1420_v19  ;;  %v1453_v53 = vmul.f32 0.2, %v1421_v56  ;;  %v1459_v22 = vsel %vm1427_vm1, %v1411_v62, %v1443_v6 }
 0x1db   :  { %v1454_v23 = vmul.f32 0.2, %v1422_v4  ;;  %v1455_v24 = vmul.f32 0.2, %v1423_v48  ;;  %v1456_v26 = vmul.f32 0.2, %v1424_v41  ;;  %v1460_v35 = vsel %vm1428_vm2, %v1412_v39, %v1444_v8 }
 0x1dc   :  { %v1457_v28 = vmul.f32 0.2, %v1425_v52  ;;  %v1461_v55 = vsel %vm1429_vm3, %v1413_v63, %v1445_v10  ;;  %v1462_v30 = vsel %vm1430_vm4, %v1414_v0, %v1446_v21  ;;  %v1463_v32 = vsel %vm1431_vm5, %v1415_v9, %v1447_v14 }
 0x1dd   :  { %v1464_v37 = vsel %vm1432_vm6, %v1416_v1, %v1448_v15  ;;  %v1465_v34 = vsel %vm1433_vm7, %v1417_v13, %v1449_v16  ;;  %v1466_v36 = vsel %vm1434_vm8, %v1418_v2, %v1450_v17  ;;  %v1467_v38 = vsel %vm1435_vm9, %v1419_v31, %v1451_v20 }
 0x1de   :  { %v1468_v40 = vsel %vm1436_vm10, %v1420_v19, %v1452_v11  ;;  %v1469_v42 = vsel %vm1437_vm11, %v1421_v56, %v1453_v53  ;;  %v1470_v25 = vsel %vm1438_vm12, %v1422_v4, %v1454_v23  ;;  %v1471_v43 = vsel %vm1439_vm13, %v1423_v48, %v1455_v24 }
 0x1df   :  { %v1472_v3 = vsel %vm1440_vm14, %v1424_v41, %v1456_v26  ;;  %v1473_v44 = vsel %vm1441_vm15, %v1425_v52, %v1457_v28  ;;  %v1722_v45 = vpack.c.bf16 %v1459_v22, %v1458_v18  ;;  %v1727_v12 = vpack.c.bf16 %v1461_v55, %v1460_v35 }
 0x1e0   :  { %v1732_v29 = vpack.c.bf16 %v1463_v32, %v1462_v30  ;;  %v1737_v33 = vpack.c.bf16 %v1465_v34, %v1464_v37  ;;  %v1742_v49 = vpack.c.bf16 %v1467_v38, %v1466_v36  ;;  %v1747_v57 = vpack.c.bf16 %v1469_v42, %v1468_v40 }
 0x1e1   :  { %1723 = vst [vmem:[%s2715_s4] sm:$0xff] %v1722_v45   ;;  %1759 = vst [vmem:[%s2715_s4 + $0x8] sm:$0xff] %v1727_v12   ;;  %v1752_v59 = vpack.c.bf16 %v1471_v43, %v1470_v25  ;;  %v1757_v60 = vpack.c.bf16 %v1473_v44, %v1472_v3 }
 0x1e2   :  { %1760 = vst [vmem:[%s2715_s4 + $0x10] sm:$0xff] %v1732_v29   ;;  %1761 = vst [vmem:[%s2715_s4 + $0x18] sm:$0xff] %v1737_v33  }
 0x1e3   :  { %1762 = vst [vmem:[%s2715_s4 + $0x20] sm:$0xff] %v1742_v49   ;;  %1763 = vst [vmem:[%s2715_s4 + $0x28] sm:$0xff] %v1747_v57  }
 0x1e4   :  { %1764 = vst [vmem:[%s2715_s4 + $0x30] sm:$0xff] %v1752_v59   ;;  %1765 = vst [vmem:[%s2715_s4 + $0x38] sm:$0xff] %v1757_v60  }

// kernel: encoder_forward.8
= control target key start
LH: loop header
LB: loop body
LE: loop exit
PB: predicated region body
PF: predicated region fallthrough
CT: control target
= control target key end

     0   :  { %s4031_s1 = inlined_call_operand.vmem [shape: bf16[2048,256], index: 1, kind: input, shape index: {}]   ;;  %s4032_s0 = inlined_call_operand.vmem [shape: bf16[32,2048], index: 0, kind: input, shape index: {}]   ;;  %s4033_s2 = inlined_call_operand.vmem [shape: f32[1,256], index: 2, kind: input, shape index: {}]   ;;  %s4034_s3 = inlined_call_operand.vmem [shape: f32[1,256], index: 3, kind: input, shape index: {}]   ;;  %s4035_s4 = inlined_call_operand.vmem [shape: bf16[32,256], index: 4, kind: output, shape index: {}]  }
   0x1   :  { %v2688_v0 = vld [vmem:[%s4031_s1 + $0x4] ss:$8 sps:$4 sm:$0xff]   ;;  %v2692_v2 = vld [vmem:[%s4031_s1] ss:$8 sps:$4 sm:$0xff]   ;;  %v2694_v4 = vld [vmem:[%s4031_s1 + $0x14] ss:$8 sps:$4 sm:$0xff]  }
   0x2   :  { %v2690_v1 = vld [vmem:[%s4031_s1 + $0x404] ss:$8 sps:$4 sm:$0xff]   ;;  %1745 = vmatprep.subr.bf16.mxu1 %v2688_v0  ;;  %v2693_v3 = vld [vmem:[%s4031_s1 + $0x400] ss:$8 sps:$4 sm:$0xff]   ;;  %v2696_v5 = vld [vmem:[%s4031_s1 + $0x414] ss:$8 sps:$4 sm:$0xff]  }
   0x3   :  { %1957 = vmatprep.subr.bf16.mxu0 %v2690_v1  ;;  %1746 = vmatpush1.bf16.msra.mxu1 %v2692_v2  ;;  %v2698_v6 = vld [vmem:[%s4031_s1 + $0x10] ss:$8 sps:$4 sm:$0xff]   ;;  %v2700_v8 = vld [vmem:[%s4031_s1 + $0x24] ss:$8 sps:$4 sm:$0xff]   ;;  %v2704_v10 = vld [vmem:[%s4031_s1 + $0x20] ss:$8 sps:$4 sm:$0xff]  }
   0x4   :  { %1958 = vmatpush1.bf16.msra.mxu0 %v2693_v3  ;;  %1747 = vmatprep.subr.bf16.mxu1 %v2694_v4  ;;  %v2699_v7 = vld [vmem:[%s4031_s1 + $0x410] ss:$8 sps:$4 sm:$0xff]   ;;  %v2702_v9 = vld [vmem:[%s4031_s1 + $0x424] ss:$8 sps:$4 sm:$0xff]   ;;  %v2705_v11 = vld [vmem:[%s4031_s1 + $0x420] ss:$8 sps:$4 sm:$0xff]  }
   0x5   :  { %1959 = vmatprep.subr.bf16.mxu0 %v2696_v5  ;;  %v2706_v12 = vld [vmem:[%s4031_s1 + $0x34] ss:$8 sps:$4 sm:$0xff]   ;;  %v2710_v14 = vld [vmem:[%s4031_s1 + $0x30] ss:$8 sps:$4 sm:$0xff]   ;;  %v2712_v16 = vld [vmem:[%s4031_s1 + $0x44] ss:$8 sps:$4 sm:$0xff]  }
   0x6   :  { %v2708_v13 = vld [vmem:[%s4031_s1 + $0x434] ss:$8 sps:$4 sm:$0xff]   ;;  %v2711_v15 = vld [vmem:[%s4031_s1 + $0x430] ss:$8 sps:$4 sm:$0xff]   ;;  %v2714_v17 = vld [vmem:[%s4031_s1 + $0x444] ss:$8 sps:$4 sm:$0xff]  }
   0x7   :  { %1748 = vmatpush1.bf16.msra.mxu1 %v2698_v6  ;;  %v2716_v18 = vld [vmem:[%s4031_s1 + $0x40] ss:$8 sps:$4 sm:$0xff]   ;;  %v2718_v20 = vld [vmem:[%s4031_s1 + $0x54] ss:$8 sps:$4 sm:$0xff]   ;;  %v2722_v22 = vld [vmem:[%s4031_s1 + $0x50] ss:$8 sps:$4 sm:$0xff]  }
   0x8   :  { %1960 = vmatpush1.bf16.msra.mxu0 %v2699_v7  ;;  %1749 = vmatprep.subr.bf16.mxu1 %v2700_v8  ;;  %v2717_v19 = vld [vmem:[%s4031_s1 + $0x440] ss:$8 sps:$4 sm:$0xff]   ;;  %v2720_v21 = vld [vmem:[%s4031_s1 + $0x454] ss:$8 sps:$4 sm:$0xff]   ;;  %v2723_v23 = vld [vmem:[%s4031_s1 + $0x450] ss:$8 sps:$4 sm:$0xff]  }
   0x9   :  { %1961 = vmatprep.subr.bf16.mxu0 %v2702_v9  ;;  %v2724_v24 = vld [vmem:[%s4031_s1 + $0x64] ss:$8 sps:$4 sm:$0xff]   ;;  %v2728_v26 = vld [vmem:[%s4031_s1 + $0x60] ss:$8 sps:$4 sm:$0xff]   ;;  %v2730_v28 = vld [vmem:[%s4031_s1 + $0x74] ss:$8 sps:$4 sm:$0xff]  }
   0xa   :  { %v2726_v25 = vld [vmem:[%s4031_s1 + $0x464] ss:$8 sps:$4 sm:$0xff]   ;;  %v2729_v27 = vld [vmem:[%s4031_s1 + $0x460] ss:$8 sps:$4 sm:$0xff]   ;;  %v2732_v29 = vld [vmem:[%s4031_s1 + $0x474] ss:$8 sps:$4 sm:$0xff]  }
   0xb   :  { %1750 = vmatpush1.bf16.msra.mxu1 %v2704_v10  ;;  %v2734_v30 = vld [vmem:[%s4031_s1 + $0x70] ss:$8 sps:$4 sm:$0xff]   ;;  %v2736_v32 = vld [vmem:[%s4031_s1 + $0x84] ss:$8 sps:$4 sm:$0xff]   ;;  %v2740_v34 = vld [vmem:[%s4031_s1 + $0x80] ss:$8 sps:$4 sm:$0xff]  }
   0xc   :  { %1962 = vmatpush1.bf16.msra.mxu0 %v2705_v11  ;;  %1751 = vmatprep.subr.bf16.mxu1 %v2706_v12  ;;  %v2735_v31 = vld [vmem:[%s4031_s1 + $0x470] ss:$8 sps:$4 sm:$0xff]   ;;  %v2738_v33 = vld [vmem:[%s4031_s1 + $0x484] ss:$8 sps:$4 sm:$0xff]   ;;  %v2741_v35 = vld [vmem:[%s4031_s1 + $0x480] ss:$8 sps:$4 sm:$0xff]  }
   0xd   :  { %1963 = vmatprep.subr.bf16.mxu0 %v2708_v13  ;;  %v2742_v36 = vld [vmem:[%s4031_s1 + $0x94] ss:$8 sps:$4 sm:$0xff]   ;;  %v2746_v38 = vld [vmem:[%s4031_s1 + $0x90] ss:$8 sps:$4 sm:$0xff]   ;;  %v2748_v40 = vld [vmem:[%s4031_s1 + $0xa4] ss:$8 sps:$4 sm:$0xff]  }
   0xe   :  { %v2744_v37 = vld [vmem:[%s4031_s1 + $0x494] ss:$8 sps:$4 sm:$0xff]   ;;  %v2747_v39 = vld [vmem:[%s4031_s1 + $0x490] ss:$8 sps:$4 sm:$0xff]   ;;  %v2750_v41 = vld [vmem:[%s4031_s1 + $0x4a4] ss:$8 sps:$4 sm:$0xff]  }
   0xf   :  { %1752 = vmatpush1.bf16.msra.mxu1 %v2710_v14  ;;  %v2752_v42 = vld [vmem:[%s4031_s1 + $0xa0] ss:$8 sps:$4 sm:$0xff]   ;;  %v2754_v44 = vld [vmem:[%s4031_s1 + $0xb4] ss:$8 sps:$4 sm:$0xff]   ;;  %v2758_v46 = vld [vmem:[%s4031_s1 + $0xb0] ss:$8 sps:$4 sm:$0xff]  }
  0x10   :  { %1964 = vmatpush1.bf16.msra.mxu0 %v2711_v15  ;;  %1753 = vmatprep.subr.bf16.mxu1 %v2712_v16  ;;  %v2753_v43 = vld [vmem:[%s4031_s1 + $0x4a0] ss:$8 sps:$4 sm:$0xff]   ;;  %v2756_v45 = vld [vmem:[%s4031_s1 + $0x4b4] ss:$8 sps:$4 sm:$0xff]   ;;  %v2759_v47 = vld [vmem:[%s4031_s1 + $0x4b0] ss:$8 sps:$4 sm:$0xff]  }
  0x11   :  { %1965 = vmatprep.subr.bf16.mxu0 %v2714_v17  ;;  %v17_v48 = vld [vmem:[%s4032_s0] sm:$0xff]  ;;  %v2766_v58 = vld [vmem:[%s4031_s1 + $0xd4] ss:$8 sps:$4 sm:$0xff]   ;;  %v2770_v60 = vld [vmem:[%s4031_s1 + $0xd0] ss:$8 sps:$4 sm:$0xff]  }
  0x12   :  { %v25_v49 = vld [vmem:[%s4032_s0 + $0x40] sm:$0xff]  ;;  %v2768_v59 = vld [vmem:[%s4031_s1 + $0x4d4] ss:$8 sps:$4 sm:$0xff]   ;;  %v2771_v61 = vld [vmem:[%s4031_s1 + $0x4d0] ss:$8 sps:$4 sm:$0xff]  }
  0x13   :  { %1754 = vmatpush1.bf16.msra.mxu1 %v2716_v18  ;;  %v2760_v50 = vld [vmem:[%s4031_s1 + $0xc4] ss:$8 sps:$4 sm:$0xff]   ;;  %v2337_v52 = vcombine.high %v17_v48, %v25_v49  ;;  %v2764_v56 = vld [vmem:[%s4031_s1 + $0xc0] ss:$8 sps:$4 sm:$0xff]   ;;  %v2778_v2 = vld [vmem:[%s4031_s1 + $0xf4] ss:$8 sps:$4 sm:$0xff]   ;;  %v2336_v8 = vcombine.low %v17_v48, %v25_v49 }
  0x14   :  { %1966 = vmatpush1.bf16.msra.mxu0 %v2717_v19  ;;  %1755 = vmatprep.subr.bf16.mxu1 %v2718_v20  ;;  %v2762_v51 = vld [vmem:[%s4031_s1 + $0x4c4] ss:$8 sps:$4 sm:$0xff]   ;;  %v2765_v57 = vld [vmem:[%s4031_s1 + $0x4c0] ss:$8 sps:$4 sm:$0xff]   ;;  %v2780_v3 = vld [vmem:[%s4031_s1 + $0x4f4] ss:$8 sps:$4 sm:$0xff]  }
  0x15   :  { %1967 = vmatprep.subr.bf16.mxu0 %v2720_v21  ;;  %v21_v53 = vld [vmem:[%s4032_s0 + $0x20] sm:$0xff]  ;;  %1777 = vmatprep.mubr.bf16.mxu1 %v2337_v52  ;;  %v2782_v4 = vld [vmem:[%s4031_s1 + $0xf0] ss:$8 sps:$4 sm:$0xff]   ;;  %v2792_v12 = vld [vmem:[%s4031_s1 + $0x114] ss:$8 sps:$4 sm:$0xff]  }
  0x16   :  { %v29_v54 = vld [vmem:[%s4032_s0 + $0x60] sm:$0xff]  ;;  %v2783_v5 = vld [vmem:[%s4031_s1 + $0x4f0] ss:$8 sps:$4 sm:$0xff]   ;;  %v2795_v13 = vld [vmem:[%s4031_s1 + $0x514] ss:$8 sps:$4 sm:$0xff]  }
  0x17   :  { %1756 = vmatpush1.bf16.msra.mxu1 %v2722_v22  ;;  %v2345_v55 = vcombine.high %v21_v53, %v29_v54  ;;  %v2772_v62 = vld [vmem:[%s4031_s1 + $0xe4] ss:$8 sps:$4 sm:$0xff]   ;;  %v2776_v0 = vld [vmem:[%s4031_s1 + $0xe0] ss:$8 sps:$4 sm:$0xff]   ;;  %v2344_v10 = vcombine.low %v21_v53, %v29_v54  ;;  %v2790_v14 = vld [vmem:[%s4031_s1 + $0x110] ss:$8 sps:$4 sm:$0xff]  }
  0x18   :  { %1968 = vmatpush1.bf16.msra.mxu0 %v2723_v23  ;;  %1757 = vmatprep.subr.bf16.mxu1 %v2724_v24  ;;  %v2774_v63 = vld [vmem:[%s4031_s1 + $0x4e4] ss:$8 sps:$4 sm:$0xff]   ;;  %v2777_v1 = vld [vmem:[%s4031_s1 + $0x4e0] ss:$8 sps:$4 sm:$0xff]   ;;  %v2793_v15 = vld [vmem:[%s4031_s1 + $0x510] ss:$8 sps:$4 sm:$0xff]  }
  0x19   :  { %1969 = vmatprep.subr.bf16.mxu0 %v2726_v25  ;;  %1989 = vmatprep.mubr.bf16.mxu0 %v2345_v55  ;;  %v2786_v6 = vld [vmem:[%s4031_s1 + $0x104] ss:$8 sps:$4 sm:$0xff]   ;;  %v2784_v9 = vld [vmem:[%s4031_s1 + $0x100] ss:$8 sps:$4 sm:$0xff]   ;;  %v2804_v20 = vld [vmem:[%s4031_s1 + $0x134] ss:$8 sps:$4 sm:$0xff]  }
  0x1a   :  { %v2789_v7 = vld [vmem:[%s4031_s1 + $0x504] ss:$8 sps:$4 sm:$0xff]   ;;  %v2787_v11 = vld [vmem:[%s4031_s1 + $0x500] ss:$8 sps:$4 sm:$0xff]   ;;  %v2807_v21 = vld [vmem:[%s4031_s1 + $0x534] ss:$8 sps:$4 sm:$0xff]  }
  0x1b   :  { %1758 = vmatpush1.bf16.msra.mxu1 %v2728_v26  ;;  %v2798_v16 = vld [vmem:[%s4031_s1 + $0x124] ss:$8 sps:$4 sm:$0xff]   ;;  %v2796_v18 = vld [vmem:[%s4031_s1 + $0x120] ss:$8 sps:$4 sm:$0xff]   ;;  %v2802_v22 = vld [vmem:[%s4031_s1 + $0x130] ss:$8 sps:$4 sm:$0xff]  }
  0x1c   :  { %1970 = vmatpush1.bf16.msra.mxu0 %v2729_v27  ;;  %1759 = vmatprep.subr.bf16.mxu1 %v2730_v28  ;;  %v2801_v17 = vld [vmem:[%s4031_s1 + $0x524] ss:$8 sps:$4 sm:$0xff]   ;;  %v2799_v19 = vld [vmem:[%s4031_s1 + $0x520] ss:$8 sps:$4 sm:$0xff]   ;;  %v2805_v23 = vld [vmem:[%s4031_s1 + $0x530] ss:$8 sps:$4 sm:$0xff]  }
  0x1d   :  { %1971 = vmatprep.subr.bf16.mxu0 %v2732_v29  ;;  %v2810_v24 = vld [vmem:[%s4031_s1 + $0x144] ss:$8 sps:$4 sm:$0xff]   ;;  %v2808_v26 = vld [vmem:[%s4031_s1 + $0x140] ss:$8 sps:$4 sm:$0xff]   ;;  %v2816_v28 = vld [vmem:[%s4031_s1 + $0x154] ss:$8 sps:$4 sm:$0xff]  }
  0x1e   :  { %v2813_v25 = vld [vmem:[%s4031_s1 + $0x544] ss:$8 sps:$4 sm:$0xff]   ;;  %v2811_v27 = vld [vmem:[%s4031_s1 + $0x540] ss:$8 sps:$4 sm:$0xff]   ;;  %v2819_v29 = vld [vmem:[%s4031_s1 + $0x554] ss:$8 sps:$4 sm:$0xff]  }
  0x1f   :  { %1760 = vmatpush1.bf16.msra.mxu1 %v2734_v30  ;;  %v33_v30 = vld [vmem:[%s4032_s0 + $0x80] sm:$0xff]  ;;  %v3422_v49 = vld [vmem:[%s4032_s0 + $0x28] sm:$0xff]  ;;  %v2829_v52 = vld [vmem:[%s4031_s1 + $0x570] ss:$8 sps:$4 sm:$0xff]  }
  0x20   :  { %1972 = vmatpush1.bf16.msra.mxu0 %v2735_v31  ;;  %1761 = vmatprep.subr.bf16.mxu1 %v2736_v32  ;;  %v41_v31 = vld [vmem:[%s4032_s0 + $0xc0] sm:$0xff]  ;;  %v2814_v32 = vld [vmem:[%s4031_s1 + $0x150] ss:$8 sps:$4 sm:$0xff]  }
  0x21   :  { %1973 = vmatprep.subr.bf16.mxu0 %v2738_v33  ;;  %v2353_v33 = vcombine.high %v33_v30, %v41_v31  ;;  %v2834_v54 = vld [vmem:[%s4031_s1 + $0x184] ss:$8 sps:$4 sm:$0xff]  }
  0x22   :  { %v2837_v55 = vld [vmem:[%s4031_s1 + $0x584] ss:$8 sps:$4 sm:$0xff]  }
  0x23   :  { %1762 = vmatpush1.bf16.msra.mxu1 %v2740_v34  ;;  %v2817_v34 = vld [vmem:[%s4031_s1 + $0x550] ss:$8 sps:$4 sm:$0xff]  }
  0x24   :  { %1974 = vmatpush1.bf16.msra.mxu0 %v2741_v35  ;;  %1763 = vmatprep.subr.bf16.mxu1 %v2742_v36  ;;  %v37_v35 = vld [vmem:[%s4032_s0 + $0xa0] sm:$0xff] }
  0x25   :  { %1975 = vmatprep.subr.bf16.mxu0 %v2744_v37  ;;  %v45_v36 = vld [vmem:[%s4032_s0 + $0xe0] sm:$0xff]  ;;  %v2352_v37 = vcombine.low %v33_v30, %v41_v31  ;;  %v2888_v30 = vld [vmem:[%s4031_s1 + $0x214] ss:$8 sps:$4 sm:$0xff]  }
  0x26   :  { %v2891_v31 = vld [vmem:[%s4031_s1 + $0x614] ss:$8 sps:$4 sm:$0xff]  }
  0x27   :  { %1764 = vmatpush1.bf16.msra.mxu1 %v2746_v38  ;;  %v2822_v38 = vld [vmem:[%s4031_s1 + $0x164] ss:$8 sps:$4 sm:$0xff]  }
  0x28   :  { %1976 = vmatpush1.bf16.msra.mxu0 %v2747_v39  ;;  %1765 = vmatprep.subr.bf16.mxu1 %v2748_v40  ;;  %v2361_v39 = vcombine.high %v37_v35, %v45_v36  ;;  %v2360_v40 = vcombine.low %v37_v35, %v45_v36  ;;  %v2886_v36 = vld [vmem:[%s4031_s1 + $0x210] ss:$8 sps:$4 sm:$0xff]  }
  0x29   :  { %1977 = vmatprep.subr.bf16.mxu0 %v2750_v41  ;;  %v2825_v41 = vld [vmem:[%s4031_s1 + $0x564] ss:$8 sps:$4 sm:$0xff]  }
  0x2b   :  { %1766 = vmatpush1.bf16.msra.mxu1 %v2752_v42  ;;  %v2820_v42 = vld [vmem:[%s4031_s1 + $0x160] ss:$8 sps:$4 sm:$0xff]  }
  0x2c   :  { %1978 = vmatpush1.bf16.msra.mxu0 %v2753_v43  ;;  %1767 = vmatprep.subr.bf16.mxu1 %v2754_v44  ;;  %v2823_v43 = vld [vmem:[%s4031_s1 + $0x560] ss:$8 sps:$4 sm:$0xff]  }
  0x2d   :  { %1979 = vmatprep.subr.bf16.mxu0 %v2756_v45  ;;  %v3404_v44 = vld [vmem:[%s4032_s0 + $0x8] sm:$0xff] }
  0x2e   :  { %v3409_v45 = vld [vmem:[%s4032_s0 + $0x48] sm:$0xff] }
  0x2f   :  { %1768 = vmatpush1.bf16.msra.mxu1 %v2758_v46  ;;  %v2828_v46 = vld [vmem:[%s4031_s1 + $0x174] ss:$8 sps:$4 sm:$0xff]   ;;  %v2339_v48 = vcombine.high %v3404_v44, %v3409_v45 }
  0x30   :  { %1980 = vmatpush1.bf16.msra.mxu0 %v2759_v47  ;;  %1769 = vmatprep.subr.bf16.mxu1 %v2760_v50  ;;  %v2831_v47 = vld [vmem:[%s4031_s1 + $0x574] ss:$8 sps:$4 sm:$0xff]   ;;  %v3427_v50 = vld [vmem:[%s4032_s0 + $0x68] sm:$0xff] }
  0x31   :  { %1981 = vmatprep.subr.bf16.mxu0 %v2762_v51  ;;  %v2826_v51 = vld [vmem:[%s4031_s1 + $0x170] ss:$8 sps:$4 sm:$0xff]   ;;  %v2347_v53 = vcombine.high %v3422_v49, %v3427_v50 }
  0x33   :  { %1770 = vmatpush1.bf16.msra.mxu1 %v2764_v56  ;;  %v2832_v56 = vld [vmem:[%s4031_s1 + $0x180] ss:$8 sps:$4 sm:$0xff]  }
  0x34   :  { %1982 = vmatpush1.bf16.msra.mxu0 %v2765_v57  ;;  %1771 = vmatprep.subr.bf16.mxu1 %v2766_v58  ;;  %v2835_v57 = vld [vmem:[%s4031_s1 + $0x580] ss:$8 sps:$4 sm:$0xff]   ;;  %v2840_v58 = vld [vmem:[%s4031_s1 + $0x194] ss:$8 sps:$4 sm:$0xff]  }
  0x35   :  { %1983 = vmatprep.subr.bf16.mxu0 %v2768_v59  ;;  %v2843_v59 = vld [vmem:[%s4031_s1 + $0x594] ss:$8 sps:$4 sm:$0xff]  }
  0x37   :  { %1772 = vmatpush1.bf16.msra.mxu1 %v2770_v60  ;;  %v2838_v60 = vld [vmem:[%s4031_s1 + $0x190] ss:$8 sps:$4 sm:$0xff]  }
  0x38   :  { %1984 = vmatpush1.bf16.msra.mxu0 %v2771_v61  ;;  %1773 = vmatprep.subr.bf16.mxu1 %v2772_v62  ;;  %v2841_v61 = vld [vmem:[%s4031_s1 + $0x590] ss:$8 sps:$4 sm:$0xff]   ;;  %v2846_v62 = vld [vmem:[%s4031_s1 + $0x1a4] ss:$8 sps:$4 sm:$0xff]  }
  0x39   :  { %1985 = vmatprep.subr.bf16.mxu0 %v2774_v63  ;;  %v2849_v63 = vld [vmem:[%s4031_s1 + $0x5a4] ss:$8 sps:$4 sm:$0xff]  }
  0x3b   :  { %1774 = vmatpush1.bf16.msra.mxu1 %v2776_v0  ;;  %v2844_v0 = vld [vmem:[%s4031_s1 + $0x1a0] ss:$8 sps:$4 sm:$0xff]  }
  0x3c   :  { %1986 = vmatpush1.bf16.msra.mxu0 %v2777_v1  ;;  %1775 = vmatprep.subr.bf16.mxu1 %v2778_v2  ;;  %v2847_v1 = vld [vmem:[%s4031_s1 + $0x5a0] ss:$8 sps:$4 sm:$0xff]   ;;  %v2852_v2 = vld [vmem:[%s4031_s1 + $0x1b4] ss:$8 sps:$4 sm:$0xff]  }
  0x3d   :  { %1987 = vmatprep.subr.bf16.mxu0 %v2780_v3  ;;  %v2855_v3 = vld [vmem:[%s4031_s1 + $0x5b4] ss:$8 sps:$4 sm:$0xff]  }
  0x3f   :  { %1776 = vmatpush1.bf16.msra.mxu1 %v2782_v4  ;;  %v2850_v4 = vld [vmem:[%s4031_s1 + $0x1b0] ss:$8 sps:$4 sm:$0xff]  }
  0x40   :  { %1988 = vmatpush1.bf16.msra.mxu0 %v2783_v5  ;;  %1798 = vmatprep.subr.bf16.mxu1 %v2786_v6  ;;  %v2853_v5 = vld [vmem:[%s4031_s1 + $0x5b0] ss:$8 sps:$4 sm:$0xff]   ;;  %v2858_v6 = vld [vmem:[%s4031_s1 + $0x1c4] ss:$8 sps:$4 sm:$0xff]  }
  0x41   :  { %2010 = vmatprep.subr.bf16.mxu0 %v2789_v7  ;;  %v2861_v7 = vld [vmem:[%s4031_s1 + $0x5c4] ss:$8 sps:$4 sm:$0xff]  }
  0x42   :  { %1778 = vmatmul.mubr.bf16.vlgmr.msra.gmra.mrb[0].mxu1 %v2336_v8  ;;  %v2856_v8 = vld [vmem:[%s4031_s1 + $0x1c0] ss:$8 sps:$4 sm:$0xff]  }
  0x43   :  { %1990 = vmatmul.mubr.bf16.vlgmr.msra.gmra.mrb[0].mxu0 %v2344_v10  ;;  %1799 = vmatpush1.bf16.msra.mxu1 %v2784_v9  ;;  %v2859_v9 = vld [vmem:[%s4031_s1 + $0x5c0] ss:$8 sps:$4 sm:$0xff]   ;;  %v2864_v10 = vld [vmem:[%s4031_s1 + $0x1d4] ss:$8 sps:$4 sm:$0xff]  }
  0x44   :  { %2011 = vmatpush1.bf16.msra.mxu0 %v2787_v11  ;;  %1800 = vmatprep.subr.bf16.mxu1 %v2792_v12  ;;  %v2867_v11 = vld [vmem:[%s4031_s1 + $0x5d4] ss:$8 sps:$4 sm:$0xff]   ;;  %v2862_v12 = vld [vmem:[%s4031_s1 + $0x1d0] ss:$8 sps:$4 sm:$0xff]  }
  0x45   :  { %2012 = vmatprep.subr.bf16.mxu0 %v2795_v13  ;;  %1787 = vmatprep.mubr.bf16.mxu1 %v2353_v33  ;;  %v2865_v13 = vld [vmem:[%s4031_s1 + $0x5d0] ss:$8 sps:$4 sm:$0xff]   ;;  %v46_v33 = vld [vmem:[%s4032_s0 + $0xe8] sm:$0xff] }
  0x46   :  { %1999 = vmatprep.mubr.bf16.mxu0 %v2361_v39  ;;  %v2897_v39 = vld [vmem:[%s4031_s1 + $0x624] ss:$8 sps:$4 sm:$0xff]  }
  0x47   :  { %1801 = vmatpush1.bf16.msra.mxu1 %v2790_v14  ;;  %v2870_v14 = vld [vmem:[%s4031_s1 + $0x1e4] ss:$8 sps:$4 sm:$0xff]  }
  0x48   :  { %2013 = vmatpush1.bf16.msra.mxu0 %v2793_v15  ;;  %1802 = vmatprep.subr.bf16.mxu1 %v2798_v16  ;;  %v2873_v15 = vld [vmem:[%s4031_s1 + $0x5e4] ss:$8 sps:$4 sm:$0xff]   ;;  %v2868_v16 = vld [vmem:[%s4031_s1 + $0x1e0] ss:$8 sps:$4 sm:$0xff]  }
  0x49   :  { %2014 = vmatprep.subr.bf16.mxu0 %v2801_v17  ;;  %v2871_v17 = vld [vmem:[%s4031_s1 + $0x5e0] ss:$8 sps:$4 sm:$0xff]  }
  0x4a   :  { %1788 = vmatmul.mubr.bf16.gmra.mrb[4].mxu1 %v2352_v37  ;;  %v2889_v37 = vld [vmem:[%s4031_s1 + $0x610] ss:$8 sps:$4 sm:$0xff]  }
  0x4b   :  { %1803 = vmatpush1.bf16.msra.mxu1 %v2796_v18  ;;  %2000 = vmatmul.mubr.bf16.gmra.mrb[4].mxu0 %v2360_v40  ;;  %v2876_v18 = vld [vmem:[%s4031_s1 + $0x1f4] ss:$8 sps:$4 sm:$0xff]   ;;  %v2892_v40 = vld [vmem:[%s4031_s1 + $0x220] ss:$8 sps:$4 sm:$0xff]  }
  0x4c   :  { %2015 = vmatpush1.bf16.msra.mxu0 %v2799_v19  ;;  %1804 = vmatprep.subr.bf16.mxu1 %v2804_v20  ;;  %v2879_v19 = vld [vmem:[%s4031_s1 + $0x5f4] ss:$8 sps:$4 sm:$0xff]   ;;  %v2874_v20 = vld [vmem:[%s4031_s1 + $0x1f0] ss:$8 sps:$4 sm:$0xff]  }
  0x4d   :  { %2016 = vmatprep.subr.bf16.mxu0 %v2807_v21  ;;  %1830 = vmatprep.mubr.bf16.mxu1 %v2339_v48  ;;  %v2877_v21 = vld [vmem:[%s4031_s1 + $0x5f0] ss:$8 sps:$4 sm:$0xff]   ;;  %v2900_v48 = vld [vmem:[%s4031_s1 + $0x234] ss:$8 sps:$4 sm:$0xff]  }
  0x4e   :  { %2042 = vmatprep.mubr.bf16.mxu0 %v2347_v53  ;;  %v2901_v53 = vld [vmem:[%s4031_s1 + $0x630] ss:$8 sps:$4 sm:$0xff]  }
  0x4f   :  { %1805 = vmatpush1.bf16.msra.mxu1 %v2802_v22  ;;  %v2882_v22 = vld [vmem:[%s4031_s1 + $0x204] ss:$8 sps:$4 sm:$0xff]  }
  0x50   :  { %2017 = vmatpush1.bf16.msra.mxu0 %v2805_v23  ;;  %1806 = vmatprep.subr.bf16.mxu1 %v2810_v24  ;;  %v2885_v23 = vld [vmem:[%s4031_s1 + $0x604] ss:$8 sps:$4 sm:$0xff]   ;;  %v2880_v24 = vld [vmem:[%s4031_s1 + $0x200] ss:$8 sps:$4 sm:$0xff]  }
  0x51   :  { %2018 = vmatprep.subr.bf16.mxu0 %v2813_v25  ;;  %v2883_v25 = vld [vmem:[%s4031_s1 + $0x600] ss:$8 sps:$4 sm:$0xff]  }
  0x53   :  { %1807 = vmatpush1.bf16.msra.mxu1 %v2808_v26  ;;  %v34_v26 = vld [vmem:[%s4032_s0 + $0x88] sm:$0xff] }
  0x54   :  { %2019 = vmatpush1.bf16.msra.mxu0 %v2811_v27  ;;  %1808 = vmatprep.subr.bf16.mxu1 %v2816_v28  ;;  %v2338_v27 = vcombine.low %v3404_v44, %v3409_v45  ;;  %v2346_v28 = vcombine.low %v3422_v49, %v3427_v50  ;;  %v3593_v45 = vld [vmem:[%s4032_s0 + $0x50] sm:$0xff] }
  0x55   :  { %2020 = vmatprep.subr.bf16.mxu0 %v2819_v29  ;;  %v42_v29 = vld [vmem:[%s4032_s0 + $0xc8] sm:$0xff]  ;;  %v2903_v49 = vld [vmem:[%s4031_s1 + $0x634] ss:$8 sps:$4 sm:$0xff]  }
  0x57   :  { %1809 = vmatpush1.bf16.msra.mxu1 %v2814_v32  ;;  %v38_v32 = vld [vmem:[%s4032_s0 + $0xa8] sm:$0xff] }
  0x58   :  { %2021 = vmatpush1.bf16.msra.mxu0 %v2817_v34  ;;  %1810 = vmatprep.subr.bf16.mxu1 %v2822_v38  ;;  %v2355_v34 = vcombine.high %v34_v26, %v42_v29  ;;  %v2363_v35 = vcombine.high %v38_v32, %v46_v33  ;;  %v2894_v38 = vld [vmem:[%s4031_s1 + $0x224] ss:$8 sps:$4 sm:$0xff]   ;;  %v2362_v44 = vcombine.low %v38_v32, %v46_v33  ;;  %v2964_v32 = vld [vmem:[%s4031_s1 + $0x2e0] ss:$8 sps:$4 sm:$0xff]  }
  0x59   :  { %2022 = vmatprep.subr.bf16.mxu0 %v2825_v41  ;;  %v2895_v41 = vld [vmem:[%s4031_s1 + $0x620] ss:$8 sps:$4 sm:$0xff]  }
  0x5a   :  { %v2967_v33 = vld [vmem:[%s4031_s1 + $0x6e0] ss:$8 sps:$4 sm:$0xff]  }
  0x5b   :  { %1811 = vmatpush1.bf16.msra.mxu1 %v2820_v42  ;;  %v3588_v42 = vld [vmem:[%s4032_s0 + $0x10] sm:$0xff] }
  0x5c   :  { %2023 = vmatpush1.bf16.msra.mxu0 %v2823_v43  ;;  %1812 = vmatprep.subr.bf16.mxu1 %v2828_v46  ;;  %v2354_v43 = vcombine.low %v34_v26, %v42_v29  ;;  %v3598_v46 = vld [vmem:[%s4032_s0 + $0x30] sm:$0xff]  ;;  %v2341_v50 = vcombine.high %v3588_v42, %v3593_v45 }
  0x5d   :  { %2024 = vmatprep.subr.bf16.mxu0 %v2831_v47  ;;  %v3603_v47 = vld [vmem:[%s4032_s0 + $0x70] sm:$0xff] }
  0x5e   :  { %v2960_v26 = vld [vmem:[%s4031_s1 + $0x2d4] ss:$8 sps:$4 sm:$0xff]   ;;  %v2961_v29 = vld [vmem:[%s4031_s1 + $0x6d0] ss:$8 sps:$4 sm:$0xff]  }
  0x5f   :  { %1813 = vmatpush1.bf16.msra.mxu1 %v2826_v51  ;;  %v2349_v51 = vcombine.high %v3598_v46, %v3603_v47 }
  0x60   :  { %2025 = vmatpush1.bf16.msra.mxu0 %v2829_v52  ;;  %1814 = vmatprep.subr.bf16.mxu1 %v2834_v54  ;;  %v2898_v52 = vld [vmem:[%s4031_s1 + $0x230] ss:$8 sps:$4 sm:$0xff]   ;;  %v2906_v54 = vld [vmem:[%s4031_s1 + $0x244] ss:$8 sps:$4 sm:$0xff]  }
  0x61   :  { %2026 = vmatprep.subr.bf16.mxu0 %v2837_v55  ;;  %v2909_v55 = vld [vmem:[%s4031_s1 + $0x644] ss:$8 sps:$4 sm:$0xff]  }
  0x63   :  { %1815 = vmatpush1.bf16.msra.mxu1 %v2832_v56  ;;  %v2904_v56 = vld [vmem:[%s4031_s1 + $0x240] ss:$8 sps:$4 sm:$0xff]  }
  0x64   :  { %2027 = vmatpush1.bf16.msra.mxu0 %v2835_v57  ;;  %1816 = vmatprep.subr.bf16.mxu1 %v2840_v58  ;;  %v2907_v57 = vld [vmem:[%s4031_s1 + $0x640] ss:$8 sps:$4 sm:$0xff]   ;;  %v2912_v58 = vld [vmem:[%s4031_s1 + $0x254] ss:$8 sps:$4 sm:$0xff]  }
  0x65   :  { %2028 = vmatprep.subr.bf16.mxu0 %v2843_v59  ;;  %v2915_v59 = vld [vmem:[%s4031_s1 + $0x654] ss:$8 sps:$4 sm:$0xff]  }
  0x67   :  { %1817 = vmatpush1.bf16.msra.mxu1 %v2838_v60  ;;  %v2910_v60 = vld [vmem:[%s4031_s1 + $0x250] ss:$8 sps:$4 sm:$0xff]  }
  0x68   :  { %2029 = vmatpush1.bf16.msra.mxu0 %v2841_v61  ;;  %1818 = vmatprep.subr.bf16.mxu1 %v2846_v62  ;;  %v2913_v61 = vld [vmem:[%s4031_s1 + $0x650] ss:$8 sps:$4 sm:$0xff]   ;;  %v2918_v62 = vld [vmem:[%s4031_s1 + $0x264] ss:$8 sps:$4 sm:$0xff]  }
  0x69   :  { %2030 = vmatprep.subr.bf16.mxu0 %v2849_v63  ;;  %v2921_v63 = vld [vmem:[%s4031_s1 + $0x664] ss:$8 sps:$4 sm:$0xff]  }
  0x6b   :  { %1819 = vmatpush1.bf16.msra.mxu1 %v2844_v0  ;;  %v2916_v0 = vld [vmem:[%s4031_s1 + $0x260] ss:$8 sps:$4 sm:$0xff]  }
  0x6c   :  { %2031 = vmatpush1.bf16.msra.mxu0 %v2847_v1  ;;  %1820 = vmatprep.subr.bf16.mxu1 %v2852_v2  ;;  %v2919_v1 = vld [vmem:[%s4031_s1 + $0x660] ss:$8 sps:$4 sm:$0xff]   ;;  %v2924_v2 = vld [vmem:[%s4031_s1 + $0x274] ss:$8 sps:$4 sm:$0xff]  }
  0x6d   :  { %2032 = vmatprep.subr.bf16.mxu0 %v2855_v3  ;;  %v2927_v3 = vld [vmem:[%s4031_s1 + $0x674] ss:$8 sps:$4 sm:$0xff]  }
  0x6f   :  { %1821 = vmatpush1.bf16.msra.mxu1 %v2850_v4  ;;  %v2922_v4 = vld [vmem:[%s4031_s1 + $0x270] ss:$8 sps:$4 sm:$0xff]  }
  0x70   :  { %2033 = vmatpush1.bf16.msra.mxu0 %v2853_v5  ;;  %1822 = vmatprep.subr.bf16.mxu1 %v2858_v6  ;;  %v2925_v5 = vld [vmem:[%s4031_s1 + $0x670] ss:$8 sps:$4 sm:$0xff]   ;;  %v2930_v6 = vld [vmem:[%s4031_s1 + $0x284] ss:$8 sps:$4 sm:$0xff]  }
  0x71   :  { %2034 = vmatprep.subr.bf16.mxu0 %v2861_v7  ;;  %v2933_v7 = vld [vmem:[%s4031_s1 + $0x684] ss:$8 sps:$4 sm:$0xff]  }
  0x73   :  { %1823 = vmatpush1.bf16.msra.mxu1 %v2856_v8  ;;  %v2928_v8 = vld [vmem:[%s4031_s1 + $0x280] ss:$8 sps:$4 sm:$0xff]  }
  0x74   :  { %2035 = vmatpush1.bf16.msra.mxu0 %v2859_v9  ;;  %1824 = vmatprep.subr.bf16.mxu1 %v2864_v10  ;;  %v2931_v9 = vld [vmem:[%s4031_s1 + $0x680] ss:$8 sps:$4 sm:$0xff]   ;;  %v2936_v10 = vld [vmem:[%s4031_s1 + $0x294] ss:$8 sps:$4 sm:$0xff]  }
  0x75   :  { %2036 = vmatprep.subr.bf16.mxu0 %v2867_v11  ;;  %v2939_v11 = vld [vmem:[%s4031_s1 + $0x694] ss:$8 sps:$4 sm:$0xff]  }
  0x77   :  { %1825 = vmatpush1.bf16.msra.mxu1 %v2862_v12  ;;  %v2934_v12 = vld [vmem:[%s4031_s1 + $0x290] ss:$8 sps:$4 sm:$0xff]  }
  0x78   :  { %2037 = vmatpush1.bf16.msra.mxu0 %v2865_v13  ;;  %1826 = vmatprep.subr.bf16.mxu1 %v2870_v14  ;;  %v2937_v13 = vld [vmem:[%s4031_s1 + $0x690] ss:$8 sps:$4 sm:$0xff]   ;;  %v2942_v14 = vld [vmem:[%s4031_s1 + $0x2a4] ss:$8 sps:$4 sm:$0xff]  }
  0x79   :  { %2038 = vmatprep.subr.bf16.mxu0 %v2873_v15  ;;  %v2945_v15 = vld [vmem:[%s4031_s1 + $0x6a4] ss:$8 sps:$4 sm:$0xff]  }
  0x7b   :  { %1827 = vmatpush1.bf16.msra.mxu1 %v2868_v16  ;;  %v2940_v16 = vld [vmem:[%s4031_s1 + $0x2a0] ss:$8 sps:$4 sm:$0xff]  }
  0x7c   :  { %2039 = vmatpush1.bf16.msra.mxu0 %v2871_v17  ;;  %1828 = vmatprep.subr.bf16.mxu1 %v2876_v18  ;;  %v2943_v17 = vld [vmem:[%s4031_s1 + $0x6a0] ss:$8 sps:$4 sm:$0xff]   ;;  %v2948_v18 = vld [vmem:[%s4031_s1 + $0x2b4] ss:$8 sps:$4 sm:$0xff]  }
  0x7d   :  { %2040 = vmatprep.subr.bf16.mxu0 %v2879_v19  ;;  %v2951_v19 = vld [vmem:[%s4031_s1 + $0x6b4] ss:$8 sps:$4 sm:$0xff]  }
  0x7f   :  { %1829 = vmatpush1.bf16.msra.mxu1 %v2874_v20  ;;  %v2946_v20 = vld [vmem:[%s4031_s1 + $0x2b0] ss:$8 sps:$4 sm:$0xff]  }
  0x80   :  { %2041 = vmatpush1.bf16.msra.mxu0 %v2877_v21  ;;  %1851 = vmatprep.subr.bf16.mxu1 %v2882_v22  ;;  %v2949_v21 = vld [vmem:[%s4031_s1 + $0x6b0] ss:$8 sps:$4 sm:$0xff]   ;;  %v2954_v22 = vld [vmem:[%s4031_s1 + $0x2c4] ss:$8 sps:$4 sm:$0xff]  }
  0x81   :  { %2063 = vmatprep.subr.bf16.mxu0 %v2885_v23  ;;  %v2957_v23 = vld [vmem:[%s4031_s1 + $0x6c4] ss:$8 sps:$4 sm:$0xff]  }
  0x82   :  { %1831 = vmatmul.mubr.bf16.vlgmr.msra.gmra.mrb[0].mxu1 %v2338_v27  ;;  %v2963_v27 = vld [vmem:[%s4031_s1 + $0x6d4] ss:$8 sps:$4 sm:$0xff]  }
  0x83   :  { %2043 = vmatmul.mubr.bf16.vlgmr.msra.gmra.mrb[0].mxu0 %v2346_v28  ;;  %1852 = vmatpush1.bf16.msra.mxu1 %v2880_v24  ;;  %v2952_v24 = vld [vmem:[%s4031_s1 + $0x2c0] ss:$8 sps:$4 sm:$0xff]   ;;  %v2958_v28 = vld [vmem:[%s4031_s1 + $0x2d0] ss:$8 sps:$4 sm:$0xff]  }
  0x84   :  { %2064 = vmatpush1.bf16.msra.mxu0 %v2883_v25  ;;  %1853 = vmatprep.subr.bf16.mxu1 %v2888_v30  ;;  %v2955_v25 = vld [vmem:[%s4031_s1 + $0x6c0] ss:$8 sps:$4 sm:$0xff]   ;;  %v2966_v30 = vld [vmem:[%s4031_s1 + $0x2e4] ss:$8 sps:$4 sm:$0xff]  }
  0x85   :  { %2065 = vmatprep.subr.bf16.mxu0 %v2891_v31  ;;  %1840 = vmatprep.mubr.bf16.mxu1 %v2355_v34  ;;  %v2969_v31 = vld [vmem:[%s4031_s1 + $0x6e4] ss:$8 sps:$4 sm:$0xff]   ;;  %v2972_v34 = vld [vmem:[%s4031_s1 + $0x2f4] ss:$8 sps:$4 sm:$0xff]  }
  0x86   :  { %2052 = vmatprep.mubr.bf16.mxu0 %v2363_v35  ;;  %v2975_v35 = vld [vmem:[%s4031_s1 + $0x6f4] ss:$8 sps:$4 sm:$0xff]  }
  0x87   :  { %1854 = vmatpush1.bf16.msra.mxu1 %v2886_v36  ;;  %v2970_v36 = vld [vmem:[%s4031_s1 + $0x2f0] ss:$8 sps:$4 sm:$0xff]  }
  0x88   :  { %2066 = vmatpush1.bf16.msra.mxu0 %v2889_v37  ;;  %1855 = vmatprep.subr.bf16.mxu1 %v2894_v38  ;;  %v2973_v37 = vld [vmem:[%s4031_s1 + $0x6f0] ss:$8 sps:$4 sm:$0xff]   ;;  %v2978_v38 = vld [vmem:[%s4031_s1 + $0x304] ss:$8 sps:$4 sm:$0xff]  }
  0x89   :  { %2067 = vmatprep.subr.bf16.mxu0 %v2897_v39  ;;  %v2981_v39 = vld [vmem:[%s4031_s1 + $0x704] ss:$8 sps:$4 sm:$0xff]  }
  0x8a   :  { %1841 = vmatmul.mubr.bf16.gmra.mrb[4].mxu1 %v2354_v43  ;;  %v2348_v43 = vcombine.low %v3598_v46, %v3603_v47  ;;  %v2984_v46 = vld [vmem:[%s4031_s1 + $0x314] ss:$8 sps:$4 sm:$0xff]  }
  0x8b   :  { %2053 = vmatmul.mubr.bf16.gmra.mrb[4].mxu0 %v2362_v44  ;;  %1856 = vmatpush1.bf16.msra.mxu1 %v2892_v40  ;;  %v35_v40 = vld [vmem:[%s4032_s0 + $0x90] sm:$0xff] }
  0x8c   :  { %2068 = vmatpush1.bf16.msra.mxu0 %v2895_v41  ;;  %1857 = vmatprep.subr.bf16.mxu1 %v2900_v48  ;;  %v2340_v41 = vcombine.low %v3588_v42, %v3593_v45  ;;  %v43_v44 = vld [vmem:[%s4032_s0 + $0xd0] sm:$0xff]  ;;  %v2976_v42 = vld [vmem:[%s4031_s1 + $0x300] ss:$8 sps:$4 sm:$0xff]  }
  0x8d   :  { %2069 = vmatprep.subr.bf16.mxu0 %v2903_v49  ;;  %1883 = vmatprep.mubr.bf16.mxu1 %v2341_v50  ;;  %v39_v48 = vld [vmem:[%s4032_s0 + $0xb0] sm:$0xff]  ;;  %v2979_v45 = vld [vmem:[%s4031_s1 + $0x700] ss:$8 sps:$4 sm:$0xff]   ;;  %v2357_v50 = vcombine.high %v35_v40, %v43_v44 }
  0x8e   :  { %2095 = vmatprep.mubr.bf16.mxu0 %v2349_v51  ;;  %v47_v49 = vld [vmem:[%s4032_s0 + $0xf0] sm:$0xff] }
  0x8f   :  { %1858 = vmatpush1.bf16.msra.mxu1 %v2898_v52  ;;  %v2987_v47 = vld [vmem:[%s4031_s1 + $0x714] ss:$8 sps:$4 sm:$0xff]   ;;  %v2365_v51 = vcombine.high %v39_v48, %v47_v49  ;;  %v2982_v52 = vld [vmem:[%s4031_s1 + $0x310] ss:$8 sps:$4 sm:$0xff]  }
  0x90   :  { %2070 = vmatpush1.bf16.msra.mxu0 %v2901_v53  ;;  %1859 = vmatprep.subr.bf16.mxu1 %v2906_v54  ;;  %v2985_v53 = vld [vmem:[%s4031_s1 + $0x710] ss:$8 sps:$4 sm:$0xff]   ;;  %v2990_v54 = vld [vmem:[%s4031_s1 + $0x324] ss:$8 sps:$4 sm:$0xff]  }
  0x91   :  { %2071 = vmatprep.subr.bf16.mxu0 %v2909_v55  ;;  %v2993_v55 = vld [vmem:[%s4031_s1 + $0x724] ss:$8 sps:$4 sm:$0xff]  }
  0x93   :  { %1860 = vmatpush1.bf16.msra.mxu1 %v2904_v56  ;;  %v3814_v56 = vld [vmem:[%s4032_s0 + $0x18] sm:$0xff] }
  0x94   :  { %2072 = vmatpush1.bf16.msra.mxu0 %v2907_v57  ;;  %1861 = vmatprep.subr.bf16.mxu1 %v2912_v58  ;;  %v2356_v57 = vcombine.low %v35_v40, %v43_v44  ;;  %v2364_v58 = vcombine.low %v39_v48, %v47_v49  ;;  %v3048_v40 = vld [vmem:[%s4031_s1 + $0x3c0] ss:$8 sps:$4 sm:$0xff]   ;;  %v3059_v44 = vld [vmem:[%s4031_s1 + $0x7d4] ss:$8 sps:$4 sm:$0xff]   ;;  %v3054_v48 = vld [vmem:[%s4031_s1 + $0x3d0] ss:$8 sps:$4 sm:$0xff]  }
  0x95   :  { %2073 = vmatprep.subr.bf16.mxu0 %v2915_v59  ;;  %v3819_v59 = vld [vmem:[%s4032_s0 + $0x58] sm:$0xff] }
  0x96   :  { %v3057_v49 = vld [vmem:[%s4031_s1 + $0x7d0] ss:$8 sps:$4 sm:$0xff]  }
  0x97   :  { %1862 = vmatpush1.bf16.msra.mxu1 %v2910_v60  ;;  %v3824_v60 = vld [vmem:[%s4032_s0 + $0x38] sm:$0xff] }
  0x98   :  { %2074 = vmatpush1.bf16.msra.mxu0 %v2913_v61  ;;  %1863 = vmatprep.subr.bf16.mxu1 %v2918_v62  ;;  %v3829_v61 = vld [vmem:[%s4032_s0 + $0x78] sm:$0xff]  ;;  %v2988_v62 = vld [vmem:[%s4031_s1 + $0x320] ss:$8 sps:$4 sm:$0xff]  }
  0x99   :  { %2075 = vmatprep.subr.bf16.mxu0 %v2921_v63  ;;  %v2991_v63 = vld [vmem:[%s4031_s1 + $0x720] ss:$8 sps:$4 sm:$0xff]  }
  0x9b   :  { %1864 = vmatpush1.bf16.msra.mxu1 %v2916_v0  ;;  %v2996_v0 = vld [vmem:[%s4031_s1 + $0x334] ss:$8 sps:$4 sm:$0xff]  }
  0x9c   :  { %2076 = vmatpush1.bf16.msra.mxu0 %v2919_v1  ;;  %1865 = vmatprep.subr.bf16.mxu1 %v2924_v2  ;;  %v2999_v1 = vld [vmem:[%s4031_s1 + $0x734] ss:$8 sps:$4 sm:$0xff]   ;;  %v2343_v2 = vcombine.high %v3814_v56, %v3819_v59 }
  0x9d   :  { %2077 = vmatprep.subr.bf16.mxu0 %v2927_v3  ;;  %v2351_v3 = vcombine.high %v3824_v60, %v3829_v61 }
  0x9f   :  { %1866 = vmatpush1.bf16.msra.mxu1 %v2922_v4  ;;  %v2994_v4 = vld [vmem:[%s4031_s1 + $0x330] ss:$8 sps:$4 sm:$0xff]  }
  0xa0   :  { %2078 = vmatpush1.bf16.msra.mxu0 %v2925_v5  ;;  %1867 = vmatprep.subr.bf16.mxu1 %v2930_v6  ;;  %v2997_v5 = vld [vmem:[%s4031_s1 + $0x730] ss:$8 sps:$4 sm:$0xff]   ;;  %v3002_v6 = vld [vmem:[%s4031_s1 + $0x344] ss:$8 sps:$4 sm:$0xff]  }
  0xa1   :  { %2079 = vmatprep.subr.bf16.mxu0 %v2933_v7  ;;  %v3005_v7 = vld [vmem:[%s4031_s1 + $0x744] ss:$8 sps:$4 sm:$0xff]  }
  0xa3   :  { %1868 = vmatpush1.bf16.msra.mxu1 %v2928_v8  ;;  %v3000_v8 = vld [vmem:[%s4031_s1 + $0x340] ss:$8 sps:$4 sm:$0xff]  }
  0xa4   :  { %2080 = vmatpush1.bf16.msra.mxu0 %v2931_v9  ;;  %1869 = vmatprep.subr.bf16.mxu1 %v2936_v10  ;;  %v3003_v9 = vld [vmem:[%s4031_s1 + $0x740] ss:$8 sps:$4 sm:$0xff]   ;;  %v3008_v10 = vld [vmem:[%s4031_s1 + $0x354] ss:$8 sps:$4 sm:$0xff]  }
  0xa5   :  { %2081 = vmatprep.subr.bf16.mxu0 %v2939_v11  ;;  %v3011_v11 = vld [vmem:[%s4031_s1 + $0x754] ss:$8 sps:$4 sm:$0xff]  }
  0xa7   :  { %1870 = vmatpush1.bf16.msra.mxu1 %v2934_v12  ;;  %v3006_v12 = vld [vmem:[%s4031_s1 + $0x350] ss:$8 sps:$4 sm:$0xff]  }
  0xa8   :  { %2082 = vmatpush1.bf16.msra.mxu0 %v2937_v13  ;;  %1871 = vmatprep.subr.bf16.mxu1 %v2942_v14  ;;  %v3009_v13 = vld [vmem:[%s4031_s1 + $0x750] ss:$8 sps:$4 sm:$0xff]   ;;  %v3014_v14 = vld [vmem:[%s4031_s1 + $0x364] ss:$8 sps:$4 sm:$0xff]  }
  0xa9   :  { %2083 = vmatprep.subr.bf16.mxu0 %v2945_v15  ;;  %v3017_v15 = vld [vmem:[%s4031_s1 + $0x764] ss:$8 sps:$4 sm:$0xff]  }
  0xab   :  { %1872 = vmatpush1.bf16.msra.mxu1 %v2940_v16  ;;  %v3012_v16 = vld [vmem:[%s4031_s1 + $0x360] ss:$8 sps:$4 sm:$0xff]  }
  0xac   :  { %2084 = vmatpush1.bf16.msra.mxu0 %v2943_v17  ;;  %1873 = vmatprep.subr.bf16.mxu1 %v2948_v18  ;;  %v3015_v17 = vld [vmem:[%s4031_s1 + $0x760] ss:$8 sps:$4 sm:$0xff]   ;;  %v3020_v18 = vld [vmem:[%s4031_s1 + $0x374] ss:$8 sps:$4 sm:$0xff]  }
  0xad   :  { %2085 = vmatprep.subr.bf16.mxu0 %v2951_v19  ;;  %v3023_v19 = vld [vmem:[%s4031_s1 + $0x774] ss:$8 sps:$4 sm:$0xff]  }
  0xaf   :  { %1874 = vmatpush1.bf16.msra.mxu1 %v2946_v20  ;;  %v3018_v20 = vld [vmem:[%s4031_s1 + $0x370] ss:$8 sps:$4 sm:$0xff]  }
  0xb0   :  { %2086 = vmatpush1.bf16.msra.mxu0 %v2949_v21  ;;  %1875 = vmatprep.subr.bf16.mxu1 %v2954_v22  ;;  %v3021_v21 = vld [vmem:[%s4031_s1 + $0x770] ss:$8 sps:$4 sm:$0xff]   ;;  %v3026_v22 = vld [vmem:[%s4031_s1 + $0x384] ss:$8 sps:$4 sm:$0xff]  }
  0xb1   :  { %2087 = vmatprep.subr.bf16.mxu0 %v2957_v23  ;;  %v3029_v23 = vld [vmem:[%s4031_s1 + $0x784] ss:$8 sps:$4 sm:$0xff]  }
  0xb3   :  { %1876 = vmatpush1.bf16.msra.mxu1 %v2952_v24  ;;  %v3024_v24 = vld [vmem:[%s4031_s1 + $0x380] ss:$8 sps:$4 sm:$0xff]  }
  0xb4   :  { %2088 = vmatpush1.bf16.msra.mxu0 %v2955_v25  ;;  %1877 = vmatprep.subr.bf16.mxu1 %v2960_v26  ;;  %v3027_v25 = vld [vmem:[%s4031_s1 + $0x780] ss:$8 sps:$4 sm:$0xff]   ;;  %v3032_v26 = vld [vmem:[%s4031_s1 + $0x394] ss:$8 sps:$4 sm:$0xff]  }
  0xb5   :  { %2089 = vmatprep.subr.bf16.mxu0 %v2963_v27  ;;  %v3035_v27 = vld [vmem:[%s4031_s1 + $0x794] ss:$8 sps:$4 sm:$0xff]  }
  0xb7   :  { %1878 = vmatpush1.bf16.msra.mxu1 %v2958_v28  ;;  %v3030_v28 = vld [vmem:[%s4031_s1 + $0x390] ss:$8 sps:$4 sm:$0xff]  }
  0xb8   :  { %2090 = vmatpush1.bf16.msra.mxu0 %v2961_v29  ;;  %1879 = vmatprep.subr.bf16.mxu1 %v2966_v30  ;;  %v3033_v29 = vld [vmem:[%s4031_s1 + $0x790] ss:$8 sps:$4 sm:$0xff]   ;;  %v3038_v30 = vld [vmem:[%s4031_s1 + $0x3a4] ss:$8 sps:$4 sm:$0xff]  }
  0xb9   :  { %2091 = vmatprep.subr.bf16.mxu0 %v2969_v31  ;;  %v3041_v31 = vld [vmem:[%s4031_s1 + $0x7a4] ss:$8 sps:$4 sm:$0xff]  }
  0xbb   :  { %1880 = vmatpush1.bf16.msra.mxu1 %v2964_v32  ;;  %v3036_v32 = vld [vmem:[%s4031_s1 + $0x3a0] ss:$8 sps:$4 sm:$0xff]  }
  0xbc   :  { %2092 = vmatpush1.bf16.msra.mxu0 %v2967_v33  ;;  %1881 = vmatprep.subr.bf16.mxu1 %v2972_v34  ;;  %v3039_v33 = vld [vmem:[%s4031_s1 + $0x7a0] ss:$8 sps:$4 sm:$0xff]   ;;  %v3044_v34 = vld [vmem:[%s4031_s1 + $0x3b4] ss:$8 sps:$4 sm:$0xff]  }
  0xbd   :  { %2093 = vmatprep.subr.bf16.mxu0 %v2975_v35  ;;  %v3047_v35 = vld [vmem:[%s4031_s1 + $0x7b4] ss:$8 sps:$4 sm:$0xff]  }
  0xbf   :  { %1882 = vmatpush1.bf16.msra.mxu1 %v2970_v36  ;;  %v3042_v36 = vld [vmem:[%s4031_s1 + $0x3b0] ss:$8 sps:$4 sm:$0xff]  }
  0xc0   :  { %2094 = vmatpush1.bf16.msra.mxu0 %v2973_v37  ;;  %1904 = vmatprep.subr.bf16.mxu1 %v2978_v38  ;;  %v3045_v37 = vld [vmem:[%s4031_s1 + $0x7b0] ss:$8 sps:$4 sm:$0xff]   ;;  %v3050_v38 = vld [vmem:[%s4031_s1 + $0x3c4] ss:$8 sps:$4 sm:$0xff]  }
  0xc1   :  { %2116 = vmatprep.subr.bf16.mxu0 %v2981_v39  ;;  %v3053_v39 = vld [vmem:[%s4031_s1 + $0x7c4] ss:$8 sps:$4 sm:$0xff]  }
  0xc2   :  { %1884 = vmatmul.mubr.bf16.vlgmr.msra.gmra.mrb[0].mxu1 %v2340_v41  ;;  %v3051_v41 = vld [vmem:[%s4031_s1 + $0x7c0] ss:$8 sps:$4 sm:$0xff]  }
  0xc3   :  { %2096 = vmatmul.mubr.bf16.vlgmr.msra.gmra.mrb[0].mxu0 %v2348_v43  ;;  %1905 = vmatpush1.bf16.msra.mxu1 %v2976_v42  ;;  %v3056_v43 = vld [vmem:[%s4031_s1 + $0x3d4] ss:$8 sps:$4 sm:$0xff]   ;;  %v3062_v42 = vld [vmem:[%s4031_s1 + $0x3e4] ss:$8 sps:$4 sm:$0xff]  }
  0xc4   :  { %2117 = vmatpush1.bf16.msra.mxu0 %v2979_v45  ;;  %1906 = vmatprep.subr.bf16.mxu1 %v2984_v46  ;;  %v3065_v45 = vld [vmem:[%s4031_s1 + $0x7e4] ss:$8 sps:$4 sm:$0xff]   ;;  %v3060_v46 = vld [vmem:[%s4031_s1 + $0x3e0] ss:$8 sps:$4 sm:$0xff]  }
  0xc5   :  { %2118 = vmatprep.subr.bf16.mxu0 %v2987_v47  ;;  %1893 = vmatprep.mubr.bf16.mxu1 %v2357_v50  ;;  %v3063_v47 = vld [vmem:[%s4031_s1 + $0x7e0] ss:$8 sps:$4 sm:$0xff]   ;;  %v3068_v50 = vld [vmem:[%s4031_s1 + $0x3f4] ss:$8 sps:$4 sm:$0xff]  }
  0xc6   :  { %2105 = vmatprep.mubr.bf16.mxu0 %v2365_v51  ;;  %v3071_v51 = vld [vmem:[%s4031_s1 + $0x7f4] ss:$8 sps:$4 sm:$0xff]  }
  0xc7   :  { %1907 = vmatpush1.bf16.msra.mxu1 %v2982_v52  ;;  %v3066_v52 = vld [vmem:[%s4031_s1 + $0x3f0] ss:$8 sps:$4 sm:$0xff]  }
  0xc8   :  { %2119 = vmatpush1.bf16.msra.mxu0 %v2985_v53  ;;  %1908 = vmatprep.subr.bf16.mxu1 %v2990_v54  ;;  %v3069_v53 = vld [vmem:[%s4031_s1 + $0x7f0] ss:$8 sps:$4 sm:$0xff]  }
  0xc9   :  { %2120 = vmatprep.subr.bf16.mxu0 %v2993_v55  ;;  %v36_v54 = vld [vmem:[%s4032_s0 + $0x98] sm:$0xff] }
  0xca   :  { %1894 = vmatmul.mubr.bf16.gmra.mrb[4].mxu1 %v2356_v57  ;;  %v44_v55 = vld [vmem:[%s4032_s0 + $0xd8] sm:$0xff] }
  0xcb   :  { %2106 = vmatmul.mubr.bf16.gmra.mrb[4].mxu0 %v2364_v58  ;;  %1909 = vmatpush1.bf16.msra.mxu1 %v2988_v62  ;;  %v40_v57 = vld [vmem:[%s4032_s0 + $0xb8] sm:$0xff]  ;;  %v2342_v62 = vcombine.low %v3814_v56, %v3819_v59 }
  0xcc   :  { %2121 = vmatpush1.bf16.msra.mxu0 %v2991_v63  ;;  %1910 = vmatprep.subr.bf16.mxu1 %v2996_v0  ;;  %v48_v58 = vld [vmem:[%s4032_s0 + $0xf8] sm:$0xff]  ;;  %v2350_v63 = vcombine.low %v3824_v60, %v3829_v61  ;;  %v2359_v0 = vcombine.high %v36_v54, %v44_v55 }
  0xcd   :  { %2122 = vmatprep.subr.bf16.mxu0 %v2999_v1  ;;  %1936 = vmatprep.mubr.bf16.mxu1 %v2343_v2  ;;  %v2367_v1 = vcombine.high %v40_v57, %v48_v58  ;;  %v2358_v2 = vcombine.low %v36_v54, %v44_v55 }
  0xce   :  { %2148 = vmatprep.mubr.bf16.mxu0 %v2351_v3  ;;  %v2366_v3 = vcombine.low %v40_v57, %v48_v58 }
  0xcf   :  { %1911 = vmatpush1.bf16.msra.mxu1 %v2994_v4 }
  0xd0   :  { %2123 = vmatpush1.bf16.msra.mxu0 %v2997_v5  ;;  %1912 = vmatprep.subr.bf16.mxu1 %v3002_v6 }
  0xd1   :  { %2124 = vmatprep.subr.bf16.mxu0 %v3005_v7 }
  0xd3   :  { %1913 = vmatpush1.bf16.msra.mxu1 %v3000_v8 }
  0xd4   :  { %2125 = vmatpush1.bf16.msra.mxu0 %v3003_v9  ;;  %1914 = vmatprep.subr.bf16.mxu1 %v3008_v10 }
  0xd5   :  { %2126 = vmatprep.subr.bf16.mxu0 %v3011_v11 }
  0xd7   :  { %1915 = vmatpush1.bf16.msra.mxu1 %v3006_v12 }
  0xd8   :  { %2127 = vmatpush1.bf16.msra.mxu0 %v3009_v13  ;;  %1916 = vmatprep.subr.bf16.mxu1 %v3014_v14 }
  0xd9   :  { %2128 = vmatprep.subr.bf16.mxu0 %v3017_v15 }
  0xdb   :  { %1917 = vmatpush1.bf16.msra.mxu1 %v3012_v16 }
  0xdc   :  { %2129 = vmatpush1.bf16.msra.mxu0 %v3015_v17  ;;  %1918 = vmatprep.subr.bf16.mxu1 %v3020_v18 }
  0xdd   :  { %2130 = vmatprep.subr.bf16.mxu0 %v3023_v19 }
  0xdf   :  { %1919 = vmatpush1.bf16.msra.mxu1 %v3018_v20 }
  0xe0   :  { %2131 = vmatpush1.bf16.msra.mxu0 %v3021_v21  ;;  %1920 = vmatprep.subr.bf16.mxu1 %v3026_v22 }
  0xe1   :  { %2132 = vmatprep.subr.bf16.mxu0 %v3029_v23 }
  0xe3   :  { %1921 = vmatpush1.bf16.msra.mxu1 %v3024_v24 }
  0xe4   :  { %2133 = vmatpush1.bf16.msra.mxu0 %v3027_v25  ;;  %1922 = vmatprep.subr.bf16.mxu1 %v3032_v26 }
  0xe5   :  { %2134 = vmatprep.subr.bf16.mxu0 %v3035_v27 }
  0xe7   :  { %1923 = vmatpush1.bf16.msra.mxu1 %v3030_v28 }
  0xe8   :  { %2135 = vmatpush1.bf16.msra.mxu0 %v3033_v29  ;;  %1924 = vmatprep.subr.bf16.mxu1 %v3038_v30 }
  0xe9   :  { %2136 = vmatprep.subr.bf16.mxu0 %v3041_v31 }
  0xeb   :  { %1925 = vmatpush1.bf16.msra.mxu1 %v3036_v32 }
  0xec   :  { %2137 = vmatpush1.bf16.msra.mxu0 %v3039_v33  ;;  %1926 = vmatprep.subr.bf16.mxu1 %v3044_v34 }
  0xed   :  { %2138 = vmatprep.subr.bf16.mxu0 %v3047_v35 }
  0xef   :  { %1927 = vmatpush1.bf16.msra.mxu1 %v3042_v36 }
  0xf0   :  { %2139 = vmatpush1.bf16.msra.mxu0 %v3045_v37  ;;  %1928 = vmatprep.subr.bf16.mxu1 %v3050_v38 }
  0xf1   :  { %2140 = vmatprep.subr.bf16.mxu0 %v3053_v39 }
  0xf3   :  { %1929 = vmatpush1.bf16.msra.mxu1 %v3048_v40 }
  0xf4   :  { %2141 = vmatpush1.bf16.msra.mxu0 %v3051_v41  ;;  %1930 = vmatprep.subr.bf16.mxu1 %v3056_v43 }
  0xf5   :  { %2142 = vmatprep.subr.bf16.mxu0 %v3059_v44 }
  0xf7   :  { %1931 = vmatpush1.bf16.msra.mxu1 %v3054_v48 }
  0xf8   :  { %2143 = vmatpush1.bf16.msra.mxu0 %v3057_v49  ;;  %1932 = vmatprep.subr.bf16.mxu1 %v3062_v42 }
  0xf9   :  { %2144 = vmatprep.subr.bf16.mxu0 %v3065_v45 }
  0xfb   :  { %1933 = vmatpush1.bf16.msra.mxu1 %v3060_v46 }
  0xfc   :  { %2145 = vmatpush1.bf16.msra.mxu0 %v3063_v47  ;;  %1934 = vmatprep.subr.bf16.mxu1 %v3068_v50 }
  0xfd   :  { %2146 = vmatprep.subr.bf16.mxu0 %v3071_v51 }
  0xff   :  { %1935 = vmatpush1.bf16.msra.mxu1 %v3066_v52 }
 0x100   :  { %2147 = vmatpush1.bf16.msra.mxu0 %v3069_v53 }
 0x102   :  { %1937 = vmatmul.mubr.bf16.vlgmr.msra.gmra.mrb[0].mxu1 %v2342_v62 }
 0x103   :  { %2149 = vmatmul.mubr.bf16.vlgmr.msra.gmra.mrb[0].mxu0 %v2350_v63  ;;  %1946 = vmatprep.mubr.bf16.mxu1 %v2359_v0 }
 0x104   :  { %2158 = vmatprep.mubr.bf16.mxu0 %v2367_v1 }
 0x10a   :  { %1947 = vmatmul.mubr.bf16.gmra.mrb[4].mxu1 %v2358_v2 }
 0x10b   :  { %2159 = vmatmul.mubr.bf16.gmra.mrb[4].mxu0 %v2366_v3 }
 0x1d5   :  { %v1938_v4 = vpop.f32.mrb[0].mxu1 }
 0x1d6   :  { %v2150_v5 = vpop.f32.mrb[0].mxu0  ;;  %v1940_v7 = vpop.f32.mrb[1].mxu1 }
 0x1d7   :  { %v2632_v6 = vadd.f32 %v2150_v5, %v1938_v4  ;;  %v2152_v56 = vpop.f32.mrb[1].mxu0  ;;  %v1942_v8 = vpop.f32.mrb[2].mxu1 }
 0x1d8   :  { %v2633_v59 = vadd.f32 %v2152_v56, %v1940_v7  ;;  %v2154_v60 = vpop.f32.mrb[2].mxu0  ;;  %v1944_v9 = vpop.f32.mrb[3].mxu1 }
 0x1d9   :  { %v2634_v61 = vadd.f32 %v2154_v60, %v1942_v8  ;;  %v2156_v10 = vpop.f32.mrb[3].mxu0 }
 0x1da   :  { %v2635_v11 = vadd.f32 %v2156_v10, %v1944_v9 }
 0x1db   :  { %v2169_v12 = vadd.f32 %v2634_v61, %v2632_v6 }
 0x1dc   :  { %v2178_v13 = vadd.f32 %v2635_v11, %v2633_v59 }
 0x1dd   :  { %v1948_v14 = vpop.f32.mrb[4].mxu1 }
 0x1de   :  { %v2160_v15 = vpop.f32.mrb[4].mxu0  ;;  %v1950_v17 = vpop.f32.mrb[5].mxu1 }
 0x1df   :  { %v2636_v16 = vadd.f32 %v2160_v15, %v1948_v14  ;;  %v2162_v18 = vpop.f32.mrb[5].mxu0  ;;  %v1952_v20 = vpop.f32.mrb[6].mxu1 }
 0x1e0   :  { %v2637_v19 = vadd.f32 %v2162_v18, %v1950_v17  ;;  %v2164_v21 = vpop.f32.mrb[6].mxu0  ;;  %v1954_v24 = vpop.f32.mrb[7].mxu1 }
 0x1e1   :  { %v2170_v22 = vadd.f32 %v2636_v16, %v2169_v12  ;;  %v2638_v23 = vadd.f32 %v2164_v21, %v1952_v20  ;;  %v2166_v25 = vpop.f32.mrb[7].mxu0  ;;  %v2230_v21 = vld [vmem:[%s4033_s2] sm:$0x3] }
 0x1e2   :  { %v2179_v26 = vadd.f32 %v2637_v19, %v2178_v13  ;;  %v2639_v27 = vadd.f32 %v2166_v25, %v1954_v24  ;;  %v2232_v13 = vlaneseq }
 0x1e3   :  { %v2171_v28 = vadd.f32 %v2638_v23, %v2170_v22 }
 0x1e4   :  { %v2180_v29 = vadd.f32 %v2639_v27, %v2179_v26  ;;  %v2233_v18 = vshrl.u32 %v2232_v13, 7  ;;  %v2260_v26 = vld [vmem:[%s4034_s3] sm:$0x3] }
 0x1e5   :  { %v2172_v30 = vrot.slane %v2171_v28, 4 }
 0x1e6   :  { %v2181_v31 = vrot.slane %v2180_v29, 4  ;;  %v2234_v20 = vsub.s32 0, %v2233_v18  ;;  %v2238_v22 = vsub.s32 1, %v2233_v18 }
 0x1e7   :  { %v2173_v32 = vadd.f32 %v2172_v30, %v2171_v28 }
 0x1e8   :  { %v2182_v33 = vadd.f32 %v2181_v31, %v2180_v29  ;;  %v2239_v24 = vrot.slane %v2230_v21, %v2238_v22  ;;  %v2265_v31 = vrot.slane %v2260_v26, %v2234_v20 }
 0x1e9   :  { %v2174_v34 = vrot.slane %v2173_v32, 2 }
 0x1ea   :  { %v2183_v35 = vrot.slane %v2182_v33, 2 }
 0x1eb   :  { %v2175_v36 = vadd.f32 %v2174_v34, %v2173_v32 }
 0x1ec   :  { %v2184_v37 = vadd.f32 %v2183_v35, %v2182_v33  ;;  %v2269_v33 = vrot.slane %v2260_v26, %v2238_v22 }
 0x1ed   :  { %v2176_v38 = vrot.slane %v2175_v36, 1 }
 0x1ee   :  { %v2185_v39 = vrot.slane %v2184_v37, 1 }
 0x1ef   :  { %v2177_v40 = vadd.f32 %v2176_v38, %v2175_v36 }
 0x1f0   :  { %v2186_v41 = vadd.f32 %v2185_v39, %v2184_v37 }
 0x1f1   :  { %v2188_v43 = vmul.f32 0.03125, %v2177_v40 }
 0x1f2   :  { %v2189_v44 = vmul.f32 0.03125, %v2186_v41 }
 0x1f3   :  { %v2190_v48 = vsub.f32 %v2632_v6, %v2188_v43  ;;  %v2192_v49 = vsub.f32 %v2634_v61, %v2188_v43  ;;  %v2194_v42 = vsub.f32 %v2636_v16, %v2188_v43  ;;  %v2196_v45 = vsub.f32 %v2638_v23, %v2188_v43 }
 0x1f4   :  { %v2191_v46 = vsub.f32 %v2633_v59, %v2189_v44  ;;  %v2193_v47 = vsub.f32 %v2635_v11, %v2189_v44  ;;  %v2195_v50 = vsub.f32 %v2637_v19, %v2189_v44  ;;  %v2197_v51 = vsub.f32 %v2639_v27, %v2189_v44 }
 0x1f5   :  { %v2198_v52 = vmul.f32 %v2190_v48, %v2190_v48  ;;  %v2200_v53 = vmul.f32 %v2192_v49, %v2192_v49  ;;  %v2202_v57 = vmul.f32 %v2194_v42, %v2194_v42  ;;  %v2204_v0 = vmul.f32 %v2196_v45, %v2196_v45 }
 0x1f6   :  { %v2199_v54 = vmul.f32 %v2191_v46, %v2191_v46  ;;  %v2201_v55 = vmul.f32 %v2193_v47, %v2193_v47  ;;  %v2203_v62 = vmul.f32 %v2195_v50, %v2195_v50  ;;  %v2205_v2 = vmul.f32 %v2197_v51, %v2197_v51 }
 0x1f7   :  { %v2206_v58 = vadd.f32 %v2200_v53, %v2198_v52  ;;  %v2235_v23 = vrot.slane %v2230_v21, %v2234_v20 }
 0x1f8   :  { %v2215_v63 = vadd.f32 %v2201_v55, %v2199_v54 }
 0x1f9   :  { %v2207_v1 = vadd.f32 %v2206_v58, %v2202_v57 }
 0x1fa   :  { %v2216_v3 = vadd.f32 %v2215_v63, %v2203_v62 }
 0x1fb   :  { %v2208_v4 = vadd.f32 %v2207_v1, %v2204_v0 }
 0x1fc   :  { %v2217_v5 = vadd.f32 %v2216_v3, %v2205_v2 }
 0x1fd   :  { %v2209_v6 = vrot.slane %v2208_v4, 4 }
 0x1fe   :  { %v2218_v7 = vrot.slane %v2217_v5, 4 }
 0x1ff   :  { %v2210_v56 = vadd.f32 %v2209_v6, %v2208_v4 }
 0x200   :  { %v2219_v59 = vadd.f32 %v2218_v7, %v2217_v5 }
 0x201   :  { %v2211_v8 = vrot.slane %v2210_v56, 2 }
 0x202   :  { %v2220_v60 = vrot.slane %v2219_v59, 2 }
 0x203   :  { %v2212_v61 = vadd.f32 %v2211_v8, %v2210_v56 }
 0x204   :  { %v2221_v9 = vadd.f32 %v2220_v60, %v2219_v59 }
 0x205   :  { %v2213_v10 = vrot.slane %v2212_v61, 1 }
 0x206   :  { %v2222_v11 = vrot.slane %v2221_v9, 1 }
 0x207   :  { %v2214_v12 = vadd.f32 %v2213_v10, %v2212_v61 }
 0x208   :  { %v2223_v14 = vadd.f32 %v2222_v11, %v2221_v9 }
 0x209   :  { %v2224_v15 = vmul.f32 0.03125, %v2214_v12 }
 0x20a   :  { %v2225_v16 = vmul.f32 0.03125, %v2223_v14 }
 0x20b   :  { %v2226_v17 = vadd.f32 1e-05, %v2224_v15 }
 0x20c   :  { %v2227_v19 = vadd.f32 1e-05, %v2225_v16 }
 0x20d   :  { %3072 = vrsqrt.f32 %v2226_v17 }
 0x20e   :  { %3074 = vrsqrt.f32 %v2227_v19 }
 0x217   :  { %v3073_v25 = vpop.eup %3072 }
 0x218   :  { %v3075_v27 = vpop.eup %3074  ;;  %v2242_v28 = vmul.f32 %v3073_v25, %v2235_v23 }
 0x219   :  { %v2243_v29 = vmul.f32 %v3075_v27, %v2239_v24 }
 0x21a   :  { %v2247_v30 = vrot.slane %v2242_v28, %v2234_v20 }
 0x21b   :  { %v2251_v32 = vrot.slane %v2243_v29, %v2234_v20 }
 0x21c   :  { %v2252_v34 = vmul.f32 %v2247_v30, %v2190_v48  ;;  %v2254_v35 = vmul.f32 %v2247_v30, %v2192_v49  ;;  %v2256_v36 = vmul.f32 %v2247_v30, %v2194_v42  ;;  %v2258_v37 = vmul.f32 %v2247_v30, %v2196_v45 }
 0x21d   :  { %v2253_v38 = vmul.f32 %v2251_v32, %v2191_v46  ;;  %v2255_v39 = vmul.f32 %v2251_v32, %v2193_v47  ;;  %v2257_v40 = vmul.f32 %v2251_v32, %v2195_v50  ;;  %v2259_v41 = vmul.f32 %v2251_v32, %v2197_v51 }
 0x21e   :  { %v2272_v43 = vadd.f32 %v2265_v31, %v2252_v34  ;;  %v2274_v44 = vadd.f32 %v2265_v31, %v2254_v35  ;;  %v2276_v52 = vadd.f32 %v2265_v31, %v2256_v36  ;;  %v2278_v53 = vadd.f32 %v2265_v31, %v2258_v37 }
 0x21f   :  { %v2273_v54 = vadd.f32 %v2269_v33, %v2253_v38  ;;  %v2275_v55 = vadd.f32 %v2269_v33, %v2255_v39  ;;  %v2277_v57 = vadd.f32 %v2269_v33, %v2257_v40  ;;  %v2279_v58 = vadd.f32 %v2269_v33, %v2259_v41 }
 0x220   :  { %vm2280_vm0 = vcmp.gt.f32.partialorder %v2272_v43, 0.0  ;;  %vm2282_vm1 = vcmp.gt.f32.partialorder %v2274_v44, 0.0  ;;  %vm2284_vm2 = vcmp.gt.f32.partialorder %v2276_v52, 0.0  ;;  %v2288_v62 = vmul.f32 0.2, %v2272_v43 }
 0x221   :  { %v2290_v48 = vmul.f32 0.2, %v2274_v44  ;;  %v2292_v49 = vmul.f32 0.2, %v2276_v52  ;;  %vm2286_vm3 = vcmp.gt.f32.partialorder %v2278_v53, 0.0  ;;  %vm2281_vm4 = vcmp.gt.f32.partialorder %v2273_v54, 0.0 }
 0x222   :  { %v2294_v42 = vmul.f32 0.2, %v2278_v53  ;;  %vm2283_vm5 = vcmp.gt.f32.partialorder %v2275_v55, 0.0  ;;  %v2296_v45 = vsel %vm2280_vm0, %v2272_v43, %v2288_v62  ;;  %vm2285_vm6 = vcmp.gt.f32.partialorder %v2277_v57, 0.0 }
 0x223   :  { %v2298_v46 = vsel %vm2282_vm1, %v2274_v44, %v2290_v48  ;;  %vm2287_vm7 = vcmp.gt.f32.partialorder %v2279_v58, 0.0  ;;  %v2300_v47 = vsel %vm2284_vm2, %v2276_v52, %v2292_v49  ;;  %v2289_v50 = vmul.f32 0.2, %v2273_v54 }
 0x224   :  { %v2291_v51 = vmul.f32 0.2, %v2275_v55  ;;  %v2293_v63 = vmul.f32 0.2, %v2277_v57  ;;  %v2302_v0 = vsel %vm2286_vm3, %v2278_v53, %v2294_v42  ;;  %v2295_v1 = vmul.f32 0.2, %v2279_v58 }
 0x225   :  { %v2297_v2 = vsel %vm2281_vm4, %v2273_v54, %v2289_v50 }
 0x226   :  { %v2299_v3 = vsel %vm2283_vm5, %v2275_v55, %v2291_v51  ;;  %v2301_v4 = vsel %vm2285_vm6, %v2277_v57, %v2293_v63  ;;  %v2303_v5 = vsel %vm2287_vm7, %v2279_v58, %v2295_v1  ;;  %v2628_v6 = vpack.c.bf16 %v2297_v2, %v2296_v45 }
 0x227   :  { %v2629_v7 = vpack.c.bf16 %v2299_v3, %v2298_v46  ;;  %v2630_v56 = vpack.c.bf16 %v2301_v4, %v2300_v47  ;;  %v2631_v59 = vpack.c.bf16 %v2303_v5, %v2302_v0 }
 0x228   :  { %2328 = vst [vmem:[%s4035_s4] sm:$0xff] %v2628_v6 }
 0x229   :  { %2329 = vst [vmem:[%s4035_s4 + $0x8] sm:$0xff] %v2629_v7  ;;  %2330 = vst [vmem:[%s4035_s4 + $0x10] sm:$0xff] %v2630_v56 }
 0x22a   :  { %2331 = vst [vmem:[%s4035_s4 + $0x18] sm:$0xff] %v2631_v59 }

// kernel: encoder_forward.9
= control target key start
LH: loop header
LB: loop body
LE: loop exit
PB: predicated region body
PF: predicated region fallthrough
CT: control target
= control target key end

     0   :  { %s7503_s0 = inlined_call_operand.vmem [shape: bf16[8,4096], index: 0, kind: input, shape index: {}]   ;;  %s7504_s1 = inlined_call_operand.vmem [shape: bf16[4096,256], index: 1, kind: input, shape index: {}]   ;;  %s7505_s2 = inlined_call_operand.vmem [shape: f32[1,256], index: 2, kind: input, shape index: {}]   ;;  %s7506_s3 = inlined_call_operand.vmem [shape: f32[1,256], index: 3, kind: input, shape index: {}]   ;;  %s7507_s4 = inlined_call_operand.vmem [shape: f32[2,8], index: 4, kind: input, shape index: {}]   ;;  %s7508_s5 = inlined_call_operand.vmem [shape: bf16[256,128], index: 5, kind: input, shape index: {}]   ;;  %s7509_s6 = inlined_call_operand.vmem [shape: f32[1,128], index: 6, kind: input, shape index: {}]   ;;  %s7510_s7 = inlined_call_operand.hbm [shape: f32[2,128], index: 7, kind: output, shape index: {}]  }
   0x1   :  { %v4877_v0 = vld [vmem:[%s7504_s1 + $0x4] ss:$8 sps:$4 sm:$0xff]   ;;  %v4881_v2 = vld [vmem:[%s7504_s1] ss:$8 sps:$4 sm:$0xff]   ;;  %v4883_v4 = vld [vmem:[%s7504_s1 + $0x14] ss:$8 sps:$4 sm:$0xff]  }
   0x2   :  { %v4879_v1 = vld [vmem:[%s7504_s1 + $0x804] ss:$8 sps:$4 sm:$0xff]   ;;  %3228 = vmatprep.subr.bf16.mxu1 %v4877_v0  ;;  %v4882_v3 = vld [vmem:[%s7504_s1 + $0x800] ss:$8 sps:$4 sm:$0xff]   ;;  %v4885_v5 = vld [vmem:[%s7504_s1 + $0x814] ss:$8 sps:$4 sm:$0xff]  }
   0x3   :  { %3556 = vmatprep.subr.bf16.mxu0 %v4879_v1  ;;  %3229 = vmatpush1.bf16.msra.mxu1 %v4881_v2  ;;  %v4887_v6 = vld [vmem:[%s7504_s1 + $0x10] ss:$8 sps:$4 sm:$0xff]   ;;  %v4889_v8 = vld [vmem:[%s7504_s1 + $0x24] ss:$8 sps:$4 sm:$0xff]   ;;  %v4893_v10 = vld [vmem:[%s7504_s1 + $0x20] ss:$8 sps:$4 sm:$0xff]  }
   0x4   :  { %3557 = vmatpush1.bf16.msra.mxu0 %v4882_v3  ;;  %3230 = vmatprep.subr.bf16.mxu1 %v4883_v4  ;;  %v4888_v7 = vld [vmem:[%s7504_s1 + $0x810] ss:$8 sps:$4 sm:$0xff]   ;;  %v4891_v9 = vld [vmem:[%s7504_s1 + $0x824] ss:$8 sps:$4 sm:$0xff]   ;;  %v4894_v11 = vld [vmem:[%s7504_s1 + $0x820] ss:$8 sps:$4 sm:$0xff]  }
   0x5   :  { %3558 = vmatprep.subr.bf16.mxu0 %v4885_v5  ;;  %v4895_v12 = vld [vmem:[%s7504_s1 + $0x34] ss:$8 sps:$4 sm:$0xff]   ;;  %v4899_v14 = vld [vmem:[%s7504_s1 + $0x30] ss:$8 sps:$4 sm:$0xff]   ;;  %v4901_v16 = vld [vmem:[%s7504_s1 + $0x44] ss:$8 sps:$4 sm:$0xff]  }
   0x6   :  { %v4897_v13 = vld [vmem:[%s7504_s1 + $0x834] ss:$8 sps:$4 sm:$0xff]   ;;  %v4900_v15 = vld [vmem:[%s7504_s1 + $0x830] ss:$8 sps:$4 sm:$0xff]   ;;  %v4903_v17 = vld [vmem:[%s7504_s1 + $0x844] ss:$8 sps:$4 sm:$0xff]  }
   0x7   :  { %3231 = vmatpush1.bf16.msra.mxu1 %v4887_v6  ;;  %v4905_v18 = vld [vmem:[%s7504_s1 + $0x40] ss:$8 sps:$4 sm:$0xff]   ;;  %v4907_v20 = vld [vmem:[%s7504_s1 + $0x54] ss:$8 sps:$4 sm:$0xff]   ;;  %v4911_v22 = vld [vmem:[%s7504_s1 + $0x50] ss:$8 sps:$4 sm:$0xff]  }
   0x8   :  { %3559 = vmatpush1.bf16.msra.mxu0 %v4888_v7  ;;  %3232 = vmatprep.subr.bf16.mxu1 %v4889_v8  ;;  %v4906_v19 = vld [vmem:[%s7504_s1 + $0x840] ss:$8 sps:$4 sm:$0xff]   ;;  %v4909_v21 = vld [vmem:[%s7504_s1 + $0x854] ss:$8 sps:$4 sm:$0xff]   ;;  %v4912_v23 = vld [vmem:[%s7504_s1 + $0x850] ss:$8 sps:$4 sm:$0xff]  }
   0x9   :  { %3560 = vmatprep.subr.bf16.mxu0 %v4891_v9  ;;  %v4913_v24 = vld [vmem:[%s7504_s1 + $0x64] ss:$8 sps:$4 sm:$0xff]   ;;  %v4917_v26 = vld [vmem:[%s7504_s1 + $0x60] ss:$8 sps:$4 sm:$0xff]   ;;  %v4919_v28 = vld [vmem:[%s7504_s1 + $0x74] ss:$8 sps:$4 sm:$0xff]  }
   0xa   :  { %v4915_v25 = vld [vmem:[%s7504_s1 + $0x864] ss:$8 sps:$4 sm:$0xff]   ;;  %v4918_v27 = vld [vmem:[%s7504_s1 + $0x860] ss:$8 sps:$4 sm:$0xff]   ;;  %v4921_v29 = vld [vmem:[%s7504_s1 + $0x874] ss:$8 sps:$4 sm:$0xff]  }
   0xb   :  { %3233 = vmatpush1.bf16.msra.mxu1 %v4893_v10  ;;  %v4923_v30 = vld [vmem:[%s7504_s1 + $0x70] ss:$8 sps:$4 sm:$0xff]   ;;  %v4925_v32 = vld [vmem:[%s7504_s1 + $0x84] ss:$8 sps:$4 sm:$0xff]   ;;  %v4929_v34 = vld [vmem:[%s7504_s1 + $0x80] ss:$8 sps:$4 sm:$0xff]  }
   0xc   :  { %3561 = vmatpush1.bf16.msra.mxu0 %v4894_v11  ;;  %3234 = vmatprep.subr.bf16.mxu1 %v4895_v12  ;;  %v4924_v31 = vld [vmem:[%s7504_s1 + $0x870] ss:$8 sps:$4 sm:$0xff]   ;;  %v4927_v33 = vld [vmem:[%s7504_s1 + $0x884] ss:$8 sps:$4 sm:$0xff]   ;;  %v4930_v35 = vld [vmem:[%s7504_s1 + $0x880] ss:$8 sps:$4 sm:$0xff]  }
   0xd   :  { %3562 = vmatprep.subr.bf16.mxu0 %v4897_v13  ;;  %v4931_v36 = vld [vmem:[%s7504_s1 + $0x94] ss:$8 sps:$4 sm:$0xff]   ;;  %v4935_v38 = vld [vmem:[%s7504_s1 + $0x90] ss:$8 sps:$4 sm:$0xff]   ;;  %v4937_v40 = vld [vmem:[%s7504_s1 + $0xa4] ss:$8 sps:$4 sm:$0xff]  }
   0xe   :  { %v4933_v37 = vld [vmem:[%s7504_s1 + $0x894] ss:$8 sps:$4 sm:$0xff]   ;;  %v4936_v39 = vld [vmem:[%s7504_s1 + $0x890] ss:$8 sps:$4 sm:$0xff]   ;;  %v4939_v41 = vld [vmem:[%s7504_s1 + $0x8a4] ss:$8 sps:$4 sm:$0xff]  }
   0xf   :  { %3235 = vmatpush1.bf16.msra.mxu1 %v4899_v14  ;;  %v4941_v42 = vld [vmem:[%s7504_s1 + $0xa0] ss:$8 sps:$4 sm:$0xff]   ;;  %v4943_v44 = vld [vmem:[%s7504_s1 + $0xb4] ss:$8 sps:$4 sm:$0xff]   ;;  %v4947_v47 = vld [vmem:[%s7504_s1 + $0xb0] ss:$8 sps:$4 sm:$0xff]  }
  0x10   :  { %3563 = vmatpush1.bf16.msra.mxu0 %v4900_v15  ;;  %3236 = vmatprep.subr.bf16.mxu1 %v4901_v16  ;;  %v4942_v43 = vld [vmem:[%s7504_s1 + $0x8a0] ss:$8 sps:$4 sm:$0xff]   ;;  %v4945_v45 = vld [vmem:[%s7504_s1 + $0x8b4] ss:$8 sps:$4 sm:$0xff]   ;;  %v4948_v49 = vld [vmem:[%s7504_s1 + $0x8b0] ss:$8 sps:$4 sm:$0xff]  }
  0x11   :  { %3564 = vmatprep.subr.bf16.mxu0 %v4903_v17  ;;  %v28_v46 = vld [vmem:[%s7503_s0] sm:$0xff]  ;;  %v4955_v56 = vld [vmem:[%s7504_s1 + $0xd4] ss:$8 sps:$4 sm:$0xff]   ;;  %v4959_v58 = vld [vmem:[%s7504_s1 + $0xd0] ss:$8 sps:$4 sm:$0xff]  }
  0x12   :  { %v4234_v48 = vcombine.high %v28_v46, %v28_v46  ;;  %v36_v50 = vld [vmem:[%s7503_s0 + $0x40] sm:$0xff]  ;;  %v4957_v57 = vld [vmem:[%s7504_s1 + $0x8d4] ss:$8 sps:$4 sm:$0xff]   ;;  %v4960_v59 = vld [vmem:[%s7504_s1 + $0x8d0] ss:$8 sps:$4 sm:$0xff]   ;;  %v4233_v6 = vcombine.low %v28_v46, %v28_v46 }
  0x13   :  { %3237 = vmatpush1.bf16.msra.mxu1 %v4905_v18  ;;  %v4949_v51 = vld [vmem:[%s7504_s1 + $0xc4] ss:$8 sps:$4 sm:$0xff]   ;;  %v4250_v53 = vcombine.high %v36_v50, %v36_v50  ;;  %v4953_v54 = vld [vmem:[%s7504_s1 + $0xc0] ss:$8 sps:$4 sm:$0xff]   ;;  %v4967_v0 = vld [vmem:[%s7504_s1 + $0xf4] ss:$8 sps:$4 sm:$0xff]   ;;  %v4249_v7 = vcombine.low %v36_v50, %v36_v50 }
  0x14   :  { %3565 = vmatpush1.bf16.msra.mxu0 %v4906_v19  ;;  %3238 = vmatprep.subr.bf16.mxu1 %v4907_v20  ;;  %v4951_v52 = vld [vmem:[%s7504_s1 + $0x8c4] ss:$8 sps:$4 sm:$0xff]   ;;  %v4954_v55 = vld [vmem:[%s7504_s1 + $0x8c0] ss:$8 sps:$4 sm:$0xff]   ;;  %v4969_v1 = vld [vmem:[%s7504_s1 + $0x8f4] ss:$8 sps:$4 sm:$0xff]  }
  0x15   :  { %3566 = vmatprep.subr.bf16.mxu0 %v4909_v21  ;;  %3260 = vmatprep.mubr.bf16.mxu1 %v4234_v48  ;;  %v4961_v60 = vld [vmem:[%s7504_s1 + $0xe4] ss:$8 sps:$4 sm:$0xff]   ;;  %v4965_v62 = vld [vmem:[%s7504_s1 + $0xe0] ss:$8 sps:$4 sm:$0xff]   ;;  %v4971_v2 = vld [vmem:[%s7504_s1 + $0xf0] ss:$8 sps:$4 sm:$0xff]  }
  0x16   :  { %3588 = vmatprep.mubr.bf16.mxu0 %v4250_v53  ;;  %v4963_v61 = vld [vmem:[%s7504_s1 + $0x8e4] ss:$8 sps:$4 sm:$0xff]   ;;  %v4966_v63 = vld [vmem:[%s7504_s1 + $0x8e0] ss:$8 sps:$4 sm:$0xff]   ;;  %v4972_v3 = vld [vmem:[%s7504_s1 + $0x8f0] ss:$8 sps:$4 sm:$0xff]  }
  0x17   :  { %3239 = vmatpush1.bf16.msra.mxu1 %v4911_v22  ;;  %v4977_v4 = vld [vmem:[%s7504_s1 + $0x104] ss:$8 sps:$4 sm:$0xff]   ;;  %v4975_v8 = vld [vmem:[%s7504_s1 + $0x100] ss:$8 sps:$4 sm:$0xff]   ;;  %v4985_v10 = vld [vmem:[%s7504_s1 + $0x114] ss:$8 sps:$4 sm:$0xff]  }
  0x18   :  { %3567 = vmatpush1.bf16.msra.mxu0 %v4912_v23  ;;  %3240 = vmatprep.subr.bf16.mxu1 %v4913_v24  ;;  %v4982_v5 = vld [vmem:[%s7504_s1 + $0x904] ss:$8 sps:$4 sm:$0xff]   ;;  %v4980_v9 = vld [vmem:[%s7504_s1 + $0x900] ss:$8 sps:$4 sm:$0xff]   ;;  %v4988_v11 = vld [vmem:[%s7504_s1 + $0x914] ss:$8 sps:$4 sm:$0xff]  }
  0x19   :  { %3568 = vmatprep.subr.bf16.mxu0 %v4915_v25  ;;  %v4983_v12 = vld [vmem:[%s7504_s1 + $0x110] ss:$8 sps:$4 sm:$0xff]   ;;  %v4991_v14 = vld [vmem:[%s7504_s1 + $0x124] ss:$8 sps:$4 sm:$0xff]   ;;  %v4989_v16 = vld [vmem:[%s7504_s1 + $0x120] ss:$8 sps:$4 sm:$0xff]  }
  0x1a   :  { %v4986_v13 = vld [vmem:[%s7504_s1 + $0x910] ss:$8 sps:$4 sm:$0xff]   ;;  %v4994_v15 = vld [vmem:[%s7504_s1 + $0x924] ss:$8 sps:$4 sm:$0xff]   ;;  %v4992_v17 = vld [vmem:[%s7504_s1 + $0x920] ss:$8 sps:$4 sm:$0xff]  }
  0x1b   :  { %3241 = vmatpush1.bf16.msra.mxu1 %v4917_v26  ;;  %v4997_v18 = vld [vmem:[%s7504_s1 + $0x134] ss:$8 sps:$4 sm:$0xff]   ;;  %v4995_v20 = vld [vmem:[%s7504_s1 + $0x130] ss:$8 sps:$4 sm:$0xff]   ;;  %v5003_v22 = vld [vmem:[%s7504_s1 + $0x144] ss:$8 sps:$4 sm:$0xff]  }
  0x1c   :  { %3569 = vmatpush1.bf16.msra.mxu0 %v4918_v27  ;;  %3242 = vmatprep.subr.bf16.mxu1 %v4919_v28  ;;  %v5000_v19 = vld [vmem:[%s7504_s1 + $0x934] ss:$8 sps:$4 sm:$0xff]   ;;  %v4998_v21 = vld [vmem:[%s7504_s1 + $0x930] ss:$8 sps:$4 sm:$0xff]   ;;  %v5006_v23 = vld [vmem:[%s7504_s1 + $0x944] ss:$8 sps:$4 sm:$0xff]  }
  0x1d   :  { %3570 = vmatprep.subr.bf16.mxu0 %v4921_v29  ;;  %v5001_v24 = vld [vmem:[%s7504_s1 + $0x140] ss:$8 sps:$4 sm:$0xff]   ;;  %v5009_v26 = vld [vmem:[%s7504_s1 + $0x154] ss:$8 sps:$4 sm:$0xff]   ;;  %v5007_v28 = vld [vmem:[%s7504_s1 + $0x150] ss:$8 sps:$4 sm:$0xff]  }
  0x1e   :  { %v5004_v25 = vld [vmem:[%s7504_s1 + $0x940] ss:$8 sps:$4 sm:$0xff]   ;;  %v5012_v27 = vld [vmem:[%s7504_s1 + $0x954] ss:$8 sps:$4 sm:$0xff]   ;;  %v5010_v29 = vld [vmem:[%s7504_s1 + $0x950] ss:$8 sps:$4 sm:$0xff]  }
  0x1f   :  { %3243 = vmatpush1.bf16.msra.mxu1 %v4923_v30  ;;  %v5015_v30 = vld [vmem:[%s7504_s1 + $0x164] ss:$8 sps:$4 sm:$0xff]   ;;  %v5033_v46 = vld [vmem:[%s7504_s1 + $0x194] ss:$8 sps:$4 sm:$0xff]   ;;  %v5031_v48 = vld [vmem:[%s7504_s1 + $0x190] ss:$8 sps:$4 sm:$0xff]  }
  0x20   :  { %3571 = vmatpush1.bf16.msra.mxu0 %v4924_v31  ;;  %3244 = vmatprep.subr.bf16.mxu1 %v4925_v32  ;;  %v5018_v31 = vld [vmem:[%s7504_s1 + $0x964] ss:$8 sps:$4 sm:$0xff]   ;;  %v5040_v53 = vld [vmem:[%s7504_s1 + $0x9a0] ss:$8 sps:$4 sm:$0xff]  }
  0x21   :  { %3572 = vmatprep.subr.bf16.mxu0 %v4927_v33  ;;  %v6042_v32 = vld [vmem:[%s7503_s0 + $0x8] sm:$0xff] }
  0x22   :  { %v5013_v33 = vld [vmem:[%s7504_s1 + $0x160] ss:$8 sps:$4 sm:$0xff]   ;;  %v5039_v50 = vld [vmem:[%s7504_s1 + $0x1a4] ss:$8 sps:$4 sm:$0xff]  }
  0x23   :  { %3245 = vmatpush1.bf16.msra.mxu1 %v4929_v34  ;;  %v5016_v34 = vld [vmem:[%s7504_s1 + $0x960] ss:$8 sps:$4 sm:$0xff]  }
  0x24   :  { %3573 = vmatpush1.bf16.msra.mxu0 %v4930_v35  ;;  %3246 = vmatprep.subr.bf16.mxu1 %v4931_v36  ;;  %v4236_v35 = vcombine.high %v6042_v32, %v6042_v32  ;;  %v6055_v36 = vld [vmem:[%s7503_s0 + $0x48] sm:$0xff] }
  0x25   :  { %3574 = vmatprep.subr.bf16.mxu0 %v4933_v37  ;;  %v5021_v37 = vld [vmem:[%s7504_s1 + $0x174] ss:$8 sps:$4 sm:$0xff]  }
  0x27   :  { %3247 = vmatpush1.bf16.msra.mxu1 %v4935_v38  ;;  %v4252_v38 = vcombine.high %v6055_v36, %v6055_v36 }
  0x28   :  { %3575 = vmatpush1.bf16.msra.mxu0 %v4936_v39  ;;  %3248 = vmatprep.subr.bf16.mxu1 %v4937_v40  ;;  %v5024_v39 = vld [vmem:[%s7504_s1 + $0x974] ss:$8 sps:$4 sm:$0xff]   ;;  %v5019_v40 = vld [vmem:[%s7504_s1 + $0x170] ss:$8 sps:$4 sm:$0xff]  }
  0x29   :  { %3576 = vmatprep.subr.bf16.mxu0 %v4939_v41  ;;  %v5022_v41 = vld [vmem:[%s7504_s1 + $0x970] ss:$8 sps:$4 sm:$0xff]  }
  0x2b   :  { %3249 = vmatpush1.bf16.msra.mxu1 %v4941_v42  ;;  %v5027_v42 = vld [vmem:[%s7504_s1 + $0x184] ss:$8 sps:$4 sm:$0xff]  }
  0x2c   :  { %3577 = vmatpush1.bf16.msra.mxu0 %v4942_v43  ;;  %3250 = vmatprep.subr.bf16.mxu1 %v4943_v44  ;;  %v5030_v43 = vld [vmem:[%s7504_s1 + $0x984] ss:$8 sps:$4 sm:$0xff]   ;;  %v5025_v44 = vld [vmem:[%s7504_s1 + $0x180] ss:$8 sps:$4 sm:$0xff]  }
  0x2d   :  { %3578 = vmatprep.subr.bf16.mxu0 %v4945_v45  ;;  %v5028_v45 = vld [vmem:[%s7504_s1 + $0x980] ss:$8 sps:$4 sm:$0xff]  }
  0x2f   :  { %3251 = vmatpush1.bf16.msra.mxu1 %v4947_v47  ;;  %v5036_v47 = vld [vmem:[%s7504_s1 + $0x994] ss:$8 sps:$4 sm:$0xff]  }
  0x30   :  { %3579 = vmatpush1.bf16.msra.mxu0 %v4948_v49  ;;  %3252 = vmatprep.subr.bf16.mxu1 %v4949_v51  ;;  %v5034_v49 = vld [vmem:[%s7504_s1 + $0x990] ss:$8 sps:$4 sm:$0xff]   ;;  %v5042_v51 = vld [vmem:[%s7504_s1 + $0x9a4] ss:$8 sps:$4 sm:$0xff]  }
  0x31   :  { %3580 = vmatprep.subr.bf16.mxu0 %v4951_v52  ;;  %v5037_v52 = vld [vmem:[%s7504_s1 + $0x1a0] ss:$8 sps:$4 sm:$0xff]  }
  0x33   :  { %3253 = vmatpush1.bf16.msra.mxu1 %v4953_v54  ;;  %v5045_v54 = vld [vmem:[%s7504_s1 + $0x1b4] ss:$8 sps:$4 sm:$0xff]  }
  0x34   :  { %3581 = vmatpush1.bf16.msra.mxu0 %v4954_v55  ;;  %3254 = vmatprep.subr.bf16.mxu1 %v4955_v56  ;;  %v5048_v55 = vld [vmem:[%s7504_s1 + $0x9b4] ss:$8 sps:$4 sm:$0xff]   ;;  %v5043_v56 = vld [vmem:[%s7504_s1 + $0x1b0] ss:$8 sps:$4 sm:$0xff]  }
  0x35   :  { %3582 = vmatprep.subr.bf16.mxu0 %v4957_v57  ;;  %v5046_v57 = vld [vmem:[%s7504_s1 + $0x9b0] ss:$8 sps:$4 sm:$0xff]  }
  0x37   :  { %3255 = vmatpush1.bf16.msra.mxu1 %v4959_v58  ;;  %v5051_v58 = vld [vmem:[%s7504_s1 + $0x1c4] ss:$8 sps:$4 sm:$0xff]  }
  0x38   :  { %3583 = vmatpush1.bf16.msra.mxu0 %v4960_v59  ;;  %3256 = vmatprep.subr.bf16.mxu1 %v4961_v60  ;;  %v5054_v59 = vld [vmem:[%s7504_s1 + $0x9c4] ss:$8 sps:$4 sm:$0xff]   ;;  %v5049_v60 = vld [vmem:[%s7504_s1 + $0x1c0] ss:$8 sps:$4 sm:$0xff]  }
  0x39   :  { %3584 = vmatprep.subr.bf16.mxu0 %v4963_v61  ;;  %v5052_v61 = vld [vmem:[%s7504_s1 + $0x9c0] ss:$8 sps:$4 sm:$0xff]  }
  0x3b   :  { %3257 = vmatpush1.bf16.msra.mxu1 %v4965_v62  ;;  %v5057_v62 = vld [vmem:[%s7504_s1 + $0x1d4] ss:$8 sps:$4 sm:$0xff]  }
  0x3c   :  { %3585 = vmatpush1.bf16.msra.mxu0 %v4966_v63  ;;  %3258 = vmatprep.subr.bf16.mxu1 %v4967_v0  ;;  %v5060_v63 = vld [vmem:[%s7504_s1 + $0x9d4] ss:$8 sps:$4 sm:$0xff]   ;;  %v5055_v0 = vld [vmem:[%s7504_s1 + $0x1d0] ss:$8 sps:$4 sm:$0xff]  }
  0x3d   :  { %3586 = vmatprep.subr.bf16.mxu0 %v4969_v1  ;;  %v5058_v1 = vld [vmem:[%s7504_s1 + $0x9d0] ss:$8 sps:$4 sm:$0xff]  }
  0x3f   :  { %3259 = vmatpush1.bf16.msra.mxu1 %v4971_v2  ;;  %v5063_v2 = vld [vmem:[%s7504_s1 + $0x1e4] ss:$8 sps:$4 sm:$0xff]  }
  0x40   :  { %3587 = vmatpush1.bf16.msra.mxu0 %v4972_v3  ;;  %3269 = vmatprep.subr.bf16.mxu1 %v4977_v4  ;;  %v5066_v3 = vld [vmem:[%s7504_s1 + $0x9e4] ss:$8 sps:$4 sm:$0xff]   ;;  %v5061_v4 = vld [vmem:[%s7504_s1 + $0x1e0] ss:$8 sps:$4 sm:$0xff]  }
  0x41   :  { %3597 = vmatprep.subr.bf16.mxu0 %v4982_v5  ;;  %v5064_v5 = vld [vmem:[%s7504_s1 + $0x9e0] ss:$8 sps:$4 sm:$0xff]  }
  0x42   :  { %3261 = vmatmul.mubr.bf16.vlgmr.msra.gmra.mrb[0].mxu1 %v4233_v6  ;;  %v5069_v6 = vld [vmem:[%s7504_s1 + $0x1f4] ss:$8 sps:$4 sm:$0xff]  }
  0x43   :  { %3589 = vmatmul.mubr.bf16.vlgmr.msra.gmra.mrb[0].mxu0 %v4249_v7  ;;  %3270 = vmatpush1.bf16.msra.mxu1 %v4975_v8  ;;  %v5072_v7 = vld [vmem:[%s7504_s1 + $0x9f4] ss:$8 sps:$4 sm:$0xff]   ;;  %v5067_v8 = vld [vmem:[%s7504_s1 + $0x1f0] ss:$8 sps:$4 sm:$0xff]  }
  0x44   :  { %3598 = vmatpush1.bf16.msra.mxu0 %v4980_v9  ;;  %3271 = vmatprep.subr.bf16.mxu1 %v4985_v10  ;;  %v5070_v9 = vld [vmem:[%s7504_s1 + $0x9f0] ss:$8 sps:$4 sm:$0xff]   ;;  %v5077_v10 = vld [vmem:[%s7504_s1 + $0x204] ss:$8 sps:$4 sm:$0xff]  }
  0x45   :  { %3599 = vmatprep.subr.bf16.mxu0 %v4988_v11  ;;  %3301 = vmatprep.mubr.bf16.mxu1 %v4236_v35  ;;  %v5082_v11 = vld [vmem:[%s7504_s1 + $0xa04] ss:$8 sps:$4 sm:$0xff]   ;;  %v5104_v35 = vld [vmem:[%s7504_s1 + $0xa40] ss:$8 sps:$4 sm:$0xff]  }
  0x46   :  { %3629 = vmatprep.mubr.bf16.mxu0 %v4252_v38  ;;  %v5107_v38 = vld [vmem:[%s7504_s1 + $0x250] ss:$8 sps:$4 sm:$0xff]  }
  0x47   :  { %3272 = vmatpush1.bf16.msra.mxu1 %v4983_v12  ;;  %v4235_v12 = vcombine.low %v6042_v32, %v6042_v32  ;;  %v5103_v32 = vld [vmem:[%s7504_s1 + $0x244] ss:$8 sps:$4 sm:$0xff]  }
  0x48   :  { %3600 = vmatpush1.bf16.msra.mxu0 %v4986_v13  ;;  %3273 = vmatprep.subr.bf16.mxu1 %v4991_v14  ;;  %v5075_v13 = vld [vmem:[%s7504_s1 + $0x200] ss:$8 sps:$4 sm:$0xff]   ;;  %v4251_v14 = vcombine.low %v6055_v36, %v6055_v36  ;;  %v5109_v36 = vld [vmem:[%s7504_s1 + $0x254] ss:$8 sps:$4 sm:$0xff]  }
  0x49   :  { %3601 = vmatprep.subr.bf16.mxu0 %v4994_v15  ;;  %v5080_v15 = vld [vmem:[%s7504_s1 + $0xa00] ss:$8 sps:$4 sm:$0xff]  }
  0x4b   :  { %3274 = vmatpush1.bf16.msra.mxu1 %v4989_v16  ;;  %v5085_v16 = vld [vmem:[%s7504_s1 + $0x214] ss:$8 sps:$4 sm:$0xff]  }
  0x4c   :  { %3602 = vmatpush1.bf16.msra.mxu0 %v4992_v17  ;;  %3275 = vmatprep.subr.bf16.mxu1 %v4997_v18  ;;  %v5088_v17 = vld [vmem:[%s7504_s1 + $0xa14] ss:$8 sps:$4 sm:$0xff]  }
  0x4d   :  { %3603 = vmatprep.subr.bf16.mxu0 %v5000_v19  ;;  %v6192_v18 = vld [vmem:[%s7503_s0 + $0x10] sm:$0xff] }
  0x4e   :  { %v4238_v19 = vcombine.high %v6192_v18, %v6192_v18 }
  0x4f   :  { %3276 = vmatpush1.bf16.msra.mxu1 %v4995_v20  ;;  %v6199_v20 = vld [vmem:[%s7503_s0 + $0x50] sm:$0xff] }
  0x50   :  { %3604 = vmatpush1.bf16.msra.mxu0 %v4998_v21  ;;  %3277 = vmatprep.subr.bf16.mxu1 %v5003_v22  ;;  %v5083_v21 = vld [vmem:[%s7504_s1 + $0x210] ss:$8 sps:$4 sm:$0xff]  }
  0x51   :  { %3605 = vmatprep.subr.bf16.mxu0 %v5006_v23  ;;  %v5086_v22 = vld [vmem:[%s7504_s1 + $0xa10] ss:$8 sps:$4 sm:$0xff]   ;;  %v4254_v23 = vcombine.high %v6199_v20, %v6199_v20 }
  0x53   :  { %3278 = vmatpush1.bf16.msra.mxu1 %v5001_v24  ;;  %v5091_v24 = vld [vmem:[%s7504_s1 + $0x224] ss:$8 sps:$4 sm:$0xff]  }
  0x54   :  { %3606 = vmatpush1.bf16.msra.mxu0 %v5004_v25  ;;  %3279 = vmatprep.subr.bf16.mxu1 %v5009_v26  ;;  %v5094_v25 = vld [vmem:[%s7504_s1 + $0xa24] ss:$8 sps:$4 sm:$0xff]   ;;  %v5089_v26 = vld [vmem:[%s7504_s1 + $0x220] ss:$8 sps:$4 sm:$0xff]  }
  0x55   :  { %3607 = vmatprep.subr.bf16.mxu0 %v5012_v27  ;;  %v5092_v27 = vld [vmem:[%s7504_s1 + $0xa20] ss:$8 sps:$4 sm:$0xff]  }
  0x57   :  { %3280 = vmatpush1.bf16.msra.mxu1 %v5007_v28  ;;  %v5097_v28 = vld [vmem:[%s7504_s1 + $0x234] ss:$8 sps:$4 sm:$0xff]  }
  0x58   :  { %3608 = vmatpush1.bf16.msra.mxu0 %v5010_v29  ;;  %3281 = vmatprep.subr.bf16.mxu1 %v5015_v30  ;;  %v5100_v29 = vld [vmem:[%s7504_s1 + $0xa34] ss:$8 sps:$4 sm:$0xff]   ;;  %v5095_v30 = vld [vmem:[%s7504_s1 + $0x230] ss:$8 sps:$4 sm:$0xff]  }
  0x59   :  { %3609 = vmatprep.subr.bf16.mxu0 %v5018_v31  ;;  %v5098_v31 = vld [vmem:[%s7504_s1 + $0xa30] ss:$8 sps:$4 sm:$0xff]  }
  0x5b   :  { %3282 = vmatpush1.bf16.msra.mxu1 %v5013_v33  ;;  %v5106_v33 = vld [vmem:[%s7504_s1 + $0xa44] ss:$8 sps:$4 sm:$0xff]  }
  0x5c   :  { %3610 = vmatpush1.bf16.msra.mxu0 %v5016_v34  ;;  %3283 = vmatprep.subr.bf16.mxu1 %v5021_v37  ;;  %v5101_v34 = vld [vmem:[%s7504_s1 + $0x240] ss:$8 sps:$4 sm:$0xff]   ;;  %v5112_v37 = vld [vmem:[%s7504_s1 + $0xa54] ss:$8 sps:$4 sm:$0xff]  }
  0x5d   :  { %3611 = vmatprep.subr.bf16.mxu0 %v5024_v39  ;;  %v5110_v39 = vld [vmem:[%s7504_s1 + $0xa50] ss:$8 sps:$4 sm:$0xff]  }
  0x5f   :  { %3284 = vmatpush1.bf16.msra.mxu1 %v5019_v40  ;;  %v5115_v40 = vld [vmem:[%s7504_s1 + $0x264] ss:$8 sps:$4 sm:$0xff]  }
  0x60   :  { %3612 = vmatpush1.bf16.msra.mxu0 %v5022_v41  ;;  %3285 = vmatprep.subr.bf16.mxu1 %v5027_v42  ;;  %v5118_v41 = vld [vmem:[%s7504_s1 + $0xa64] ss:$8 sps:$4 sm:$0xff]   ;;  %v5113_v42 = vld [vmem:[%s7504_s1 + $0x260] ss:$8 sps:$4 sm:$0xff]  }
  0x61   :  { %3613 = vmatprep.subr.bf16.mxu0 %v5030_v43  ;;  %v5116_v43 = vld [vmem:[%s7504_s1 + $0xa60] ss:$8 sps:$4 sm:$0xff]  }
  0x63   :  { %3286 = vmatpush1.bf16.msra.mxu1 %v5025_v44  ;;  %v5121_v44 = vld [vmem:[%s7504_s1 + $0x274] ss:$8 sps:$4 sm:$0xff]  }
  0x64   :  { %3614 = vmatpush1.bf16.msra.mxu0 %v5028_v45  ;;  %3287 = vmatprep.subr.bf16.mxu1 %v5033_v46  ;;  %v5124_v45 = vld [vmem:[%s7504_s1 + $0xa74] ss:$8 sps:$4 sm:$0xff]   ;;  %v5119_v46 = vld [vmem:[%s7504_s1 + $0x270] ss:$8 sps:$4 sm:$0xff]  }
  0x65   :  { %3615 = vmatprep.subr.bf16.mxu0 %v5036_v47  ;;  %v5122_v47 = vld [vmem:[%s7504_s1 + $0xa70] ss:$8 sps:$4 sm:$0xff]  }
  0x67   :  { %3288 = vmatpush1.bf16.msra.mxu1 %v5031_v48  ;;  %v5127_v48 = vld [vmem:[%s7504_s1 + $0x284] ss:$8 sps:$4 sm:$0xff]  }
  0x68   :  { %3616 = vmatpush1.bf16.msra.mxu0 %v5034_v49  ;;  %3289 = vmatprep.subr.bf16.mxu1 %v5039_v50  ;;  %v5130_v49 = vld [vmem:[%s7504_s1 + $0xa84] ss:$8 sps:$4 sm:$0xff]   ;;  %v5125_v50 = vld [vmem:[%s7504_s1 + $0x280] ss:$8 sps:$4 sm:$0xff]  }
  0x69   :  { %3617 = vmatprep.subr.bf16.mxu0 %v5042_v51  ;;  %v5128_v51 = vld [vmem:[%s7504_s1 + $0xa80] ss:$8 sps:$4 sm:$0xff]  }
  0x6b   :  { %3290 = vmatpush1.bf16.msra.mxu1 %v5037_v52  ;;  %v5133_v52 = vld [vmem:[%s7504_s1 + $0x294] ss:$8 sps:$4 sm:$0xff]  }
  0x6c   :  { %3618 = vmatpush1.bf16.msra.mxu0 %v5040_v53  ;;  %3291 = vmatprep.subr.bf16.mxu1 %v5045_v54  ;;  %v5136_v53 = vld [vmem:[%s7504_s1 + $0xa94] ss:$8 sps:$4 sm:$0xff]   ;;  %v5131_v54 = vld [vmem:[%s7504_s1 + $0x290] ss:$8 sps:$4 sm:$0xff]  }
  0x6d   :  { %3619 = vmatprep.subr.bf16.mxu0 %v5048_v55  ;;  %v5134_v55 = vld [vmem:[%s7504_s1 + $0xa90] ss:$8 sps:$4 sm:$0xff]  }
  0x6f   :  { %3292 = vmatpush1.bf16.msra.mxu1 %v5043_v56  ;;  %v5139_v56 = vld [vmem:[%s7504_s1 + $0x2a4] ss:$8 sps:$4 sm:$0xff]  }
  0x70   :  { %3620 = vmatpush1.bf16.msra.mxu0 %v5046_v57  ;;  %3293 = vmatprep.subr.bf16.mxu1 %v5051_v58  ;;  %v5142_v57 = vld [vmem:[%s7504_s1 + $0xaa4] ss:$8 sps:$4 sm:$0xff]   ;;  %v5137_v58 = vld [vmem:[%s7504_s1 + $0x2a0] ss:$8 sps:$4 sm:$0xff]  }
  0x71   :  { %3621 = vmatprep.subr.bf16.mxu0 %v5054_v59  ;;  %v5140_v59 = vld [vmem:[%s7504_s1 + $0xaa0] ss:$8 sps:$4 sm:$0xff]  }
  0x73   :  { %3294 = vmatpush1.bf16.msra.mxu1 %v5049_v60  ;;  %v5145_v60 = vld [vmem:[%s7504_s1 + $0x2b4] ss:$8 sps:$4 sm:$0xff]  }
  0x74   :  { %3622 = vmatpush1.bf16.msra.mxu0 %v5052_v61  ;;  %3295 = vmatprep.subr.bf16.mxu1 %v5057_v62  ;;  %v5148_v61 = vld [vmem:[%s7504_s1 + $0xab4] ss:$8 sps:$4 sm:$0xff]   ;;  %v5143_v62 = vld [vmem:[%s7504_s1 + $0x2b0] ss:$8 sps:$4 sm:$0xff]  }
  0x75   :  { %3623 = vmatprep.subr.bf16.mxu0 %v5060_v63  ;;  %v5146_v63 = vld [vmem:[%s7504_s1 + $0xab0] ss:$8 sps:$4 sm:$0xff]  }
  0x77   :  { %3296 = vmatpush1.bf16.msra.mxu1 %v5055_v0  ;;  %v5151_v0 = vld [vmem:[%s7504_s1 + $0x2c4] ss:$8 sps:$4 sm:$0xff]  }
  0x78   :  { %3624 = vmatpush1.bf16.msra.mxu0 %v5058_v1  ;;  %3297 = vmatprep.subr.bf16.mxu1 %v5063_v2  ;;  %v5154_v1 = vld [vmem:[%s7504_s1 + $0xac4] ss:$8 sps:$4 sm:$0xff]   ;;  %v5149_v2 = vld [vmem:[%s7504_s1 + $0x2c0] ss:$8 sps:$4 sm:$0xff]  }
  0x79   :  { %3625 = vmatprep.subr.bf16.mxu0 %v5066_v3  ;;  %v5152_v3 = vld [vmem:[%s7504_s1 + $0xac0] ss:$8 sps:$4 sm:$0xff]  }
  0x7b   :  { %3298 = vmatpush1.bf16.msra.mxu1 %v5061_v4  ;;  %v5157_v4 = vld [vmem:[%s7504_s1 + $0x2d4] ss:$8 sps:$4 sm:$0xff]  }
  0x7c   :  { %3626 = vmatpush1.bf16.msra.mxu0 %v5064_v5  ;;  %3299 = vmatprep.subr.bf16.mxu1 %v5069_v6  ;;  %v5160_v5 = vld [vmem:[%s7504_s1 + $0xad4] ss:$8 sps:$4 sm:$0xff]   ;;  %v5155_v6 = vld [vmem:[%s7504_s1 + $0x2d0] ss:$8 sps:$4 sm:$0xff]  }
  0x7d   :  { %3627 = vmatprep.subr.bf16.mxu0 %v5072_v7  ;;  %v5158_v7 = vld [vmem:[%s7504_s1 + $0xad0] ss:$8 sps:$4 sm:$0xff]  }
  0x7f   :  { %3300 = vmatpush1.bf16.msra.mxu1 %v5067_v8  ;;  %v5163_v8 = vld [vmem:[%s7504_s1 + $0x2e4] ss:$8 sps:$4 sm:$0xff]  }
  0x80   :  { %3628 = vmatpush1.bf16.msra.mxu0 %v5070_v9  ;;  %3310 = vmatprep.subr.bf16.mxu1 %v5077_v10  ;;  %v5166_v9 = vld [vmem:[%s7504_s1 + $0xae4] ss:$8 sps:$4 sm:$0xff]   ;;  %v5161_v10 = vld [vmem:[%s7504_s1 + $0x2e0] ss:$8 sps:$4 sm:$0xff]  }
  0x81   :  { %3638 = vmatprep.subr.bf16.mxu0 %v5082_v11  ;;  %v5164_v11 = vld [vmem:[%s7504_s1 + $0xae0] ss:$8 sps:$4 sm:$0xff]  }
  0x82   :  { %3302 = vmatmul.mubr.bf16.vlgmr.msra.gmra.mrb[0].mxu1 %v4235_v12  ;;  %v5169_v12 = vld [vmem:[%s7504_s1 + $0x2f4] ss:$8 sps:$4 sm:$0xff]  }
  0x83   :  { %3630 = vmatmul.mubr.bf16.vlgmr.msra.gmra.mrb[0].mxu0 %v4251_v14  ;;  %3311 = vmatpush1.bf16.msra.mxu1 %v5075_v13  ;;  %v5172_v13 = vld [vmem:[%s7504_s1 + $0xaf4] ss:$8 sps:$4 sm:$0xff]   ;;  %v5167_v14 = vld [vmem:[%s7504_s1 + $0x2f0] ss:$8 sps:$4 sm:$0xff]  }
  0x84   :  { %3639 = vmatpush1.bf16.msra.mxu0 %v5080_v15  ;;  %3312 = vmatprep.subr.bf16.mxu1 %v5085_v16  ;;  %v5170_v15 = vld [vmem:[%s7504_s1 + $0xaf0] ss:$8 sps:$4 sm:$0xff]   ;;  %v5177_v16 = vld [vmem:[%s7504_s1 + $0x304] ss:$8 sps:$4 sm:$0xff]  }
  0x85   :  { %3640 = vmatprep.subr.bf16.mxu0 %v5088_v17  ;;  %3342 = vmatprep.mubr.bf16.mxu1 %v4238_v19  ;;  %v5182_v17 = vld [vmem:[%s7504_s1 + $0xb04] ss:$8 sps:$4 sm:$0xff]   ;;  %v5175_v19 = vld [vmem:[%s7504_s1 + $0x300] ss:$8 sps:$4 sm:$0xff]  }
  0x86   :  { %3670 = vmatprep.mubr.bf16.mxu0 %v4254_v23  ;;  %v4253_v23 = vcombine.low %v6199_v20, %v6199_v20 }
  0x87   :  { %3313 = vmatpush1.bf16.msra.mxu1 %v5083_v21  ;;  %v5180_v21 = vld [vmem:[%s7504_s1 + $0xb00] ss:$8 sps:$4 sm:$0xff]  }
  0x88   :  { %3641 = vmatpush1.bf16.msra.mxu0 %v5086_v22  ;;  %3314 = vmatprep.subr.bf16.mxu1 %v5091_v24  ;;  %v4237_v22 = vcombine.low %v6192_v18, %v6192_v18  ;;  %v6396_v24 = vld [vmem:[%s7503_s0 + $0x18] sm:$0xff] }
  0x89   :  { %3642 = vmatprep.subr.bf16.mxu0 %v5094_v25  ;;  %v6401_v25 = vld [vmem:[%s7503_s0 + $0x58] sm:$0xff]  ;;  %v4240_v20 = vcombine.high %v6396_v24, %v6396_v24 }
  0x8a   :  { %v5188_v18 = vld [vmem:[%s7504_s1 + $0xb14] ss:$8 sps:$4 sm:$0xff]  }
  0x8b   :  { %3315 = vmatpush1.bf16.msra.mxu1 %v5089_v26  ;;  %v5185_v26 = vld [vmem:[%s7504_s1 + $0x314] ss:$8 sps:$4 sm:$0xff]  }
  0x8c   :  { %3643 = vmatpush1.bf16.msra.mxu0 %v5092_v27  ;;  %3316 = vmatprep.subr.bf16.mxu1 %v5097_v28  ;;  %v4256_v27 = vcombine.high %v6401_v25, %v6401_v25  ;;  %v5183_v28 = vld [vmem:[%s7504_s1 + $0x310] ss:$8 sps:$4 sm:$0xff]  }
  0x8d   :  { %3644 = vmatprep.subr.bf16.mxu0 %v5100_v29  ;;  %v5186_v29 = vld [vmem:[%s7504_s1 + $0xb10] ss:$8 sps:$4 sm:$0xff]  }
  0x8f   :  { %3317 = vmatpush1.bf16.msra.mxu1 %v5095_v30  ;;  %v5191_v30 = vld [vmem:[%s7504_s1 + $0x324] ss:$8 sps:$4 sm:$0xff]  }
  0x90   :  { %3645 = vmatpush1.bf16.msra.mxu0 %v5098_v31  ;;  %3318 = vmatprep.subr.bf16.mxu1 %v5103_v32  ;;  %v5194_v31 = vld [vmem:[%s7504_s1 + $0xb24] ss:$8 sps:$4 sm:$0xff]   ;;  %v5189_v32 = vld [vmem:[%s7504_s1 + $0x320] ss:$8 sps:$4 sm:$0xff]  }
  0x91   :  { %3646 = vmatprep.subr.bf16.mxu0 %v5106_v33  ;;  %v5192_v33 = vld [vmem:[%s7504_s1 + $0xb20] ss:$8 sps:$4 sm:$0xff]  }
  0x93   :  { %3319 = vmatpush1.bf16.msra.mxu1 %v5101_v34  ;;  %v5197_v34 = vld [vmem:[%s7504_s1 + $0x334] ss:$8 sps:$4 sm:$0xff]  }
  0x94   :  { %3647 = vmatpush1.bf16.msra.mxu0 %v5104_v35  ;;  %3320 = vmatprep.subr.bf16.mxu1 %v5109_v36  ;;  %v5200_v35 = vld [vmem:[%s7504_s1 + $0xb34] ss:$8 sps:$4 sm:$0xff]   ;;  %v5195_v36 = vld [vmem:[%s7504_s1 + $0x330] ss:$8 sps:$4 sm:$0xff]  }
  0x95   :  { %3648 = vmatprep.subr.bf16.mxu0 %v5112_v37  ;;  %v5198_v37 = vld [vmem:[%s7504_s1 + $0xb30] ss:$8 sps:$4 sm:$0xff]  }
  0x97   :  { %3321 = vmatpush1.bf16.msra.mxu1 %v5107_v38  ;;  %v5203_v38 = vld [vmem:[%s7504_s1 + $0x344] ss:$8 sps:$4 sm:$0xff]  }
  0x98   :  { %3649 = vmatpush1.bf16.msra.mxu0 %v5110_v39  ;;  %3322 = vmatprep.subr.bf16.mxu1 %v5115_v40  ;;  %v5206_v39 = vld [vmem:[%s7504_s1 + $0xb44] ss:$8 sps:$4 sm:$0xff]   ;;  %v5201_v40 = vld [vmem:[%s7504_s1 + $0x340] ss:$8 sps:$4 sm:$0xff]  }
  0x99   :  { %3650 = vmatprep.subr.bf16.mxu0 %v5118_v41  ;;  %v5204_v41 = vld [vmem:[%s7504_s1 + $0xb40] ss:$8 sps:$4 sm:$0xff]  }
  0x9b   :  { %3323 = vmatpush1.bf16.msra.mxu1 %v5113_v42  ;;  %v5209_v42 = vld [vmem:[%s7504_s1 + $0x354] ss:$8 sps:$4 sm:$0xff]  }
  0x9c   :  { %3651 = vmatpush1.bf16.msra.mxu0 %v5116_v43  ;;  %3324 = vmatprep.subr.bf16.mxu1 %v5121_v44  ;;  %v5212_v43 = vld [vmem:[%s7504_s1 + $0xb54] ss:$8 sps:$4 sm:$0xff]   ;;  %v5207_v44 = vld [vmem:[%s7504_s1 + $0x350] ss:$8 sps:$4 sm:$0xff]  }
  0x9d   :  { %3652 = vmatprep.subr.bf16.mxu0 %v5124_v45  ;;  %v5210_v45 = vld [vmem:[%s7504_s1 + $0xb50] ss:$8 sps:$4 sm:$0xff]  }
  0x9f   :  { %3325 = vmatpush1.bf16.msra.mxu1 %v5119_v46  ;;  %v5215_v46 = vld [vmem:[%s7504_s1 + $0x364] ss:$8 sps:$4 sm:$0xff]  }
  0xa0   :  { %3653 = vmatpush1.bf16.msra.mxu0 %v5122_v47  ;;  %3326 = vmatprep.subr.bf16.mxu1 %v5127_v48  ;;  %v5218_v47 = vld [vmem:[%s7504_s1 + $0xb64] ss:$8 sps:$4 sm:$0xff]   ;;  %v5213_v48 = vld [vmem:[%s7504_s1 + $0x360] ss:$8 sps:$4 sm:$0xff]  }
  0xa1   :  { %3654 = vmatprep.subr.bf16.mxu0 %v5130_v49  ;;  %v5216_v49 = vld [vmem:[%s7504_s1 + $0xb60] ss:$8 sps:$4 sm:$0xff]  }
  0xa3   :  { %3327 = vmatpush1.bf16.msra.mxu1 %v5125_v50  ;;  %v5221_v50 = vld [vmem:[%s7504_s1 + $0x374] ss:$8 sps:$4 sm:$0xff]  }
  0xa4   :  { %3655 = vmatpush1.bf16.msra.mxu0 %v5128_v51  ;;  %3328 = vmatprep.subr.bf16.mxu1 %v5133_v52  ;;  %v5224_v51 = vld [vmem:[%s7504_s1 + $0xb74] ss:$8 sps:$4 sm:$0xff]   ;;  %v5219_v52 = vld [vmem:[%s7504_s1 + $0x370] ss:$8 sps:$4 sm:$0xff]  }
  0xa5   :  { %3656 = vmatprep.subr.bf16.mxu0 %v5136_v53  ;;  %v5222_v53 = vld [vmem:[%s7504_s1 + $0xb70] ss:$8 sps:$4 sm:$0xff]  }
  0xa7   :  { %3329 = vmatpush1.bf16.msra.mxu1 %v5131_v54  ;;  %v5227_v54 = vld [vmem:[%s7504_s1 + $0x384] ss:$8 sps:$4 sm:$0xff]  }
  0xa8   :  { %3657 = vmatpush1.bf16.msra.mxu0 %v5134_v55  ;;  %3330 = vmatprep.subr.bf16.mxu1 %v5139_v56  ;;  %v5230_v55 = vld [vmem:[%s7504_s1 + $0xb84] ss:$8 sps:$4 sm:$0xff]   ;;  %v5225_v56 = vld [vmem:[%s7504_s1 + $0x380] ss:$8 sps:$4 sm:$0xff]  }
  0xa9   :  { %3658 = vmatprep.subr.bf16.mxu0 %v5142_v57  ;;  %v5228_v57 = vld [vmem:[%s7504_s1 + $0xb80] ss:$8 sps:$4 sm:$0xff]  }
  0xab   :  { %3331 = vmatpush1.bf16.msra.mxu1 %v5137_v58  ;;  %v5233_v58 = vld [vmem:[%s7504_s1 + $0x394] ss:$8 sps:$4 sm:$0xff]  }
  0xac   :  { %3659 = vmatpush1.bf16.msra.mxu0 %v5140_v59  ;;  %3332 = vmatprep.subr.bf16.mxu1 %v5145_v60  ;;  %v5236_v59 = vld [vmem:[%s7504_s1 + $0xb94] ss:$8 sps:$4 sm:$0xff]   ;;  %v5231_v60 = vld [vmem:[%s7504_s1 + $0x390] ss:$8 sps:$4 sm:$0xff]  }
  0xad   :  { %3660 = vmatprep.subr.bf16.mxu0 %v5148_v61  ;;  %v5234_v61 = vld [vmem:[%s7504_s1 + $0xb90] ss:$8 sps:$4 sm:$0xff]  }
  0xaf   :  { %3333 = vmatpush1.bf16.msra.mxu1 %v5143_v62  ;;  %v5239_v62 = vld [vmem:[%s7504_s1 + $0x3a4] ss:$8 sps:$4 sm:$0xff]  }
  0xb0   :  { %3661 = vmatpush1.bf16.msra.mxu0 %v5146_v63  ;;  %3334 = vmatprep.subr.bf16.mxu1 %v5151_v0  ;;  %v5242_v63 = vld [vmem:[%s7504_s1 + $0xba4] ss:$8 sps:$4 sm:$0xff]   ;;  %v5237_v0 = vld [vmem:[%s7504_s1 + $0x3a0] ss:$8 sps:$4 sm:$0xff]  }
  0xb1   :  { %3662 = vmatprep.subr.bf16.mxu0 %v5154_v1  ;;  %v5240_v1 = vld [vmem:[%s7504_s1 + $0xba0] ss:$8 sps:$4 sm:$0xff]  }
  0xb3   :  { %3335 = vmatpush1.bf16.msra.mxu1 %v5149_v2  ;;  %v5245_v2 = vld [vmem:[%s7504_s1 + $0x3b4] ss:$8 sps:$4 sm:$0xff]  }
  0xb4   :  { %3663 = vmatpush1.bf16.msra.mxu0 %v5152_v3  ;;  %3336 = vmatprep.subr.bf16.mxu1 %v5157_v4  ;;  %v5248_v3 = vld [vmem:[%s7504_s1 + $0xbb4] ss:$8 sps:$4 sm:$0xff]   ;;  %v5243_v4 = vld [vmem:[%s7504_s1 + $0x3b0] ss:$8 sps:$4 sm:$0xff]  }
  0xb5   :  { %3664 = vmatprep.subr.bf16.mxu0 %v5160_v5  ;;  %v5246_v5 = vld [vmem:[%s7504_s1 + $0xbb0] ss:$8 sps:$4 sm:$0xff]  }
  0xb7   :  { %3337 = vmatpush1.bf16.msra.mxu1 %v5155_v6  ;;  %v5251_v6 = vld [vmem:[%s7504_s1 + $0x3c4] ss:$8 sps:$4 sm:$0xff]  }
  0xb8   :  { %3665 = vmatpush1.bf16.msra.mxu0 %v5158_v7  ;;  %3338 = vmatprep.subr.bf16.mxu1 %v5163_v8  ;;  %v5254_v7 = vld [vmem:[%s7504_s1 + $0xbc4] ss:$8 sps:$4 sm:$0xff]   ;;  %v5249_v8 = vld [vmem:[%s7504_s1 + $0x3c0] ss:$8 sps:$4 sm:$0xff]  }
  0xb9   :  { %3666 = vmatprep.subr.bf16.mxu0 %v5166_v9  ;;  %v5252_v9 = vld [vmem:[%s7504_s1 + $0xbc0] ss:$8 sps:$4 sm:$0xff]  }
  0xbb   :  { %3339 = vmatpush1.bf16.msra.mxu1 %v5161_v10  ;;  %v5257_v10 = vld [vmem:[%s7504_s1 + $0x3d4] ss:$8 sps:$4 sm:$0xff]  }
  0xbc   :  { %3667 = vmatpush1.bf16.msra.mxu0 %v5164_v11  ;;  %3340 = vmatprep.subr.bf16.mxu1 %v5169_v12  ;;  %v5260_v11 = vld [vmem:[%s7504_s1 + $0xbd4] ss:$8 sps:$4 sm:$0xff]   ;;  %v5255_v12 = vld [vmem:[%s7504_s1 + $0x3d0] ss:$8 sps:$4 sm:$0xff]  }
  0xbd   :  { %3668 = vmatprep.subr.bf16.mxu0 %v5172_v13  ;;  %v5258_v13 = vld [vmem:[%s7504_s1 + $0xbd0] ss:$8 sps:$4 sm:$0xff]  }
  0xbf   :  { %3341 = vmatpush1.bf16.msra.mxu1 %v5167_v14  ;;  %v5263_v14 = vld [vmem:[%s7504_s1 + $0x3e4] ss:$8 sps:$4 sm:$0xff]  }
  0xc0   :  { %3669 = vmatpush1.bf16.msra.mxu0 %v5170_v15  ;;  %3351 = vmatprep.subr.bf16.mxu1 %v5177_v16  ;;  %v5266_v15 = vld [vmem:[%s7504_s1 + $0xbe4] ss:$8 sps:$4 sm:$0xff]   ;;  %v5261_v16 = vld [vmem:[%s7504_s1 + $0x3e0] ss:$8 sps:$4 sm:$0xff]  }
  0xc1   :  { %3679 = vmatprep.subr.bf16.mxu0 %v5182_v17  ;;  %v5264_v17 = vld [vmem:[%s7504_s1 + $0xbe0] ss:$8 sps:$4 sm:$0xff]  }
  0xc2   :  { %3343 = vmatmul.mubr.bf16.vlgmr.msra.gmra.mrb[0].mxu1 %v4237_v22  ;;  %v5267_v22 = vld [vmem:[%s7504_s1 + $0x3f0] ss:$8 sps:$4 sm:$0xff]  }
  0xc3   :  { %3671 = vmatmul.mubr.bf16.vlgmr.msra.gmra.mrb[0].mxu0 %v4253_v23  ;;  %3352 = vmatpush1.bf16.msra.mxu1 %v5175_v19  ;;  %v5269_v19 = vld [vmem:[%s7504_s1 + $0x3f4] ss:$8 sps:$4 sm:$0xff]   ;;  %v5270_v23 = vld [vmem:[%s7504_s1 + $0xbf0] ss:$8 sps:$4 sm:$0xff]  }
  0xc4   :  { %3680 = vmatpush1.bf16.msra.mxu0 %v5180_v21  ;;  %3353 = vmatprep.subr.bf16.mxu1 %v5185_v26  ;;  %v5272_v21 = vld [vmem:[%s7504_s1 + $0xbf4] ss:$8 sps:$4 sm:$0xff]   ;;  %v5277_v26 = vld [vmem:[%s7504_s1 + $0x404] ss:$8 sps:$4 sm:$0xff]  }
  0xc5   :  { %3681 = vmatprep.subr.bf16.mxu0 %v5188_v18  ;;  %3383 = vmatprep.mubr.bf16.mxu1 %v4240_v20  ;;  %v5282_v18 = vld [vmem:[%s7504_s1 + $0xc04] ss:$8 sps:$4 sm:$0xff]  }
  0xc6   :  { %3711 = vmatprep.mubr.bf16.mxu0 %v4256_v27  ;;  %v6596_v20 = vld [vmem:[%s7503_s0 + $0x20] sm:$0xff]  ;;  %v4239_v27 = vcombine.low %v6396_v24, %v6396_v24  ;;  %v5285_v24 = vld [vmem:[%s7504_s1 + $0x414] ss:$8 sps:$4 sm:$0xff]  }
  0xc7   :  { %3354 = vmatpush1.bf16.msra.mxu1 %v5183_v28  ;;  %v4255_v28 = vcombine.low %v6401_v25, %v6401_v25  ;;  %v5288_v25 = vld [vmem:[%s7504_s1 + $0xc14] ss:$8 sps:$4 sm:$0xff]  }
  0xc8   :  { %3682 = vmatpush1.bf16.msra.mxu0 %v5186_v29  ;;  %3355 = vmatprep.subr.bf16.mxu1 %v5191_v30  ;;  %v6605_v29 = vld [vmem:[%s7503_s0 + $0x60] sm:$0xff] }
  0xc9   :  { %3683 = vmatprep.subr.bf16.mxu0 %v5194_v31  ;;  %v5275_v30 = vld [vmem:[%s7504_s1 + $0x400] ss:$8 sps:$4 sm:$0xff]  }
  0xca   :  { %v5280_v31 = vld [vmem:[%s7504_s1 + $0xc00] ss:$8 sps:$4 sm:$0xff]  }
  0xcb   :  { %3356 = vmatpush1.bf16.msra.mxu1 %v5189_v32  ;;  %v4242_v32 = vcombine.high %v6596_v20, %v6596_v20 }
  0xcc   :  { %3684 = vmatpush1.bf16.msra.mxu0 %v5192_v33  ;;  %3357 = vmatprep.subr.bf16.mxu1 %v5197_v34  ;;  %v4258_v33 = vcombine.high %v6605_v29, %v6605_v29  ;;  %v5283_v34 = vld [vmem:[%s7504_s1 + $0x410] ss:$8 sps:$4 sm:$0xff]  }
  0xcd   :  { %3685 = vmatprep.subr.bf16.mxu0 %v5200_v35  ;;  %v5286_v35 = vld [vmem:[%s7504_s1 + $0xc10] ss:$8 sps:$4 sm:$0xff]  }
  0xcf   :  { %3358 = vmatpush1.bf16.msra.mxu1 %v5195_v36  ;;  %v5291_v36 = vld [vmem:[%s7504_s1 + $0x424] ss:$8 sps:$4 sm:$0xff]  }
  0xd0   :  { %3686 = vmatpush1.bf16.msra.mxu0 %v5198_v37  ;;  %3359 = vmatprep.subr.bf16.mxu1 %v5203_v38  ;;  %v5294_v37 = vld [vmem:[%s7504_s1 + $0xc24] ss:$8 sps:$4 sm:$0xff]   ;;  %v5289_v38 = vld [vmem:[%s7504_s1 + $0x420] ss:$8 sps:$4 sm:$0xff]  }
  0xd1   :  { %3687 = vmatprep.subr.bf16.mxu0 %v5206_v39  ;;  %v5292_v39 = vld [vmem:[%s7504_s1 + $0xc20] ss:$8 sps:$4 sm:$0xff]  }
  0xd3   :  { %3360 = vmatpush1.bf16.msra.mxu1 %v5201_v40  ;;  %v5297_v40 = vld [vmem:[%s7504_s1 + $0x434] ss:$8 sps:$4 sm:$0xff]  }
  0xd4   :  { %3688 = vmatpush1.bf16.msra.mxu0 %v5204_v41  ;;  %3361 = vmatprep.subr.bf16.mxu1 %v5209_v42  ;;  %v5300_v41 = vld [vmem:[%s7504_s1 + $0xc34] ss:$8 sps:$4 sm:$0xff]   ;;  %v5295_v42 = vld [vmem:[%s7504_s1 + $0x430] ss:$8 sps:$4 sm:$0xff]  }
  0xd5   :  { %3689 = vmatprep.subr.bf16.mxu0 %v5212_v43  ;;  %v5298_v43 = vld [vmem:[%s7504_s1 + $0xc30] ss:$8 sps:$4 sm:$0xff]  }
  0xd7   :  { %3362 = vmatpush1.bf16.msra.mxu1 %v5207_v44  ;;  %v5303_v44 = vld [vmem:[%s7504_s1 + $0x444] ss:$8 sps:$4 sm:$0xff]  }
  0xd8   :  { %3690 = vmatpush1.bf16.msra.mxu0 %v5210_v45  ;;  %3363 = vmatprep.subr.bf16.mxu1 %v5215_v46  ;;  %v5306_v45 = vld [vmem:[%s7504_s1 + $0xc44] ss:$8 sps:$4 sm:$0xff]   ;;  %v5301_v46 = vld [vmem:[%s7504_s1 + $0x440] ss:$8 sps:$4 sm:$0xff]  }
  0xd9   :  { %3691 = vmatprep.subr.bf16.mxu0 %v5218_v47  ;;  %v5304_v47 = vld [vmem:[%s7504_s1 + $0xc40] ss:$8 sps:$4 sm:$0xff]  }
  0xdb   :  { %3364 = vmatpush1.bf16.msra.mxu1 %v5213_v48  ;;  %v5309_v48 = vld [vmem:[%s7504_s1 + $0x454] ss:$8 sps:$4 sm:$0xff]  }
  0xdc   :  { %3692 = vmatpush1.bf16.msra.mxu0 %v5216_v49  ;;  %3365 = vmatprep.subr.bf16.mxu1 %v5221_v50  ;;  %v5312_v49 = vld [vmem:[%s7504_s1 + $0xc54] ss:$8 sps:$4 sm:$0xff]   ;;  %v5307_v50 = vld [vmem:[%s7504_s1 + $0x450] ss:$8 sps:$4 sm:$0xff]  }
  0xdd   :  { %3693 = vmatprep.subr.bf16.mxu0 %v5224_v51  ;;  %v5310_v51 = vld [vmem:[%s7504_s1 + $0xc50] ss:$8 sps:$4 sm:$0xff]  }
  0xdf   :  { %3366 = vmatpush1.bf16.msra.mxu1 %v5219_v52  ;;  %v5315_v52 = vld [vmem:[%s7504_s1 + $0x464] ss:$8 sps:$4 sm:$0xff]  }
  0xe0   :  { %3694 = vmatpush1.bf16.msra.mxu0 %v5222_v53  ;;  %3367 = vmatprep.subr.bf16.mxu1 %v5227_v54  ;;  %v5318_v53 = vld [vmem:[%s7504_s1 + $0xc64] ss:$8 sps:$4 sm:$0xff]   ;;  %v5313_v54 = vld [vmem:[%s7504_s1 + $0x460] ss:$8 sps:$4 sm:$0xff]  }
  0xe1   :  { %3695 = vmatprep.subr.bf16.mxu0 %v5230_v55  ;;  %v5316_v55 = vld [vmem:[%s7504_s1 + $0xc60] ss:$8 sps:$4 sm:$0xff]  }
  0xe3   :  { %3368 = vmatpush1.bf16.msra.mxu1 %v5225_v56  ;;  %v5321_v56 = vld [vmem:[%s7504_s1 + $0x474] ss:$8 sps:$4 sm:$0xff]  }
  0xe4   :  { %3696 = vmatpush1.bf16.msra.mxu0 %v5228_v57  ;;  %3369 = vmatprep.subr.bf16.mxu1 %v5233_v58  ;;  %v5324_v57 = vld [vmem:[%s7504_s1 + $0xc74] ss:$8 sps:$4 sm:$0xff]   ;;  %v5319_v58 = vld [vmem:[%s7504_s1 + $0x470] ss:$8 sps:$4 sm:$0xff]  }
  0xe5   :  { %3697 = vmatprep.subr.bf16.mxu0 %v5236_v59  ;;  %v5322_v59 = vld [vmem:[%s7504_s1 + $0xc70] ss:$8 sps:$4 sm:$0xff]  }
  0xe7   :  { %3370 = vmatpush1.bf16.msra.mxu1 %v5231_v60  ;;  %v5327_v60 = vld [vmem:[%s7504_s1 + $0x484] ss:$8 sps:$4 sm:$0xff]  }
  0xe8   :  { %3698 = vmatpush1.bf16.msra.mxu0 %v5234_v61  ;;  %3371 = vmatprep.subr.bf16.mxu1 %v5239_v62  ;;  %v5330_v61 = vld [vmem:[%s7504_s1 + $0xc84] ss:$8 sps:$4 sm:$0xff]   ;;  %v5325_v62 = vld [vmem:[%s7504_s1 + $0x480] ss:$8 sps:$4 sm:$0xff]  }
  0xe9   :  { %3699 = vmatprep.subr.bf16.mxu0 %v5242_v63  ;;  %v5328_v63 = vld [vmem:[%s7504_s1 + $0xc80] ss:$8 sps:$4 sm:$0xff]  }
  0xeb   :  { %3372 = vmatpush1.bf16.msra.mxu1 %v5237_v0  ;;  %v5333_v0 = vld [vmem:[%s7504_s1 + $0x494] ss:$8 sps:$4 sm:$0xff]  }
  0xec   :  { %3700 = vmatpush1.bf16.msra.mxu0 %v5240_v1  ;;  %3373 = vmatprep.subr.bf16.mxu1 %v5245_v2  ;;  %v5336_v1 = vld [vmem:[%s7504_s1 + $0xc94] ss:$8 sps:$4 sm:$0xff]   ;;  %v5331_v2 = vld [vmem:[%s7504_s1 + $0x490] ss:$8 sps:$4 sm:$0xff]  }
  0xed   :  { %3701 = vmatprep.subr.bf16.mxu0 %v5248_v3  ;;  %v5334_v3 = vld [vmem:[%s7504_s1 + $0xc90] ss:$8 sps:$4 sm:$0xff]  }
  0xef   :  { %3374 = vmatpush1.bf16.msra.mxu1 %v5243_v4  ;;  %v5339_v4 = vld [vmem:[%s7504_s1 + $0x4a4] ss:$8 sps:$4 sm:$0xff]  }
  0xf0   :  { %3702 = vmatpush1.bf16.msra.mxu0 %v5246_v5  ;;  %3375 = vmatprep.subr.bf16.mxu1 %v5251_v6  ;;  %v5342_v5 = vld [vmem:[%s7504_s1 + $0xca4] ss:$8 sps:$4 sm:$0xff]   ;;  %v5337_v6 = vld [vmem:[%s7504_s1 + $0x4a0] ss:$8 sps:$4 sm:$0xff]  }
  0xf1   :  { %3703 = vmatprep.subr.bf16.mxu0 %v5254_v7  ;;  %v5340_v7 = vld [vmem:[%s7504_s1 + $0xca0] ss:$8 sps:$4 sm:$0xff]  }
  0xf3   :  { %3376 = vmatpush1.bf16.msra.mxu1 %v5249_v8  ;;  %v5345_v8 = vld [vmem:[%s7504_s1 + $0x4b4] ss:$8 sps:$4 sm:$0xff]  }
  0xf4   :  { %3704 = vmatpush1.bf16.msra.mxu0 %v5252_v9  ;;  %3377 = vmatprep.subr.bf16.mxu1 %v5257_v10  ;;  %v5348_v9 = vld [vmem:[%s7504_s1 + $0xcb4] ss:$8 sps:$4 sm:$0xff]   ;;  %v5343_v10 = vld [vmem:[%s7504_s1 + $0x4b0] ss:$8 sps:$4 sm:$0xff]  }
  0xf5   :  { %3705 = vmatprep.subr.bf16.mxu0 %v5260_v11  ;;  %v5346_v11 = vld [vmem:[%s7504_s1 + $0xcb0] ss:$8 sps:$4 sm:$0xff]  }
  0xf7   :  { %3378 = vmatpush1.bf16.msra.mxu1 %v5255_v12  ;;  %v5351_v12 = vld [vmem:[%s7504_s1 + $0x4c4] ss:$8 sps:$4 sm:$0xff]  }
  0xf8   :  { %3706 = vmatpush1.bf16.msra.mxu0 %v5258_v13  ;;  %3379 = vmatprep.subr.bf16.mxu1 %v5263_v14  ;;  %v5354_v13 = vld [vmem:[%s7504_s1 + $0xcc4] ss:$8 sps:$4 sm:$0xff]   ;;  %v5349_v14 = vld [vmem:[%s7504_s1 + $0x4c0] ss:$8 sps:$4 sm:$0xff]  }
  0xf9   :  { %3707 = vmatprep.subr.bf16.mxu0 %v5266_v15  ;;  %v5352_v15 = vld [vmem:[%s7504_s1 + $0xcc0] ss:$8 sps:$4 sm:$0xff]  }
  0xfb   :  { %3380 = vmatpush1.bf16.msra.mxu1 %v5261_v16  ;;  %v5357_v16 = vld [vmem:[%s7504_s1 + $0x4d4] ss:$8 sps:$4 sm:$0xff]  }
  0xfc   :  { %3708 = vmatpush1.bf16.msra.mxu0 %v5264_v17  ;;  %3381 = vmatprep.subr.bf16.mxu1 %v5269_v19  ;;  %v5360_v17 = vld [vmem:[%s7504_s1 + $0xcd4] ss:$8 sps:$4 sm:$0xff]   ;;  %v5355_v19 = vld [vmem:[%s7504_s1 + $0x4d0] ss:$8 sps:$4 sm:$0xff]  }
  0xfd   :  { %3709 = vmatprep.subr.bf16.mxu0 %v5272_v21  ;;  %v5358_v21 = vld [vmem:[%s7504_s1 + $0xcd0] ss:$8 sps:$4 sm:$0xff]  }
  0xff   :  { %3382 = vmatpush1.bf16.msra.mxu1 %v5267_v22  ;;  %v5363_v22 = vld [vmem:[%s7504_s1 + $0x4e4] ss:$8 sps:$4 sm:$0xff]  }
 0x100   :  { %3710 = vmatpush1.bf16.msra.mxu0 %v5270_v23  ;;  %3392 = vmatprep.subr.bf16.mxu1 %v5277_v26  ;;  %v5366_v23 = vld [vmem:[%s7504_s1 + $0xce4] ss:$8 sps:$4 sm:$0xff]   ;;  %v5361_v26 = vld [vmem:[%s7504_s1 + $0x4e0] ss:$8 sps:$4 sm:$0xff]  }
 0x101   :  { %3720 = vmatprep.subr.bf16.mxu0 %v5282_v18  ;;  %v5364_v18 = vld [vmem:[%s7504_s1 + $0xce0] ss:$8 sps:$4 sm:$0xff]  }
 0x102   :  { %3384 = vmatmul.mubr.bf16.vlgmr.msra.gmra.mrb[0].mxu1 %v4239_v27  ;;  %v5369_v27 = vld [vmem:[%s7504_s1 + $0x4f4] ss:$8 sps:$4 sm:$0xff]  }
 0x103   :  { %3712 = vmatmul.mubr.bf16.vlgmr.msra.gmra.mrb[0].mxu0 %v4255_v28  ;;  %3393 = vmatpush1.bf16.msra.mxu1 %v5275_v30  ;;  %v5372_v28 = vld [vmem:[%s7504_s1 + $0xcf4] ss:$8 sps:$4 sm:$0xff]   ;;  %v5367_v30 = vld [vmem:[%s7504_s1 + $0x4f0] ss:$8 sps:$4 sm:$0xff]  }
 0x104   :  { %3721 = vmatpush1.bf16.msra.mxu0 %v5280_v31  ;;  %3394 = vmatprep.subr.bf16.mxu1 %v5285_v24  ;;  %v5370_v31 = vld [vmem:[%s7504_s1 + $0xcf0] ss:$8 sps:$4 sm:$0xff]   ;;  %v5377_v24 = vld [vmem:[%s7504_s1 + $0x504] ss:$8 sps:$4 sm:$0xff]  }
 0x105   :  { %3722 = vmatprep.subr.bf16.mxu0 %v5288_v25  ;;  %3424 = vmatprep.mubr.bf16.mxu1 %v4242_v32  ;;  %v5382_v25 = vld [vmem:[%s7504_s1 + $0xd04] ss:$8 sps:$4 sm:$0xff]  }
 0x106   :  { %3752 = vmatprep.mubr.bf16.mxu0 %v4258_v33  ;;  %v6806_v32 = vld [vmem:[%s7503_s0 + $0x28] sm:$0xff] }
 0x107   :  { %3395 = vmatpush1.bf16.msra.mxu1 %v5283_v34  ;;  %v6811_v33 = vld [vmem:[%s7503_s0 + $0x68] sm:$0xff]  ;;  %v4241_v34 = vcombine.low %v6596_v20, %v6596_v20  ;;  %v5388_v20 = vld [vmem:[%s7504_s1 + $0xd14] ss:$8 sps:$4 sm:$0xff]  }
 0x108   :  { %3723 = vmatpush1.bf16.msra.mxu0 %v5286_v35  ;;  %3396 = vmatprep.subr.bf16.mxu1 %v5291_v36  ;;  %v4257_v35 = vcombine.low %v6605_v29, %v6605_v29  ;;  %v5375_v36 = vld [vmem:[%s7504_s1 + $0x500] ss:$8 sps:$4 sm:$0xff]   ;;  %v4244_v29 = vcombine.high %v6806_v32, %v6806_v32 }
 0x109   :  { %3724 = vmatprep.subr.bf16.mxu0 %v5294_v37  ;;  %v5380_v37 = vld [vmem:[%s7504_s1 + $0xd00] ss:$8 sps:$4 sm:$0xff]  }
 0x10b   :  { %3397 = vmatpush1.bf16.msra.mxu1 %v5289_v38  ;;  %v5385_v38 = vld [vmem:[%s7504_s1 + $0x514] ss:$8 sps:$4 sm:$0xff]  }
 0x10c   :  { %3725 = vmatpush1.bf16.msra.mxu0 %v5292_v39  ;;  %3398 = vmatprep.subr.bf16.mxu1 %v5297_v40  ;;  %v4260_v39 = vcombine.high %v6811_v33, %v6811_v33  ;;  %v5383_v40 = vld [vmem:[%s7504_s1 + $0x510] ss:$8 sps:$4 sm:$0xff]  }
 0x10d   :  { %3726 = vmatprep.subr.bf16.mxu0 %v5300_v41  ;;  %v5386_v41 = vld [vmem:[%s7504_s1 + $0xd10] ss:$8 sps:$4 sm:$0xff]  }
 0x10f   :  { %3399 = vmatpush1.bf16.msra.mxu1 %v5295_v42  ;;  %v5391_v42 = vld [vmem:[%s7504_s1 + $0x524] ss:$8 sps:$4 sm:$0xff]  }
 0x110   :  { %3727 = vmatpush1.bf16.msra.mxu0 %v5298_v43  ;;  %3400 = vmatprep.subr.bf16.mxu1 %v5303_v44  ;;  %v5394_v43 = vld [vmem:[%s7504_s1 + $0xd24] ss:$8 sps:$4 sm:$0xff]   ;;  %v5389_v44 = vld [vmem:[%s7504_s1 + $0x520] ss:$8 sps:$4 sm:$0xff]  }
 0x111   :  { %3728 = vmatprep.subr.bf16.mxu0 %v5306_v45  ;;  %v5392_v45 = vld [vmem:[%s7504_s1 + $0xd20] ss:$8 sps:$4 sm:$0xff]  }
 0x113   :  { %3401 = vmatpush1.bf16.msra.mxu1 %v5301_v46  ;;  %v5397_v46 = vld [vmem:[%s7504_s1 + $0x534] ss:$8 sps:$4 sm:$0xff]  }
 0x114   :  { %3729 = vmatpush1.bf16.msra.mxu0 %v5304_v47  ;;  %3402 = vmatprep.subr.bf16.mxu1 %v5309_v48  ;;  %v5400_v47 = vld [vmem:[%s7504_s1 + $0xd34] ss:$8 sps:$4 sm:$0xff]   ;;  %v5395_v48 = vld [vmem:[%s7504_s1 + $0x530] ss:$8 sps:$4 sm:$0xff]  }
 0x115   :  { %3730 = vmatprep.subr.bf16.mxu0 %v5312_v49  ;;  %v5398_v49 = vld [vmem:[%s7504_s1 + $0xd30] ss:$8 sps:$4 sm:$0xff]  }
 0x117   :  { %3403 = vmatpush1.bf16.msra.mxu1 %v5307_v50  ;;  %v5403_v50 = vld [vmem:[%s7504_s1 + $0x544] ss:$8 sps:$4 sm:$0xff]  }
 0x118   :  { %3731 = vmatpush1.bf16.msra.mxu0 %v5310_v51  ;;  %3404 = vmatprep.subr.bf16.mxu1 %v5315_v52  ;;  %v5406_v51 = vld [vmem:[%s7504_s1 + $0xd44] ss:$8 sps:$4 sm:$0xff]   ;;  %v5401_v52 = vld [vmem:[%s7504_s1 + $0x540] ss:$8 sps:$4 sm:$0xff]  }
 0x119   :  { %3732 = vmatprep.subr.bf16.mxu0 %v5318_v53  ;;  %v5404_v53 = vld [vmem:[%s7504_s1 + $0xd40] ss:$8 sps:$4 sm:$0xff]  }
 0x11b   :  { %3405 = vmatpush1.bf16.msra.mxu1 %v5313_v54  ;;  %v5409_v54 = vld [vmem:[%s7504_s1 + $0x554] ss:$8 sps:$4 sm:$0xff]  }
 0x11c   :  { %3733 = vmatpush1.bf16.msra.mxu0 %v5316_v55  ;;  %3406 = vmatprep.subr.bf16.mxu1 %v5321_v56  ;;  %v5412_v55 = vld [vmem:[%s7504_s1 + $0xd54] ss:$8 sps:$4 sm:$0xff]   ;;  %v5407_v56 = vld [vmem:[%s7504_s1 + $0x550] ss:$8 sps:$4 sm:$0xff]  }
 0x11d   :  { %3734 = vmatprep.subr.bf16.mxu0 %v5324_v57  ;;  %v5410_v57 = vld [vmem:[%s7504_s1 + $0xd50] ss:$8 sps:$4 sm:$0xff]  }
 0x11f   :  { %3407 = vmatpush1.bf16.msra.mxu1 %v5319_v58  ;;  %v5415_v58 = vld [vmem:[%s7504_s1 + $0x564] ss:$8 sps:$4 sm:$0xff]  }
 0x120   :  { %3735 = vmatpush1.bf16.msra.mxu0 %v5322_v59  ;;  %3408 = vmatprep.subr.bf16.mxu1 %v5327_v60  ;;  %v5418_v59 = vld [vmem:[%s7504_s1 + $0xd64] ss:$8 sps:$4 sm:$0xff]  }
 0x121   :  { %3736 = vmatprep.subr.bf16.mxu0 %v5330_v61 }
 0x123   :  { %3409 = vmatpush1.bf16.msra.mxu1 %v5325_v62 }
 0x124   :  { %3737 = vmatpush1.bf16.msra.mxu0 %v5328_v63  ;;  %3410 = vmatprep.subr.bf16.mxu1 %v5333_v0 }
 0x125   :  { %3738 = vmatprep.subr.bf16.mxu0 %v5336_v1 }
 0x127   :  { %3411 = vmatpush1.bf16.msra.mxu1 %v5331_v2 }
 0x128   :  { %3739 = vmatpush1.bf16.msra.mxu0 %v5334_v3  ;;  %3412 = vmatprep.subr.bf16.mxu1 %v5339_v4 }
 0x129   :  { %3740 = vmatprep.subr.bf16.mxu0 %v5342_v5 }
 0x12b   :  { %3413 = vmatpush1.bf16.msra.mxu1 %v5337_v6 }
 0x12c   :  { %3741 = vmatpush1.bf16.msra.mxu0 %v5340_v7  ;;  %3414 = vmatprep.subr.bf16.mxu1 %v5345_v8 }
 0x12d   :  { %3742 = vmatprep.subr.bf16.mxu0 %v5348_v9 }
 0x12f   :  { %3415 = vmatpush1.bf16.msra.mxu1 %v5343_v10 }
 0x130   :  { %3743 = vmatpush1.bf16.msra.mxu0 %v5346_v11  ;;  %3416 = vmatprep.subr.bf16.mxu1 %v5351_v12 }
 0x131   :  { %3744 = vmatprep.subr.bf16.mxu0 %v5354_v13 }
 0x133   :  { %3417 = vmatpush1.bf16.msra.mxu1 %v5349_v14 }
 0x134   :  { %3745 = vmatpush1.bf16.msra.mxu0 %v5352_v15  ;;  %3418 = vmatprep.subr.bf16.mxu1 %v5357_v16 }
 0x135   :  { %3746 = vmatprep.subr.bf16.mxu0 %v5360_v17 }
 0x137   :  { %3419 = vmatpush1.bf16.msra.mxu1 %v5355_v19 }
 0x138   :  { %3747 = vmatpush1.bf16.msra.mxu0 %v5358_v21  ;;  %3420 = vmatprep.subr.bf16.mxu1 %v5363_v22 }
 0x139   :  { %3748 = vmatprep.subr.bf16.mxu0 %v5366_v23 }
 0x13b   :  { %3421 = vmatpush1.bf16.msra.mxu1 %v5361_v26 }
 0x13c   :  { %3749 = vmatpush1.bf16.msra.mxu0 %v5364_v18  ;;  %3422 = vmatprep.subr.bf16.mxu1 %v5369_v27 }
 0x13d   :  { %3750 = vmatprep.subr.bf16.mxu0 %v5372_v28 }
 0x13f   :  { %3423 = vmatpush1.bf16.msra.mxu1 %v5367_v30 }
 0x140   :  { %3751 = vmatpush1.bf16.msra.mxu0 %v5370_v31  ;;  %3433 = vmatprep.subr.bf16.mxu1 %v5377_v24 }
 0x141   :  { %3761 = vmatprep.subr.bf16.mxu0 %v5382_v25 }
 0x142   :  { %3425 = vmatmul.mubr.bf16.vlgmr.msra.gmra.mrb[0].mxu1 %v4241_v34 }
 0x143   :  { %3753 = vmatmul.mubr.bf16.vlgmr.msra.gmra.mrb[0].mxu0 %v4257_v35  ;;  %3434 = vmatpush1.bf16.msra.mxu1 %v5375_v36 }
 0x144   :  { %3762 = vmatpush1.bf16.msra.mxu0 %v5380_v37  ;;  %3435 = vmatprep.subr.bf16.mxu1 %v5385_v38 }
 0x145   :  { %3763 = vmatprep.subr.bf16.mxu0 %v5388_v20  ;;  %3465 = vmatprep.mubr.bf16.mxu1 %v4244_v29 }
 0x146   :  { %3793 = vmatprep.mubr.bf16.mxu0 %v4260_v39 }
 0x147   :  { %3436 = vmatpush1.bf16.msra.mxu1 %v5383_v40 }
 0x148   :  { %3764 = vmatpush1.bf16.msra.mxu0 %v5386_v41  ;;  %3437 = vmatprep.subr.bf16.mxu1 %v5391_v42 }
 0x149   :  { %3765 = vmatprep.subr.bf16.mxu0 %v5394_v43 }
 0x14b   :  { %3438 = vmatpush1.bf16.msra.mxu1 %v5389_v44 }
 0x14c   :  { %3766 = vmatpush1.bf16.msra.mxu0 %v5392_v45  ;;  %3439 = vmatprep.subr.bf16.mxu1 %v5397_v46 }
 0x14d   :  { %3767 = vmatprep.subr.bf16.mxu0 %v5400_v47 }
 0x14f   :  { %3440 = vmatpush1.bf16.msra.mxu1 %v5395_v48 }
 0x150   :  { %3768 = vmatpush1.bf16.msra.mxu0 %v5398_v49  ;;  %3441 = vmatprep.subr.bf16.mxu1 %v5403_v50 }
 0x151   :  { %3769 = vmatprep.subr.bf16.mxu0 %v5406_v51 }
 0x153   :  { %3442 = vmatpush1.bf16.msra.mxu1 %v5401_v52 }
 0x154   :  { %3770 = vmatpush1.bf16.msra.mxu0 %v5404_v53  ;;  %3443 = vmatprep.subr.bf16.mxu1 %v5409_v54 }
 0x155   :  { %3771 = vmatprep.subr.bf16.mxu0 %v5412_v55 }
 0x156   :  { %12 = vsyncpa [#allocation3], 0  ;;  %v5413_v60 = vld [vmem:[%s7504_s1 + $0x560] ss:$8 sps:$4 sm:$0xff]   ;;  %v5421_v62 = vld [vmem:[%s7504_s1 + $0x574] ss:$8 sps:$4 sm:$0xff]   ;;  %v4243_v29 = vcombine.low %v6806_v32, %v6806_v32  ;;  %v4259_v39 = vcombine.low %v6811_v33, %v6811_v33 }
 0x157   :  { %3444 = vmatpush1.bf16.msra.mxu1 %v5407_v56  ;;  %v5416_v61 = vld [vmem:[%s7504_s1 + $0xd60] ss:$8 sps:$4 sm:$0xff]   ;;  %v5424_v63 = vld [vmem:[%s7504_s1 + $0xd74] ss:$8 sps:$4 sm:$0xff]   ;;  %v5419_v0 = vld [vmem:[%s7504_s1 + $0x570] ss:$8 sps:$4 sm:$0xff]  }
 0x158   :  { %3772 = vmatpush1.bf16.msra.mxu0 %v5410_v57  ;;  %3445 = vmatprep.subr.bf16.mxu1 %v5415_v58  ;;  %v5422_v1 = vld [vmem:[%s7504_s1 + $0xd70] ss:$8 sps:$4 sm:$0xff]   ;;  %v5427_v2 = vld [vmem:[%s7504_s1 + $0x584] ss:$8 sps:$4 sm:$0xff]   ;;  %v5425_v4 = vld [vmem:[%s7504_s1 + $0x580] ss:$8 sps:$4 sm:$0xff]  }
 0x159   :  { %3773 = vmatprep.subr.bf16.mxu0 %v5418_v59  ;;  %v5430_v3 = vld [vmem:[%s7504_s1 + $0xd84] ss:$8 sps:$4 sm:$0xff]   ;;  %v5428_v5 = vld [vmem:[%s7504_s1 + $0xd80] ss:$8 sps:$4 sm:$0xff]   ;;  %v5433_v6 = vld [vmem:[%s7504_s1 + $0x594] ss:$8 sps:$4 sm:$0xff]  }
 0x15a   :  { %v5436_v7 = vld [vmem:[%s7504_s1 + $0xd94] ss:$8 sps:$4 sm:$0xff]   ;;  %v5431_v8 = vld [vmem:[%s7504_s1 + $0x590] ss:$8 sps:$4 sm:$0xff]   ;;  %v5439_v10 = vld [vmem:[%s7504_s1 + $0x5a4] ss:$8 sps:$4 sm:$0xff]  }
 0x15b   :  { %3446 = vmatpush1.bf16.msra.mxu1 %v5413_v60  ;;  %v5434_v9 = vld [vmem:[%s7504_s1 + $0xd90] ss:$8 sps:$4 sm:$0xff]   ;;  %v5442_v11 = vld [vmem:[%s7504_s1 + $0xda4] ss:$8 sps:$4 sm:$0xff]   ;;  %v5437_v12 = vld [vmem:[%s7504_s1 + $0x5a0] ss:$8 sps:$4 sm:$0xff]  }
 0x15c   :  { %3774 = vmatpush1.bf16.msra.mxu0 %v5416_v61  ;;  %3447 = vmatprep.subr.bf16.mxu1 %v5421_v62  ;;  %v5440_v13 = vld [vmem:[%s7504_s1 + $0xda0] ss:$8 sps:$4 sm:$0xff]   ;;  %v5445_v14 = vld [vmem:[%s7504_s1 + $0x5b4] ss:$8 sps:$4 sm:$0xff]   ;;  %v5443_v16 = vld [vmem:[%s7504_s1 + $0x5b0] ss:$8 sps:$4 sm:$0xff]  }
 0x15d   :  { %3775 = vmatprep.subr.bf16.mxu0 %v5424_v63  ;;  %v5448_v15 = vld [vmem:[%s7504_s1 + $0xdb4] ss:$8 sps:$4 sm:$0xff]   ;;  %v5446_v17 = vld [vmem:[%s7504_s1 + $0xdb0] ss:$8 sps:$4 sm:$0xff]   ;;  %v5451_v19 = vld [vmem:[%s7504_s1 + $0x5c4] ss:$8 sps:$4 sm:$0xff]  }
 0x15e   :  { %v5454_v21 = vld [vmem:[%s7504_s1 + $0xdc4] ss:$8 sps:$4 sm:$0xff]   ;;  %v5449_v22 = vld [vmem:[%s7504_s1 + $0x5c0] ss:$8 sps:$4 sm:$0xff]   ;;  %v5457_v26 = vld [vmem:[%s7504_s1 + $0x5d4] ss:$8 sps:$4 sm:$0xff]  }
 0x15f   :  { %3448 = vmatpush1.bf16.msra.mxu1 %v5419_v0  ;;  %v5452_v23 = vld [vmem:[%s7504_s1 + $0xdc0] ss:$8 sps:$4 sm:$0xff]   ;;  %v5460_v18 = vld [vmem:[%s7504_s1 + $0xdd4] ss:$8 sps:$4 sm:$0xff]   ;;  %v5455_v27 = vld [vmem:[%s7504_s1 + $0x5d0] ss:$8 sps:$4 sm:$0xff]  }
 0x160   :  { %3776 = vmatpush1.bf16.msra.mxu0 %v5422_v1  ;;  %3449 = vmatprep.subr.bf16.mxu1 %v5427_v2  ;;  %v5458_v28 = vld [vmem:[%s7504_s1 + $0xdd0] ss:$8 sps:$4 sm:$0xff]   ;;  %v5463_v30 = vld [vmem:[%s7504_s1 + $0x5e4] ss:$8 sps:$4 sm:$0xff]   ;;  %v5461_v24 = vld [vmem:[%s7504_s1 + $0x5e0] ss:$8 sps:$4 sm:$0xff]  }
 0x161   :  { %3777 = vmatprep.subr.bf16.mxu0 %v5430_v3  ;;  %v5466_v31 = vld [vmem:[%s7504_s1 + $0xde4] ss:$8 sps:$4 sm:$0xff]   ;;  %v5464_v25 = vld [vmem:[%s7504_s1 + $0xde0] ss:$8 sps:$4 sm:$0xff]   ;;  %v5469_v34 = vld [vmem:[%s7504_s1 + $0x5f4] ss:$8 sps:$4 sm:$0xff]  }
 0x162   :  { %v5472_v35 = vld [vmem:[%s7504_s1 + $0xdf4] ss:$8 sps:$4 sm:$0xff]   ;;  %v5467_v36 = vld [vmem:[%s7504_s1 + $0x5f0] ss:$8 sps:$4 sm:$0xff]   ;;  %v5477_v38 = vld [vmem:[%s7504_s1 + $0x604] ss:$8 sps:$4 sm:$0xff]  }
 0x163   :  { %3450 = vmatpush1.bf16.msra.mxu1 %v5425_v4  ;;  %v5470_v37 = vld [vmem:[%s7504_s1 + $0xdf0] ss:$8 sps:$4 sm:$0xff]   ;;  %v5482_v20 = vld [vmem:[%s7504_s1 + $0xe04] ss:$8 sps:$4 sm:$0xff]   ;;  %v5475_v42 = vld [vmem:[%s7504_s1 + $0x600] ss:$8 sps:$4 sm:$0xff]  }
 0x164   :  { %3778 = vmatpush1.bf16.msra.mxu0 %v5428_v5  ;;  %3451 = vmatprep.subr.bf16.mxu1 %v5433_v6  ;;  %v7020_v40 = vld [vmem:[%s7503_s0 + $0x30] sm:$0xff]  ;;  %v5480_v32 = vld [vmem:[%s7504_s1 + $0xe00] ss:$8 sps:$4 sm:$0xff]   ;;  %v5491_v48 = vld [vmem:[%s7504_s1 + $0x624] ss:$8 sps:$4 sm:$0xff]   ;;  %vm3966_vm2 = vcmask 64512  }
 0x165   :  { %3779 = vmatprep.subr.bf16.mxu0 %v5436_v7  ;;  %v7025_v41 = vld [vmem:[%s7503_s0 + $0x70] sm:$0xff]  ;;  %v4246_v44 = vcombine.high %v7020_v40, %v7020_v40  ;;  %v5494_v49 = vld [vmem:[%s7504_s1 + $0xe24] ss:$8 sps:$4 sm:$0xff]   ;;  %v5489_v50 = vld [vmem:[%s7504_s1 + $0x620] ss:$8 sps:$4 sm:$0xff]   ;;  %s5722_s27 = smov [#allocation2]  }
 0x166   :  { %v5485_v33 = vld [vmem:[%s7504_s1 + $0x614] ss:$8 sps:$4 sm:$0xff]   ;;  %v4262_v45 = vcombine.high %v7025_v41, %v7025_v41  ;;  %v5483_v46 = vld [vmem:[%s7504_s1 + $0x610] ss:$8 sps:$4 sm:$0xff]   ;;  %v5492_v51 = vld [vmem:[%s7504_s1 + $0xe20] ss:$8 sps:$4 sm:$0xff]  }
 0x167   :  { %3452 = vmatpush1.bf16.msra.mxu1 %v5431_v8  ;;  %v5488_v43 = vld [vmem:[%s7504_s1 + $0xe14] ss:$8 sps:$4 sm:$0xff]   ;;  %v5486_v47 = vld [vmem:[%s7504_s1 + $0xe10] ss:$8 sps:$4 sm:$0xff]   ;;  %v5503_v56 = vld [vmem:[%s7504_s1 + $0x644] ss:$8 sps:$4 sm:$0xff]  }
 0x168   :  { %3780 = vmatpush1.bf16.msra.mxu0 %v5434_v9  ;;  %3453 = vmatprep.subr.bf16.mxu1 %v5439_v10  ;;  %v5497_v52 = vld [vmem:[%s7504_s1 + $0x634] ss:$8 sps:$4 sm:$0xff]   ;;  %v5495_v54 = vld [vmem:[%s7504_s1 + $0x630] ss:$8 sps:$4 sm:$0xff]   ;;  %v5506_v57 = vld [vmem:[%s7504_s1 + $0xe44] ss:$8 sps:$4 sm:$0xff]  }
 0x169   :  { %3781 = vmatprep.subr.bf16.mxu0 %v5442_v11  ;;  %v5500_v53 = vld [vmem:[%s7504_s1 + $0xe34] ss:$8 sps:$4 sm:$0xff]   ;;  %v5498_v55 = vld [vmem:[%s7504_s1 + $0xe30] ss:$8 sps:$4 sm:$0xff]   ;;  %v5501_v58 = vld [vmem:[%s7504_s1 + $0x640] ss:$8 sps:$4 sm:$0xff]  }
 0x16a   :  { %v5504_v59 = vld [vmem:[%s7504_s1 + $0xe40] ss:$8 sps:$4 sm:$0xff]   ;;  %v5509_v60 = vld [vmem:[%s7504_s1 + $0x654] ss:$8 sps:$4 sm:$0xff]   ;;  %v5507_v62 = vld [vmem:[%s7504_s1 + $0x650] ss:$8 sps:$4 sm:$0xff]  }
 0x16b   :  { %3454 = vmatpush1.bf16.msra.mxu1 %v5437_v12  ;;  %v5512_v61 = vld [vmem:[%s7504_s1 + $0xe54] ss:$8 sps:$4 sm:$0xff]   ;;  %v5510_v63 = vld [vmem:[%s7504_s1 + $0xe50] ss:$8 sps:$4 sm:$0xff]   ;;  %v5515_v0 = vld [vmem:[%s7504_s1 + $0x664] ss:$8 sps:$4 sm:$0xff]  }
 0x16c   :  { %3782 = vmatpush1.bf16.msra.mxu0 %v5440_v13  ;;  %3455 = vmatprep.subr.bf16.mxu1 %v5445_v14  ;;  %v5518_v1 = vld [vmem:[%s7504_s1 + $0xe64] ss:$8 sps:$4 sm:$0xff]   ;;  %v5513_v2 = vld [vmem:[%s7504_s1 + $0x660] ss:$8 sps:$4 sm:$0xff]   ;;  %v5521_v4 = vld [vmem:[%s7504_s1 + $0x674] ss:$8 sps:$4 sm:$0xff]  }
 0x16d   :  { %3783 = vmatprep.subr.bf16.mxu0 %v5448_v15  ;;  %v5516_v3 = vld [vmem:[%s7504_s1 + $0xe60] ss:$8 sps:$4 sm:$0xff]   ;;  %v5524_v5 = vld [vmem:[%s7504_s1 + $0xe74] ss:$8 sps:$4 sm:$0xff]   ;;  %v5519_v6 = vld [vmem:[%s7504_s1 + $0x670] ss:$8 sps:$4 sm:$0xff]  }
 0x16e   :  { %v5522_v7 = vld [vmem:[%s7504_s1 + $0xe70] ss:$8 sps:$4 sm:$0xff]   ;;  %v5527_v8 = vld [vmem:[%s7504_s1 + $0x684] ss:$8 sps:$4 sm:$0xff]   ;;  %v5525_v10 = vld [vmem:[%s7504_s1 + $0x680] ss:$8 sps:$4 sm:$0xff]  }
 0x16f   :  { %3456 = vmatpush1.bf16.msra.mxu1 %v5443_v16  ;;  %v5530_v9 = vld [vmem:[%s7504_s1 + $0xe84] ss:$8 sps:$4 sm:$0xff]   ;;  %v5528_v11 = vld [vmem:[%s7504_s1 + $0xe80] ss:$8 sps:$4 sm:$0xff]   ;;  %v5533_v12 = vld [vmem:[%s7504_s1 + $0x694] ss:$8 sps:$4 sm:$0xff]  }
 0x170   :  { %3784 = vmatpush1.bf16.msra.mxu0 %v5446_v17  ;;  %3457 = vmatprep.subr.bf16.mxu1 %v5451_v19  ;;  %v5536_v13 = vld [vmem:[%s7504_s1 + $0xe94] ss:$8 sps:$4 sm:$0xff]   ;;  %v5531_v14 = vld [vmem:[%s7504_s1 + $0x690] ss:$8 sps:$4 sm:$0xff]   ;;  %v5539_v16 = vld [vmem:[%s7504_s1 + $0x6a4] ss:$8 sps:$4 sm:$0xff]  }
 0x171   :  { %3785 = vmatprep.subr.bf16.mxu0 %v5454_v21  ;;  %v5534_v15 = vld [vmem:[%s7504_s1 + $0xe90] ss:$8 sps:$4 sm:$0xff]   ;;  %v5542_v17 = vld [vmem:[%s7504_s1 + $0xea4] ss:$8 sps:$4 sm:$0xff]   ;;  %v5537_v19 = vld [vmem:[%s7504_s1 + $0x6a0] ss:$8 sps:$4 sm:$0xff]  }
 0x172   :  { %v5540_v21 = vld [vmem:[%s7504_s1 + $0xea0] ss:$8 sps:$4 sm:$0xff]   ;;  %s4225_s28 = sshll.u32 %s5722_s27, 4  ;;  %s4226_s28 = int_to_ptr.vmem [resolvable:$true] %s4225_s28 }
 0x173   :  { %3458 = vmatpush1.bf16.msra.mxu1 %v5449_v22  ;;  %v5545_v22 = vld [vmem:[%s7504_s1 + $0x6b4] ss:$8 sps:$4 sm:$0xff]   ;;  %p5702_p1 = scmp.lt.s32.totalorder %s4226_s28, %s4226_s28 }
 0x174   :  { %3786 = vmatpush1.bf16.msra.mxu0 %v5452_v23  ;;  %3459 = vmatprep.subr.bf16.mxu1 %v5457_v26  ;;  %v5548_v23 = vld [vmem:[%s7504_s1 + $0xeb4] ss:$8 sps:$4 sm:$0xff]   ;;  %v5543_v26 = vld [vmem:[%s7504_s1 + $0x6b0] ss:$8 sps:$4 sm:$0xff]  }
 0x175   :  { %3787 = vmatprep.subr.bf16.mxu0 %v5460_v18  ;;  %v5546_v18 = vld [vmem:[%s7504_s1 + $0xeb0] ss:$8 sps:$4 sm:$0xff]  }
 0x177   :  { %3460 = vmatpush1.bf16.msra.mxu1 %v5455_v27  ;;  %v5551_v27 = vld [vmem:[%s7504_s1 + $0x6c4] ss:$8 sps:$4 sm:$0xff]  }
 0x178   :  { %3788 = vmatpush1.bf16.msra.mxu0 %v5458_v28  ;;  %3461 = vmatprep.subr.bf16.mxu1 %v5463_v30  ;;  %v5554_v28 = vld [vmem:[%s7504_s1 + $0xec4] ss:$8 sps:$4 sm:$0xff]   ;;  %v5549_v30 = vld [vmem:[%s7504_s1 + $0x6c0] ss:$8 sps:$4 sm:$0xff]  }
 0x179   :  { %3789 = vmatprep.subr.bf16.mxu0 %v5466_v31  ;;  %v5552_v31 = vld [vmem:[%s7504_s1 + $0xec0] ss:$8 sps:$4 sm:$0xff]  }
 0x17b   :  { %3462 = vmatpush1.bf16.msra.mxu1 %v5461_v24  ;;  %v5557_v24 = vld [vmem:[%s7504_s1 + $0x6d4] ss:$8 sps:$4 sm:$0xff]  }
 0x17c   :  { %3790 = vmatpush1.bf16.msra.mxu0 %v5464_v25  ;;  %3463 = vmatprep.subr.bf16.mxu1 %v5469_v34  ;;  %v5560_v25 = vld [vmem:[%s7504_s1 + $0xed4] ss:$8 sps:$4 sm:$0xff]   ;;  %v5555_v34 = vld [vmem:[%s7504_s1 + $0x6d0] ss:$8 sps:$4 sm:$0xff]  }
 0x17d   :  { %3791 = vmatprep.subr.bf16.mxu0 %v5472_v35  ;;  %v5558_v35 = vld [vmem:[%s7504_s1 + $0xed0] ss:$8 sps:$4 sm:$0xff]  }
 0x17f   :  { %3464 = vmatpush1.bf16.msra.mxu1 %v5467_v36  ;;  %v5563_v36 = vld [vmem:[%s7504_s1 + $0x6e4] ss:$8 sps:$4 sm:$0xff]  }
 0x180   :  { %3792 = vmatpush1.bf16.msra.mxu0 %v5470_v37  ;;  %3474 = vmatprep.subr.bf16.mxu1 %v5477_v38  ;;  %v5566_v37 = vld [vmem:[%s7504_s1 + $0xee4] ss:$8 sps:$4 sm:$0xff]   ;;  %v5561_v38 = vld [vmem:[%s7504_s1 + $0x6e0] ss:$8 sps:$4 sm:$0xff]  }
 0x181   :  { %3802 = vmatprep.subr.bf16.mxu0 %v5482_v20  ;;  %v5564_v20 = vld [vmem:[%s7504_s1 + $0xee0] ss:$8 sps:$4 sm:$0xff]  }
 0x182   :  { %3466 = vmatmul.mubr.bf16.vlgmr.msra.gmra.mrb[0].mxu1 %v4243_v29  ;;  %v5569_v29 = vld [vmem:[%s7504_s1 + $0x6f4] ss:$8 sps:$4 sm:$0xff]  }
 0x183   :  { %3794 = vmatmul.mubr.bf16.vlgmr.msra.gmra.mrb[0].mxu0 %v4259_v39  ;;  %3475 = vmatpush1.bf16.msra.mxu1 %v5475_v42  ;;  %v5572_v39 = vld [vmem:[%s7504_s1 + $0xef4] ss:$8 sps:$4 sm:$0xff]   ;;  %v5567_v42 = vld [vmem:[%s7504_s1 + $0x6f0] ss:$8 sps:$4 sm:$0xff]  }
 0x184   :  { %3803 = vmatpush1.bf16.msra.mxu0 %v5480_v32  ;;  %3476 = vmatprep.subr.bf16.mxu1 %v5485_v33  ;;  %v5570_v32 = vld [vmem:[%s7504_s1 + $0xef0] ss:$8 sps:$4 sm:$0xff]   ;;  %v5577_v33 = vld [vmem:[%s7504_s1 + $0x704] ss:$8 sps:$4 sm:$0xff]  }
 0x185   :  { %3804 = vmatprep.subr.bf16.mxu0 %v5488_v43  ;;  %3506 = vmatprep.mubr.bf16.mxu1 %v4246_v44  ;;  %v5582_v43 = vld [vmem:[%s7504_s1 + $0xf04] ss:$8 sps:$4 sm:$0xff]   ;;  %v4245_v44 = vcombine.low %v7020_v40, %v7020_v40  ;;  %v5580_v40 = vld [vmem:[%s7504_s1 + $0xf00] ss:$8 sps:$4 sm:$0xff]  }
 0x186   :  { %3834 = vmatprep.mubr.bf16.mxu0 %v4262_v45  ;;  %v4261_v45 = vcombine.low %v7025_v41, %v7025_v41  ;;  %v5585_v41 = vld [vmem:[%s7504_s1 + $0x714] ss:$8 sps:$4 sm:$0xff]  }
 0x187   :  { %3477 = vmatpush1.bf16.msra.mxu1 %v5483_v46  ;;  %v7230_v46 = vld [vmem:[%s7503_s0 + $0x38] sm:$0xff] }
 0x188   :  { %3805 = vmatpush1.bf16.msra.mxu0 %v5486_v47  ;;  %3478 = vmatprep.subr.bf16.mxu1 %v5491_v48  ;;  %v7235_v47 = vld [vmem:[%s7503_s0 + $0x78] sm:$0xff]  ;;  %v5575_v48 = vld [vmem:[%s7504_s1 + $0x700] ss:$8 sps:$4 sm:$0xff]  }
 0x189   :  { %3806 = vmatprep.subr.bf16.mxu0 %v5494_v49  ;;  %v5588_v49 = vld [vmem:[%s7504_s1 + $0xf14] ss:$8 sps:$4 sm:$0xff]  }
 0x18b   :  { %3479 = vmatpush1.bf16.msra.mxu1 %v5489_v50  ;;  %v4248_v50 = vcombine.high %v7230_v46, %v7230_v46 }
 0x18c   :  { %3807 = vmatpush1.bf16.msra.mxu0 %v5492_v51  ;;  %3480 = vmatprep.subr.bf16.mxu1 %v5497_v52  ;;  %v4264_v51 = vcombine.high %v7235_v47, %v7235_v47  ;;  %v5583_v52 = vld [vmem:[%s7504_s1 + $0x710] ss:$8 sps:$4 sm:$0xff]  }
 0x18d   :  { %3808 = vmatprep.subr.bf16.mxu0 %v5500_v53  ;;  %v5586_v53 = vld [vmem:[%s7504_s1 + $0xf10] ss:$8 sps:$4 sm:$0xff]  }
 0x18f   :  { %3481 = vmatpush1.bf16.msra.mxu1 %v5495_v54  ;;  %v5591_v54 = vld [vmem:[%s7504_s1 + $0x724] ss:$8 sps:$4 sm:$0xff]  }
 0x190   :  { %3809 = vmatpush1.bf16.msra.mxu0 %v5498_v55  ;;  %3482 = vmatprep.subr.bf16.mxu1 %v5503_v56  ;;  %v5594_v55 = vld [vmem:[%s7504_s1 + $0xf24] ss:$8 sps:$4 sm:$0xff]   ;;  %v5589_v56 = vld [vmem:[%s7504_s1 + $0x720] ss:$8 sps:$4 sm:$0xff]  }
 0x191   :  { %3810 = vmatprep.subr.bf16.mxu0 %v5506_v57  ;;  %v5592_v57 = vld [vmem:[%s7504_s1 + $0xf20] ss:$8 sps:$4 sm:$0xff]  }
 0x193   :  { %3483 = vmatpush1.bf16.msra.mxu1 %v5501_v58  ;;  %v5597_v58 = vld [vmem:[%s7504_s1 + $0x734] ss:$8 sps:$4 sm:$0xff]  }
 0x194   :  { %3811 = vmatpush1.bf16.msra.mxu0 %v5504_v59  ;;  %3484 = vmatprep.subr.bf16.mxu1 %v5509_v60  ;;  %v5600_v59 = vld [vmem:[%s7504_s1 + $0xf34] ss:$8 sps:$4 sm:$0xff]   ;;  %v5595_v60 = vld [vmem:[%s7504_s1 + $0x730] ss:$8 sps:$4 sm:$0xff]  }
 0x195   :  { %3812 = vmatprep.subr.bf16.mxu0 %v5512_v61  ;;  %v5598_v61 = vld [vmem:[%s7504_s1 + $0xf30] ss:$8 sps:$4 sm:$0xff]  }
 0x197   :  { %3485 = vmatpush1.bf16.msra.mxu1 %v5507_v62  ;;  %v5603_v62 = vld [vmem:[%s7504_s1 + $0x744] ss:$8 sps:$4 sm:$0xff]  }
 0x198   :  { %3813 = vmatpush1.bf16.msra.mxu0 %v5510_v63  ;;  %3486 = vmatprep.subr.bf16.mxu1 %v5515_v0  ;;  %v5606_v63 = vld [vmem:[%s7504_s1 + $0xf44] ss:$8 sps:$4 sm:$0xff]   ;;  %v5601_v0 = vld [vmem:[%s7504_s1 + $0x740] ss:$8 sps:$4 sm:$0xff]  }
 0x199   :  { %3814 = vmatprep.subr.bf16.mxu0 %v5518_v1  ;;  %v5604_v1 = vld [vmem:[%s7504_s1 + $0xf40] ss:$8 sps:$4 sm:$0xff]  }
 0x19b   :  { %3487 = vmatpush1.bf16.msra.mxu1 %v5513_v2  ;;  %v5609_v2 = vld [vmem:[%s7504_s1 + $0x754] ss:$8 sps:$4 sm:$0xff]  }
 0x19c   :  { %3815 = vmatpush1.bf16.msra.mxu0 %v5516_v3  ;;  %3488 = vmatprep.subr.bf16.mxu1 %v5521_v4  ;;  %v5612_v3 = vld [vmem:[%s7504_s1 + $0xf54] ss:$8 sps:$4 sm:$0xff]   ;;  %v5607_v4 = vld [vmem:[%s7504_s1 + $0x750] ss:$8 sps:$4 sm:$0xff]  }
 0x19d   :  { %3816 = vmatprep.subr.bf16.mxu0 %v5524_v5  ;;  %v5610_v5 = vld [vmem:[%s7504_s1 + $0xf50] ss:$8 sps:$4 sm:$0xff]  }
 0x19f   :  { %3489 = vmatpush1.bf16.msra.mxu1 %v5519_v6  ;;  %v5615_v6 = vld [vmem:[%s7504_s1 + $0x764] ss:$8 sps:$4 sm:$0xff]  }
 0x1a0   :  { %3817 = vmatpush1.bf16.msra.mxu0 %v5522_v7  ;;  %3490 = vmatprep.subr.bf16.mxu1 %v5527_v8  ;;  %v5618_v7 = vld [vmem:[%s7504_s1 + $0xf64] ss:$8 sps:$4 sm:$0xff]   ;;  %v5613_v8 = vld [vmem:[%s7504_s1 + $0x760] ss:$8 sps:$4 sm:$0xff]  }
 0x1a1   :  { %3818 = vmatprep.subr.bf16.mxu0 %v5530_v9  ;;  %v5616_v9 = vld [vmem:[%s7504_s1 + $0xf60] ss:$8 sps:$4 sm:$0xff]  }
 0x1a3   :  { %3491 = vmatpush1.bf16.msra.mxu1 %v5525_v10  ;;  %v5621_v10 = vld [vmem:[%s7504_s1 + $0x774] ss:$8 sps:$4 sm:$0xff]  }
 0x1a4   :  { %3819 = vmatpush1.bf16.msra.mxu0 %v5528_v11  ;;  %3492 = vmatprep.subr.bf16.mxu1 %v5533_v12  ;;  %v5624_v11 = vld [vmem:[%s7504_s1 + $0xf74] ss:$8 sps:$4 sm:$0xff]   ;;  %v5619_v12 = vld [vmem:[%s7504_s1 + $0x770] ss:$8 sps:$4 sm:$0xff]  }
 0x1a5   :  { %3820 = vmatprep.subr.bf16.mxu0 %v5536_v13  ;;  %v5622_v13 = vld [vmem:[%s7504_s1 + $0xf70] ss:$8 sps:$4 sm:$0xff]  }
 0x1a7   :  { %3493 = vmatpush1.bf16.msra.mxu1 %v5531_v14  ;;  %v5627_v14 = vld [vmem:[%s7504_s1 + $0x784] ss:$8 sps:$4 sm:$0xff]  }
 0x1a8   :  { %3821 = vmatpush1.bf16.msra.mxu0 %v5534_v15  ;;  %3494 = vmatprep.subr.bf16.mxu1 %v5539_v16  ;;  %v5630_v15 = vld [vmem:[%s7504_s1 + $0xf84] ss:$8 sps:$4 sm:$0xff]   ;;  %v5625_v16 = vld [vmem:[%s7504_s1 + $0x780] ss:$8 sps:$4 sm:$0xff]  }
 0x1a9   :  { %3822 = vmatprep.subr.bf16.mxu0 %v5542_v17  ;;  %v5628_v17 = vld [vmem:[%s7504_s1 + $0xf80] ss:$8 sps:$4 sm:$0xff]  }
 0x1ab   :  { %3495 = vmatpush1.bf16.msra.mxu1 %v5537_v19  ;;  %v5633_v19 = vld [vmem:[%s7504_s1 + $0x794] ss:$8 sps:$4 sm:$0xff]  }
 0x1ac   :  { %3823 = vmatpush1.bf16.msra.mxu0 %v5540_v21  ;;  %3496 = vmatprep.subr.bf16.mxu1 %v5545_v22  ;;  %v5636_v21 = vld [vmem:[%s7504_s1 + $0xf94] ss:$8 sps:$4 sm:$0xff]   ;;  %v5631_v22 = vld [vmem:[%s7504_s1 + $0x790] ss:$8 sps:$4 sm:$0xff]  }
 0x1ad   :  { %3824 = vmatprep.subr.bf16.mxu0 %v5548_v23  ;;  %v5634_v23 = vld [vmem:[%s7504_s1 + $0xf90] ss:$8 sps:$4 sm:$0xff]  }
 0x1af   :  { %3497 = vmatpush1.bf16.msra.mxu1 %v5543_v26  ;;  %v5639_v26 = vld [vmem:[%s7504_s1 + $0x7a4] ss:$8 sps:$4 sm:$0xff]  }
 0x1b0   :  { %3825 = vmatpush1.bf16.msra.mxu0 %v5546_v18  ;;  %3498 = vmatprep.subr.bf16.mxu1 %v5551_v27  ;;  %v5642_v18 = vld [vmem:[%s7504_s1 + $0xfa4] ss:$8 sps:$4 sm:$0xff]   ;;  %v5637_v27 = vld [vmem:[%s7504_s1 + $0x7a0] ss:$8 sps:$4 sm:$0xff]  }
 0x1b1   :  { %3826 = vmatprep.subr.bf16.mxu0 %v5554_v28  ;;  %v5640_v28 = vld [vmem:[%s7504_s1 + $0xfa0] ss:$8 sps:$4 sm:$0xff]  }
 0x1b3   :  { %3499 = vmatpush1.bf16.msra.mxu1 %v5549_v30  ;;  %v5645_v30 = vld [vmem:[%s7504_s1 + $0x7b4] ss:$8 sps:$4 sm:$0xff]  }
 0x1b4   :  { %3827 = vmatpush1.bf16.msra.mxu0 %v5552_v31  ;;  %3500 = vmatprep.subr.bf16.mxu1 %v5557_v24  ;;  %v5648_v31 = vld [vmem:[%s7504_s1 + $0xfb4] ss:$8 sps:$4 sm:$0xff]   ;;  %v5643_v24 = vld [vmem:[%s7504_s1 + $0x7b0] ss:$8 sps:$4 sm:$0xff]  }
 0x1b5   :  { %3828 = vmatprep.subr.bf16.mxu0 %v5560_v25  ;;  %v5646_v25 = vld [vmem:[%s7504_s1 + $0xfb0] ss:$8 sps:$4 sm:$0xff]  }
 0x1b7   :  { %3501 = vmatpush1.bf16.msra.mxu1 %v5555_v34  ;;  %v5651_v34 = vld [vmem:[%s7504_s1 + $0x7c4] ss:$8 sps:$4 sm:$0xff]  }
 0x1b8   :  { %3829 = vmatpush1.bf16.msra.mxu0 %v5558_v35  ;;  %3502 = vmatprep.subr.bf16.mxu1 %v5563_v36  ;;  %v5654_v35 = vld [vmem:[%s7504_s1 + $0xfc4] ss:$8 sps:$4 sm:$0xff]   ;;  %v5649_v36 = vld [vmem:[%s7504_s1 + $0x7c0] ss:$8 sps:$4 sm:$0xff]  }
 0x1b9   :  { %3830 = vmatprep.subr.bf16.mxu0 %v5566_v37  ;;  %v5652_v37 = vld [vmem:[%s7504_s1 + $0xfc0] ss:$8 sps:$4 sm:$0xff]  }
 0x1bb   :  { %3503 = vmatpush1.bf16.msra.mxu1 %v5561_v38  ;;  %v5657_v38 = vld [vmem:[%s7504_s1 + $0x7d4] ss:$8 sps:$4 sm:$0xff]  }
 0x1bc   :  { %3831 = vmatpush1.bf16.msra.mxu0 %v5564_v20  ;;  %3504 = vmatprep.subr.bf16.mxu1 %v5569_v29  ;;  %v5660_v20 = vld [vmem:[%s7504_s1 + $0xfd4] ss:$8 sps:$4 sm:$0xff]   ;;  %v5655_v29 = vld [vmem:[%s7504_s1 + $0x7d0] ss:$8 sps:$4 sm:$0xff]  }
 0x1bd   :  { %3832 = vmatprep.subr.bf16.mxu0 %v5572_v39  ;;  %v5658_v39 = vld [vmem:[%s7504_s1 + $0xfd0] ss:$8 sps:$4 sm:$0xff]  }
 0x1bf   :  { %3505 = vmatpush1.bf16.msra.mxu1 %v5567_v42  ;;  %v5663_v42 = vld [vmem:[%s7504_s1 + $0x7e4] ss:$8 sps:$4 sm:$0xff]  }
 0x1c0   :  { %3833 = vmatpush1.bf16.msra.mxu0 %v5570_v32  ;;  %3515 = vmatprep.subr.bf16.mxu1 %v5577_v33  ;;  %v5666_v32 = vld [vmem:[%s7504_s1 + $0xfe4] ss:$8 sps:$4 sm:$0xff]   ;;  %v5661_v33 = vld [vmem:[%s7504_s1 + $0x7e0] ss:$8 sps:$4 sm:$0xff]  }
 0x1c1   :  { %3843 = vmatprep.subr.bf16.mxu0 %v5582_v43  ;;  %v5664_v43 = vld [vmem:[%s7504_s1 + $0xfe0] ss:$8 sps:$4 sm:$0xff]  }
 0x1c2   :  { %3507 = vmatmul.mubr.bf16.vlgmr.msra.gmra.mrb[0].mxu1 %v4245_v44  ;;  %v5669_v44 = vld [vmem:[%s7504_s1 + $0x7f4] ss:$8 sps:$4 sm:$0xff]  }
 0x1c3   :  { %3835 = vmatmul.mubr.bf16.vlgmr.msra.gmra.mrb[0].mxu0 %v4261_v45  ;;  %3516 = vmatpush1.bf16.msra.mxu1 %v5575_v48  ;;  %v5672_v45 = vld [vmem:[%s7504_s1 + $0xff4] ss:$8 sps:$4 sm:$0xff]   ;;  %v5667_v48 = vld [vmem:[%s7504_s1 + $0x7f0] ss:$8 sps:$4 sm:$0xff]  }
 0x1c4   :  { %3844 = vmatpush1.bf16.msra.mxu0 %v5580_v40  ;;  %3517 = vmatprep.subr.bf16.mxu1 %v5585_v41  ;;  %v5670_v40 = vld [vmem:[%s7504_s1 + $0xff0] ss:$8 sps:$4 sm:$0xff]   ;;  %v4247_v41 = vcombine.low %v7230_v46, %v7230_v46  ;;  %v5679_v46 = vld [vmem:[%s7508_s5 + $0x48] sm:$0xff]  }
 0x1c5   :  { %3845 = vmatprep.subr.bf16.mxu0 %v5588_v49  ;;  %3547 = vmatprep.mubr.bf16.mxu1 %v4248_v50  ;;  %v4263_v49 = vcombine.low %v7235_v47, %v7235_v47  ;;  %v5721_v50 = vmov 0.0   ;;  %v5680_v47 = vld [vmem:[%s7508_s5 + $0x8] sm:$0xff]  }
 0x1c6   :  { %3875 = vmatprep.mubr.bf16.mxu0 %v4264_v51  ;;  %v5677_v51 = vld [vmem:[%s7508_s5 + $0x40] sm:$0xff]  }
 0x1c7   :  { %3518 = vmatpush1.bf16.msra.mxu1 %v5583_v52  ;;  %v5678_v52 = vld [vmem:[%s7508_s5] sm:$0xff]  }
 0x1c8   :  { %3846 = vmatpush1.bf16.msra.mxu0 %v5586_v53  ;;  %3519 = vmatprep.subr.bf16.mxu1 %v5591_v54  ;;  %v5681_v53 = vld [vmem:[%s7508_s5 + $0x50] sm:$0xff]  }
 0x1c9   :  { %3847 = vmatprep.subr.bf16.mxu0 %v5594_v55  ;;  %v5682_v54 = vld [vmem:[%s7508_s5 + $0x10] sm:$0xff]   ;;  %v5683_v55 = vld [vmem:[%s7508_s5 + $0x58] sm:$0xff]  }
 0x1cb   :  { %3520 = vmatpush1.bf16.msra.mxu1 %v5589_v56  ;;  %v5684_v56 = vld [vmem:[%s7508_s5 + $0x18] sm:$0xff]  }
 0x1cc   :  { %3848 = vmatpush1.bf16.msra.mxu0 %v5592_v57  ;;  %3521 = vmatprep.subr.bf16.mxu1 %v5597_v58  ;;  %v5685_v57 = vld [vmem:[%s7508_s5 + $0x60] sm:$0xff]  }
 0x1cd   :  { %3849 = vmatprep.subr.bf16.mxu0 %v5600_v59  ;;  %v5686_v58 = vld [vmem:[%s7508_s5 + $0x20] sm:$0xff]   ;;  %v5687_v59 = vld [vmem:[%s7508_s5 + $0x68] sm:$0xff]  }
 0x1cf   :  { %3522 = vmatpush1.bf16.msra.mxu1 %v5595_v60  ;;  %v5688_v60 = vld [vmem:[%s7508_s5 + $0x28] sm:$0xff]  }
 0x1d0   :  { %3850 = vmatpush1.bf16.msra.mxu0 %v5598_v61  ;;  %3523 = vmatprep.subr.bf16.mxu1 %v5603_v62  ;;  %v5689_v61 = vld [vmem:[%s7508_s5 + $0x70] sm:$0xff]  }
 0x1d1   :  { %3851 = vmatprep.subr.bf16.mxu0 %v5606_v63  ;;  %v5690_v62 = vld [vmem:[%s7508_s5 + $0x30] sm:$0xff]  }
 0x1d3   :  { %3524 = vmatpush1.bf16.msra.mxu1 %v5601_v0 }
 0x1d4   :  { %3852 = vmatpush1.bf16.msra.mxu0 %v5604_v1  ;;  %3525 = vmatprep.subr.bf16.mxu1 %v5609_v2 }
 0x1d5   :  { %3853 = vmatprep.subr.bf16.mxu0 %v5612_v3 }
 0x1d7   :  { %3526 = vmatpush1.bf16.msra.mxu1 %v5607_v4 }
 0x1d8   :  { %3854 = vmatpush1.bf16.msra.mxu0 %v5610_v5  ;;  %3527 = vmatprep.subr.bf16.mxu1 %v5615_v6 }
 0x1d9   :  { %3855 = vmatprep.subr.bf16.mxu0 %v5618_v7 }
 0x1db   :  { %3528 = vmatpush1.bf16.msra.mxu1 %v5613_v8 }
 0x1dc   :  { %3856 = vmatpush1.bf16.msra.mxu0 %v5616_v9  ;;  %3529 = vmatprep.subr.bf16.mxu1 %v5621_v10 }
 0x1dd   :  { %3857 = vmatprep.subr.bf16.mxu0 %v5624_v11 }
 0x1df   :  { %3530 = vmatpush1.bf16.msra.mxu1 %v5619_v12 }
 0x1e0   :  { %3858 = vmatpush1.bf16.msra.mxu0 %v5622_v13  ;;  %3531 = vmatprep.subr.bf16.mxu1 %v5627_v14 }
 0x1e1   :  { %3859 = vmatprep.subr.bf16.mxu0 %v5630_v15 }
 0x1e3   :  { %3532 = vmatpush1.bf16.msra.mxu1 %v5625_v16 }
 0x1e4   :  { %3860 = vmatpush1.bf16.msra.mxu0 %v5628_v17  ;;  %3533 = vmatprep.subr.bf16.mxu1 %v5633_v19 }
 0x1e5   :  { %3861 = vmatprep.subr.bf16.mxu0 %v5636_v21 }
 0x1e7   :  { %3534 = vmatpush1.bf16.msra.mxu1 %v5631_v22 }
 0x1e8   :  { %3862 = vmatpush1.bf16.msra.mxu0 %v5634_v23  ;;  %3535 = vmatprep.subr.bf16.mxu1 %v5639_v26 }
 0x1e9   :  { %3863 = vmatprep.subr.bf16.mxu0 %v5642_v18 }
 0x1eb   :  { %3536 = vmatpush1.bf16.msra.mxu1 %v5637_v27 }
 0x1ec   :  { %3864 = vmatpush1.bf16.msra.mxu0 %v5640_v28  ;;  %3537 = vmatprep.subr.bf16.mxu1 %v5645_v30 }
 0x1ed   :  { %3865 = vmatprep.subr.bf16.mxu0 %v5648_v31 }
 0x1ef   :  { %3538 = vmatpush1.bf16.msra.mxu1 %v5643_v24 }
 0x1f0   :  { %3866 = vmatpush1.bf16.msra.mxu0 %v5646_v25  ;;  %3539 = vmatprep.subr.bf16.mxu1 %v5651_v34 }
 0x1f1   :  { %3867 = vmatprep.subr.bf16.mxu0 %v5654_v35 }
 0x1f3   :  { %3540 = vmatpush1.bf16.msra.mxu1 %v5649_v36 }
 0x1f4   :  { %3868 = vmatpush1.bf16.msra.mxu0 %v5652_v37  ;;  %3541 = vmatprep.subr.bf16.mxu1 %v5657_v38 }
 0x1f5   :  { %3869 = vmatprep.subr.bf16.mxu0 %v5660_v20 }
 0x1f7   :  { %3542 = vmatpush1.bf16.msra.mxu1 %v5655_v29 }
 0x1f8   :  { %3870 = vmatpush1.bf16.msra.mxu0 %v5658_v39  ;;  %3543 = vmatprep.subr.bf16.mxu1 %v5663_v42  ;;  %v3923_v42 = vlaneseq }
 0x1f9   :  { %3871 = vmatprep.subr.bf16.mxu0 %v5666_v32 }
 0x1fb   :  { %3544 = vmatpush1.bf16.msra.mxu1 %v5661_v33 }
 0x1fc   :  { %3872 = vmatpush1.bf16.msra.mxu0 %v5664_v43  ;;  %3545 = vmatprep.subr.bf16.mxu1 %v5669_v44 }
 0x1fd   :  { %3873 = vmatprep.subr.bf16.mxu0 %v5672_v45  ;;  %v3924_v45 = vshrl.u32 %v3923_v42, 7 }
 0x1ff   :  { %3546 = vmatpush1.bf16.msra.mxu1 %v5667_v48 }
 0x200   :  { %3874 = vmatpush1.bf16.msra.mxu0 %v5670_v40  ;;  %4795 = vmatprep.subr.bf16.mxu1 %v5677_v51  ;;  %v3925_v40 = vsub.s32 0, %v3924_v45 }
 0x202   :  { %3548 = vmatmul.mubr.bf16.vlgmr.msra.gmra.mrb[0].mxu1 %v4247_v41  ;;  %v3921_v41 = vld [vmem:[%s7505_s2] sm:$0x3] }
 0x203   :  { %3876 = vmatmul.mubr.bf16.vlgmr.msra.gmra.mrb[0].mxu0 %v4263_v49  ;;  %4796 = vmatpush3.bf16.msra.mxu1 %v5678_v52  ;;  %v3929_v49 = vsub.s32 1, %v3924_v45 }
 0x204   :  { %4034 = vmatprep.mubr.f32.mxu0 %v5721_v50  ;;  %4797 = vmatprep.subr.bf16.mxu1 %v5679_v46  ;;  %v3926_v50 = vrot.slane %v3921_v41, %v3925_v40  ;;  %v3945_v46 = vld [vmem:[%s7506_s3] sm:$0x3] }
 0x205   :  { %v3930_v51 = vrot.slane %v3921_v41, %v3929_v49 }
 0x207   :  { %4798 = vmatpush3.bf16.msra.mxu1 %v5680_v47 }
 0x208   :  { %4799 = vmatprep.subr.bf16.mxu1 %v5681_v53 }
 0x20b   :  { %4800 = vmatpush3.bf16.msra.mxu1 %v5682_v54 }
 0x20c   :  { %4801 = vmatprep.subr.bf16.mxu1 %v5683_v55 }
 0x20f   :  { %4802 = vmatpush3.bf16.msra.mxu1 %v5684_v56  ;;  %v3950_v56 = vrot.slane %v3945_v46, %v3925_v40 }
 0x210   :  { %4803 = vmatprep.subr.bf16.mxu1 %v5685_v57 }
 0x213   :  { %4804 = vmatpush3.bf16.msra.mxu1 %v5686_v58  ;;  %v3954_v58 = vrot.slane %v3945_v46, %v3929_v49 }
 0x214   :  { %4805 = vmatprep.subr.bf16.mxu1 %v5687_v59 }
 0x217   :  { %4806 = vmatpush3.bf16.msra.mxu1 %v5688_v60 }
 0x218   :  { %4807 = vmatprep.subr.bf16.mxu1 %v5689_v61 }
 0x21b   :  { %4808 = vmatpush3.bf16.msra.mxu1 %v5690_v62 }
 0x2d5   :  { %v3549_v63 = vpop.f32.mrb[0].mxu1 }
 0x2d6   :  { %v3877_v0 = vpop.f32.mrb[0].mxu0  ;;  %v3551_v2 = vpop.f32.mrb[1].mxu1 }
 0x2d7   :  { %v4817_v1 = vadd.f32 %v3877_v0, %v3549_v63  ;;  %v3879_v3 = vpop.f32.mrb[1].mxu0  ;;  %v3553_v5 = vpop.f32.mrb[2].mxu1 }
 0x2d8   :  { %v4818_v4 = vadd.f32 %v3879_v3, %v3551_v2  ;;  %v3881_v6 = vpop.f32.mrb[2].mxu0  ;;  %v3554_v8 = vpop.f32.mrb[3].mxu1  ;;  %v3965_v2 = vld [vmem:[%s7507_s4] sm:$0x3]  ;;  %v5692_v5 = vld [vmem:[%s7508_s5 + $0x38] sm:$0xff]  }
 0x2d9   :  { %v3884_v7 = vrot.slane %v4817_v1, 4  ;;  %v3882_v9 = vpop.f32.mrb[3].mxu0 }
 0x2da   :  { %v3890_v10 = vrot.slane %v4818_v4, 4 }
 0x2db   :  { %v3885_v11 = vadd.f32 %v4817_v1, %v3884_v7 }
 0x2dc   :  { %v3891_v12 = vadd.f32 %v4818_v4, %v3890_v10 }
 0x2dd   :  { %v3886_v13 = vrot.slane %v3885_v11, 2 }
 0x2de   :  { %v3892_v14 = vrot.slane %v3891_v12, 2 }
 0x2df   :  { %v3887_v15 = vadd.f32 %v3886_v13, %v3885_v11 }
 0x2e0   :  { %v3893_v16 = vadd.f32 %v3892_v14, %v3891_v12  ;;  %v4778_v12 = vld [vmem:[%s7509_s6] ss:$0 sm:$0xff] }
 0x2e1   :  { %v3888_v17 = vrot.slane %v3887_v15, 1 }
 0x2e2   :  { %v3894_v19 = vrot.slane %v3893_v16, 1 }
 0x2e3   :  { %v3889_v21 = vadd.f32 %v3888_v17, %v3887_v15 }
 0x2e4   :  { %v3895_v22 = vadd.f32 %v3894_v19, %v3893_v16 }
 0x2e5   :  { %v3897_v23 = vmul.f32 0.125, %v3889_v21 }
 0x2e6   :  { %v3898_v26 = vmul.f32 0.125, %v3895_v22 }
 0x2e7   :  { %v3899_v18 = vsub.f32 %v4817_v1, %v3897_v23 }
 0x2e8   :  { %v3900_v27 = vsub.f32 %v4818_v4, %v3898_v26  ;;  %v5691_v4 = vld [vmem:[%s7508_s5 + $0x78] sm:$0xff]   ;;  %s5697_s5 = scalar_lea.vmem %s4226_s28, 32 }
 0x2e9   :  { %v3901_v28 = vmul.f32 %v3899_v18, %v3899_v18  ;;  %4809 = vmatprep.subr.bf16.mxu1 %v5691_v4  ;;  %p5698_p0 = scmp.ne.s32.totalorder %s4226_s28, %s5697_s5  ;;  %p5703_p2 = scmp.lt.s32.totalorder %s5697_s5, %s5697_s5 }
 0x2ea   :  { %v3902_v30 = vmul.f32 %v3900_v27, %v3900_v27  ;;  %4810 = vmatpush3.bf16.msra.mxu1 %v5692_v5 }
 0x2eb   :  { %v3903_v31 = vrot.slane %v3901_v28, 4  ;;  %p5704_p3 = por %p5703_p2, %p5702_p1 }
 0x2ec   :  { %v3909_v24 = vrot.slane %v3902_v30, 4 }
 0x2ed   :  { %v3904_v25 = vadd.f32 %v3903_v31, %v3901_v28  ;;  %p5705_p4 = pnand %p5704_p3, %p5698_p0 }
 0x2ee   :  { %v3910_v34 = vadd.f32 %v3909_v24, %v3902_v30 }
 0x2ef   :  { %v3905_v35 = vrot.slane %v3904_v25, 2 }
 0x2f0   :  { %v3911_v36 = vrot.slane %v3910_v34, 2 }
 0x2f1   :  { %v3906_v37 = vadd.f32 %v3905_v35, %v3904_v25 }
 0x2f2   :  { %v3912_v38 = vadd.f32 %v3911_v36, %v3910_v34 }
 0x2f3   :  { %v3907_v20 = vrot.slane %v3906_v37, 1 }
 0x2f4   :  { %v3913_v29 = vrot.slane %v3912_v38, 1 }
 0x2f5   :  { %v3908_v39 = vadd.f32 %v3907_v20, %v3906_v37 }
 0x2f6   :  { %v3914_v32 = vadd.f32 %v3913_v29, %v3912_v38 }
 0x2f7   :  { %v3915_v33 = vmul.f32 0.125, %v3908_v39 }
 0x2f8   :  { %v3916_v43 = vmul.f32 0.125, %v3914_v32 }
 0x2f9   :  { %v3917_v44 = vadd.f32 1e-05, %v3915_v33 }
 0x2fa   :  { %v3918_v48 = vadd.f32 1e-05, %v3916_v43 }
 0x2fb   :  { %5693 = vrsqrt.f32 %v3917_v44 }
 0x2fc   :  { %5695 = vrsqrt.f32 %v3918_v48 }
 0x305   :  { %v5694_v52 = vpop.eup %5693 }
 0x306   :  { %v5696_v47 = vpop.eup %5695  ;;  %v3933_v53 = vmul.f32 %v5694_v52, %v3926_v50 }
 0x307   :  { %v3934_v54 = vmul.f32 %v5696_v47, %v3930_v51 }
 0x308   :  { %v3938_v55 = vrot.slane %v3933_v53, %v3925_v40 }
 0x309   :  { %v3942_v57 = vrot.slane %v3934_v54, %v3925_v40 }
 0x30a   :  { %v3943_v59 = vmul.f32 %v3938_v55, %v3899_v18 }
 0x30b   :  { %v3944_v60 = vmul.f32 %v3942_v57, %v3900_v27 }
 0x30c   :  { %v3957_v61 = vadd.f32 %v3950_v56, %v3943_v59 }
 0x30d   :  { %v3958_v62 = vadd.f32 %v3954_v58, %v3944_v60 }
 0x30e   :  { %v3961_v63 = vmul.f32 0.2, %v3957_v61  ;;  %vm3959_vm1 = vcmp.gt.f32.partialorder %v3957_v61, 0.0 }
 0x30f   :  { %vm3960_vm0 = vcmp.gt.f32.partialorder %v3958_v62, 0.0  ;;  %v3962_v0 = vmul.f32 0.2, %v3958_v62 }
 0x310   :  { %v3963_v3 = vsel %vm3959_vm1, %v3957_v61, %v3961_v63 }
 0x311   :  { %v3964_v1 = vsel %vm3960_vm0, %v3958_v62, %v3962_v0 }
 0x312   :  { %3970 = vmatprep.subr.mxu0 %v3964_v1 }
 0x313   :  { %3971 = vmatpush1.msra.mxu0 %v3963_v3 }
 0x314   :  { %4777 = vmatmul.mubr.msk.f32.vlgmr.msra.gmra.mrb[4].mxu0 %vm3966_vm2, %v3965_v2 }
 0x3e7   :  { %v4036_v6 = vpop.f32.mrb[4].mxu0 }
 0x3e8   :  { %v4038_v7 = vpop.f32.mrb[5].mxu0  ;;  %v4041_v9 = vpack.c.bf16 %v4036_v6, %v4036_v6 }
 0x3e9   :  { %v4042_v8 = vpack.c.bf16 %v4038_v7, %v4038_v7 }
 0x3eb   :  { %4210 = vmatprep.mubr.bf16.mxu1 %v4042_v8 }
 0x3ec   :  { %4211 = vmatmul.mubr.bf16.vlgmr.msra.gmra.mrb[4].mxu1 %v4041_v9 }
 0x4bf   :  { %v4811_v10 = vpop.f32.mrb[4].mxu1 }
 0x4c0   :  { %v4812_v11 = vpop.f32.mrb[5].mxu1 }
 0x4c1   :  { %v4813_v13 = vadd.f32 %v4812_v11, %v4811_v10  ;;  %v4814_v14 = vpop.f32.mrb[6].mxu1 }
 0x4c2   :  { %v4815_v15 = vpop.f32.mrb[7].mxu1 }
 0x4c3   :  { %v4213_v16 = vadd.f32 %v4813_v13, %v4778_v12 }
 0x4c5   :  { %4218 = vst [vmem:[#allocation2] sm:$0x3] %v4213_v16 }
 0x4c6   :  { %5708 = shalt.err (!%p5705_p4)
}
 0x4c7   :  { %s5709_s8 = scalar_lea.hbm %s7510_s7, 32 }
 0x4c8   :  { %p5710_p5 = scmp.ne.s32.totalorder %s7510_s7, %s5709_s8  ;;  %p5713_p6 = scmp.lt.u32.totalorder %s5709_s8, %s7510_s7 }
 0x4ca   :  { %p5715_p7 = pnand %p5713_p6, %p5710_p5 }
 0x4cc   :  { %5718 = shalt.err (!%p5715_p7)
}
 0x4cd   :  { %4228 = dma.vmem_to_hbm [thread:$0]  %s4226_s28, 32, %s7510_s7, [#allocation3]  }
 0x4ce   :  { %5719 = dma.done.wait [#allocation3], 32  }
 0x4cf   :  { %5720 = vsyncadd [#allocation3], 4294967264 }
 0x4d0   :  { %4232 = vsyncpa [#allocation3], 1 }

</bundles_post_ra>
